<compile_context>
chip_gen: v5e
topology: v5e:2x2
jax: 0.10.0
libtpu: 0.0.40
codegen_flags: <defaults>
</compile_context>

<pallas_src>
import jax
import jax.numpy as jnp
from jax.experimental import pallas as pl
from jax.experimental.pallas import tpu as pltpu

_EPS = 1e-5


def _conv3x3(frame_ref, y3, H, W, Cin, Cout, w_ref, b_ref):
    """3x3 same-pad conv as 3 MXU matmuls with K = 3*Cin.

    frame_ref: f32 VMEM scratch (H+2, W, 3*Cin).  Lane group dw holds the image
    shifted by (dw-1) columns; rows 0 / H+1 and the shifted-out column slivers are
    the conv's zero padding and are re-zeroed cheaply on every call (correct for
    any megacore split of the batch grid, since scratch is per-core).
    """
    C3 = 3 * Cin
    # ---- halo: zero only the cells the taps read but the interior never writes ----
    frame_ref[0:1, :, :] = jnp.zeros((1, W, C3), jnp.float32)
    frame_ref[H + 1:H + 2, :, :] = jnp.zeros((1, W, C3), jnp.float32)
    frame_ref[:, 0:1, :] = jnp.zeros((H + 2, 1, C3), jnp.float32)
    frame_ref[:, W - 1:W, :] = jnp.zeros((H + 2, 1, C3), jnp.float32)
    # ---- interior: the 3 dw column shifts packed into lane groups -----------------
    frame_ref[1:H + 1, 1:W, 0:Cin] = y3[:, :W - 1, :]          # dw = -1
    frame_ref[1:H + 1, :, Cin:2 * Cin] = y3                    # dw =  0
    frame_ref[1:H + 1, 0:W - 1, 2 * Cin:C3] = y3[:, 1:, :]     # dw = +1
    # ---- 3 matmuls: dh row shifts are cheap leading-dim slices of the frame -------
    acc = None
    for dh in range(3):
        tap = frame_ref[dh:dh + H, :, :].reshape(H * W, C3).astype(jnp.bfloat16)
        prod = jnp.dot(tap, w_ref[dh], preferred_element_type=jnp.float32)
        acc = prod if acc is None else acc + prod
    return acc + b_ref[...]                                    # (H*W, Cout) f32


def _build_discnet_kernel(cfgs, b_tile):
    """cfgs: static list of (H, W, Cin, Cout, pool) per block."""
    nb = len(cfgs)
    nparams = 7 * nb + 3   # per block: w1,b1,gmat,gamma,beta,w2,b2 ; head: wf,wa,cconst

    def kernel(*refs):
        x_ref = refs[0]
        prefs = refs[1:1 + nparams]
        o_ref = refs[1 + nparams]
        srefs = refs[2 + nparams:]
        wf, wa, cconst = prefs[7 * nb:]

        for img in range(b_tile):               # static in-kernel batch loop
            y3 = x_ref[img]                     # (H0, W0, Cin0) f32
            for bi, (H, W, Cin, Cout, pool) in enumerate(cfgs):
                w1, b1, gmat, gamma, beta, w2, b2 = prefs[7 * bi:7 * bi + 7]
                f1, f2 = srefs[2 * bi], srefs[2 * bi + 1]

                # ---- conv1 + bias + GroupNorm (folded scale/shift) + ReLU ----------
                a = _conv3x3(f1, y3, H, W, Cin, Cout, w1, b1)      # (H*W, Cout)
                csum = jnp.sum(a, axis=0, keepdims=True)           # (1, Cout)
                csq = jnp.sum(a * a, axis=0, keepdims=True)        # (1, Cout)
                # gmat already carries the 1/(group_size*H*W) factor.
                mean = jnp.dot(csum, gmat[...], preferred_element_type=jnp.float32)
                msq = jnp.dot(csq, gmat[...], preferred_element_type=jnp.float32)
                var = jnp.maximum(msq - mean * mean, 0.0)          # clamp: no rsqrt(neg)
                scale = jax.lax.rsqrt(var + _EPS) * gamma[...]     # (1, Cout)
                shift = beta[...] - mean * scale                   # (1, Cout)
                a = jnp.maximum(a * scale + shift, 0.0)            # 2 VPU ops/elem

                # ---- conv2 + bias + ReLU (+ 2x2 maxpool for DownBlock) -------------
                a = _conv3x3(f2, a.reshape(H, W, Cout), H, W, Cout, Cout, w2, b2)
                y3 = jnp.maximum(a, 0.0).reshape(H, W, Cout)
                if pool:
                    Ho, Wo = H // 2, W // 2
                    t = y3.reshape(Ho, 2, W, Cout)                 # leading split: free
                    t = jnp.maximum(t[:, 0], t[:, 1])              # H-pool first (cheap)
                    t = t.reshape(Ho, Wo, 2, Cout)
                    y3 = jnp.maximum(t[:, :, 0, :], t[:, :, 1, :])  # W-pool on half rows

            # ---- fused head: 1x1 conv (C->1) + adv Linear(H*W -> 1) ----------------
            # validity = sum_{p,c} x[p,c]*wf[c]*wa[p] + (bf*sum(wa) + ba)
            Hf, Wf, Cl = y3.shape
            yl = y3.reshape(Hf * Wf, Cl)
            v = jnp.sum(yl * wf[...] * wa[...], axis=1, keepdims=True)
            v = jnp.sum(v, axis=0, keepdims=True)                  # (1, 1)
            o_ref[img] = v + cconst[...]

    return kernel


def _pick_batch_tile(n):
    # Amortise per-step pipeline overhead but keep >= 2 grid steps for megacore.
    for cand in (8, 4, 2):
        if n % cand == 0 and n // cand >= 2:
            return cand
    return 1


def _vmem_limit_bytes():
    # v7x has only 64 MiB physical VMEM per TensorCore -> leave headroom there;
    # v5e / v6e have 128 MiB, so spend more of it when available.
    try:
        cap = int(pltpu.get_tpu_info().vmem_capacity_bytes)
    except Exception:
        cap = 64 * 1024 * 1024
    return max(32 * 1024 * 1024, min((cap * 3) // 4, 112 * 1024 * 1024))


def discnet_forward(x_nhwc, params, *, batch_tile=None):
    """x_nhwc: (N, H, W, Cin) f32.  Returns (N, 1) f32 validity scores."""
    cfgs = params["cfgs"]
    N, H0, W0, C0 = x_nhwc.shape
    assert (H0, W0, C0) == (cfgs[0][0], cfgs[0][1], cfgs[0][2]), (x_nhwc.shape, cfgs[0])
    b_tile = batch_tile if batch_tile is not None else _pick_batch_tile(N)
    assert N % b_tile == 0

    def const_spec(arr):
        nd = arr.ndim
        return pl.BlockSpec(arr.shape, lambda n, _nd=nd: (0,) * _nd)

    flat_inputs = [x_nhwc.astype(jnp.float32)]
    in_specs = [pl.BlockSpec((b_tile, H0, W0, C0), lambda n: (n, 0, 0, 0))]
    scratch_shapes = []
    for blk, (H, W, Cin, Cout, _pool) in zip(params["blocks"], cfgs):
        for name in ("w1", "b1", "gmat", "gamma", "beta", "w2", "b2"):
            arr = blk[name]
            flat_inputs.append(arr)
            in_specs.append(const_spec(arr))
        # im2col frames: (H+2, W, 3*C) per conv (halo rows/cols carry the zero pad).
        scratch_shapes.append(pltpu.VMEM((H + 2, W, 3 * Cin), jnp.float32))
        scratch_shapes.append(pltpu.VMEM((H + 2, W, 3 * Cout), jnp.float32))
    for name in ("wf", "wa", "cconst"):
        arr = params["head"][name]
        flat_inputs.append(arr)
        in_specs.append(const_spec(arr))

    out = pl.pallas_call(
        _build_discnet_kernel(cfgs, b_tile),
        out_shape=jax.ShapeDtypeStruct((N, 1, 1), jnp.float32),
        grid=(N // b_tile,),
        in_specs=in_specs,
        out_specs=pl.BlockSpec((b_tile, 1, 1), lambda n: (n, 0, 0)),
        scratch_shapes=scratch_shapes,
        compiler_params=pltpu.CompilerParams(
            dimension_semantics=("parallel",),       # batch axis feeds both TCs on v7x
            vmem_limit_bytes=_vmem_limit_bytes(),    # generation-aware VMEM budget
        ),
    )(*flat_inputs)
    return out.reshape(N, 1)


def _uniform(key, shape, bound):
    return jax.random.uniform(key, shape, jnp.float32, minval=-bound, maxval=bound)


def init_discnet_params(key, *, img_height, img_width, input_nc, filter_base,
                        num_block, group_size):
    # Block channel plan: (cin, cout, has_pool), mirroring DiscNet.__init__.
    plan = [(input_nc, filter_base, True), (filter_base, filter_base, False)]
    for i in range(num_block - 1):
        cin = filter_base * 2 ** i
        cout = filter_base * 2 ** (i + 1)
        plan += [(cin, cout, True), (cout, cout, False)]

    cfgs, blocks = [], []
    h, w = img_height, img_width
    for cin, cout, pool in plan:
        if pool:
            assert h % 2 == 0 and w % 2 == 0, "maxpool needs even spatial dims"
        ngroups = max(1, cout // group_size)
        assert cout % ngroups == 0
        gs = cout // ngroups
        key, k1a, k1b, k2a, k2b = jax.random.split(key, 5)
        bound1 = (1.0 / (cin * 9)) ** 0.5
        bound2 = (1.0 / (cout * 9)) ** 0.5
        # Group-averaging matrix with 1/(group_size*H*W) folded in:
        # (csum @ gmat)[j] = mean over {all pixels, channels in group(j)}.
        gmat = ((jnp.arange(cout)[:, None] // gs) == (jnp.arange(cout)[None, :] // gs))
        gmat = gmat.astype(jnp.float32) / float(gs * h * w)
        # Conv weights HWIO (3,3,Cin,Cout) -> (dh, dw*Cin + c, Cout) bf16 slabs,
        # matching the frame's lane packing (dw in lane groups, dh = matmul index).
        w1 = _uniform(k1a, (3, 3, cin, cout), bound1).reshape(3, 3 * cin, cout)
        w2 = _uniform(k2a, (3, 3, cout, cout), bound2).reshape(3, 3 * cout, cout)
        blocks.append(dict(
            w1=w1.astype(jnp.bfloat16),
            b1=_uniform(k1b, (1, cout), bound1),
            gmat=gmat,
            gamma=jnp.ones((1, cout), jnp.float32),   # GroupNorm affine defaults
            beta=jnp.zeros((1, cout), jnp.float32),
            w2=w2.astype(jnp.bfloat16),
            b2=_uniform(k2b, (1, cout), bound2),
        ))
        cfgs.append((h, w, cin, cout, pool))
        if pool:
            h, w = h // 2, w // 2

    c_last = filter_base * 2 ** (num_block - 1)
    hw = h * w
    key, kfw, kfb, kaw, kab = jax.random.split(key, 5)
    bf_bound = (1.0 / c_last) ** 0.5
    la_bound = (1.0 / hw) ** 0.5
    wf = _uniform(kfw, (1, c_last), bf_bound)     # final 1x1 conv weight (row vector)
    bf = _uniform(kfb, (), bf_bound)              # final 1x1 conv bias
    wa = _uniform(kaw, (hw, 1), la_bound)         # adv_layer Linear weight (column)
    ba = _uniform(kab, (), la_bound)              # adv_layer Linear bias
    cconst = (bf * jnp.sum(wa) + ba).reshape(1, 1)  # folded constant of the fused head
    return dict(blocks=blocks, head=dict(wf=wf, wa=wa, cconst=cconst), cfgs=cfgs)


if __name__ == "__main__":
    B, input_nc, img_h, img_w = 2, 4, 16, 16
    filter_base, num_block, group_size = 8, 2, 4

    key = jax.random.PRNGKey(0)
    kx, kp = jax.random.split(key)
    x_nchw = jax.random.normal(kx, (B, input_nc, img_h, img_w), jnp.float32)  # PyTorch NCHW
    x_nhwc = jnp.transpose(x_nchw, (0, 2, 3, 1))                              # kernel layout

    params = init_discnet_params(kp, img_height=img_h, img_width=img_w,
                                 input_nc=input_nc, filter_base=filter_base,
                                 num_block=num_block, group_size=group_size)

    validity = discnet_forward(x_nhwc, params)
    validity = jax.block_until_ready(validity)
    assert validity.shape == (B, 1), validity.shape
    assert bool(jnp.all(jnp.isfinite(validity)))
    print("KERNEL_OK")
</pallas_src>

<mosaic_0001>
module attributes {stable_mosaic.version = 11 : i64} {
  func.func @kernel(%arg0: i32, %arg1: memref<1x16x16x4xf32, #tpu.memory_space<vmem>>, %arg2: memref<3x12x8xbf16, #tpu.memory_space<vmem>>, %arg3: memref<1x8xf32, #tpu.memory_space<vmem>>, %arg4: memref<8x8xf32, #tpu.memory_space<vmem>>, %arg5: memref<1x8xf32, #tpu.memory_space<vmem>>, %arg6: memref<1x8xf32, #tpu.memory_space<vmem>>, %arg7: memref<3x24x8xbf16, #tpu.memory_space<vmem>>, %arg8: memref<1x8xf32, #tpu.memory_space<vmem>>, %arg9: memref<3x24x8xbf16, #tpu.memory_space<vmem>>, %arg10: memref<1x8xf32, #tpu.memory_space<vmem>>, %arg11: memref<8x8xf32, #tpu.memory_space<vmem>>, %arg12: memref<1x8xf32, #tpu.memory_space<vmem>>, %arg13: memref<1x8xf32, #tpu.memory_space<vmem>>, %arg14: memref<3x24x8xbf16, #tpu.memory_space<vmem>>, %arg15: memref<1x8xf32, #tpu.memory_space<vmem>>, %arg16: memref<3x24x16xbf16, #tpu.memory_space<vmem>>, %arg17: memref<1x16xf32, #tpu.memory_space<vmem>>, %arg18: memref<16x16xf32, #tpu.memory_space<vmem>>, %arg19: memref<1x16xf32, #tpu.memory_space<vmem>>, %arg20: memref<1x16xf32, #tpu.memory_space<vmem>>, %arg21: memref<3x48x16xbf16, #tpu.memory_space<vmem>>, %arg22: memref<1x16xf32, #tpu.memory_space<vmem>>, %arg23: memref<3x48x16xbf16, #tpu.memory_space<vmem>>, %arg24: memref<1x16xf32, #tpu.memory_space<vmem>>, %arg25: memref<16x16xf32, #tpu.memory_space<vmem>>, %arg26: memref<1x16xf32, #tpu.memory_space<vmem>>, %arg27: memref<1x16xf32, #tpu.memory_space<vmem>>, %arg28: memref<3x48x16xbf16, #tpu.memory_space<vmem>>, %arg29: memref<1x16xf32, #tpu.memory_space<vmem>>, %arg30: memref<1x16xf32, #tpu.memory_space<vmem>>, %arg31: memref<16x1xf32, #tpu.memory_space<vmem>>, %arg32: memref<1x1xf32, #tpu.memory_space<vmem>>, %arg33: memref<1x1x1xf32, #tpu.memory_space<vmem>>, %arg34: memref<18x16x12xf32, #tpu.memory_space<vmem>>, %arg35: memref<18x16x24xf32, #tpu.memory_space<vmem>>, %arg36: memref<10x8x24xf32, #tpu.memory_space<vmem>>, %arg37: memref<10x8x24xf32, #tpu.memory_space<vmem>>, %arg38: memref<10x8x24xf32, #tpu.memory_space<vmem>>, %arg39: memref<10x8x48xf32, #tpu.memory_space<vmem>>, %arg40: memref<6x4x48xf32, #tpu.memory_space<vmem>>, %arg41: memref<6x4x48xf32, #tpu.memory_space<vmem>>) attributes {dimension_semantics = [#tpu.dimension_semantics<parallel>], iteration_bounds = array<i64: 2>, scalar_prefetch = 0 : i64, scratch_operands = 8 : i64, tpu.core_type = #tpu.core_type<tc>, window_params = [{transform_indices = @transform_0, window_bounds = array<i64: 1, 16, 16, 4>}, {pipeline_mode = #tpu.pipeline_mode<synchronous>, transform_indices = @transform_1, window_bounds = array<i64: 3, 12, 8>}, {pipeline_mode = #tpu.pipeline_mode<synchronous>, transform_indices = @transform_2, window_bounds = array<i64: 1, 8>}, {pipeline_mode = #tpu.pipeline_mode<synchronous>, transform_indices = @transform_3, window_bounds = array<i64: 8, 8>}, {pipeline_mode = #tpu.pipeline_mode<synchronous>, transform_indices = @transform_4, window_bounds = array<i64: 1, 8>}, {pipeline_mode = #tpu.pipeline_mode<synchronous>, transform_indices = @transform_5, window_bounds = array<i64: 1, 8>}, {pipeline_mode = #tpu.pipeline_mode<synchronous>, transform_indices = @transform_6, window_bounds = array<i64: 3, 24, 8>}, {pipeline_mode = #tpu.pipeline_mode<synchronous>, transform_indices = @transform_7, window_bounds = array<i64: 1, 8>}, {pipeline_mode = #tpu.pipeline_mode<synchronous>, transform_indices = @transform_8, window_bounds = array<i64: 3, 24, 8>}, {pipeline_mode = #tpu.pipeline_mode<synchronous>, transform_indices = @transform_9, window_bounds = array<i64: 1, 8>}, {pipeline_mode = #tpu.pipeline_mode<synchronous>, transform_indices = @transform_10, window_bounds = array<i64: 8, 8>}, {pipeline_mode = #tpu.pipeline_mode<synchronous>, transform_indices = @transform_11, window_bounds = array<i64: 1, 8>}, {pipeline_mode = #tpu.pipeline_mode<synchronous>, transform_indices = @transform_12, window_bounds = array<i64: 1, 8>}, {pipeline_mode = #tpu.pipeline_mode<synchronous>, transform_indices = @transform_13, window_bounds = array<i64: 3, 24, 8>}, {pipeline_mode = #tpu.pipeline_mode<synchronous>, transform_indices = @transform_14, window_bounds = array<i64: 1, 8>}, {pipeline_mode = #tpu.pipeline_mode<synchronous>, transform_indices = @transform_15, window_bounds = array<i64: 3, 24, 16>}, {pipeline_mode = #tpu.pipeline_mode<synchronous>, transform_indices = @transform_16, window_bounds = array<i64: 1, 16>}, {pipeline_mode = #tpu.pipeline_mode<synchronous>, transform_indices = @transform_17, window_bounds = array<i64: 16, 16>}, {pipeline_mode = #tpu.pipeline_mode<synchronous>, transform_indices = @transform_18, window_bounds = array<i64: 1, 16>}, {pipeline_mode = #tpu.pipeline_mode<synchronous>, transform_indices = @transform_19, window_bounds = array<i64: 1, 16>}, {pipeline_mode = #tpu.pipeline_mode<synchronous>, transform_indices = @transform_20, window_bounds = array<i64: 3, 48, 16>}, {pipeline_mode = #tpu.pipeline_mode<synchronous>, transform_indices = @transform_21, window_bounds = array<i64: 1, 16>}, {pipeline_mode = #tpu.pipeline_mode<synchronous>, transform_indices = @transform_22, window_bounds = array<i64: 3, 48, 16>}, {pipeline_mode = #tpu.pipeline_mode<synchronous>, transform_indices = @transform_23, window_bounds = array<i64: 1, 16>}, {pipeline_mode = #tpu.pipeline_mode<synchronous>, transform_indices = @transform_24, window_bounds = array<i64: 16, 16>}, {pipeline_mode = #tpu.pipeline_mode<synchronous>, transform_indices = @transform_25, window_bounds = array<i64: 1, 16>}, {pipeline_mode = #tpu.pipeline_mode<synchronous>, transform_indices = @transform_26, window_bounds = array<i64: 1, 16>}, {pipeline_mode = #tpu.pipeline_mode<synchronous>, transform_indices = @transform_27, window_bounds = array<i64: 3, 48, 16>}, {pipeline_mode = #tpu.pipeline_mode<synchronous>, transform_indices = @transform_28, window_bounds = array<i64: 1, 16>}, {pipeline_mode = #tpu.pipeline_mode<synchronous>, transform_indices = @transform_29, window_bounds = array<i64: 1, 16>}, {pipeline_mode = #tpu.pipeline_mode<synchronous>, transform_indices = @transform_30, window_bounds = array<i64: 16, 1>}, {pipeline_mode = #tpu.pipeline_mode<synchronous>, transform_indices = @transform_31, window_bounds = array<i64: 1, 1>}, {transform_indices = @transform_32, window_bounds = array<i64: 1, 1, 1>}]} {
    %c0 = arith.constant 0 : index
    %c0_0 = arith.constant 0 : index
    %c0_1 = arith.constant 0 : index
    %c0_2 = arith.constant 0 : index
    %0 = vector.load %arg1[%c0, %c0_0, %c0_1, %c0_2] : memref<1x16x16x4xf32, #tpu.memory_space<vmem>>, vector<1x16x16x4xf32>
    %1 = vector.shape_cast %0 : vector<1x16x16x4xf32> to vector<16x16x4xf32>
    %cst = arith.constant 0.000000e+00 : f32
    %2 = vector.broadcast %cst : f32 to vector<1x16x12xf32>
    %c0_3 = arith.constant 0 : index
    %c0_4 = arith.constant 0 : index
    %c0_5 = arith.constant 0 : index
    %3 = vector.load %arg34[%c0_3, %c0_4, %c0_5] : memref<18x16x12xf32, #tpu.memory_space<vmem>>, vector<1x16x12xf32>
    tpu.vector_store %arg34[%c0_3, %c0_4, %c0_5], %2 {strides = array<i32>} : memref<18x16x12xf32, #tpu.memory_space<vmem>>, vector<1x16x12xf32>,
    %cst_6 = arith.constant 0.000000e+00 : f32
    %4 = vector.broadcast %cst_6 : f32 to vector<1x16x12xf32>
    %c17 = arith.constant 17 : index
    %c0_7 = arith.constant 0 : index
    %c0_8 = arith.constant 0 : index
    %5 = vector.load %arg34[%c17, %c0_7, %c0_8] : memref<18x16x12xf32, #tpu.memory_space<vmem>>, vector<1x16x12xf32>
    tpu.vector_store %arg34[%c17, %c0_7, %c0_8], %4 {strides = array<i32>} : memref<18x16x12xf32, #tpu.memory_space<vmem>>, vector<1x16x12xf32>,
    %cst_9 = arith.constant 0.000000e+00 : f32
    %6 = vector.broadcast %cst_9 : f32 to vector<18x1x12xf32>
    %c0_10 = arith.constant 0 : index
    %c0_11 = arith.constant 0 : index
    %c0_12 = arith.constant 0 : index
    %7 = vector.load %arg34[%c0_10, %c0_11, %c0_12] : memref<18x16x12xf32, #tpu.memory_space<vmem>>, vector<18x1x12xf32>
    tpu.vector_store %arg34[%c0_10, %c0_11, %c0_12], %6 {strides = array<i32>} : memref<18x16x12xf32, #tpu.memory_space<vmem>>, vector<18x1x12xf32>,
    %cst_13 = arith.constant 0.000000e+00 : f32
    %8 = vector.broadcast %cst_13 : f32 to vector<18x1x12xf32>
    %c0_14 = arith.constant 0 : index
    %c15 = arith.constant 15 : index
    %c0_15 = arith.constant 0 : index
    %9 = vector.load %arg34[%c0_14, %c15, %c0_15] : memref<18x16x12xf32, #tpu.memory_space<vmem>>, vector<18x1x12xf32>
    tpu.vector_store %arg34[%c0_14, %c15, %c0_15], %8 {strides = array<i32>} : memref<18x16x12xf32, #tpu.memory_space<vmem>>, vector<18x1x12xf32>,
    %10 = vector.extract_strided_slice %1 {offsets = [0, 0, 0], sizes = [16, 15, 4], strides = [1, 1, 1]} : vector<16x16x4xf32> to vector<16x15x4xf32>
    %c1 = arith.constant 1 : index
    %c1_16 = arith.constant 1 : index
    %c0_17 = arith.constant 0 : index
    %11 = vector.load %arg34[%c1, %c1_16, %c0_17] : memref<18x16x12xf32, #tpu.memory_space<vmem>>, vector<16x15x4xf32>
    tpu.vector_store %arg34[%c1, %c1_16, %c0_17], %10 {strides = array<i32>} : memref<18x16x12xf32, #tpu.memory_space<vmem>>, vector<16x15x4xf32>,
    %c1_18 = arith.constant 1 : index
    %c0_19 = arith.constant 0 : index
    %c4 = arith.constant 4 : index
    %12 = vector.load %arg34[%c1_18, %c0_19, %c4] : memref<18x16x12xf32, #tpu.memory_space<vmem>>, vector<16x16x4xf32>
    tpu.vector_store %arg34[%c1_18, %c0_19, %c4], %1 {strides = array<i32>} : memref<18x16x12xf32, #tpu.memory_space<vmem>>, vector<16x16x4xf32>,
    %13 = vector.extract_strided_slice %1 {offsets = [0, 1, 0], sizes = [16, 15, 4], strides = [1, 1, 1]} : vector<16x16x4xf32> to vector<16x15x4xf32>
    %c1_20 = arith.constant 1 : index
    %c0_21 = arith.constant 0 : index
    %c8 = arith.constant 8 : index
    %14 = vector.load %arg34[%c1_20, %c0_21, %c8] : memref<18x16x12xf32, #tpu.memory_space<vmem>>, vector<16x15x4xf32>
    tpu.vector_store %arg34[%c1_20, %c0_21, %c8], %13 {strides = array<i32>} : memref<18x16x12xf32, #tpu.memory_space<vmem>>, vector<16x15x4xf32>,
    %c0_22 = arith.constant 0 : index
    %c0_23 = arith.constant 0 : index
    %c0_24 = arith.constant 0 : index
    %15 = vector.load %arg34[%c0_22, %c0_23, %c0_24] : memref<18x16x12xf32, #tpu.memory_space<vmem>>, vector<16x16x12xf32>
    %16 = vector.shape_cast %15 : vector<16x16x12xf32> to vector<256x12xf32>
    %17 = arith.truncf %16 : vector<256x12xf32> to vector<256x12xbf16>
    %c0_25 = arith.constant 0 : index
    %c0_26 = arith.constant 0 : index
    %c0_27 = arith.constant 0 : index
    %18 = vector.load %arg2[%c0_25, %c0_26, %c0_27] : memref<3x12x8xbf16, #tpu.memory_space<vmem>>, vector<1x12x8xbf16>
    %19 = vector.shape_cast %18 : vector<1x12x8xbf16> to vector<12x8xbf16>
    %cst_28 = arith.constant dense<0.000000e+00> : vector<256x8xf32>
    %20 = tpu.matmul %17, %19, %cst_28 {dimension_numbers = #tpu.dot_dimension_numbers<[1], [0], [0], [1], [0, 0, 1, 1], [], []>} : vector<256x12xbf16>, vector<12x8xbf16>, vector<256x8xf32> -> vector<256x8xf32>
    %c1_29 = arith.constant 1 : index
    %c0_30 = arith.constant 0 : index
    %c0_31 = arith.constant 0 : index
    %21 = vector.load %arg34[%c1_29, %c0_30, %c0_31] : memref<18x16x12xf32, #tpu.memory_space<vmem>>, vector<16x16x12xf32>
    %22 = vector.shape_cast %21 : vector<16x16x12xf32> to vector<256x12xf32>
    %23 = arith.truncf %22 : vector<256x12xf32> to vector<256x12xbf16>
    %c1_32 = arith.constant 1 : index
    %c0_33 = arith.constant 0 : index
    %c0_34 = arith.constant 0 : index
    %24 = vector.load %arg2[%c1_32, %c0_33, %c0_34] : memref<3x12x8xbf16, #tpu.memory_space<vmem>>, vector<1x12x8xbf16>
    %25 = vector.shape_cast %24 : vector<1x12x8xbf16> to vector<12x8xbf16>
    %cst_35 = arith.constant dense<0.000000e+00> : vector<256x8xf32>
    %26 = tpu.matmul %23, %25, %cst_35 {dimension_numbers = #tpu.dot_dimension_numbers<[1], [0], [0], [1], [0, 0, 1, 1], [], []>} : vector<256x12xbf16>, vector<12x8xbf16>, vector<256x8xf32> -> vector<256x8xf32>
    %27 = arith.addf %20, %26 : vector<256x8xf32>
    %c2 = arith.constant 2 : index
    %c0_36 = arith.constant 0 : index
    %c0_37 = arith.constant 0 : index
    %28 = vector.load %arg34[%c2, %c0_36, %c0_37] : memref<18x16x12xf32, #tpu.memory_space<vmem>>, vector<16x16x12xf32>
    %29 = vector.shape_cast %28 : vector<16x16x12xf32> to vector<256x12xf32>
    %30 = arith.truncf %29 : vector<256x12xf32> to vector<256x12xbf16>
    %c2_38 = arith.constant 2 : index
    %c0_39 = arith.constant 0 : index
    %c0_40 = arith.constant 0 : index
    %31 = vector.load %arg2[%c2_38, %c0_39, %c0_40] : memref<3x12x8xbf16, #tpu.memory_space<vmem>>, vector<1x12x8xbf16>
    %32 = vector.shape_cast %31 : vector<1x12x8xbf16> to vector<12x8xbf16>
    %cst_41 = arith.constant dense<0.000000e+00> : vector<256x8xf32>
    %33 = tpu.matmul %30, %32, %cst_41 {dimension_numbers = #tpu.dot_dimension_numbers<[1], [0], [0], [1], [0, 0, 1, 1], [], []>} : vector<256x12xbf16>, vector<12x8xbf16>, vector<256x8xf32> -> vector<256x8xf32>
    %34 = arith.addf %27, %33 : vector<256x8xf32>
    %c0_42 = arith.constant 0 : index
    %c0_43 = arith.constant 0 : index
    %35 = vector.load %arg3[%c0_42, %c0_43] : memref<1x8xf32, #tpu.memory_space<vmem>>, vector<1x8xf32>
    %36 = vector.broadcast %35 : vector<1x8xf32> to vector<256x8xf32>
    %37 = arith.addf %34, %36 : vector<256x8xf32>
    %cst_44 = arith.constant dense<0.000000e+00> : vector<8xf32>
    %38 = vector.multi_reduction <add>, %37, %cst_44 [0] : vector<256x8xf32> to vector<8xf32>
    %39 = vector.shape_cast %38 : vector<8xf32> to vector<1x8xf32>
    %40 = arith.mulf %37, %37 : vector<256x8xf32>
    %cst_45 = arith.constant dense<0.000000e+00> : vector<8xf32>
    %41 = vector.multi_reduction <add>, %40, %cst_45 [0] : vector<256x8xf32> to vector<8xf32>
    %42 = vector.shape_cast %41 : vector<8xf32> to vector<1x8xf32>
    %c0_46 = arith.constant 0 : index
    %c0_47 = arith.constant 0 : index
    %43 = vector.load %arg4[%c0_46, %c0_47] : memref<8x8xf32, #tpu.memory_space<vmem>>, vector<8x8xf32>
    %cst_48 = arith.constant dense<0.000000e+00> : vector<1x8xf32>
    %44 = tpu.matmul %39, %43, %cst_48 {dimension_numbers = #tpu.dot_dimension_numbers<[1], [0], [0], [1], [0, 0, 1, 1], [], []>} : vector<1x8xf32>, vector<8x8xf32>, vector<1x8xf32> -> vector<1x8xf32>
    %c0_49 = arith.constant 0 : index
    %c0_50 = arith.constant 0 : index
    %45 = vector.load %arg4[%c0_49, %c0_50] : memref<8x8xf32, #tpu.memory_space<vmem>>, vector<8x8xf32>
    %cst_51 = arith.constant dense<0.000000e+00> : vector<1x8xf32>
    %46 = tpu.matmul %42, %45, %cst_51 {dimension_numbers = #tpu.dot_dimension_numbers<[1], [0], [0], [1], [0, 0, 1, 1], [], []>} : vector<1x8xf32>, vector<8x8xf32>, vector<1x8xf32> -> vector<1x8xf32>
    %47 = arith.mulf %44, %44 : vector<1x8xf32>
    %48 = arith.subf %46, %47 : vector<1x8xf32>
    %cst_52 = arith.constant 0.000000e+00 : f32
    %49 = vector.broadcast %cst_52 : f32 to vector<1x8xf32>
    %50 = arith.maximumf %48, %49 : vector<1x8xf32>
    %cst_53 = arith.constant 9.99999974E-6 : f32
    %51 = vector.broadcast %cst_53 : f32 to vector<1x8xf32>
    %52 = arith.addf %50, %51 : vector<1x8xf32>
    %53 = math.rsqrt %52 : vector<1x8xf32>
    %c0_54 = arith.constant 0 : index
    %c0_55 = arith.constant 0 : index
    %54 = vector.load %arg5[%c0_54, %c0_55] : memref<1x8xf32, #tpu.memory_space<vmem>>, vector<1x8xf32>
    %55 = arith.mulf %53, %54 : vector<1x8xf32>
    %c0_56 = arith.constant 0 : index
    %c0_57 = arith.constant 0 : index
    %56 = vector.load %arg6[%c0_56, %c0_57] : memref<1x8xf32, #tpu.memory_space<vmem>>, vector<1x8xf32>
    %57 = arith.mulf %44, %55 : vector<1x8xf32>
    %58 = arith.subf %56, %57 : vector<1x8xf32>
    %59 = vector.broadcast %55 : vector<1x8xf32> to vector<256x8xf32>
    %60 = arith.mulf %37, %59 : vector<256x8xf32>
    %61 = vector.broadcast %58 : vector<1x8xf32> to vector<256x8xf32>
    %62 = arith.addf %60, %61 : vector<256x8xf32>
    %cst_58 = arith.constant 0.000000e+00 : f32
    %63 = vector.broadcast %cst_58 : f32 to vector<256x8xf32>
    %64 = arith.maximumf %62, %63 : vector<256x8xf32>
    %65 = vector.shape_cast %64 : vector<256x8xf32> to vector<16x16x8xf32>
    %cst_59 = arith.constant 0.000000e+00 : f32
    %66 = vector.broadcast %cst_59 : f32 to vector<1x16x24xf32>
    %c0_60 = arith.constant 0 : index
    %c0_61 = arith.constant 0 : index
    %c0_62 = arith.constant 0 : index
    %67 = vector.load %arg35[%c0_60, %c0_61, %c0_62] : memref<18x16x24xf32, #tpu.memory_space<vmem>>, vector<1x16x24xf32>
    tpu.vector_store %arg35[%c0_60, %c0_61, %c0_62], %66 {strides = array<i32>} : memref<18x16x24xf32, #tpu.memory_space<vmem>>, vector<1x16x24xf32>,
    %cst_63 = arith.constant 0.000000e+00 : f32
    %68 = vector.broadcast %cst_63 : f32 to vector<1x16x24xf32>
    %c17_64 = arith.constant 17 : index
    %c0_65 = arith.constant 0 : index
    %c0_66 = arith.constant 0 : index
    %69 = vector.load %arg35[%c17_64, %c0_65, %c0_66] : memref<18x16x24xf32, #tpu.memory_space<vmem>>, vector<1x16x24xf32>
    tpu.vector_store %arg35[%c17_64, %c0_65, %c0_66], %68 {strides = array<i32>} : memref<18x16x24xf32, #tpu.memory_space<vmem>>, vector<1x16x24xf32>,
    %cst_67 = arith.constant 0.000000e+00 : f32
    %70 = vector.broadcast %cst_67 : f32 to vector<18x1x24xf32>
    %c0_68 = arith.constant 0 : index
    %c0_69 = arith.constant 0 : index
    %c0_70 = arith.constant 0 : index
    %71 = vector.load %arg35[%c0_68, %c0_69, %c0_70] : memref<18x16x24xf32, #tpu.memory_space<vmem>>, vector<18x1x24xf32>
    tpu.vector_store %arg35[%c0_68, %c0_69, %c0_70], %70 {strides = array<i32>} : memref<18x16x24xf32, #tpu.memory_space<vmem>>, vector<18x1x24xf32>,
    %cst_71 = arith.constant 0.000000e+00 : f32
    %72 = vector.broadcast %cst_71 : f32 to vector<18x1x24xf32>
    %c0_72 = arith.constant 0 : index
    %c15_73 = arith.constant 15 : index
    %c0_74 = arith.constant 0 : index
    %73 = vector.load %arg35[%c0_72, %c15_73, %c0_74] : memref<18x16x24xf32, #tpu.memory_space<vmem>>, vector<18x1x24xf32>
    tpu.vector_store %arg35[%c0_72, %c15_73, %c0_74], %72 {strides = array<i32>} : memref<18x16x24xf32, #tpu.memory_space<vmem>>, vector<18x1x24xf32>,
    %74 = vector.extract_strided_slice %65 {offsets = [0, 0, 0], sizes = [16, 15, 8], strides = [1, 1, 1]} : vector<16x16x8xf32> to vector<16x15x8xf32>
    %c1_75 = arith.constant 1 : index
    %c1_76 = arith.constant 1 : index
    %c0_77 = arith.constant 0 : index
    %75 = vector.load %arg35[%c1_75, %c1_76, %c0_77] : memref<18x16x24xf32, #tpu.memory_space<vmem>>, vector<16x15x8xf32>
    tpu.vector_store %arg35[%c1_75, %c1_76, %c0_77], %74 {strides = array<i32>} : memref<18x16x24xf32, #tpu.memory_space<vmem>>, vector<16x15x8xf32>,
    %c1_78 = arith.constant 1 : index
    %c0_79 = arith.constant 0 : index
    %c8_80 = arith.constant 8 : index
    %76 = vector.load %arg35[%c1_78, %c0_79, %c8_80] : memref<18x16x24xf32, #tpu.memory_space<vmem>>, vector<16x16x8xf32>
    tpu.vector_store %arg35[%c1_78, %c0_79, %c8_80], %65 {strides = array<i32>} : memref<18x16x24xf32, #tpu.memory_space<vmem>>, vector<16x16x8xf32>,
    %77 = vector.extract_strided_slice %65 {offsets = [0, 1, 0], sizes = [16, 15, 8], strides = [1, 1, 1]} : vector<16x16x8xf32> to vector<16x15x8xf32>
    %c1_81 = arith.constant 1 : index
    %c0_82 = arith.constant 0 : index
    %c16 = arith.constant 16 : index
    %78 = vector.load %arg35[%c1_81, %c0_82, %c16] : memref<18x16x24xf32, #tpu.memory_space<vmem>>, vector<16x15x8xf32>
    tpu.vector_store %arg35[%c1_81, %c0_82, %c16], %77 {strides = array<i32>} : memref<18x16x24xf32, #tpu.memory_space<vmem>>, vector<16x15x8xf32>,
    %c0_83 = arith.constant 0 : index
    %c0_84 = arith.constant 0 : index
    %c0_85 = arith.constant 0 : index
    %79 = vector.load %arg35[%c0_83, %c0_84, %c0_85] : memref<18x16x24xf32, #tpu.memory_space<vmem>>, vector<16x16x24xf32>
    %80 = vector.shape_cast %79 : vector<16x16x24xf32> to vector<256x24xf32>
    %81 = arith.truncf %80 : vector<256x24xf32> to vector<256x24xbf16>
    %c0_86 = arith.constant 0 : index
    %c0_87 = arith.constant 0 : index
    %c0_88 = arith.constant 0 : index
    %82 = vector.load %arg7[%c0_86, %c0_87, %c0_88] : memref<3x24x8xbf16, #tpu.memory_space<vmem>>, vector<1x24x8xbf16>
    %83 = vector.shape_cast %82 : vector<1x24x8xbf16> to vector<24x8xbf16>
    %cst_89 = arith.constant dense<0.000000e+00> : vector<256x8xf32>
    %84 = tpu.matmul %81, %83, %cst_89 {dimension_numbers = #tpu.dot_dimension_numbers<[1], [0], [0], [1], [0, 0, 1, 1], [], []>} : vector<256x24xbf16>, vector<24x8xbf16>, vector<256x8xf32> -> vector<256x8xf32>
    %c1_90 = arith.constant 1 : index
    %c0_91 = arith.constant 0 : index
    %c0_92 = arith.constant 0 : index
    %85 = vector.load %arg35[%c1_90, %c0_91, %c0_92] : memref<18x16x24xf32, #tpu.memory_space<vmem>>, vector<16x16x24xf32>
    %86 = vector.shape_cast %85 : vector<16x16x24xf32> to vector<256x24xf32>
    %87 = arith.truncf %86 : vector<256x24xf32> to vector<256x24xbf16>
    %c1_93 = arith.constant 1 : index
    %c0_94 = arith.constant 0 : index
    %c0_95 = arith.constant 0 : index
    %88 = vector.load %arg7[%c1_93, %c0_94, %c0_95] : memref<3x24x8xbf16, #tpu.memory_space<vmem>>, vector<1x24x8xbf16>
    %89 = vector.shape_cast %88 : vector<1x24x8xbf16> to vector<24x8xbf16>
    %cst_96 = arith.constant dense<0.000000e+00> : vector<256x8xf32>
    %90 = tpu.matmul %87, %89, %cst_96 {dimension_numbers = #tpu.dot_dimension_numbers<[1], [0], [0], [1], [0, 0, 1, 1], [], []>} : vector<256x24xbf16>, vector<24x8xbf16>, vector<256x8xf32> -> vector<256x8xf32>
    %91 = arith.addf %84, %90 : vector<256x8xf32>
    %c2_97 = arith.constant 2 : index
    %c0_98 = arith.constant 0 : index
    %c0_99 = arith.constant 0 : index
    %92 = vector.load %arg35[%c2_97, %c0_98, %c0_99] : memref<18x16x24xf32, #tpu.memory_space<vmem>>, vector<16x16x24xf32>
    %93 = vector.shape_cast %92 : vector<16x16x24xf32> to vector<256x24xf32>
    %94 = arith.truncf %93 : vector<256x24xf32> to vector<256x24xbf16>
    %c2_100 = arith.constant 2 : index
    %c0_101 = arith.constant 0 : index
    %c0_102 = arith.constant 0 : index
    %95 = vector.load %arg7[%c2_100, %c0_101, %c0_102] : memref<3x24x8xbf16, #tpu.memory_space<vmem>>, vector<1x24x8xbf16>
    %96 = vector.shape_cast %95 : vector<1x24x8xbf16> to vector<24x8xbf16>
    %cst_103 = arith.constant dense<0.000000e+00> : vector<256x8xf32>
    %97 = tpu.matmul %94, %96, %cst_103 {dimension_numbers = #tpu.dot_dimension_numbers<[1], [0], [0], [1], [0, 0, 1, 1], [], []>} : vector<256x24xbf16>, vector<24x8xbf16>, vector<256x8xf32> -> vector<256x8xf32>
    %98 = arith.addf %91, %97 : vector<256x8xf32>
    %c0_104 = arith.constant 0 : index
    %c0_105 = arith.constant 0 : index
    %99 = vector.load %arg8[%c0_104, %c0_105] : memref<1x8xf32, #tpu.memory_space<vmem>>, vector<1x8xf32>
    %100 = vector.broadcast %99 : vector<1x8xf32> to vector<256x8xf32>
    %101 = arith.addf %98, %100 : vector<256x8xf32>
    %cst_106 = arith.constant 0.000000e+00 : f32
    %102 = vector.broadcast %cst_106 : f32 to vector<256x8xf32>
    %103 = arith.maximumf %101, %102 : vector<256x8xf32>
    %104 = vector.shape_cast %103 : vector<256x8xf32> to vector<16x16x8xf32>
    %105 = vector.shape_cast %104 : vector<16x16x8xf32> to vector<8x2x16x8xf32>
    %106 = vector.extract_strided_slice %105 {offsets = [0, 0, 0, 0], sizes = [8, 1, 16, 8], strides = [1, 1, 1, 1]} : vector<8x2x16x8xf32> to vector<8x1x16x8xf32>
    %107 = vector.shape_cast %106 : vector<8x1x16x8xf32> to vector<8x16x8xf32>
    %108 = vector.extract_strided_slice %105 {offsets = [0, 1, 0, 0], sizes = [8, 1, 16, 8], strides = [1, 1, 1, 1]} : vector<8x2x16x8xf32> to vector<8x1x16x8xf32>
    %109 = vector.shape_cast %108 : vector<8x1x16x8xf32> to vector<8x16x8xf32>
    %110 = arith.maximumf %107, %109 : vector<8x16x8xf32>
    %111 = vector.shape_cast %110 : vector<8x16x8xf32> to vector<8x8x2x8xf32>
    %112 = vector.extract_strided_slice %111 {offsets = [0, 0, 0, 0], sizes = [8, 8, 1, 8], strides = [1, 1, 1, 1]} : vector<8x8x2x8xf32> to vector<8x8x1x8xf32>
    %113 = vector.shape_cast %112 : vector<8x8x1x8xf32> to vector<8x8x8xf32>
    %114 = vector.extract_strided_slice %111 {offsets = [0, 0, 1, 0], sizes = [8, 8, 1, 8], strides = [1, 1, 1, 1]} : vector<8x8x2x8xf32> to vector<8x8x1x8xf32>
    %115 = vector.shape_cast %114 : vector<8x8x1x8xf32> to vector<8x8x8xf32>
    %116 = arith.maximumf %113, %115 : vector<8x8x8xf32>
    %cst_107 = arith.constant 0.000000e+00 : f32
    %117 = vector.broadcast %cst_107 : f32 to vector<1x8x24xf32>
    %c0_108 = arith.constant 0 : index
    %c0_109 = arith.constant 0 : index
    %c0_110 = arith.constant 0 : index
    %118 = vector.load %arg36[%c0_108, %c0_109, %c0_110] : memref<10x8x24xf32, #tpu.memory_space<vmem>>, vector<1x8x24xf32>
    tpu.vector_store %arg36[%c0_108, %c0_109, %c0_110], %117 {strides = array<i32>} : memref<10x8x24xf32, #tpu.memory_space<vmem>>, vector<1x8x24xf32>,
    %cst_111 = arith.constant 0.000000e+00 : f32
    %119 = vector.broadcast %cst_111 : f32 to vector<1x8x24xf32>
    %c9 = arith.constant 9 : index
    %c0_112 = arith.constant 0 : index
    %c0_113 = arith.constant 0 : index
    %120 = vector.load %arg36[%c9, %c0_112, %c0_113] : memref<10x8x24xf32, #tpu.memory_space<vmem>>, vector<1x8x24xf32>
    tpu.vector_store %arg36[%c9, %c0_112, %c0_113], %119 {strides = array<i32>} : memref<10x8x24xf32, #tpu.memory_space<vmem>>, vector<1x8x24xf32>,
    %cst_114 = arith.constant 0.000000e+00 : f32
    %121 = vector.broadcast %cst_114 : f32 to vector<10x1x24xf32>
    %c0_115 = arith.constant 0 : index
    %c0_116 = arith.constant 0 : index
    %c0_117 = arith.constant 0 : index
    %122 = vector.load %arg36[%c0_115, %c0_116, %c0_117] : memref<10x8x24xf32, #tpu.memory_space<vmem>>, vector<10x1x24xf32>
    tpu.vector_store %arg36[%c0_115, %c0_116, %c0_117], %121 {strides = array<i32>} : memref<10x8x24xf32, #tpu.memory_space<vmem>>, vector<10x1x24xf32>,
    %cst_118 = arith.constant 0.000000e+00 : f32
    %123 = vector.broadcast %cst_118 : f32 to vector<10x1x24xf32>
    %c0_119 = arith.constant 0 : index
    %c7 = arith.constant 7 : index
    %c0_120 = arith.constant 0 : index
    %124 = vector.load %arg36[%c0_119, %c7, %c0_120] : memref<10x8x24xf32, #tpu.memory_space<vmem>>, vector<10x1x24xf32>
    tpu.vector_store %arg36[%c0_119, %c7, %c0_120], %123 {strides = array<i32>} : memref<10x8x24xf32, #tpu.memory_space<vmem>>, vector<10x1x24xf32>,
    %125 = vector.extract_strided_slice %116 {offsets = [0, 0, 0], sizes = [8, 7, 8], strides = [1, 1, 1]} : vector<8x8x8xf32> to vector<8x7x8xf32>
    %c1_121 = arith.constant 1 : index
    %c1_122 = arith.constant 1 : index
    %c0_123 = arith.constant 0 : index
    %126 = vector.load %arg36[%c1_121, %c1_122, %c0_123] : memref<10x8x24xf32, #tpu.memory_space<vmem>>, vector<8x7x8xf32>
    tpu.vector_store %arg36[%c1_121, %c1_122, %c0_123], %125 {strides = array<i32>} : memref<10x8x24xf32, #tpu.memory_space<vmem>>, vector<8x7x8xf32>,
    %c1_124 = arith.constant 1 : index
    %c0_125 = arith.constant 0 : index
    %c8_126 = arith.constant 8 : index
    %127 = vector.load %arg36[%c1_124, %c0_125, %c8_126] : memref<10x8x24xf32, #tpu.memory_space<vmem>>, vector<8x8x8xf32>
    tpu.vector_store %arg36[%c1_124, %c0_125, %c8_126], %116 {strides = array<i32>} : memref<10x8x24xf32, #tpu.memory_space<vmem>>, vector<8x8x8xf32>,
    %128 = vector.extract_strided_slice %116 {offsets = [0, 1, 0], sizes = [8, 7, 8], strides = [1, 1, 1]} : vector<8x8x8xf32> to vector<8x7x8xf32>
    %c1_127 = arith.constant 1 : index
    %c0_128 = arith.constant 0 : index
    %c16_129 = arith.constant 16 : index
    %129 = vector.load %arg36[%c1_127, %c0_128, %c16_129] : memref<10x8x24xf32, #tpu.memory_space<vmem>>, vector<8x7x8xf32>
    tpu.vector_store %arg36[%c1_127, %c0_128, %c16_129], %128 {strides = array<i32>} : memref<10x8x24xf32, #tpu.memory_space<vmem>>, vector<8x7x8xf32>,
    %c0_130 = arith.constant 0 : index
    %c0_131 = arith.constant 0 : index
    %c0_132 = arith.constant 0 : index
    %130 = vector.load %arg36[%c0_130, %c0_131, %c0_132] : memref<10x8x24xf32, #tpu.memory_space<vmem>>, vector<8x8x24xf32>
    %131 = vector.shape_cast %130 : vector<8x8x24xf32> to vector<64x24xf32>
    %132 = arith.truncf %131 : vector<64x24xf32> to vector<64x24xbf16>
    %c0_133 = arith.constant 0 : index
    %c0_134 = arith.constant 0 : index
    %c0_135 = arith.constant 0 : index
    %133 = vector.load %arg9[%c0_133, %c0_134, %c0_135] : memref<3x24x8xbf16, #tpu.memory_space<vmem>>, vector<1x24x8xbf16>
    %134 = vector.shape_cast %133 : vector<1x24x8xbf16> to vector<24x8xbf16>
    %cst_136 = arith.constant dense<0.000000e+00> : vector<64x8xf32>
    %135 = tpu.matmul %132, %134, %cst_136 {dimension_numbers = #tpu.dot_dimension_numbers<[1], [0], [0], [1], [0, 0, 1, 1], [], []>} : vector<64x24xbf16>, vector<24x8xbf16>, vector<64x8xf32> -> vector<64x8xf32>
    %c1_137 = arith.constant 1 : index
    %c0_138 = arith.constant 0 : index
    %c0_139 = arith.constant 0 : index
    %136 = vector.load %arg36[%c1_137, %c0_138, %c0_139] : memref<10x8x24xf32, #tpu.memory_space<vmem>>, vector<8x8x24xf32>
    %137 = vector.shape_cast %136 : vector<8x8x24xf32> to vector<64x24xf32>
    %138 = arith.truncf %137 : vector<64x24xf32> to vector<64x24xbf16>
    %c1_140 = arith.constant 1 : index
    %c0_141 = arith.constant 0 : index
    %c0_142 = arith.constant 0 : index
    %139 = vector.load %arg9[%c1_140, %c0_141, %c0_142] : memref<3x24x8xbf16, #tpu.memory_space<vmem>>, vector<1x24x8xbf16>
    %140 = vector.shape_cast %139 : vector<1x24x8xbf16> to vector<24x8xbf16>
    %cst_143 = arith.constant dense<0.000000e+00> : vector<64x8xf32>
    %141 = tpu.matmul %138, %140, %cst_143 {dimension_numbers = #tpu.dot_dimension_numbers<[1], [0], [0], [1], [0, 0, 1, 1], [], []>} : vector<64x24xbf16>, vector<24x8xbf16>, vector<64x8xf32> -> vector<64x8xf32>
    %142 = arith.addf %135, %141 : vector<64x8xf32>
    %c2_144 = arith.constant 2 : index
    %c0_145 = arith.constant 0 : index
    %c0_146 = arith.constant 0 : index
    %143 = vector.load %arg36[%c2_144, %c0_145, %c0_146] : memref<10x8x24xf32, #tpu.memory_space<vmem>>, vector<8x8x24xf32>
    %144 = vector.shape_cast %143 : vector<8x8x24xf32> to vector<64x24xf32>
    %145 = arith.truncf %144 : vector<64x24xf32> to vector<64x24xbf16>
    %c2_147 = arith.constant 2 : index
    %c0_148 = arith.constant 0 : index
    %c0_149 = arith.constant 0 : index
    %146 = vector.load %arg9[%c2_147, %c0_148, %c0_149] : memref<3x24x8xbf16, #tpu.memory_space<vmem>>, vector<1x24x8xbf16>
    %147 = vector.shape_cast %146 : vector<1x24x8xbf16> to vector<24x8xbf16>
    %cst_150 = arith.constant dense<0.000000e+00> : vector<64x8xf32>
    %148 = tpu.matmul %145, %147, %cst_150 {dimension_numbers = #tpu.dot_dimension_numbers<[1], [0], [0], [1], [0, 0, 1, 1], [], []>} : vector<64x24xbf16>, vector<24x8xbf16>, vector<64x8xf32> -> vector<64x8xf32>
    %149 = arith.addf %142, %148 : vector<64x8xf32>
    %c0_151 = arith.constant 0 : index
    %c0_152 = arith.constant 0 : index
    %150 = vector.load %arg10[%c0_151, %c0_152] : memref<1x8xf32, #tpu.memory_space<vmem>>, vector<1x8xf32>
    %151 = vector.broadcast %150 : vector<1x8xf32> to vector<64x8xf32>
    %152 = arith.addf %149, %151 : vector<64x8xf32>
    %cst_153 = arith.constant dense<0.000000e+00> : vector<8xf32>
    %153 = vector.multi_reduction <add>, %152, %cst_153 [0] : vector<64x8xf32> to vector<8xf32>
    %154 = vector.shape_cast %153 : vector<8xf32> to vector<1x8xf32>
    %155 = arith.mulf %152, %152 : vector<64x8xf32>
    %cst_154 = arith.constant dense<0.000000e+00> : vector<8xf32>
    %156 = vector.multi_reduction <add>, %155, %cst_154 [0] : vector<64x8xf32> to vector<8xf32>
    %157 = vector.shape_cast %156 : vector<8xf32> to vector<1x8xf32>
    %c0_155 = arith.constant 0 : index
    %c0_156 = arith.constant 0 : index
    %158 = vector.load %arg11[%c0_155, %c0_156] : memref<8x8xf32, #tpu.memory_space<vmem>>, vector<8x8xf32>
    %cst_157 = arith.constant dense<0.000000e+00> : vector<1x8xf32>
    %159 = tpu.matmul %154, %158, %cst_157 {dimension_numbers = #tpu.dot_dimension_numbers<[1], [0], [0], [1], [0, 0, 1, 1], [], []>} : vector<1x8xf32>, vector<8x8xf32>, vector<1x8xf32> -> vector<1x8xf32>
    %c0_158 = arith.constant 0 : index
    %c0_159 = arith.constant 0 : index
    %160 = vector.load %arg11[%c0_158, %c0_159] : memref<8x8xf32, #tpu.memory_space<vmem>>, vector<8x8xf32>
    %cst_160 = arith.constant dense<0.000000e+00> : vector<1x8xf32>
    %161 = tpu.matmul %157, %160, %cst_160 {dimension_numbers = #tpu.dot_dimension_numbers<[1], [0], [0], [1], [0, 0, 1, 1], [], []>} : vector<1x8xf32>, vector<8x8xf32>, vector<1x8xf32> -> vector<1x8xf32>
    %162 = arith.mulf %159, %159 : vector<1x8xf32>
    %163 = arith.subf %161, %162 : vector<1x8xf32>
    %cst_161 = arith.constant 0.000000e+00 : f32
    %164 = vector.broadcast %cst_161 : f32 to vector<1x8xf32>
    %165 = arith.maximumf %163, %164 : vector<1x8xf32>
    %cst_162 = arith.constant 9.99999974E-6 : f32
    %166 = vector.broadcast %cst_162 : f32 to vector<1x8xf32>
    %167 = arith.addf %165, %166 : vector<1x8xf32>
    %168 = math.rsqrt %167 : vector<1x8xf32>
    %c0_163 = arith.constant 0 : index
    %c0_164 = arith.constant 0 : index
    %169 = vector.load %arg12[%c0_163, %c0_164] : memref<1x8xf32, #tpu.memory_space<vmem>>, vector<1x8xf32>
    %170 = arith.mulf %168, %169 : vector<1x8xf32>
    %c0_165 = arith.constant 0 : index
    %c0_166 = arith.constant 0 : index
    %171 = vector.load %arg13[%c0_165, %c0_166] : memref<1x8xf32, #tpu.memory_space<vmem>>, vector<1x8xf32>
    %172 = arith.mulf %159, %170 : vector<1x8xf32>
    %173 = arith.subf %171, %172 : vector<1x8xf32>
    %174 = vector.broadcast %170 : vector<1x8xf32> to vector<64x8xf32>
    %175 = arith.mulf %152, %174 : vector<64x8xf32>
    %176 = vector.broadcast %173 : vector<1x8xf32> to vector<64x8xf32>
    %177 = arith.addf %175, %176 : vector<64x8xf32>
    %cst_167 = arith.constant 0.000000e+00 : f32
    %178 = vector.broadcast %cst_167 : f32 to vector<64x8xf32>
    %179 = arith.maximumf %177, %178 : vector<64x8xf32>
    %180 = vector.shape_cast %179 : vector<64x8xf32> to vector<8x8x8xf32>
    %cst_168 = arith.constant 0.000000e+00 : f32
    %181 = vector.broadcast %cst_168 : f32 to vector<1x8x24xf32>
    %c0_169 = arith.constant 0 : index
    %c0_170 = arith.constant 0 : index
    %c0_171 = arith.constant 0 : index
    %182 = vector.load %arg37[%c0_169, %c0_170, %c0_171] : memref<10x8x24xf32, #tpu.memory_space<vmem>>, vector<1x8x24xf32>
    tpu.vector_store %arg37[%c0_169, %c0_170, %c0_171], %181 {strides = array<i32>} : memref<10x8x24xf32, #tpu.memory_space<vmem>>, vector<1x8x24xf32>,
    %cst_172 = arith.constant 0.000000e+00 : f32
    %183 = vector.broadcast %cst_172 : f32 to vector<1x8x24xf32>
    %c9_173 = arith.constant 9 : index
    %c0_174 = arith.constant 0 : index
    %c0_175 = arith.constant 0 : index
    %184 = vector.load %arg37[%c9_173, %c0_174, %c0_175] : memref<10x8x24xf32, #tpu.memory_space<vmem>>, vector<1x8x24xf32>
    tpu.vector_store %arg37[%c9_173, %c0_174, %c0_175], %183 {strides = array<i32>} : memref<10x8x24xf32, #tpu.memory_space<vmem>>, vector<1x8x24xf32>,
    %cst_176 = arith.constant 0.000000e+00 : f32
    %185 = vector.broadcast %cst_176 : f32 to vector<10x1x24xf32>
    %c0_177 = arith.constant 0 : index
    %c0_178 = arith.constant 0 : index
    %c0_179 = arith.constant 0 : index
    %186 = vector.load %arg37[%c0_177, %c0_178, %c0_179] : memref<10x8x24xf32, #tpu.memory_space<vmem>>, vector<10x1x24xf32>
    tpu.vector_store %arg37[%c0_177, %c0_178, %c0_179], %185 {strides = array<i32>} : memref<10x8x24xf32, #tpu.memory_space<vmem>>, vector<10x1x24xf32>,
    %cst_180 = arith.constant 0.000000e+00 : f32
    %187 = vector.broadcast %cst_180 : f32 to vector<10x1x24xf32>
    %c0_181 = arith.constant 0 : index
    %c7_182 = arith.constant 7 : index
    %c0_183 = arith.constant 0 : index
    %188 = vector.load %arg37[%c0_181, %c7_182, %c0_183] : memref<10x8x24xf32, #tpu.memory_space<vmem>>, vector<10x1x24xf32>
    tpu.vector_store %arg37[%c0_181, %c7_182, %c0_183], %187 {strides = array<i32>} : memref<10x8x24xf32, #tpu.memory_space<vmem>>, vector<10x1x24xf32>,
    %189 = vector.extract_strided_slice %180 {offsets = [0, 0, 0], sizes = [8, 7, 8], strides = [1, 1, 1]} : vector<8x8x8xf32> to vector<8x7x8xf32>
    %c1_184 = arith.constant 1 : index
    %c1_185 = arith.constant 1 : index
    %c0_186 = arith.constant 0 : index
    %190 = vector.load %arg37[%c1_184, %c1_185, %c0_186] : memref<10x8x24xf32, #tpu.memory_space<vmem>>, vector<8x7x8xf32>
    tpu.vector_store %arg37[%c1_184, %c1_185, %c0_186], %189 {strides = array<i32>} : memref<10x8x24xf32, #tpu.memory_space<vmem>>, vector<8x7x8xf32>,
    %c1_187 = arith.constant 1 : index
    %c0_188 = arith.constant 0 : index
    %c8_189 = arith.constant 8 : index
    %191 = vector.load %arg37[%c1_187, %c0_188, %c8_189] : memref<10x8x24xf32, #tpu.memory_space<vmem>>, vector<8x8x8xf32>
    tpu.vector_store %arg37[%c1_187, %c0_188, %c8_189], %180 {strides = array<i32>} : memref<10x8x24xf32, #tpu.memory_space<vmem>>, vector<8x8x8xf32>,
    %192 = vector.extract_strided_slice %180 {offsets = [0, 1, 0], sizes = [8, 7, 8], strides = [1, 1, 1]} : vector<8x8x8xf32> to vector<8x7x8xf32>
    %c1_190 = arith.constant 1 : index
    %c0_191 = arith.constant 0 : index
    %c16_192 = arith.constant 16 : index
    %193 = vector.load %arg37[%c1_190, %c0_191, %c16_192] : memref<10x8x24xf32, #tpu.memory_space<vmem>>, vector<8x7x8xf32>
    tpu.vector_store %arg37[%c1_190, %c0_191, %c16_192], %192 {strides = array<i32>} : memref<10x8x24xf32, #tpu.memory_space<vmem>>, vector<8x7x8xf32>,
    %c0_193 = arith.constant 0 : index
    %c0_194 = arith.constant 0 : index
    %c0_195 = arith.constant 0 : index
    %194 = vector.load %arg37[%c0_193, %c0_194, %c0_195] : memref<10x8x24xf32, #tpu.memory_space<vmem>>, vector<8x8x24xf32>
    %195 = vector.shape_cast %194 : vector<8x8x24xf32> to vector<64x24xf32>
    %196 = arith.truncf %195 : vector<64x24xf32> to vector<64x24xbf16>
    %c0_196 = arith.constant 0 : index
    %c0_197 = arith.constant 0 : index
    %c0_198 = arith.constant 0 : index
    %197 = vector.load %arg14[%c0_196, %c0_197, %c0_198] : memref<3x24x8xbf16, #tpu.memory_space<vmem>>, vector<1x24x8xbf16>
    %198 = vector.shape_cast %197 : vector<1x24x8xbf16> to vector<24x8xbf16>
    %cst_199 = arith.constant dense<0.000000e+00> : vector<64x8xf32>
    %199 = tpu.matmul %196, %198, %cst_199 {dimension_numbers = #tpu.dot_dimension_numbers<[1], [0], [0], [1], [0, 0, 1, 1], [], []>} : vector<64x24xbf16>, vector<24x8xbf16>, vector<64x8xf32> -> vector<64x8xf32>
    %c1_200 = arith.constant 1 : index
    %c0_201 = arith.constant 0 : index
    %c0_202 = arith.constant 0 : index
    %200 = vector.load %arg37[%c1_200, %c0_201, %c0_202] : memref<10x8x24xf32, #tpu.memory_space<vmem>>, vector<8x8x24xf32>
    %201 = vector.shape_cast %200 : vector<8x8x24xf32> to vector<64x24xf32>
    %202 = arith.truncf %201 : vector<64x24xf32> to vector<64x24xbf16>
    %c1_203 = arith.constant 1 : index
    %c0_204 = arith.constant 0 : index
    %c0_205 = arith.constant 0 : index
    %203 = vector.load %arg14[%c1_203, %c0_204, %c0_205] : memref<3x24x8xbf16, #tpu.memory_space<vmem>>, vector<1x24x8xbf16>
    %204 = vector.shape_cast %203 : vector<1x24x8xbf16> to vector<24x8xbf16>
    %cst_206 = arith.constant dense<0.000000e+00> : vector<64x8xf32>
    %205 = tpu.matmul %202, %204, %cst_206 {dimension_numbers = #tpu.dot_dimension_numbers<[1], [0], [0], [1], [0, 0, 1, 1], [], []>} : vector<64x24xbf16>, vector<24x8xbf16>, vector<64x8xf32> -> vector<64x8xf32>
    %206 = arith.addf %199, %205 : vector<64x8xf32>
    %c2_207 = arith.constant 2 : index
    %c0_208 = arith.constant 0 : index
    %c0_209 = arith.constant 0 : index
    %207 = vector.load %arg37[%c2_207, %c0_208, %c0_209] : memref<10x8x24xf32, #tpu.memory_space<vmem>>, vector<8x8x24xf32>
    %208 = vector.shape_cast %207 : vector<8x8x24xf32> to vector<64x24xf32>
    %209 = arith.truncf %208 : vector<64x24xf32> to vector<64x24xbf16>
    %c2_210 = arith.constant 2 : index
    %c0_211 = arith.constant 0 : index
    %c0_212 = arith.constant 0 : index
    %210 = vector.load %arg14[%c2_210, %c0_211, %c0_212] : memref<3x24x8xbf16, #tpu.memory_space<vmem>>, vector<1x24x8xbf16>
    %211 = vector.shape_cast %210 : vector<1x24x8xbf16> to vector<24x8xbf16>
    %cst_213 = arith.constant dense<0.000000e+00> : vector<64x8xf32>
    %212 = tpu.matmul %209, %211, %cst_213 {dimension_numbers = #tpu.dot_dimension_numbers<[1], [0], [0], [1], [0, 0, 1, 1], [], []>} : vector<64x24xbf16>, vector<24x8xbf16>, vector<64x8xf32> -> vector<64x8xf32>
    %213 = arith.addf %206, %212 : vector<64x8xf32>
    %c0_214 = arith.constant 0 : index
    %c0_215 = arith.constant 0 : index
    %214 = vector.load %arg15[%c0_214, %c0_215] : memref<1x8xf32, #tpu.memory_space<vmem>>, vector<1x8xf32>
    %215 = vector.broadcast %214 : vector<1x8xf32> to vector<64x8xf32>
    %216 = arith.addf %213, %215 : vector<64x8xf32>
    %cst_216 = arith.constant 0.000000e+00 : f32
    %217 = vector.broadcast %cst_216 : f32 to vector<64x8xf32>
    %218 = arith.maximumf %216, %217 : vector<64x8xf32>
    %219 = vector.shape_cast %218 : vector<64x8xf32> to vector<8x8x8xf32>
    %cst_217 = arith.constant 0.000000e+00 : f32
    %220 = vector.broadcast %cst_217 : f32 to vector<1x8x24xf32>
    %c0_218 = arith.constant 0 : index
    %c0_219 = arith.constant 0 : index
    %c0_220 = arith.constant 0 : index
    %221 = vector.load %arg38[%c0_218, %c0_219, %c0_220] : memref<10x8x24xf32, #tpu.memory_space<vmem>>, vector<1x8x24xf32>
    tpu.vector_store %arg38[%c0_218, %c0_219, %c0_220], %220 {strides = array<i32>} : memref<10x8x24xf32, #tpu.memory_space<vmem>>, vector<1x8x24xf32>,
    %cst_221 = arith.constant 0.000000e+00 : f32
    %222 = vector.broadcast %cst_221 : f32 to vector<1x8x24xf32>
    %c9_222 = arith.constant 9 : index
    %c0_223 = arith.constant 0 : index
    %c0_224 = arith.constant 0 : index
    %223 = vector.load %arg38[%c9_222, %c0_223, %c0_224] : memref<10x8x24xf32, #tpu.memory_space<vmem>>, vector<1x8x24xf32>
    tpu.vector_store %arg38[%c9_222, %c0_223, %c0_224], %222 {strides = array<i32>} : memref<10x8x24xf32, #tpu.memory_space<vmem>>, vector<1x8x24xf32>,
    %cst_225 = arith.constant 0.000000e+00 : f32
    %224 = vector.broadcast %cst_225 : f32 to vector<10x1x24xf32>
    %c0_226 = arith.constant 0 : index
    %c0_227 = arith.constant 0 : index
    %c0_228 = arith.constant 0 : index
    %225 = vector.load %arg38[%c0_226, %c0_227, %c0_228] : memref<10x8x24xf32, #tpu.memory_space<vmem>>, vector<10x1x24xf32>
    tpu.vector_store %arg38[%c0_226, %c0_227, %c0_228], %224 {strides = array<i32>} : memref<10x8x24xf32, #tpu.memory_space<vmem>>, vector<10x1x24xf32>,
    %cst_229 = arith.constant 0.000000e+00 : f32
    %226 = vector.broadcast %cst_229 : f32 to vector<10x1x24xf32>
    %c0_230 = arith.constant 0 : index
    %c7_231 = arith.constant 7 : index
    %c0_232 = arith.constant 0 : index
    %227 = vector.load %arg38[%c0_230, %c7_231, %c0_232] : memref<10x8x24xf32, #tpu.memory_space<vmem>>, vector<10x1x24xf32>
    tpu.vector_store %arg38[%c0_230, %c7_231, %c0_232], %226 {strides = array<i32>} : memref<10x8x24xf32, #tpu.memory_space<vmem>>, vector<10x1x24xf32>,
    %228 = vector.extract_strided_slice %219 {offsets = [0, 0, 0], sizes = [8, 7, 8], strides = [1, 1, 1]} : vector<8x8x8xf32> to vector<8x7x8xf32>
    %c1_233 = arith.constant 1 : index
    %c1_234 = arith.constant 1 : index
    %c0_235 = arith.constant 0 : index
    %229 = vector.load %arg38[%c1_233, %c1_234, %c0_235] : memref<10x8x24xf32, #tpu.memory_space<vmem>>, vector<8x7x8xf32>
    tpu.vector_store %arg38[%c1_233, %c1_234, %c0_235], %228 {strides = array<i32>} : memref<10x8x24xf32, #tpu.memory_space<vmem>>, vector<8x7x8xf32>,
    %c1_236 = arith.constant 1 : index
    %c0_237 = arith.constant 0 : index
    %c8_238 = arith.constant 8 : index
    %230 = vector.load %arg38[%c1_236, %c0_237, %c8_238] : memref<10x8x24xf32, #tpu.memory_space<vmem>>, vector<8x8x8xf32>
    tpu.vector_store %arg38[%c1_236, %c0_237, %c8_238], %219 {strides = array<i32>} : memref<10x8x24xf32, #tpu.memory_space<vmem>>, vector<8x8x8xf32>,
    %231 = vector.extract_strided_slice %219 {offsets = [0, 1, 0], sizes = [8, 7, 8], strides = [1, 1, 1]} : vector<8x8x8xf32> to vector<8x7x8xf32>
    %c1_239 = arith.constant 1 : index
    %c0_240 = arith.constant 0 : index
    %c16_241 = arith.constant 16 : index
    %232 = vector.load %arg38[%c1_239, %c0_240, %c16_241] : memref<10x8x24xf32, #tpu.memory_space<vmem>>, vector<8x7x8xf32>
    tpu.vector_store %arg38[%c1_239, %c0_240, %c16_241], %231 {strides = array<i32>} : memref<10x8x24xf32, #tpu.memory_space<vmem>>, vector<8x7x8xf32>,
    %c0_242 = arith.constant 0 : index
    %c0_243 = arith.constant 0 : index
    %c0_244 = arith.constant 0 : index
    %233 = vector.load %arg38[%c0_242, %c0_243, %c0_244] : memref<10x8x24xf32, #tpu.memory_space<vmem>>, vector<8x8x24xf32>
    %234 = vector.shape_cast %233 : vector<8x8x24xf32> to vector<64x24xf32>
    %235 = arith.truncf %234 : vector<64x24xf32> to vector<64x24xbf16>
    %c0_245 = arith.constant 0 : index
    %c0_246 = arith.constant 0 : index
    %c0_247 = arith.constant 0 : index
    %236 = vector.load %arg16[%c0_245, %c0_246, %c0_247] : memref<3x24x16xbf16, #tpu.memory_space<vmem>>, vector<1x24x16xbf16>
    %237 = vector.shape_cast %236 : vector<1x24x16xbf16> to vector<24x16xbf16>
    %cst_248 = arith.constant dense<0.000000e+00> : vector<64x16xf32>
    %238 = tpu.matmul %235, %237, %cst_248 {dimension_numbers = #tpu.dot_dimension_numbers<[1], [0], [0], [1], [0, 0, 1, 1], [], []>} : vector<64x24xbf16>, vector<24x16xbf16>, vector<64x16xf32> -> vector<64x16xf32>
    %c1_249 = arith.constant 1 : index
    %c0_250 = arith.constant 0 : index
    %c0_251 = arith.constant 0 : index
    %239 = vector.load %arg38[%c1_249, %c0_250, %c0_251] : memref<10x8x24xf32, #tpu.memory_space<vmem>>, vector<8x8x24xf32>
    %240 = vector.shape_cast %239 : vector<8x8x24xf32> to vector<64x24xf32>
    %241 = arith.truncf %240 : vector<64x24xf32> to vector<64x24xbf16>
    %c1_252 = arith.constant 1 : index
    %c0_253 = arith.constant 0 : index
    %c0_254 = arith.constant 0 : index
    %242 = vector.load %arg16[%c1_252, %c0_253, %c0_254] : memref<3x24x16xbf16, #tpu.memory_space<vmem>>, vector<1x24x16xbf16>
    %243 = vector.shape_cast %242 : vector<1x24x16xbf16> to vector<24x16xbf16>
    %cst_255 = arith.constant dense<0.000000e+00> : vector<64x16xf32>
    %244 = tpu.matmul %241, %243, %cst_255 {dimension_numbers = #tpu.dot_dimension_numbers<[1], [0], [0], [1], [0, 0, 1, 1], [], []>} : vector<64x24xbf16>, vector<24x16xbf16>, vector<64x16xf32> -> vector<64x16xf32>
    %245 = arith.addf %238, %244 : vector<64x16xf32>
    %c2_256 = arith.constant 2 : index
    %c0_257 = arith.constant 0 : index
    %c0_258 = arith.constant 0 : index
    %246 = vector.load %arg38[%c2_256, %c0_257, %c0_258] : memref<10x8x24xf32, #tpu.memory_space<vmem>>, vector<8x8x24xf32>
    %247 = vector.shape_cast %246 : vector<8x8x24xf32> to vector<64x24xf32>
    %248 = arith.truncf %247 : vector<64x24xf32> to vector<64x24xbf16>
    %c2_259 = arith.constant 2 : index
    %c0_260 = arith.constant 0 : index
    %c0_261 = arith.constant 0 : index
    %249 = vector.load %arg16[%c2_259, %c0_260, %c0_261] : memref<3x24x16xbf16, #tpu.memory_space<vmem>>, vector<1x24x16xbf16>
    %250 = vector.shape_cast %249 : vector<1x24x16xbf16> to vector<24x16xbf16>
    %cst_262 = arith.constant dense<0.000000e+00> : vector<64x16xf32>
    %251 = tpu.matmul %248, %250, %cst_262 {dimension_numbers = #tpu.dot_dimension_numbers<[1], [0], [0], [1], [0, 0, 1, 1], [], []>} : vector<64x24xbf16>, vector<24x16xbf16>, vector<64x16xf32> -> vector<64x16xf32>
    %252 = arith.addf %245, %251 : vector<64x16xf32>
    %c0_263 = arith.constant 0 : index
    %c0_264 = arith.constant 0 : index
    %253 = vector.load %arg17[%c0_263, %c0_264] : memref<1x16xf32, #tpu.memory_space<vmem>>, vector<1x16xf32>
    %254 = vector.broadcast %253 : vector<1x16xf32> to vector<64x16xf32>
    %255 = arith.addf %252, %254 : vector<64x16xf32>
    %cst_265 = arith.constant dense<0.000000e+00> : vector<16xf32>
    %256 = vector.multi_reduction <add>, %255, %cst_265 [0] : vector<64x16xf32> to vector<16xf32>
    %257 = vector.shape_cast %256 : vector<16xf32> to vector<1x16xf32>
    %258 = arith.mulf %255, %255 : vector<64x16xf32>
    %cst_266 = arith.constant dense<0.000000e+00> : vector<16xf32>
    %259 = vector.multi_reduction <add>, %258, %cst_266 [0] : vector<64x16xf32> to vector<16xf32>
    %260 = vector.shape_cast %259 : vector<16xf32> to vector<1x16xf32>
    %c0_267 = arith.constant 0 : index
    %c0_268 = arith.constant 0 : index
    %261 = vector.load %arg18[%c0_267, %c0_268] : memref<16x16xf32, #tpu.memory_space<vmem>>, vector<16x16xf32>
    %cst_269 = arith.constant dense<0.000000e+00> : vector<1x16xf32>
    %262 = tpu.matmul %257, %261, %cst_269 {dimension_numbers = #tpu.dot_dimension_numbers<[1], [0], [0], [1], [0, 0, 1, 1], [], []>} : vector<1x16xf32>, vector<16x16xf32>, vector<1x16xf32> -> vector<1x16xf32>
    %c0_270 = arith.constant 0 : index
    %c0_271 = arith.constant 0 : index
    %263 = vector.load %arg18[%c0_270, %c0_271] : memref<16x16xf32, #tpu.memory_space<vmem>>, vector<16x16xf32>
    %cst_272 = arith.constant dense<0.000000e+00> : vector<1x16xf32>
    %264 = tpu.matmul %260, %263, %cst_272 {dimension_numbers = #tpu.dot_dimension_numbers<[1], [0], [0], [1], [0, 0, 1, 1], [], []>} : vector<1x16xf32>, vector<16x16xf32>, vector<1x16xf32> -> vector<1x16xf32>
    %265 = arith.mulf %262, %262 : vector<1x16xf32>
    %266 = arith.subf %264, %265 : vector<1x16xf32>
    %cst_273 = arith.constant 0.000000e+00 : f32
    %267 = vector.broadcast %cst_273 : f32 to vector<1x16xf32>
    %268 = arith.maximumf %266, %267 : vector<1x16xf32>
    %cst_274 = arith.constant 9.99999974E-6 : f32
    %269 = vector.broadcast %cst_274 : f32 to vector<1x16xf32>
    %270 = arith.addf %268, %269 : vector<1x16xf32>
    %271 = math.rsqrt %270 : vector<1x16xf32>
    %c0_275 = arith.constant 0 : index
    %c0_276 = arith.constant 0 : index
    %272 = vector.load %arg19[%c0_275, %c0_276] : memref<1x16xf32, #tpu.memory_space<vmem>>, vector<1x16xf32>
    %273 = arith.mulf %271, %272 : vector<1x16xf32>
    %c0_277 = arith.constant 0 : index
    %c0_278 = arith.constant 0 : index
    %274 = vector.load %arg20[%c0_277, %c0_278] : memref<1x16xf32, #tpu.memory_space<vmem>>, vector<1x16xf32>
    %275 = arith.mulf %262, %273 : vector<1x16xf32>
    %276 = arith.subf %274, %275 : vector<1x16xf32>
    %277 = vector.broadcast %273 : vector<1x16xf32> to vector<64x16xf32>
    %278 = arith.mulf %255, %277 : vector<64x16xf32>
    %279 = vector.broadcast %276 : vector<1x16xf32> to vector<64x16xf32>
    %280 = arith.addf %278, %279 : vector<64x16xf32>
    %cst_279 = arith.constant 0.000000e+00 : f32
    %281 = vector.broadcast %cst_279 : f32 to vector<64x16xf32>
    %282 = arith.maximumf %280, %281 : vector<64x16xf32>
    %283 = vector.shape_cast %282 : vector<64x16xf32> to vector<8x8x16xf32>
    %cst_280 = arith.constant 0.000000e+00 : f32
    %284 = vector.broadcast %cst_280 : f32 to vector<1x8x48xf32>
    %c0_281 = arith.constant 0 : index
    %c0_282 = arith.constant 0 : index
    %c0_283 = arith.constant 0 : index
    %285 = vector.load %arg39[%c0_281, %c0_282, %c0_283] : memref<10x8x48xf32, #tpu.memory_space<vmem>>, vector<1x8x48xf32>
    tpu.vector_store %arg39[%c0_281, %c0_282, %c0_283], %284 {strides = array<i32>} : memref<10x8x48xf32, #tpu.memory_space<vmem>>, vector<1x8x48xf32>,
    %cst_284 = arith.constant 0.000000e+00 : f32
    %286 = vector.broadcast %cst_284 : f32 to vector<1x8x48xf32>
    %c9_285 = arith.constant 9 : index
    %c0_286 = arith.constant 0 : index
    %c0_287 = arith.constant 0 : index
    %287 = vector.load %arg39[%c9_285, %c0_286, %c0_287] : memref<10x8x48xf32, #tpu.memory_space<vmem>>, vector<1x8x48xf32>
    tpu.vector_store %arg39[%c9_285, %c0_286, %c0_287], %286 {strides = array<i32>} : memref<10x8x48xf32, #tpu.memory_space<vmem>>, vector<1x8x48xf32>,
    %cst_288 = arith.constant 0.000000e+00 : f32
    %288 = vector.broadcast %cst_288 : f32 to vector<10x1x48xf32>
    %c0_289 = arith.constant 0 : index
    %c0_290 = arith.constant 0 : index
    %c0_291 = arith.constant 0 : index
    %289 = vector.load %arg39[%c0_289, %c0_290, %c0_291] : memref<10x8x48xf32, #tpu.memory_space<vmem>>, vector<10x1x48xf32>
    tpu.vector_store %arg39[%c0_289, %c0_290, %c0_291], %288 {strides = array<i32>} : memref<10x8x48xf32, #tpu.memory_space<vmem>>, vector<10x1x48xf32>,
    %cst_292 = arith.constant 0.000000e+00 : f32
    %290 = vector.broadcast %cst_292 : f32 to vector<10x1x48xf32>
    %c0_293 = arith.constant 0 : index
    %c7_294 = arith.constant 7 : index
    %c0_295 = arith.constant 0 : index
    %291 = vector.load %arg39[%c0_293, %c7_294, %c0_295] : memref<10x8x48xf32, #tpu.memory_space<vmem>>, vector<10x1x48xf32>
    tpu.vector_store %arg39[%c0_293, %c7_294, %c0_295], %290 {strides = array<i32>} : memref<10x8x48xf32, #tpu.memory_space<vmem>>, vector<10x1x48xf32>,
    %292 = vector.extract_strided_slice %283 {offsets = [0, 0, 0], sizes = [8, 7, 16], strides = [1, 1, 1]} : vector<8x8x16xf32> to vector<8x7x16xf32>
    %c1_296 = arith.constant 1 : index
    %c1_297 = arith.constant 1 : index
    %c0_298 = arith.constant 0 : index
    %293 = vector.load %arg39[%c1_296, %c1_297, %c0_298] : memref<10x8x48xf32, #tpu.memory_space<vmem>>, vector<8x7x16xf32>
    tpu.vector_store %arg39[%c1_296, %c1_297, %c0_298], %292 {strides = array<i32>} : memref<10x8x48xf32, #tpu.memory_space<vmem>>, vector<8x7x16xf32>,
    %c1_299 = arith.constant 1 : index
    %c0_300 = arith.constant 0 : index
    %c16_301 = arith.constant 16 : index
    %294 = vector.load %arg39[%c1_299, %c0_300, %c16_301] : memref<10x8x48xf32, #tpu.memory_space<vmem>>, vector<8x8x16xf32>
    tpu.vector_store %arg39[%c1_299, %c0_300, %c16_301], %283 {strides = array<i32>} : memref<10x8x48xf32, #tpu.memory_space<vmem>>, vector<8x8x16xf32>,
    %295 = vector.extract_strided_slice %283 {offsets = [0, 1, 0], sizes = [8, 7, 16], strides = [1, 1, 1]} : vector<8x8x16xf32> to vector<8x7x16xf32>
    %c1_302 = arith.constant 1 : index
    %c0_303 = arith.constant 0 : index
    %c32 = arith.constant 32 : index
    %296 = vector.load %arg39[%c1_302, %c0_303, %c32] : memref<10x8x48xf32, #tpu.memory_space<vmem>>, vector<8x7x16xf32>
    tpu.vector_store %arg39[%c1_302, %c0_303, %c32], %295 {strides = array<i32>} : memref<10x8x48xf32, #tpu.memory_space<vmem>>, vector<8x7x16xf32>,
    %c0_304 = arith.constant 0 : index
    %c0_305 = arith.constant 0 : index
    %c0_306 = arith.constant 0 : index
    %297 = vector.load %arg39[%c0_304, %c0_305, %c0_306] : memref<10x8x48xf32, #tpu.memory_space<vmem>>, vector<8x8x48xf32>
    %298 = vector.shape_cast %297 : vector<8x8x48xf32> to vector<64x48xf32>
    %299 = arith.truncf %298 : vector<64x48xf32> to vector<64x48xbf16>
    %c0_307 = arith.constant 0 : index
    %c0_308 = arith.constant 0 : index
    %c0_309 = arith.constant 0 : index
    %300 = vector.load %arg21[%c0_307, %c0_308, %c0_309] : memref<3x48x16xbf16, #tpu.memory_space<vmem>>, vector<1x48x16xbf16>
    %301 = vector.shape_cast %300 : vector<1x48x16xbf16> to vector<48x16xbf16>
    %cst_310 = arith.constant dense<0.000000e+00> : vector<64x16xf32>
    %302 = tpu.matmul %299, %301, %cst_310 {dimension_numbers = #tpu.dot_dimension_numbers<[1], [0], [0], [1], [0, 0, 1, 1], [], []>} : vector<64x48xbf16>, vector<48x16xbf16>, vector<64x16xf32> -> vector<64x16xf32>
    %c1_311 = arith.constant 1 : index
    %c0_312 = arith.constant 0 : index
    %c0_313 = arith.constant 0 : index
    %303 = vector.load %arg39[%c1_311, %c0_312, %c0_313] : memref<10x8x48xf32, #tpu.memory_space<vmem>>, vector<8x8x48xf32>
    %304 = vector.shape_cast %303 : vector<8x8x48xf32> to vector<64x48xf32>
    %305 = arith.truncf %304 : vector<64x48xf32> to vector<64x48xbf16>
    %c1_314 = arith.constant 1 : index
    %c0_315 = arith.constant 0 : index
    %c0_316 = arith.constant 0 : index
    %306 = vector.load %arg21[%c1_314, %c0_315, %c0_316] : memref<3x48x16xbf16, #tpu.memory_space<vmem>>, vector<1x48x16xbf16>
    %307 = vector.shape_cast %306 : vector<1x48x16xbf16> to vector<48x16xbf16>
    %cst_317 = arith.constant dense<0.000000e+00> : vector<64x16xf32>
    %308 = tpu.matmul %305, %307, %cst_317 {dimension_numbers = #tpu.dot_dimension_numbers<[1], [0], [0], [1], [0, 0, 1, 1], [], []>} : vector<64x48xbf16>, vector<48x16xbf16>, vector<64x16xf32> -> vector<64x16xf32>
    %309 = arith.addf %302, %308 : vector<64x16xf32>
    %c2_318 = arith.constant 2 : index
    %c0_319 = arith.constant 0 : index
    %c0_320 = arith.constant 0 : index
    %310 = vector.load %arg39[%c2_318, %c0_319, %c0_320] : memref<10x8x48xf32, #tpu.memory_space<vmem>>, vector<8x8x48xf32>
    %311 = vector.shape_cast %310 : vector<8x8x48xf32> to vector<64x48xf32>
    %312 = arith.truncf %311 : vector<64x48xf32> to vector<64x48xbf16>
    %c2_321 = arith.constant 2 : index
    %c0_322 = arith.constant 0 : index
    %c0_323 = arith.constant 0 : index
    %313 = vector.load %arg21[%c2_321, %c0_322, %c0_323] : memref<3x48x16xbf16, #tpu.memory_space<vmem>>, vector<1x48x16xbf16>
    %314 = vector.shape_cast %313 : vector<1x48x16xbf16> to vector<48x16xbf16>
    %cst_324 = arith.constant dense<0.000000e+00> : vector<64x16xf32>
    %315 = tpu.matmul %312, %314, %cst_324 {dimension_numbers = #tpu.dot_dimension_numbers<[1], [0], [0], [1], [0, 0, 1, 1], [], []>} : vector<64x48xbf16>, vector<48x16xbf16>, vector<64x16xf32> -> vector<64x16xf32>
    %316 = arith.addf %309, %315 : vector<64x16xf32>
    %c0_325 = arith.constant 0 : index
    %c0_326 = arith.constant 0 : index
    %317 = vector.load %arg22[%c0_325, %c0_326] : memref<1x16xf32, #tpu.memory_space<vmem>>, vector<1x16xf32>
    %318 = vector.broadcast %317 : vector<1x16xf32> to vector<64x16xf32>
    %319 = arith.addf %316, %318 : vector<64x16xf32>
    %cst_327 = arith.constant 0.000000e+00 : f32
    %320 = vector.broadcast %cst_327 : f32 to vector<64x16xf32>
    %321 = arith.maximumf %319, %320 : vector<64x16xf32>
    %322 = vector.shape_cast %321 : vector<64x16xf32> to vector<8x8x16xf32>
    %323 = vector.shape_cast %322 : vector<8x8x16xf32> to vector<4x2x8x16xf32>
    %324 = vector.extract_strided_slice %323 {offsets = [0, 0, 0, 0], sizes = [4, 1, 8, 16], strides = [1, 1, 1, 1]} : vector<4x2x8x16xf32> to vector<4x1x8x16xf32>
    %325 = vector.shape_cast %324 : vector<4x1x8x16xf32> to vector<4x8x16xf32>
    %326 = vector.extract_strided_slice %323 {offsets = [0, 1, 0, 0], sizes = [4, 1, 8, 16], strides = [1, 1, 1, 1]} : vector<4x2x8x16xf32> to vector<4x1x8x16xf32>
    %327 = vector.shape_cast %326 : vector<4x1x8x16xf32> to vector<4x8x16xf32>
    %328 = arith.maximumf %325, %327 : vector<4x8x16xf32>
    %329 = vector.shape_cast %328 : vector<4x8x16xf32> to vector<4x4x2x16xf32>
    %330 = vector.extract_strided_slice %329 {offsets = [0, 0, 0, 0], sizes = [4, 4, 1, 16], strides = [1, 1, 1, 1]} : vector<4x4x2x16xf32> to vector<4x4x1x16xf32>
    %331 = vector.shape_cast %330 : vector<4x4x1x16xf32> to vector<4x4x16xf32>
    %332 = vector.extract_strided_slice %329 {offsets = [0, 0, 1, 0], sizes = [4, 4, 1, 16], strides = [1, 1, 1, 1]} : vector<4x4x2x16xf32> to vector<4x4x1x16xf32>
    %333 = vector.shape_cast %332 : vector<4x4x1x16xf32> to vector<4x4x16xf32>
    %334 = arith.maximumf %331, %333 : vector<4x4x16xf32>
    %cst_328 = arith.constant 0.000000e+00 : f32
    %335 = vector.broadcast %cst_328 : f32 to vector<1x4x48xf32>
    %c0_329 = arith.constant 0 : index
    %c0_330 = arith.constant 0 : index
    %c0_331 = arith.constant 0 : index
    %336 = vector.load %arg40[%c0_329, %c0_330, %c0_331] : memref<6x4x48xf32, #tpu.memory_space<vmem>>, vector<1x4x48xf32>
    tpu.vector_store %arg40[%c0_329, %c0_330, %c0_331], %335 {strides = array<i32>} : memref<6x4x48xf32, #tpu.memory_space<vmem>>, vector<1x4x48xf32>,
    %cst_332 = arith.constant 0.000000e+00 : f32
    %337 = vector.broadcast %cst_332 : f32 to vector<1x4x48xf32>
    %c5 = arith.constant 5 : index
    %c0_333 = arith.constant 0 : index
    %c0_334 = arith.constant 0 : index
    %338 = vector.load %arg40[%c5, %c0_333, %c0_334] : memref<6x4x48xf32, #tpu.memory_space<vmem>>, vector<1x4x48xf32>
    tpu.vector_store %arg40[%c5, %c0_333, %c0_334], %337 {strides = array<i32>} : memref<6x4x48xf32, #tpu.memory_space<vmem>>, vector<1x4x48xf32>,
    %cst_335 = arith.constant 0.000000e+00 : f32
    %339 = vector.broadcast %cst_335 : f32 to vector<6x1x48xf32>
    %c0_336 = arith.constant 0 : index
    %c0_337 = arith.constant 0 : index
    %c0_338 = arith.constant 0 : index
    %340 = vector.load %arg40[%c0_336, %c0_337, %c0_338] : memref<6x4x48xf32, #tpu.memory_space<vmem>>, vector<6x1x48xf32>
    tpu.vector_store %arg40[%c0_336, %c0_337, %c0_338], %339 {strides = array<i32>} : memref<6x4x48xf32, #tpu.memory_space<vmem>>, vector<6x1x48xf32>,
    %cst_339 = arith.constant 0.000000e+00 : f32
    %341 = vector.broadcast %cst_339 : f32 to vector<6x1x48xf32>
    %c0_340 = arith.constant 0 : index
    %c3 = arith.constant 3 : index
    %c0_341 = arith.constant 0 : index
    %342 = vector.load %arg40[%c0_340, %c3, %c0_341] : memref<6x4x48xf32, #tpu.memory_space<vmem>>, vector<6x1x48xf32>
    tpu.vector_store %arg40[%c0_340, %c3, %c0_341], %341 {strides = array<i32>} : memref<6x4x48xf32, #tpu.memory_space<vmem>>, vector<6x1x48xf32>,
    %343 = vector.extract_strided_slice %334 {offsets = [0, 0, 0], sizes = [4, 3, 16], strides = [1, 1, 1]} : vector<4x4x16xf32> to vector<4x3x16xf32>
    %c1_342 = arith.constant 1 : index
    %c1_343 = arith.constant 1 : index
    %c0_344 = arith.constant 0 : index
    %344 = vector.load %arg40[%c1_342, %c1_343, %c0_344] : memref<6x4x48xf32, #tpu.memory_space<vmem>>, vector<4x3x16xf32>
    tpu.vector_store %arg40[%c1_342, %c1_343, %c0_344], %343 {strides = array<i32>} : memref<6x4x48xf32, #tpu.memory_space<vmem>>, vector<4x3x16xf32>,
    %c1_345 = arith.constant 1 : index
    %c0_346 = arith.constant 0 : index
    %c16_347 = arith.constant 16 : index
    %345 = vector.load %arg40[%c1_345, %c0_346, %c16_347] : memref<6x4x48xf32, #tpu.memory_space<vmem>>, vector<4x4x16xf32>
    tpu.vector_store %arg40[%c1_345, %c0_346, %c16_347], %334 {strides = array<i32>} : memref<6x4x48xf32, #tpu.memory_space<vmem>>, vector<4x4x16xf32>,
    %346 = vector.extract_strided_slice %334 {offsets = [0, 1, 0], sizes = [4, 3, 16], strides = [1, 1, 1]} : vector<4x4x16xf32> to vector<4x3x16xf32>
    %c1_348 = arith.constant 1 : index
    %c0_349 = arith.constant 0 : index
    %c32_350 = arith.constant 32 : index
    %347 = vector.load %arg40[%c1_348, %c0_349, %c32_350] : memref<6x4x48xf32, #tpu.memory_space<vmem>>, vector<4x3x16xf32>
    tpu.vector_store %arg40[%c1_348, %c0_349, %c32_350], %346 {strides = array<i32>} : memref<6x4x48xf32, #tpu.memory_space<vmem>>, vector<4x3x16xf32>,
    %c0_351 = arith.constant 0 : index
    %c0_352 = arith.constant 0 : index
    %c0_353 = arith.constant 0 : index
    %348 = vector.load %arg40[%c0_351, %c0_352, %c0_353] : memref<6x4x48xf32, #tpu.memory_space<vmem>>, vector<4x4x48xf32>
    %349 = vector.shape_cast %348 : vector<4x4x48xf32> to vector<16x48xf32>
    %350 = arith.truncf %349 : vector<16x48xf32> to vector<16x48xbf16>
    %c0_354 = arith.constant 0 : index
    %c0_355 = arith.constant 0 : index
    %c0_356 = arith.constant 0 : index
    %351 = vector.load %arg23[%c0_354, %c0_355, %c0_356] : memref<3x48x16xbf16, #tpu.memory_space<vmem>>, vector<1x48x16xbf16>
    %352 = vector.shape_cast %351 : vector<1x48x16xbf16> to vector<48x16xbf16>
    %cst_357 = arith.constant dense<0.000000e+00> : vector<16x16xf32>
    %353 = tpu.matmul %350, %352, %cst_357 {dimension_numbers = #tpu.dot_dimension_numbers<[1], [0], [0], [1], [0, 0, 1, 1], [], []>} : vector<16x48xbf16>, vector<48x16xbf16>, vector<16x16xf32> -> vector<16x16xf32>
    %c1_358 = arith.constant 1 : index
    %c0_359 = arith.constant 0 : index
    %c0_360 = arith.constant 0 : index
    %354 = vector.load %arg40[%c1_358, %c0_359, %c0_360] : memref<6x4x48xf32, #tpu.memory_space<vmem>>, vector<4x4x48xf32>
    %355 = vector.shape_cast %354 : vector<4x4x48xf32> to vector<16x48xf32>
    %356 = arith.truncf %355 : vector<16x48xf32> to vector<16x48xbf16>
    %c1_361 = arith.constant 1 : index
    %c0_362 = arith.constant 0 : index
    %c0_363 = arith.constant 0 : index
    %357 = vector.load %arg23[%c1_361, %c0_362, %c0_363] : memref<3x48x16xbf16, #tpu.memory_space<vmem>>, vector<1x48x16xbf16>
    %358 = vector.shape_cast %357 : vector<1x48x16xbf16> to vector<48x16xbf16>
    %cst_364 = arith.constant dense<0.000000e+00> : vector<16x16xf32>
    %359 = tpu.matmul %356, %358, %cst_364 {dimension_numbers = #tpu.dot_dimension_numbers<[1], [0], [0], [1], [0, 0, 1, 1], [], []>} : vector<16x48xbf16>, vector<48x16xbf16>, vector<16x16xf32> -> vector<16x16xf32>
    %360 = arith.addf %353, %359 : vector<16x16xf32>
    %c2_365 = arith.constant 2 : index
    %c0_366 = arith.constant 0 : index
    %c0_367 = arith.constant 0 : index
    %361 = vector.load %arg40[%c2_365, %c0_366, %c0_367] : memref<6x4x48xf32, #tpu.memory_space<vmem>>, vector<4x4x48xf32>
    %362 = vector.shape_cast %361 : vector<4x4x48xf32> to vector<16x48xf32>
    %363 = arith.truncf %362 : vector<16x48xf32> to vector<16x48xbf16>
    %c2_368 = arith.constant 2 : index
    %c0_369 = arith.constant 0 : index
    %c0_370 = arith.constant 0 : index
    %364 = vector.load %arg23[%c2_368, %c0_369, %c0_370] : memref<3x48x16xbf16, #tpu.memory_space<vmem>>, vector<1x48x16xbf16>
    %365 = vector.shape_cast %364 : vector<1x48x16xbf16> to vector<48x16xbf16>
    %cst_371 = arith.constant dense<0.000000e+00> : vector<16x16xf32>
    %366 = tpu.matmul %363, %365, %cst_371 {dimension_numbers = #tpu.dot_dimension_numbers<[1], [0], [0], [1], [0, 0, 1, 1], [], []>} : vector<16x48xbf16>, vector<48x16xbf16>, vector<16x16xf32> -> vector<16x16xf32>
    %367 = arith.addf %360, %366 : vector<16x16xf32>
    %c0_372 = arith.constant 0 : index
    %c0_373 = arith.constant 0 : index
    %368 = vector.load %arg24[%c0_372, %c0_373] : memref<1x16xf32, #tpu.memory_space<vmem>>, vector<1x16xf32>
    %369 = vector.broadcast %368 : vector<1x16xf32> to vector<16x16xf32>
    %370 = arith.addf %367, %369 : vector<16x16xf32>
    %cst_374 = arith.constant dense<0.000000e+00> : vector<16xf32>
    %371 = vector.multi_reduction <add>, %370, %cst_374 [0] : vector<16x16xf32> to vector<16xf32>
    %372 = vector.shape_cast %371 : vector<16xf32> to vector<1x16xf32>
    %373 = arith.mulf %370, %370 : vector<16x16xf32>
    %cst_375 = arith.constant dense<0.000000e+00> : vector<16xf32>
    %374 = vector.multi_reduction <add>, %373, %cst_375 [0] : vector<16x16xf32> to vector<16xf32>
    %375 = vector.shape_cast %374 : vector<16xf32> to vector<1x16xf32>
    %c0_376 = arith.constant 0 : index
    %c0_377 = arith.constant 0 : index
    %376 = vector.load %arg25[%c0_376, %c0_377] : memref<16x16xf32, #tpu.memory_space<vmem>>, vector<16x16xf32>
    %cst_378 = arith.constant dense<0.000000e+00> : vector<1x16xf32>
    %377 = tpu.matmul %372, %376, %cst_378 {dimension_numbers = #tpu.dot_dimension_numbers<[1], [0], [0], [1], [0, 0, 1, 1], [], []>} : vector<1x16xf32>, vector<16x16xf32>, vector<1x16xf32> -> vector<1x16xf32>
    %c0_379 = arith.constant 0 : index
    %c0_380 = arith.constant 0 : index
    %378 = vector.load %arg25[%c0_379, %c0_380] : memref<16x16xf32, #tpu.memory_space<vmem>>, vector<16x16xf32>
    %cst_381 = arith.constant dense<0.000000e+00> : vector<1x16xf32>
    %379 = tpu.matmul %375, %378, %cst_381 {dimension_numbers = #tpu.dot_dimension_numbers<[1], [0], [0], [1], [0, 0, 1, 1], [], []>} : vector<1x16xf32>, vector<16x16xf32>, vector<1x16xf32> -> vector<1x16xf32>
    %380 = arith.mulf %377, %377 : vector<1x16xf32>
    %381 = arith.subf %379, %380 : vector<1x16xf32>
    %cst_382 = arith.constant 0.000000e+00 : f32
    %382 = vector.broadcast %cst_382 : f32 to vector<1x16xf32>
    %383 = arith.maximumf %381, %382 : vector<1x16xf32>
    %cst_383 = arith.constant 9.99999974E-6 : f32
    %384 = vector.broadcast %cst_383 : f32 to vector<1x16xf32>
    %385 = arith.addf %383, %384 : vector<1x16xf32>
    %386 = math.rsqrt %385 : vector<1x16xf32>
    %c0_384 = arith.constant 0 : index
    %c0_385 = arith.constant 0 : index
    %387 = vector.load %arg26[%c0_384, %c0_385] : memref<1x16xf32, #tpu.memory_space<vmem>>, vector<1x16xf32>
    %388 = arith.mulf %386, %387 : vector<1x16xf32>
    %c0_386 = arith.constant 0 : index
    %c0_387 = arith.constant 0 : index
    %389 = vector.load %arg27[%c0_386, %c0_387] : memref<1x16xf32, #tpu.memory_space<vmem>>, vector<1x16xf32>
    %390 = arith.mulf %377, %388 : vector<1x16xf32>
    %391 = arith.subf %389, %390 : vector<1x16xf32>
    %392 = vector.broadcast %388 : vector<1x16xf32> to vector<16x16xf32>
    %393 = arith.mulf %370, %392 : vector<16x16xf32>
    %394 = vector.broadcast %391 : vector<1x16xf32> to vector<16x16xf32>
    %395 = arith.addf %393, %394 : vector<16x16xf32>
    %cst_388 = arith.constant 0.000000e+00 : f32
    %396 = vector.broadcast %cst_388 : f32 to vector<16x16xf32>
    %397 = arith.maximumf %395, %396 : vector<16x16xf32>
    %398 = vector.shape_cast %397 : vector<16x16xf32> to vector<4x4x16xf32>
    %cst_389 = arith.constant 0.000000e+00 : f32
    %399 = vector.broadcast %cst_389 : f32 to vector<1x4x48xf32>
    %c0_390 = arith.constant 0 : index
    %c0_391 = arith.constant 0 : index
    %c0_392 = arith.constant 0 : index
    %400 = vector.load %arg41[%c0_390, %c0_391, %c0_392] : memref<6x4x48xf32, #tpu.memory_space<vmem>>, vector<1x4x48xf32>
    tpu.vector_store %arg41[%c0_390, %c0_391, %c0_392], %399 {strides = array<i32>} : memref<6x4x48xf32, #tpu.memory_space<vmem>>, vector<1x4x48xf32>,
    %cst_393 = arith.constant 0.000000e+00 : f32
    %401 = vector.broadcast %cst_393 : f32 to vector<1x4x48xf32>
    %c5_394 = arith.constant 5 : index
    %c0_395 = arith.constant 0 : index
    %c0_396 = arith.constant 0 : index
    %402 = vector.load %arg41[%c5_394, %c0_395, %c0_396] : memref<6x4x48xf32, #tpu.memory_space<vmem>>, vector<1x4x48xf32>
    tpu.vector_store %arg41[%c5_394, %c0_395, %c0_396], %401 {strides = array<i32>} : memref<6x4x48xf32, #tpu.memory_space<vmem>>, vector<1x4x48xf32>,
    %cst_397 = arith.constant 0.000000e+00 : f32
    %403 = vector.broadcast %cst_397 : f32 to vector<6x1x48xf32>
    %c0_398 = arith.constant 0 : index
    %c0_399 = arith.constant 0 : index
    %c0_400 = arith.constant 0 : index
    %404 = vector.load %arg41[%c0_398, %c0_399, %c0_400] : memref<6x4x48xf32, #tpu.memory_space<vmem>>, vector<6x1x48xf32>
    tpu.vector_store %arg41[%c0_398, %c0_399, %c0_400], %403 {strides = array<i32>} : memref<6x4x48xf32, #tpu.memory_space<vmem>>, vector<6x1x48xf32>,
    %cst_401 = arith.constant 0.000000e+00 : f32
    %405 = vector.broadcast %cst_401 : f32 to vector<6x1x48xf32>
    %c0_402 = arith.constant 0 : index
    %c3_403 = arith.constant 3 : index
    %c0_404 = arith.constant 0 : index
    %406 = vector.load %arg41[%c0_402, %c3_403, %c0_404] : memref<6x4x48xf32, #tpu.memory_space<vmem>>, vector<6x1x48xf32>
    tpu.vector_store %arg41[%c0_402, %c3_403, %c0_404], %405 {strides = array<i32>} : memref<6x4x48xf32, #tpu.memory_space<vmem>>, vector<6x1x48xf32>,
    %407 = vector.extract_strided_slice %398 {offsets = [0, 0, 0], sizes = [4, 3, 16], strides = [1, 1, 1]} : vector<4x4x16xf32> to vector<4x3x16xf32>
    %c1_405 = arith.constant 1 : index
    %c1_406 = arith.constant 1 : index
    %c0_407 = arith.constant 0 : index
    %408 = vector.load %arg41[%c1_405, %c1_406, %c0_407] : memref<6x4x48xf32, #tpu.memory_space<vmem>>, vector<4x3x16xf32>
    tpu.vector_store %arg41[%c1_405, %c1_406, %c0_407], %407 {strides = array<i32>} : memref<6x4x48xf32, #tpu.memory_space<vmem>>, vector<4x3x16xf32>,
    %c1_408 = arith.constant 1 : index
    %c0_409 = arith.constant 0 : index
    %c16_410 = arith.constant 16 : index
    %409 = vector.load %arg41[%c1_408, %c0_409, %c16_410] : memref<6x4x48xf32, #tpu.memory_space<vmem>>, vector<4x4x16xf32>
    tpu.vector_store %arg41[%c1_408, %c0_409, %c16_410], %398 {strides = array<i32>} : memref<6x4x48xf32, #tpu.memory_space<vmem>>, vector<4x4x16xf32>,
    %410 = vector.extract_strided_slice %398 {offsets = [0, 1, 0], sizes = [4, 3, 16], strides = [1, 1, 1]} : vector<4x4x16xf32> to vector<4x3x16xf32>
    %c1_411 = arith.constant 1 : index
    %c0_412 = arith.constant 0 : index
    %c32_413 = arith.constant 32 : index
    %411 = vector.load %arg41[%c1_411, %c0_412, %c32_413] : memref<6x4x48xf32, #tpu.memory_space<vmem>>, vector<4x3x16xf32>
    tpu.vector_store %arg41[%c1_411, %c0_412, %c32_413], %410 {strides = array<i32>} : memref<6x4x48xf32, #tpu.memory_space<vmem>>, vector<4x3x16xf32>,
    %c0_414 = arith.constant 0 : index
    %c0_415 = arith.constant 0 : index
    %c0_416 = arith.constant 0 : index
    %412 = vector.load %arg41[%c0_414, %c0_415, %c0_416] : memref<6x4x48xf32, #tpu.memory_space<vmem>>, vector<4x4x48xf32>
    %413 = vector.shape_cast %412 : vector<4x4x48xf32> to vector<16x48xf32>
    %414 = arith.truncf %413 : vector<16x48xf32> to vector<16x48xbf16>
    %c0_417 = arith.constant 0 : index
    %c0_418 = arith.constant 0 : index
    %c0_419 = arith.constant 0 : index
    %415 = vector.load %arg28[%c0_417, %c0_418, %c0_419] : memref<3x48x16xbf16, #tpu.memory_space<vmem>>, vector<1x48x16xbf16>
    %416 = vector.shape_cast %415 : vector<1x48x16xbf16> to vector<48x16xbf16>
    %cst_420 = arith.constant dense<0.000000e+00> : vector<16x16xf32>
    %417 = tpu.matmul %414, %416, %cst_420 {dimension_numbers = #tpu.dot_dimension_numbers<[1], [0], [0], [1], [0, 0, 1, 1], [], []>} : vector<16x48xbf16>, vector<48x16xbf16>, vector<16x16xf32> -> vector<16x16xf32>
    %c1_421 = arith.constant 1 : index
    %c0_422 = arith.constant 0 : index
    %c0_423 = arith.constant 0 : index
    %418 = vector.load %arg41[%c1_421, %c0_422, %c0_423] : memref<6x4x48xf32, #tpu.memory_space<vmem>>, vector<4x4x48xf32>
    %419 = vector.shape_cast %418 : vector<4x4x48xf32> to vector<16x48xf32>
    %420 = arith.truncf %419 : vector<16x48xf32> to vector<16x48xbf16>
    %c1_424 = arith.constant 1 : index
    %c0_425 = arith.constant 0 : index
    %c0_426 = arith.constant 0 : index
    %421 = vector.load %arg28[%c1_424, %c0_425, %c0_426] : memref<3x48x16xbf16, #tpu.memory_space<vmem>>, vector<1x48x16xbf16>
    %422 = vector.shape_cast %421 : vector<1x48x16xbf16> to vector<48x16xbf16>
    %cst_427 = arith.constant dense<0.000000e+00> : vector<16x16xf32>
    %423 = tpu.matmul %420, %422, %cst_427 {dimension_numbers = #tpu.dot_dimension_numbers<[1], [0], [0], [1], [0, 0, 1, 1], [], []>} : vector<16x48xbf16>, vector<48x16xbf16>, vector<16x16xf32> -> vector<16x16xf32>
    %424 = arith.addf %417, %423 : vector<16x16xf32>
    %c2_428 = arith.constant 2 : index
    %c0_429 = arith.constant 0 : index
    %c0_430 = arith.constant 0 : index
    %425 = vector.load %arg41[%c2_428, %c0_429, %c0_430] : memref<6x4x48xf32, #tpu.memory_space<vmem>>, vector<4x4x48xf32>
    %426 = vector.shape_cast %425 : vector<4x4x48xf32> to vector<16x48xf32>
    %427 = arith.truncf %426 : vector<16x48xf32> to vector<16x48xbf16>
    %c2_431 = arith.constant 2 : index
    %c0_432 = arith.constant 0 : index
    %c0_433 = arith.constant 0 : index
    %428 = vector.load %arg28[%c2_431, %c0_432, %c0_433] : memref<3x48x16xbf16, #tpu.memory_space<vmem>>, vector<1x48x16xbf16>
    %429 = vector.shape_cast %428 : vector<1x48x16xbf16> to vector<48x16xbf16>
    %cst_434 = arith.constant dense<0.000000e+00> : vector<16x16xf32>
    %430 = tpu.matmul %427, %429, %cst_434 {dimension_numbers = #tpu.dot_dimension_numbers<[1], [0], [0], [1], [0, 0, 1, 1], [], []>} : vector<16x48xbf16>, vector<48x16xbf16>, vector<16x16xf32> -> vector<16x16xf32>
    %431 = arith.addf %424, %430 : vector<16x16xf32>
    %c0_435 = arith.constant 0 : index
    %c0_436 = arith.constant 0 : index
    %432 = vector.load %arg29[%c0_435, %c0_436] : memref<1x16xf32, #tpu.memory_space<vmem>>, vector<1x16xf32>
    %433 = vector.broadcast %432 : vector<1x16xf32> to vector<16x16xf32>
    %434 = arith.addf %431, %433 : vector<16x16xf32>
    %cst_437 = arith.constant 0.000000e+00 : f32
    %435 = vector.broadcast %cst_437 : f32 to vector<16x16xf32>
    %436 = arith.maximumf %434, %435 : vector<16x16xf32>
    %437 = vector.shape_cast %436 : vector<16x16xf32> to vector<4x4x16xf32>
    %438 = vector.shape_cast %437 : vector<4x4x16xf32> to vector<16x16xf32>
    %c0_438 = arith.constant 0 : index
    %c0_439 = arith.constant 0 : index
    %439 = vector.load %arg30[%c0_438, %c0_439] : memref<1x16xf32, #tpu.memory_space<vmem>>, vector<1x16xf32>
    %440 = vector.broadcast %439 : vector<1x16xf32> to vector<16x16xf32>
    %441 = arith.mulf %438, %440 : vector<16x16xf32>
    %c0_440 = arith.constant 0 : index
    %c0_441 = arith.constant 0 : index
    %442 = vector.load %arg31[%c0_440, %c0_441] : memref<16x1xf32, #tpu.memory_space<vmem>>, vector<16x1xf32>
    %443 = vector.broadcast %442 : vector<16x1xf32> to vector<16x16xf32>
    %444 = arith.mulf %441, %443 : vector<16x16xf32>
    %cst_442 = arith.constant dense<0.000000e+00> : vector<16xf32>
    %445 = vector.multi_reduction <add>, %444, %cst_442 [1] : vector<16x16xf32> to vector<16xf32>
    %446 = vector.shape_cast %445 : vector<16xf32> to vector<16x1xf32>
    %cst_443 = arith.constant dense<0.000000e+00> : vector<1xf32>
    %447 = vector.multi_reduction <add>, %446, %cst_443 [0] : vector<16x1xf32> to vector<1xf32>
    %448 = vector.shape_cast %447 : vector<1xf32> to vector<1x1xf32>
    %c0_444 = arith.constant 0 : index
    %c0_445 = arith.constant 0 : index
    %449 = vector.load %arg32[%c0_444, %c0_445] : memref<1x1xf32, #tpu.memory_space<vmem>>, vector<1x1xf32>
    %450 = arith.addf %448, %449 : vector<1x1xf32>
    %c0_446 = arith.constant 0 : index
    %c0_447 = arith.constant 0 : index
    %c0_448 = arith.constant 0 : index
    %451 = vector.load %arg33[%c0_446, %c0_447, %c0_448] : memref<1x1x1xf32, #tpu.memory_space<vmem>>, vector<1x1x1xf32>
    %452 = vector.shape_cast %451 : vector<1x1x1xf32> to vector<1x1xf32>
    %453 = vector.shape_cast %450 : vector<1x1xf32> to vector<1x1x1xf32>
    tpu.vector_store %arg33[%c0_446, %c0_447, %c0_448], %453 {strides = array<i32>} : memref<1x1x1xf32, #tpu.memory_space<vmem>>, vector<1x1x1xf32>,
    return
  }
  func.func @transform_0(%arg0: i32) -> (i32, i32, i32, i32) {
    %c0_i32 = arith.constant 0 : i32
    %c0_i32_0 = arith.constant 0 : i32
    %c0_i32_1 = arith.constant 0 : i32
    %c0_i32_2 = arith.constant 0 : i32
    return %arg0, %c0_i32, %c0_i32_0, %c0_i32_1 : i32, i32, i32, i32
  }
  func.func @transform_1(%arg0: i32) -> (i32, i32, i32) {
    %c0_i32 = arith.constant 0 : i32
    %c0_i32_0 = arith.constant 0 : i32
    %c0_i32_1 = arith.constant 0 : i32
    %c0_i32_2 = arith.constant 0 : i32
    return %c0_i32, %c0_i32_0, %c0_i32_1 : i32, i32, i32
  }
  func.func @transform_2(%arg0: i32) -> (i32, i32) {
    %c0_i32 = arith.constant 0 : i32
    %c0_i32_0 = arith.constant 0 : i32
    %c0_i32_1 = arith.constant 0 : i32
    return %c0_i32, %c0_i32_0 : i32, i32
  }
  func.func @transform_3(%arg0: i32) -> (i32, i32) {
    %c0_i32 = arith.constant 0 : i32
    %c0_i32_0 = arith.constant 0 : i32
    %c0_i32_1 = arith.constant 0 : i32
    return %c0_i32, %c0_i32_0 : i32, i32
  }
  func.func @transform_4(%arg0: i32) -> (i32, i32) {
    %c0_i32 = arith.constant 0 : i32
    %c0_i32_0 = arith.constant 0 : i32
    %c0_i32_1 = arith.constant 0 : i32
    return %c0_i32, %c0_i32_0 : i32, i32
  }
  func.func @transform_5(%arg0: i32) -> (i32, i32) {
    %c0_i32 = arith.constant 0 : i32
    %c0_i32_0 = arith.constant 0 : i32
    %c0_i32_1 = arith.constant 0 : i32
    return %c0_i32, %c0_i32_0 : i32, i32
  }
  func.func @transform_6(%arg0: i32) -> (i32, i32, i32) {
    %c0_i32 = arith.constant 0 : i32
    %c0_i32_0 = arith.constant 0 : i32
    %c0_i32_1 = arith.constant 0 : i32
    %c0_i32_2 = arith.constant 0 : i32
    return %c0_i32, %c0_i32_0, %c0_i32_1 : i32, i32, i32
  }
  func.func @transform_7(%arg0: i32) -> (i32, i32) {
    %c0_i32 = arith.constant 0 : i32
    %c0_i32_0 = arith.constant 0 : i32
    %c0_i32_1 = arith.constant 0 : i32
    return %c0_i32, %c0_i32_0 : i32, i32
  }
  func.func @transform_8(%arg0: i32) -> (i32, i32, i32) {
    %c0_i32 = arith.constant 0 : i32
    %c0_i32_0 = arith.constant 0 : i32
    %c0_i32_1 = arith.constant 0 : i32
    %c0_i32_2 = arith.constant 0 : i32
    return %c0_i32, %c0_i32_0, %c0_i32_1 : i32, i32, i32
  }
  func.func @transform_9(%arg0: i32) -> (i32, i32) {
    %c0_i32 = arith.constant 0 : i32
    %c0_i32_0 = arith.constant 0 : i32
    %c0_i32_1 = arith.constant 0 : i32
    return %c0_i32, %c0_i32_0 : i32, i32
  }
  func.func @transform_10(%arg0: i32) -> (i32, i32) {
    %c0_i32 = arith.constant 0 : i32
    %c0_i32_0 = arith.constant 0 : i32
    %c0_i32_1 = arith.constant 0 : i32
    return %c0_i32, %c0_i32_0 : i32, i32
  }
  func.func @transform_11(%arg0: i32) -> (i32, i32) {
    %c0_i32 = arith.constant 0 : i32
    %c0_i32_0 = arith.constant 0 : i32
    %c0_i32_1 = arith.constant 0 : i32
    return %c0_i32, %c0_i32_0 : i32, i32
  }
  func.func @transform_12(%arg0: i32) -> (i32, i32) {
    %c0_i32 = arith.constant 0 : i32
    %c0_i32_0 = arith.constant 0 : i32
    %c0_i32_1 = arith.constant 0 : i32
    return %c0_i32, %c0_i32_0 : i32, i32
  }
  func.func @transform_13(%arg0: i32) -> (i32, i32, i32) {
    %c0_i32 = arith.constant 0 : i32
    %c0_i32_0 = arith.constant 0 : i32
    %c0_i32_1 = arith.constant 0 : i32
    %c0_i32_2 = arith.constant 0 : i32
    return %c0_i32, %c0_i32_0, %c0_i32_1 : i32, i32, i32
  }
  func.func @transform_14(%arg0: i32) -> (i32, i32) {
    %c0_i32 = arith.constant 0 : i32
    %c0_i32_0 = arith.constant 0 : i32
    %c0_i32_1 = arith.constant 0 : i32
    return %c0_i32, %c0_i32_0 : i32, i32
  }
  func.func @transform_15(%arg0: i32) -> (i32, i32, i32) {
    %c0_i32 = arith.constant 0 : i32
    %c0_i32_0 = arith.constant 0 : i32
    %c0_i32_1 = arith.constant 0 : i32
    %c0_i32_2 = arith.constant 0 : i32
    return %c0_i32, %c0_i32_0, %c0_i32_1 : i32, i32, i32
  }
  func.func @transform_16(%arg0: i32) -> (i32, i32) {
    %c0_i32 = arith.constant 0 : i32
    %c0_i32_0 = arith.constant 0 : i32
    %c0_i32_1 = arith.constant 0 : i32
    return %c0_i32, %c0_i32_0 : i32, i32
  }
  func.func @transform_17(%arg0: i32) -> (i32, i32) {
    %c0_i32 = arith.constant 0 : i32
    %c0_i32_0 = arith.constant 0 : i32
    %c0_i32_1 = arith.constant 0 : i32
    return %c0_i32, %c0_i32_0 : i32, i32
  }
  func.func @transform_18(%arg0: i32) -> (i32, i32) {
    %c0_i32 = arith.constant 0 : i32
    %c0_i32_0 = arith.constant 0 : i32
    %c0_i32_1 = arith.constant 0 : i32
    return %c0_i32, %c0_i32_0 : i32, i32
  }
  func.func @transform_19(%arg0: i32) -> (i32, i32) {
    %c0_i32 = arith.constant 0 : i32
    %c0_i32_0 = arith.constant 0 : i32
    %c0_i32_1 = arith.constant 0 : i32
    return %c0_i32, %c0_i32_0 : i32, i32
  }
  func.func @transform_20(%arg0: i32) -> (i32, i32, i32) {
    %c0_i32 = arith.constant 0 : i32
    %c0_i32_0 = arith.constant 0 : i32
    %c0_i32_1 = arith.constant 0 : i32
    %c0_i32_2 = arith.constant 0 : i32
    return %c0_i32, %c0_i32_0, %c0_i32_1 : i32, i32, i32
  }
  func.func @transform_21(%arg0: i32) -> (i32, i32) {
    %c0_i32 = arith.constant 0 : i32
    %c0_i32_0 = arith.constant 0 : i32
    %c0_i32_1 = arith.constant 0 : i32
    return %c0_i32, %c0_i32_0 : i32, i32
  }
  func.func @transform_22(%arg0: i32) -> (i32, i32, i32) {
    %c0_i32 = arith.constant 0 : i32
    %c0_i32_0 = arith.constant 0 : i32
    %c0_i32_1 = arith.constant 0 : i32
    %c0_i32_2 = arith.constant 0 : i32
    return %c0_i32, %c0_i32_0, %c0_i32_1 : i32, i32, i32
  }
  func.func @transform_23(%arg0: i32) -> (i32, i32) {
    %c0_i32 = arith.constant 0 : i32
    %c0_i32_0 = arith.constant 0 : i32
    %c0_i32_1 = arith.constant 0 : i32
    return %c0_i32, %c0_i32_0 : i32, i32
  }
  func.func @transform_24(%arg0: i32) -> (i32, i32) {
    %c0_i32 = arith.constant 0 : i32
    %c0_i32_0 = arith.constant 0 : i32
    %c0_i32_1 = arith.constant 0 : i32
    return %c0_i32, %c0_i32_0 : i32, i32
  }
  func.func @transform_25(%arg0: i32) -> (i32, i32) {
    %c0_i32 = arith.constant 0 : i32
    %c0_i32_0 = arith.constant 0 : i32
    %c0_i32_1 = arith.constant 0 : i32
    return %c0_i32, %c0_i32_0 : i32, i32
  }
  func.func @transform_26(%arg0: i32) -> (i32, i32) {
    %c0_i32 = arith.constant 0 : i32
    %c0_i32_0 = arith.constant 0 : i32
    %c0_i32_1 = arith.constant 0 : i32
    return %c0_i32, %c0_i32_0 : i32, i32
  }
  func.func @transform_27(%arg0: i32) -> (i32, i32, i32) {
    %c0_i32 = arith.constant 0 : i32
    %c0_i32_0 = arith.constant 0 : i32
    %c0_i32_1 = arith.constant 0 : i32
    %c0_i32_2 = arith.constant 0 : i32
    return %c0_i32, %c0_i32_0, %c0_i32_1 : i32, i32, i32
  }
  func.func @transform_28(%arg0: i32) -> (i32, i32) {
    %c0_i32 = arith.constant 0 : i32
    %c0_i32_0 = arith.constant 0 : i32
    %c0_i32_1 = arith.constant 0 : i32
    return %c0_i32, %c0_i32_0 : i32, i32
  }
  func.func @transform_29(%arg0: i32) -> (i32, i32) {
    %c0_i32 = arith.constant 0 : i32
    %c0_i32_0 = arith.constant 0 : i32
    %c0_i32_1 = arith.constant 0 : i32
    return %c0_i32, %c0_i32_0 : i32, i32
  }
  func.func @transform_30(%arg0: i32) -> (i32, i32) {
    %c0_i32 = arith.constant 0 : i32
    %c0_i32_0 = arith.constant 0 : i32
    %c0_i32_1 = arith.constant 0 : i32
    return %c0_i32, %c0_i32_0 : i32, i32
  }
  func.func @transform_31(%arg0: i32) -> (i32, i32) {
    %c0_i32 = arith.constant 0 : i32
    %c0_i32_0 = arith.constant 0 : i32
    %c0_i32_1 = arith.constant 0 : i32
    return %c0_i32, %c0_i32_0 : i32, i32
  }
  func.func @transform_32(%arg0: i32) -> (i32, i32, i32) {
    %c0_i32 = arith.constant 0 : i32
    %c0_i32_0 = arith.constant 0 : i32
    %c0_i32_1 = arith.constant 0 : i32
    return %arg0, %c0_i32, %c0_i32_0 : i32, i32, i32
  }
}

</mosaic_0001>

<bundles_post_ra>
// kernel: tpu_custom_call.1
= control target key start
LH: loop header
LB: loop body
LE: loop exit
PB: predicated region body
PF: predicated region fallthrough
CT: control target
= control target key end

     0   :  { %s7228_s6 = smov 1   ;;  %s7229_s10 = smov 2   ;;  %s9681_s0 = inlined_call_operand.smem [shape: u32[33], index: -1, kind: input, shape index: {}] }
   0x1   :  { %s7274_s5 = sld [smem:[%s9681_s0]]   ;;  %s7230_s14 = smov 3  }
   0x2   :  { %s7279_s9 = sld [smem:[%s9681_s0 + %s7228_s6]]   ;;  %s7231_s18 = smov 4  }
   0x3   :  { %s7284_s13 = sld [smem:[%s9681_s0 + %s7229_s10]]   ;;  %s7232_s22 = smov 5  }
   0x4   :  { %s7289_s17 = sld [smem:[%s9681_s0 + %s7230_s14]]   ;;  %s7233_s26 = smov 6  }
   0x5   :  { %s7294_s21 = sld [smem:[%s9681_s0 + %s7231_s18]]   ;;  %s7234_s30 = smov 7  }
   0x6   :  { %s7299_s25 = sld [smem:[%s9681_s0 + %s7232_s22]]   ;;  %s7235_s4 = smov 8  }
   0x7   :  { %s7304_s29 = sld [smem:[%s9681_s0 + %s7233_s26]]   ;;  %s7236_s10 = smov 9  }
   0x8   :  { %s7309_s3 = sld [smem:[%s9681_s0 + %s7234_s30]]   ;;  %s7237_s15 = smov 10  }
   0x9   :  { %s7314_s8 = sld [smem:[%s9681_s0 + %s7235_s4]]   ;;  %s7238_s20 = smov 11  }
   0xa   :  { %s7319_s14 = sld [smem:[%s9681_s0 + %s7236_s10]]   ;;  %s7239_s26 = smov 12  }
   0xb   :  { %s7324_s19 = sld [smem:[%s9681_s0 + %s7237_s15]]   ;;  %s7240_s1 = smov 13  }
   0xc   :  { %s7329_s24 = sld [smem:[%s9681_s0 + %s7238_s20]]   ;;  %s7241_s7 = smov 14  }
   0xd   :  { %s7334_s30 = sld [smem:[%s9681_s0 + %s7239_s26]]   ;;  %s7242_s15 = smov 15  }
   0xe   :  { %s7339_s6 = sld [smem:[%s9681_s0 + %s7240_s1]]   ;;  %s7243_s22 = smov 16  }
   0xf   :  { %s7344_s12 = sld [smem:[%s9681_s0 + %s7241_s7]]   ;;  %s7244_s28 = smov 17  }
  0x10   :  { %s7349_s20 = sld [smem:[%s9681_s0 + %s7242_s15]]   ;;  %s7245_s7 = smov 18  }
  0x11   :  { %s7354_s27 = sld [smem:[%s9681_s0 + %s7243_s22]]   ;;  %s7246_s15 = smov 19  }
  0x12   :  { %s7359_s4 = sld [smem:[%s9681_s0 + %s7244_s28]]   ;;  %s7247_s22 = smov 20  }
  0x13   :  { %s7248_s28 = smov 21   ;;  %s7259_s23 = smov 32  }
  0x15   :  { %9691 = sst [smem:[#allocation11_spill]] %s7344_s12 }
  0x16   :  { %9692 = sst [smem:[#allocation12_spill]] %s7349_s20 }
  0x17   :  { %9693 = sst [smem:[#allocation13_spill]] %s7354_s27 }
  0x18   :  { %9694 = sst [smem:[#allocation14_spill]] %s7359_s4 }
  0x19   :  { %s7364_s12 = sld [smem:[%s9681_s0 + %s7245_s7]]   ;;  %s7249_s7 = smov 22  }
  0x1a   :  { %s7369_s20 = sld [smem:[%s9681_s0 + %s7246_s15]]   ;;  %s7250_s15 = smov 23  }
  0x1b   :  { %s7374_s27 = sld [smem:[%s9681_s0 + %s7247_s22]]   ;;  %s7251_s22 = smov 24  }
  0x1c   :  { %s7379_s4 = sld [smem:[%s9681_s0 + %s7248_s28]]   ;;  %s7252_s28 = smov 25  }
  0x1f   :  { %9695 = sst [smem:[#allocation15_spill]] %s7364_s12 }
  0x20   :  { %9696 = sst [smem:[#allocation16_spill]] %s7369_s20 }
  0x21   :  { %9697 = sst [smem:[#allocation17_spill]] %s7374_s27 }
  0x22   :  { %9698 = sst [smem:[#allocation18_spill]] %s7379_s4 }
  0x23   :  { %s7384_s12 = sld [smem:[%s9681_s0 + %s7249_s7]]   ;;  %s7253_s7 = smov 26  }
  0x24   :  { %s7389_s20 = sld [smem:[%s9681_s0 + %s7250_s15]]   ;;  %s7254_s15 = smov 27  }
  0x25   :  { %s7394_s27 = sld [smem:[%s9681_s0 + %s7251_s22]]   ;;  %s7255_s22 = smov 28  }
  0x26   :  { %s7399_s4 = sld [smem:[%s9681_s0 + %s7252_s28]]   ;;  %s7256_s28 = smov 29  }
  0x29   :  { %9699 = sst [smem:[#allocation19_spill]] %s7384_s12 }
  0x2a   :  { %9700 = sst [smem:[#allocation20_spill]] %s7389_s20 }
  0x2b   :  { %9701 = sst [smem:[#allocation21_spill]] %s7394_s27 }
  0x2c   :  { %9702 = sst [smem:[#allocation22_spill]] %s7399_s4 }
  0x2d   :  { %s7404_s12 = sld [smem:[%s9681_s0 + %s7253_s7]]   ;;  %s7257_s7 = smov 30  }
  0x2e   :  { %s7409_s20 = sld [smem:[%s9681_s0 + %s7254_s15]]   ;;  %s7258_s15 = smov 31  }
  0x2f   :  { %s7414_s27 = sld [smem:[%s9681_s0 + %s7255_s22]]  }
  0x30   :  { %s7419_s4 = sld [smem:[%s9681_s0 + %s7256_s28]]   ;;  %s7434_s28 = smov 0  }
  0x33   :  { %9703 = sst [smem:[#allocation23_spill]] %s7404_s12 }
  0x34   :  { %9704 = sst [smem:[#allocation24_spill]] %s7409_s20 }
  0x35   :  { %9705 = sst [smem:[#allocation25_spill]] %s7414_s27 }
  0x36   :  { %s7424_s12 = sld [smem:[%s9681_s0 + %s7257_s7]]  }
  0x37   :  { %s6629_s20 = sld [smem:[%s9681_s0 + %s7258_s15]]  }
  0x38   :  { %s7432_s27 = sld [smem:[%s9681_s0 + %s7259_s23]]  }
  0x3d   :  { %v70_v0 = vstv %s6629_s20 }
  0x3e   :  { %71 = vst [vmem:[#allocation10] sm:$0x1] %v70_v0 }
  0x3f LB: > { %s6631_s1 = sadd.s32 4294967295, %s7226_s28   ;;  %p6635_p0 = scmp.ge.s32.totalorder %s7226_s28, 1  ;;  %s7226_s28 = sphi %s7434_s28, %s77_s28  }
  0x40   : > { %p897_p1 = scmp.lt.s32.totalorder %s7226_s28, 3 }
  0x42   : > { %p898_p2 = pnand %p6635_p0, %p897_p1 }
  0x44   : > { %901 = sbr.rel (%p898_p2) target bundleno = 3966 (0xf7e), region = 148 }
  0x49   : > { %p977_p3 = scmp.lt.s32.totalorder %s6631_s1, 1  ;;  %vm1024_vm0 = vcmask 90112   ;;  %vm1062_vm1 = vcmask 31744   ;;  %v9688_v1 = vmov 0.0   ;;  %vm1064_vm2 = vcmask 30720   ;;  %s7261_s2 = smov 8  }
  0x4a   : > { %1045 = vst.msk [vmem:[#allocation2 + $0x2f] sm:$0x1] %vm1024_vm0, %v9688_v1  ;;  %s7262_s7 = smov 4   ;;  %vm1018_vm3 = vcmask 97280   ;;  %v6662_v20 = vld [vmem:[%s7279_s9] sm:$0xf] }
  0x4b   : > { %s9725_s1 = smov (!%p977_p3, %s6631_s1), 1  ;;  %1026 = vst.msk [vmem:[#allocation2 + $0x10] sm:$0x1] %vm1024_vm0, %v9688_v1  ;;  %v7111_v21 = vld [vmem:[%s7279_s9] sm:$0x30]  ;;  %vm1541_vm4 = vcmask 1045504  }
  0x4c   : > { %1027 = vst.msk [vmem:[#allocation2 + $0x20] sm:$0x1] %vm1024_vm0, %v9688_v1  ;;  %s7110_s0 = sshll.u32 %s9725_s1, 8  ;;  %v6663_v22 = vor.u32 %v7111_v21, %v6662_v20  ;;  %vm1224_vm5 = vcmask 64544   ;;  %v6684_v29 = vld [vmem:[%s7279_s9 + $0x10] sm:$0xf] }
  0x4d   : > { %1028 = vst.msk [vmem:[#allocation2 + $0x30] sm:$0x1] %vm1024_vm0, %v9688_v1  ;;  %s7454_s20 = scalar_lea.vmem %s7274_s5, %s7110_s0  ;;  %v7113_v30 = vld [vmem:[%s7279_s9 + $0x10] sm:$0x30]  ;;  %v6642_v35 = vld [vmem:[%s7279_s9 + $0x8] sm:$0xf] }
  0x4e   : > { %1029 = vst.msk [vmem:[#allocation2 + $0x40] sm:$0x1] %vm1024_vm0, %v9688_v1  ;;  %v988_v2 = vld [vmem:[%s7454_s20 + $0x10] sm:$0xff]  ;;  %v989_v3 = vld [vmem:[%s7454_s20 + $0x18] sm:$0xff]  ;;  %v986_v4 = vld [vmem:[%s7454_s20] sm:$0xff]  ;;  %v1688_v23 = vsel %vm1541_vm4, %v6663_v22, 0  ;;  %v6685_v31 = vor.u32 %v7113_v30, %v6684_v29 }
  0x4f   : > { %1030 = vst.msk [vmem:[#allocation2 + $0x50] sm:$0x1] %vm1024_vm0, %v9688_v1  ;;  %1261 = vrot.lane.b32.xlu1 %v988_v2, %s7261_s2  ;;  %1132 = vrot.lane.b32.xlu0 %v988_v2, %s7262_s7  ;;  %v987_v5 = vld [vmem:[%s7454_s20 + $0x8] sm:$0xff]  ;;  %v990_v6 = vld [vmem:[%s7454_s20 + $0x20] sm:$0xff]  ;;  %vm1353_vm6 = vcmask 97345   ;;  %vm1355_vm7 = vcmask 97344  }
  0x50   : > { %1066 = vst.msk [vmem:[#allocation2 + $0x21] sm:$0xff] %vm1062_vm1, %v988_v2  ;;  %1128 = vrot.lane.b32.xlu2 %v986_v4, %s7262_s7  ;;  %v991_v7 = vld [vmem:[%s7454_s20 + $0x28] sm:$0xff]  ;;  %v992_v8 = vld [vmem:[%s7454_s20 + $0x30] sm:$0xff]  ;;  %v993_v9 = vld [vmem:[%s7454_s20 + $0x38] sm:$0xff]  ;;  %1697 = vmatpush.bf16.msra.mxu1 %v1688_v23  ;;  %v1885_v33 = vsel %vm1541_vm4, %v6685_v31, 0  ;;  %vm2044_vm8 = vcmask 64512  }
  0x51   : > { %1067 = vst.msk [vmem:[#allocation2 + $0x29] sm:$0x7f] %vm1064_vm2, %v989_v3  ;;  %v994_v10 = vld [vmem:[%s7454_s20 + $0x40] sm:$0xff]  ;;  %v995_v11 = vld [vmem:[%s7454_s20 + $0x48] sm:$0xff]  ;;  %v997_v12 = vld [vmem:[%s7454_s20 + $0x58] sm:$0xff]  ;;  %1894 = vmatpush.bf16.msra.mxu2 %v1885_v33  ;;  %vm2909_vm9 = vcmask 1043456  }
  0x52   : > { %1031 = vst.msk [vmem:[#allocation2 + $0x60] sm:$0x1] %vm1024_vm0, %v9688_v1  ;;  %v996_v13 = vld [vmem:[%s7454_s20 + $0x50] sm:$0xff]  ;;  %v998_v14 = vld [vmem:[%s7454_s20 + $0x60] sm:$0xff]  ;;  %v999_v15 = vld [vmem:[%s7454_s20 + $0x68] sm:$0xff]  ;;  %vm2387_vm10 = vcmask 188416  }
  0x53   : > { %1032 = vst.msk [vmem:[#allocation2 + $0x70] sm:$0x1] %vm1024_vm0, %v9688_v1  ;;  %v1000_v16 = vld [vmem:[%s7454_s20 + $0x70] sm:$0xff]  ;;  %v1001_v17 = vld [vmem:[%s7454_s20 + $0x78] sm:$0xff]  ;;  %v1003_v18 = vld [vmem:[%s7454_s20 + $0x88] sm:$0xff]  ;;  %s7263_s10 = smov 16  }
  0x54   : > { %1033 = vst.msk [vmem:[#allocation2 + $0x80] sm:$0x1] %vm1024_vm0, %v9688_v1  ;;  %v1002_v19 = vld [vmem:[%s7454_s20 + $0x80] sm:$0xff]  ;;  %v1004_v25 = vld [vmem:[%s7454_s20 + $0x90] sm:$0xff]  ;;  %v1005_v34 = vld [vmem:[%s7454_s20 + $0x98] sm:$0xff]  ;;  %vm2426_vm14 = vcmask 63488  }
  0x55   : > { %1034 = vst.msk [vmem:[#allocation2 + $0x90] sm:$0x1] %vm1024_vm0, %v9688_v1  ;;  %v7112_v36 = vld [vmem:[%s7279_s9 + $0x8] sm:$0x30]  ;;  %v1006_v40 = vld [vmem:[%s7454_s20 + $0xa0] sm:$0xff]  ;;  %v1009_v53 = vld [vmem:[%s7454_s20 + $0xb8] sm:$0xff] }
  0x56   : > { %1035 = vst.msk [vmem:[#allocation2 + $0xa0] sm:$0x1] %vm1024_vm0, %v9688_v1  ;;  %v6643_v37 = vor.u32 %v7112_v36, %v6642_v35  ;;  %v1007_v44 = vld [vmem:[%s7454_s20 + $0xa8] sm:$0xff]  ;;  %v1008_v54 = vld [vmem:[%s7454_s20 + $0xb0] sm:$0xff]  ;;  %v1010_v61 = vld [vmem:[%s7454_s20 + $0xc0] sm:$0xff]  ;;  %vm2381_vm15 = vcmask 195584  }
  0x57   : > { %1036 = vst.msk [vmem:[#allocation2 + $0xb0] sm:$0x1] %vm1024_vm0, %v9688_v1  ;;  %1263 = vrot.lane.b32.xlu1 %v989_v3, %s7261_s2  ;;  %1134 = vrot.lane.b32.xlu0 %v989_v3, %s7262_s7  ;;  %v1016_v29 = vld [vmem:[%s7454_s20 + $0xf0] sm:$0xff]  ;;  %v1017_v36 = vld [vmem:[%s7454_s20 + $0xf8] sm:$0xff]  ;;  %s9709_s11 = sld [smem:[#allocation12_spill]]  ;;  %s7264_s0 = smov 32  }
  0x58   : > { %1037 = vst.msk [vmem:[#allocation2 + $0xc0] sm:$0x1] %vm1024_vm0, %v9688_v1  ;;  %1130 = vrot.lane.b32.xlu2 %v987_v5, %s7262_s7  ;;  %v1543_v38 = vsel %vm1541_vm4, %v6643_v37, 0  ;;  %vm3974_vm4 = vcmask 1042434   ;;  %s9710_s15 = sld [smem:[#allocation11_spill]] }
  0x59   : > { %1038 = vst.msk [vmem:[#allocation2 + $0xd0] sm:$0x1] %vm1024_vm0, %v9688_v1  ;;  %1552 = vmatpush.bf16.msra.mxu0 %v1543_v38  ;;  %s9711_s16 = sld [smem:[#allocation14_spill]] }
  0x5a   : > { %1039 = vst.msk [vmem:[#allocation2 + $0xe0] sm:$0x1] %vm1024_vm0, %v9688_v1  ;;  %s9712_s18 = sld [smem:[#allocation13_spill]] }
  0x5b   : > { %1040 = vst.msk [vmem:[#allocation2 + $0xf0] sm:$0x1] %vm1024_vm0, %v9688_v1  ;;  %s9713_s23 = sld [smem:[#allocation15_spill]] }
  0x5c   : > { %1041 = vst.msk [vmem:[#allocation2 + $0x100] sm:$0x1] %vm1024_vm0, %v9688_v1  ;;  %s9714_s22 = sld [smem:[#allocation16_spill]] }
  0x5d   : > { %1044 = vst.msk [vmem:[#allocation2 + $0x1f] sm:$0x1] %vm1024_vm0, %v9688_v1  ;;  %s9715_s26 = sld [smem:[#allocation17_spill]] }
  0x5e   : > { %1046 = vst.msk [vmem:[#allocation2 + $0x3f] sm:$0x1] %vm1024_vm0, %v9688_v1 }
  0x5f   : > { %1047 = vst.msk [vmem:[#allocation2 + $0x4f] sm:$0x1] %vm1024_vm0, %v9688_v1  ;;  %1259 = vrot.lane.b32.xlu1 %v987_v5, %s7261_s2  ;;  %1257 = vrot.lane.b32.xlu0 %v986_v4, %s7261_s2 }
  0x60   : > { %1048 = vst.msk [vmem:[#allocation2 + $0x5f] sm:$0x1] %vm1024_vm0, %v9688_v1  ;;  %1136 = vrot.lane.b32.xlu2 %v990_v6, %s7262_s7 }
  0x61   : > { %1049 = vst.msk [vmem:[#allocation2 + $0x6f] sm:$0x1] %vm1024_vm0, %v9688_v1 }
  0x62   : > { %1050 = vst.msk [vmem:[#allocation2 + $0x7f] sm:$0x1] %vm1024_vm0, %v9688_v1 }
  0x63   : > { %1051 = vst.msk [vmem:[#allocation2 + $0x8f] sm:$0x1] %vm1024_vm0, %v9688_v1 }
  0x64   : > { %1052 = vst.msk [vmem:[#allocation2 + $0x9f] sm:$0x1] %vm1024_vm0, %v9688_v1 }
  0x65   : > { %1053 = vst.msk [vmem:[#allocation2 + $0xaf] sm:$0x1] %vm1024_vm0, %v9688_v1 }
  0x66   : > { %1054 = vst.msk [vmem:[#allocation2 + $0xbf] sm:$0x1] %vm1024_vm0, %v9688_v1 }
  0x67   : > { %1055 = vst.msk [vmem:[#allocation2 + $0xcf] sm:$0x1] %vm1024_vm0, %v9688_v1  ;;  %1138 = vrot.lane.b32.xlu0 %v991_v7, %s7262_s7  ;;  %1265 = vrot.lane.b32.xlu1 %v990_v6, %s7261_s2 }
  0x68   : > { %1056 = vst.msk [vmem:[#allocation2 + $0xdf] sm:$0x1] %vm1024_vm0, %v9688_v1  ;;  %1267 = vrot.lane.b32.xlu2 %v991_v7, %s7261_s2 }
  0x69   : > { %1057 = vst.msk [vmem:[#allocation2 + $0xef] sm:$0x1] %vm1024_vm0, %v9688_v1 }
  0x6a   : > { %1058 = vst.msk [vmem:[#allocation2 + $0xff] sm:$0x1] %vm1024_vm0, %v9688_v1 }
  0x6b   : > { %1059 = vst.msk [vmem:[#allocation2 + $0x10f] sm:$0x1] %vm1024_vm0, %v9688_v1 }
  0x6c   : > { %1065 = vst.msk [vmem:[#allocation2 + $0x19] sm:$0x7f] %vm1064_vm2, %v987_v5  ;;  %v1011_v5 = vld [vmem:[%s7454_s20 + $0xc8] sm:$0xff] }
  0x6d   : > { %1063 = vst.msk [vmem:[#allocation2 + $0x11] sm:$0xff] %vm1062_vm1, %v986_v4 }
  0x6e   : > { %1069 = vst.msk [vmem:[#allocation2 + $0x39] sm:$0x7f] %vm1064_vm2, %v991_v7 }
  0x6f   : > { %1068 = vst.msk [vmem:[#allocation2 + $0x31] sm:$0xff] %vm1062_vm1, %v990_v6  ;;  %1140 = vrot.lane.b32.xlu0 %v992_v8, %s7262_s7  ;;  %1142 = vrot.lane.b32.xlu1 %v993_v9, %s7262_s7 }
  0x70   : > { %1070 = vst.msk [vmem:[#allocation2 + $0x41] sm:$0xff] %vm1062_vm1, %v992_v8  ;;  %1269 = vrot.lane.b32.xlu2 %v992_v8, %s7261_s2  ;;  %v1012_v8 = vld [vmem:[%s7454_s20 + $0xd0] sm:$0xff] }
  0x71   : > { %1071 = vst.msk [vmem:[#allocation2 + $0x49] sm:$0x7f] %vm1064_vm2, %v993_v9 }
  0x72   : > { %1072 = vst.msk [vmem:[#allocation2 + $0x51] sm:$0xff] %vm1062_vm1, %v994_v10 }
  0x73   : > { %1073 = vst.msk [vmem:[#allocation2 + $0x59] sm:$0x7f] %vm1064_vm2, %v995_v11 }
  0x74   : > { %1075 = vst.msk [vmem:[#allocation2 + $0x69] sm:$0x7f] %vm1064_vm2, %v997_v12 }
  0x75   : > { %1074 = vst.msk [vmem:[#allocation2 + $0x61] sm:$0xff] %vm1062_vm1, %v996_v13 }
  0x76   : > { %1076 = vst.msk [vmem:[#allocation2 + $0x71] sm:$0xff] %vm1062_vm1, %v998_v14 }
  0x77   : > { %1077 = vst.msk [vmem:[#allocation2 + $0x79] sm:$0x7f] %vm1064_vm2, %v999_v15  ;;  %1271 = vrot.lane.b32.xlu0 %v993_v9, %s7261_s2  ;;  %1144 = vrot.lane.b32.xlu1 %v994_v10, %s7262_s7 }
  0x78   : > { %1146 = vrot.lane.b32.xlu2 %v995_v11, %s7262_s7  ;;  %1078 = vst.msk [vmem:[#allocation2 + $0x81] sm:$0xff] %vm1062_vm1, %v1000_v16 }
  0x79   : > { %1079 = vst.msk [vmem:[#allocation2 + $0x89] sm:$0x7f] %vm1064_vm2, %v1001_v17 }
  0x7a   : > { %1019 = vst.msk [vmem:[#allocation2] sm:$0xff] %vm1018_vm3, %v9688_v1 }
  0x7b   : > { %1020 = vst.msk [vmem:[#allocation2 + $0x8] sm:$0xff] %vm1018_vm3, %v9688_v1 }
  0x7c   : > { %1022 = vst.msk [vmem:[#allocation2 + $0x110] sm:$0xff] %vm1018_vm3, %v9688_v1 }
  0x7d   : > { %1081 = vst.msk [vmem:[#allocation2 + $0x99] sm:$0x7f] %vm1064_vm2, %v1003_v18 }
  0x7e   : > { %1080 = vst.msk [vmem:[#allocation2 + $0x91] sm:$0xff] %vm1062_vm1, %v1002_v19 }
  0x7f   : > { %1275 = vrot.lane.b32.xlu1 %v995_v11, %s7261_s2  ;;  %1273 = vrot.lane.b32.xlu0 %v994_v10, %s7261_s2  ;;  %1025 = vst.msk [vmem:[#allocation2] sm:$0x1] %vm1024_vm0, %v9688_v1 }
  0x80   : > { %1148 = vrot.lane.b32.xlu2 %v996_v13, %s7262_s7  ;;  %1043 = vst.msk [vmem:[#allocation2 + $0xf] sm:$0x1] %vm1024_vm0, %v9688_v1 }
  0x81   : > { %1023 = vst.msk [vmem:[#allocation2 + $0x118] sm:$0xff] %vm1018_vm3, %v9688_v1 }
  0x82   : > { %1042 = vst.msk [vmem:[#allocation2 + $0x110] sm:$0x1] %vm1024_vm0, %v9688_v1 }
  0x83   : > { %1060 = vst.msk [vmem:[#allocation2 + $0x11f] sm:$0x1] %vm1024_vm0, %v9688_v1  ;;  %vm2586_vm0 = vcmask 130112  }
  0x84   : > { %1082 = vst.msk [vmem:[#allocation2 + $0xa1] sm:$0xff] %vm1062_vm1, %v1004_v25 }
  0x85   : > { %1083 = vst.msk [vmem:[#allocation2 + $0xa9] sm:$0x7f] %vm1064_vm2, %v1005_v34 }
  0x86   : > { %v1387_v26 = vld [vmem:[#allocation2] sm:$0xff]  ;;  %1084 = vst.msk [vmem:[#allocation2 + $0xb1] sm:$0xff] %vm1062_vm1, %v1006_v40 }
  0x87   : > { %1150 = vrot.lane.b32.xlu0 %v997_v12, %s7262_s7  ;;  %1277 = vrot.lane.b32.xlu1 %v996_v13, %s7261_s2  ;;  %v1388_v27 = vld [vmem:[#allocation2 + $0x8] sm:$0xff]  ;;  %1085 = vst.msk [vmem:[#allocation2 + $0xb9] sm:$0x7f] %vm1064_vm2, %v1007_v44 }
  0x88   : > { %1279 = vrot.lane.b32.xlu2 %v997_v12, %s7261_s2  ;;  %v1419_v28 = vpack.c.bf16 %v1388_v27, %v1387_v26  ;;  %1087 = vst.msk [vmem:[#allocation2 + $0xc9] sm:$0x7f] %vm1064_vm2, %v1009_v53 }
  0x89   : > { %1086 = vst.msk [vmem:[#allocation2 + $0xc1] sm:$0xff] %vm1062_vm1, %v1008_v54 }
  0x8a   : > { %6664 = vmatmul.msk.bf16.vlgmr.msra.gmra.mxu1 %vm1018_vm3, %v1419_v28  ;;  %1088 = vst.msk [vmem:[#allocation2 + $0xd1] sm:$0xff] %vm1062_vm1, %v1010_v61 }
  0x8b   : > { %1089 = vst.msk [vmem:[#allocation2 + $0xd9] sm:$0x7f] %vm1064_vm2, %v1011_v5 }
  0x8c   : > { %1090 = vst.msk [vmem:[#allocation2 + $0xe1] sm:$0xff] %vm1062_vm1, %v1012_v8 }
  0x8d   : > { %1094 = vst.msk [vmem:[#allocation2 + $0x101] sm:$0xff] %vm1062_vm1, %v1016_v29 }
  0x8e   : > { %1095 = vst.msk [vmem:[#allocation2 + $0x109] sm:$0x7f] %vm1064_vm2, %v1017_v36 }
  0x8f   : > { %1152 = vrot.lane.b32.xlu0 %v998_v14, %s7262_s7  ;;  %1154 = vrot.lane.b32.xlu1 %v999_v15, %s7262_s7 }
  0x90   : > { %1281 = vrot.lane.b32.xlu2 %v998_v14, %s7261_s2 }
  0x97   : > { %1283 = vrot.lane.b32.xlu0 %v999_v15, %s7261_s2  ;;  %1156 = vrot.lane.b32.xlu1 %v1000_v16, %s7262_s7  ;;  %v1013_v15 = vld [vmem:[%s7454_s20 + $0xd8] sm:$0xff] }
  0x98   : > { %1158 = vrot.lane.b32.xlu2 %v1001_v17, %s7262_s7  ;;  %1091 = vst.msk [vmem:[#allocation2 + $0xe9] sm:$0x7f] %vm1064_vm2, %v1013_v15 }
  0x9f   : > { %1287 = vrot.lane.b32.xlu1 %v1001_v17, %s7261_s2  ;;  %1285 = vrot.lane.b32.xlu0 %v1000_v16, %s7261_s2 }
  0xa0   : > { %1160 = vrot.lane.b32.xlu2 %v1002_v19, %s7262_s7 }
  0xa7   : > { %1162 = vrot.lane.b32.xlu0 %v1003_v18, %s7262_s7  ;;  %1289 = vrot.lane.b32.xlu1 %v1002_v19, %s7261_s2 }
  0xa8   : > { %1291 = vrot.lane.b32.xlu2 %v1003_v18, %s7261_s2 }
  0xaa   : > { %v1129_v24 = vpop.permute.xlu2 %1128 }
  0xab   : > { %1225 = vst.msk [vmem:[#allocation2 + $0x10] sm:$0xff] %vm1224_vm5, %v1129_v24  ;;  %v1015_v24 = vld [vmem:[%s7454_s20 + $0xe8] sm:$0xff] }
  0xac   : > { %1093 = vst.msk [vmem:[#allocation2 + $0xf9] sm:$0x7f] %vm1064_vm2, %v1015_v24  ;;  %vm2717_vm2 = vcmask 195712  }
  0xaf   : > { %1164 = vrot.lane.b32.xlu0 %v1004_v25, %s7262_s7  ;;  %1166 = vrot.lane.b32.xlu1 %v1005_v34, %s7262_s7 }
  0xb0   : > { %1293 = vrot.lane.b32.xlu2 %v1004_v25, %s7261_s2  ;;  %v1014_v25 = vld [vmem:[%s7454_s20 + $0xe0] sm:$0xff]  ;;  %s9716_s20 = sld [smem:[#allocation18_spill]] }
  0xb1   : > { %1092 = vst.msk [vmem:[#allocation2 + $0xf1] sm:$0xff] %vm1062_vm1, %v1014_v25  ;;  %vm2715_vm1 = vcmask 195713  }
  0xb2   : > { %v1131_v32 = vpop.permute.xlu2 %1130 }
  0xb3   : > { %1226 = vst.msk [vmem:[#allocation2 + $0x18] sm:$0xff] %vm1224_vm5, %v1131_v32 }
  0xb7   : > { %1295 = vrot.lane.b32.xlu0 %v1005_v34, %s7261_s2  ;;  %1168 = vrot.lane.b32.xlu1 %v1006_v40, %s7262_s7 }
  0xb8   : > { %1170 = vrot.lane.b32.xlu2 %v1007_v44, %s7262_s7 }
  0xba   : > { %v1137_v39 = vpop.permute.xlu2 %1136 }
  0xbb   : > { %1229 = vst.msk [vmem:[#allocation2 + $0x30] sm:$0xff] %vm1224_vm5, %v1137_v39 }
  0xbf   : > { %1297 = vrot.lane.b32.xlu0 %v1006_v40, %s7261_s2  ;;  %1299 = vrot.lane.b32.xlu1 %v1007_v44, %s7261_s2 }
  0xc0   : > { %1172 = vrot.lane.b32.xlu2 %v1008_v54, %s7262_s7 }
  0xc1   : > { %v1262_v41 = vpop.permute.xlu1 %1261  ;;  %v1133_v42 = vpop.permute.xlu0 %1132 }
  0xc2   : > { %1227 = vst.msk [vmem:[#allocation2 + $0x20] sm:$0xff] %vm1224_vm5, %v1133_v42  ;;  %v1268_v43 = vpop.permute.xlu2 %1267 }
  0xc3   : > { %1357 = vst.msk [vmem:[#allocation2 + $0x1f] sm:$0xfe] %vm1353_vm6, %v1262_v41 }
  0xc7   : > { %1174 = vrot.lane.b32.xlu0 %v1009_v53, %s7262_s7  ;;  %1301 = vrot.lane.b32.xlu1 %v1008_v54, %s7261_s2 }
  0xc8   : > { %1303 = vrot.lane.b32.xlu2 %v1009_v53, %s7261_s2 }
  0xc9   : > { %v1264_v45 = vpop.permute.xlu1 %1263  ;;  %v1135_v46 = vpop.permute.xlu0 %1134 }
  0xca   : > { %1228 = vst.msk [vmem:[#allocation2 + $0x28] sm:$0xff] %vm1224_vm5, %v1135_v46  ;;  %v1270_v47 = vpop.permute.xlu2 %1269 }
  0xcb   : > { %1358 = vst.msk [vmem:[#allocation2 + $0x27] sm:$0xff] %vm1355_vm7, %v1264_v45 }
  0xcf   : > { %1176 = vrot.lane.b32.xlu0 %v1010_v61, %s7262_s7  ;;  %1178 = vrot.lane.b32.xlu1 %v1011_v5, %s7262_s7 }
  0xd0   : > { %1305 = vrot.lane.b32.xlu2 %v1010_v61, %s7261_s2 }
  0xd1   : > { %v1260_v48 = vpop.permute.xlu1 %1259  ;;  %v1258_v49 = vpop.permute.xlu0 %1257 }
  0xd2   : > { %1356 = vst.msk [vmem:[#allocation2 + $0x17] sm:$0xff] %vm1355_vm7, %v1260_v48  ;;  %v1780_v50 = vld [vmem:[#allocation2 + $0x20] sm:$0xff]  ;;  %v1781_v51 = vld [vmem:[#allocation2 + $0x28] sm:$0xff]  ;;  %v1147_v55 = vpop.permute.xlu2 %1146 }
  0xd3   : > { %1354 = vst.msk [vmem:[#allocation2 + $0xf] sm:$0xfe] %vm1353_vm6, %v1258_v49  ;;  %v1812_v52 = vpack.c.bf16 %v1781_v51, %v1780_v50 }
  0xd4   : > { %1234 = vst.msk [vmem:[#allocation2 + $0x58] sm:$0xff] %vm1224_vm5, %v1147_v55 }
  0xd5   : > { %6686 = vmatmul.msk.bf16.vlgmr.msra.gmra.mxu2 %vm1018_vm3, %v1812_v52 }
  0xd7   : > { %1307 = vrot.lane.b32.xlu0 %v1011_v5, %s7261_s2  ;;  %1180 = vrot.lane.b32.xlu1 %v1012_v8, %s7262_s7 }
  0xd8   : > { %1182 = vrot.lane.b32.xlu2 %v1013_v15, %s7262_s7 }
  0xd9   : > { %v1139_v56 = vpop.permute.xlu0 %1138  ;;  %v1266_v57 = vpop.permute.xlu1 %1265  ;;  %v1438_v58 = vld [vmem:[#allocation2 + $0x18] sm:$0xff] }
  0xda   : > { %1230 = vst.msk [vmem:[#allocation2 + $0x38] sm:$0xff] %vm1224_vm5, %v1139_v56  ;;  %v1437_v59 = vld [vmem:[#allocation2 + $0x10] sm:$0xff]  ;;  %v1149_v62 = vpop.permute.xlu2 %1148 }
  0xdb   : > { %1359 = vst.msk [vmem:[#allocation2 + $0x2f] sm:$0xfe] %vm1353_vm6, %v1266_v57  ;;  %v1469_v60 = vpack.c.bf16 %v1438_v58, %v1437_v59 }
  0xdc   : > { %1360 = vst.msk [vmem:[#allocation2 + $0x37] sm:$0xff] %vm1355_vm7, %v1268_v43 }
  0xdd   : > { %6644 = vmatmul.msk.bf16.vlgmr.msra.gmra.mxu0 %vm1018_vm3, %v1469_v60  ;;  %6665 = vmatmul.msk.bf16.gmra.mxu1 %vm1018_vm3, %v1469_v60  ;;  %1235 = vst.msk [vmem:[#allocation2 + $0x60] sm:$0xff] %vm1224_vm5, %v1149_v62 }
  0xdf   : > { %1309 = vrot.lane.b32.xlu0 %v1012_v8, %s7261_s2  ;;  %1311 = vrot.lane.b32.xlu1 %v1013_v15, %s7261_s2 }
  0xe0   : > { %1184 = vrot.lane.b32.xlu2 %v1014_v25, %s7262_s7 }
  0xe1   : > { %v1141_v63 = vpop.permute.xlu0 %1140  ;;  %v1143_v0 = vpop.permute.xlu1 %1142 }
  0xe2   : > { %1231 = vst.msk [vmem:[#allocation2 + $0x40] sm:$0xff] %vm1224_vm5, %v1141_v63  ;;  %v1280_v14 = vpop.permute.xlu2 %1279 }
  0xe3   : > { %v1782_v2 = vld [vmem:[#allocation2 + $0x30] sm:$0xff]  ;;  %v1783_v3 = vld [vmem:[#allocation2 + $0x38] sm:$0xff]  ;;  %1232 = vst.msk [vmem:[#allocation2 + $0x48] sm:$0xff] %vm1224_vm5, %v1143_v0 }
  0xe4   : > { %v1813_v4 = vpack.c.bf16 %v1783_v3, %v1782_v2  ;;  %1361 = vst.msk [vmem:[#allocation2 + $0x3f] sm:$0xfe] %vm1353_vm6, %v1270_v47 }
  0xe6   : > { %6687 = vmatmul.msk.bf16.gmra.mxu2 %vm1018_vm3, %v1813_v4 }
  0xe7   : > { %1186 = vrot.lane.b32.xlu0 %v1015_v24, %s7262_s7  ;;  %1313 = vrot.lane.b32.xlu1 %v1014_v25, %s7261_s2 }
  0xe8   : > { %1315 = vrot.lane.b32.xlu2 %v1015_v24, %s7261_s2 }
  0xe9   : > { %v1272_v6 = vpop.permute.xlu0 %1271  ;;  %v1145_v7 = vpop.permute.xlu1 %1144 }
  0xea   : > { %1362 = vst.msk [vmem:[#allocation2 + $0x47] sm:$0xff] %vm1355_vm7, %v1272_v6  ;;  %v1282_v18 = vpop.permute.xlu2 %1281 }
  0xeb   : > { %1233 = vst.msk [vmem:[#allocation2 + $0x50] sm:$0xff] %vm1224_vm5, %v1145_v7 }
  0xed   : > { %6645 = vmatmul.msk.bf16.gmra.mxu0 %vm1018_vm3, %v1812_v52  ;;  %6666 = vmatmul.msk.bf16.gmra.mxu1 %vm1018_vm3, %v1812_v52 }
  0xef   : > { %1188 = vrot.lane.b32.xlu0 %v1016_v29, %s7262_s7  ;;  %1190 = vrot.lane.b32.xlu1 %v1017_v36, %s7262_s7  ;;  %s9718_s7 = sld [smem:[#allocation21_spill]] }
  0xf0   : > { %1317 = vrot.lane.b32.xlu2 %v1016_v29, %s7261_s2 }
  0xf1   : > { %v1784_v9 = vld [vmem:[#allocation2 + $0x40] sm:$0xff]  ;;  %v1785_v10 = vld [vmem:[#allocation2 + $0x48] sm:$0xff]  ;;  %v1276_v11 = vpop.permute.xlu1 %1275  ;;  %v1274_v12 = vpop.permute.xlu0 %1273 }
  0xf2   : > { %v1814_v13 = vpack.c.bf16 %v1785_v10, %v1784_v9  ;;  %1364 = vst.msk [vmem:[#allocation2 + $0x57] sm:$0xff] %vm1355_vm7, %v1276_v11  ;;  %v1159_v26 = vpop.permute.xlu2 %1158 }
  0xf3   : > { %1363 = vst.msk [vmem:[#allocation2 + $0x4f] sm:$0xfe] %vm1353_vm6, %v1274_v12 }
  0xf4   : > { %1240 = vst.msk [vmem:[#allocation2 + $0x88] sm:$0xff] %vm1224_vm5, %v1159_v26 }
  0xf6   : > { %6688 = vmatmul.msk.bf16.gmra.mxu2 %vm1018_vm3, %v1814_v13 }
  0xf7   : > { %1319 = vrot.lane.b32.xlu0 %v1017_v36, %s7261_s2 }
  0xf9   : > { %v1151_v16 = vpop.permute.xlu0 %1150  ;;  %v1278_v17 = vpop.permute.xlu1 %1277  ;;  %v1787_v20 = vld [vmem:[#allocation2 + $0x58] sm:$0xff] }
  0xfa   : > { %1236 = vst.msk [vmem:[#allocation2 + $0x68] sm:$0xff] %vm1224_vm5, %v1151_v16  ;;  %v1786_v19 = vld [vmem:[#allocation2 + $0x50] sm:$0xff]  ;;  %v1161_v30 = vpop.permute.xlu2 %1160 }
  0xfb   : > { %1365 = vst.msk [vmem:[#allocation2 + $0x5f] sm:$0xfe] %vm1353_vm6, %v1278_v17  ;;  %v1815_v23 = vpack.c.bf16 %v1787_v20, %v1786_v19 }
  0xfc   : > { %1366 = vst.msk [vmem:[#allocation2 + $0x67] sm:$0xff] %vm1355_vm7, %v1280_v14 }
  0xfd   : > { %6646 = vmatmul.msk.bf16.gmra.mxu0 %vm1018_vm3, %v1813_v4  ;;  %6667 = vmatmul.msk.bf16.gmra.mxu1 %vm1018_vm3, %v1813_v4  ;;  %1241 = vst.msk [vmem:[#allocation2 + $0x90] sm:$0xff] %vm1224_vm5, %v1161_v30  ;;  %v2215_v4 = vld [vmem:[%s7289_s17] sm:$0xff] }
  0xfe   : > { %2234 = vmatpush.msrb.mxu0 %v2215_v4  ;;  %2257 = vmatpush.msra.mxu3 %v2215_v4 }
 0x101   : > { %v1153_v21 = vpop.permute.xlu0 %1152  ;;  %v1155_v22 = vpop.permute.xlu1 %1154 }
 0x102   : > { %1237 = vst.msk [vmem:[#allocation2 + $0x70] sm:$0xff] %vm1224_vm5, %v1153_v21  ;;  %v1292_v37 = vpop.permute.xlu2 %1291 }
 0x103   : > { %1238 = vst.msk [vmem:[#allocation2 + $0x78] sm:$0xff] %vm1224_vm5, %v1155_v22  ;;  %v1788_v31 = vld [vmem:[#allocation2 + $0x60] sm:$0xff]  ;;  %v1789_v32 = vld [vmem:[#allocation2 + $0x68] sm:$0xff] }
 0x104   : > { %1367 = vst.msk [vmem:[#allocation2 + $0x6f] sm:$0xfe] %vm1353_vm6, %v1282_v18  ;;  %v1816_v35 = vpack.c.bf16 %v1789_v32, %v1788_v31 }
 0x106   : > { %6689 = vmatmul.msk.bf16.gmra.mxu2 %vm1018_vm3, %v1815_v23 }
 0x107   : > { %v1699_v58 = vpop.f32.mrf.mxu1 }
 0x109   : > { %v1284_v27 = vpop.permute.xlu0 %1283  ;;  %v1157_v28 = vpop.permute.xlu1 %1156 }
 0x10a   : > { %1368 = vst.msk [vmem:[#allocation2 + $0x77] sm:$0xff] %vm1355_vm7, %v1284_v27  ;;  %v1294_v44 = vpop.permute.xlu2 %1293 }
 0x10b   : > { %1239 = vst.msk [vmem:[#allocation2 + $0x80] sm:$0xff] %vm1224_vm5, %v1157_v28 }
 0x10d   : > { %6647 = vmatmul.msk.bf16.gmra.mxu0 %vm1018_vm3, %v1814_v13  ;;  %6668 = vmatmul.msk.bf16.gmra.mxu1 %vm1018_vm3, %v1814_v13 }
 0x10f   : > { %v1701_v0 = vpop.f32.mrf.mxu1 }
 0x111   : > { %v1288_v33 = vpop.permute.xlu1 %1287  ;;  %v1286_v34 = vpop.permute.xlu0 %1285  ;;  %v1790_v40 = vld [vmem:[#allocation2 + $0x70] sm:$0xff]  ;;  %v1791_v41 = vld [vmem:[#allocation2 + $0x78] sm:$0xff] }
 0x112   : > { %1370 = vst.msk [vmem:[#allocation2 + $0x87] sm:$0xff] %vm1355_vm7, %v1288_v33  ;;  %v1817_v43 = vpack.c.bf16 %v1791_v41, %v1790_v40  ;;  %v1171_v51 = vpop.permute.xlu2 %1170 }
 0x113   : > { %1369 = vst.msk [vmem:[#allocation2 + $0x7f] sm:$0xfe] %vm1353_vm6, %v1286_v34 }
 0x114   : > { %1246 = vst.msk [vmem:[#allocation2 + $0xb8] sm:$0xff] %vm1224_vm5, %v1171_v51 }
 0x116   : > { %6690 = vmatmul.msk.bf16.gmra.mxu2 %vm1018_vm3, %v1816_v35 }
 0x119   : > { %v1163_v38 = vpop.permute.xlu0 %1162  ;;  %v1290_v39 = vpop.permute.xlu1 %1289  ;;  %v1793_v48 = vld [vmem:[#allocation2 + $0x88] sm:$0xff] }
 0x11a   : > { %1242 = vst.msk [vmem:[#allocation2 + $0x98] sm:$0xff] %vm1224_vm5, %v1163_v38  ;;  %v1792_v47 = vld [vmem:[#allocation2 + $0x80] sm:$0xff]  ;;  %v1173_v57 = vpop.permute.xlu2 %1172 }
 0x11b   : > { %1371 = vst.msk [vmem:[#allocation2 + $0x8f] sm:$0xfe] %vm1353_vm6, %v1290_v39  ;;  %v1818_v50 = vpack.c.bf16 %v1793_v48, %v1792_v47 }
 0x11c   : > { %1372 = vst.msk [vmem:[#allocation2 + $0x97] sm:$0xff] %vm1355_vm7, %v1292_v37 }
 0x11d   : > { %6648 = vmatmul.msk.bf16.gmra.mxu0 %vm1018_vm3, %v1815_v23  ;;  %6669 = vmatmul.msk.bf16.gmra.mxu1 %vm1018_vm3, %v1815_v23  ;;  %1247 = vst.msk [vmem:[#allocation2 + $0xc0] sm:$0xff] %vm1224_vm5, %v1173_v57 }
 0x121   : > { %v1165_v42 = vpop.permute.xlu0 %1164  ;;  %v1167_v45 = vpop.permute.xlu1 %1166 }
 0x122   : > { %1243 = vst.msk [vmem:[#allocation2 + $0xa0] sm:$0xff] %vm1224_vm5, %v1165_v42  ;;  %v1304_v61 = vpop.permute.xlu2 %1303 }
 0x123   : > { %1373 = vst.msk [vmem:[#allocation2 + $0x9f] sm:$0xfe] %vm1353_vm6, %v1294_v44  ;;  %v1794_v54 = vld [vmem:[#allocation2 + $0x90] sm:$0xff]  ;;  %v1795_v55 = vld [vmem:[#allocation2 + $0x98] sm:$0xff] }
 0x124   : > { %1244 = vst.msk [vmem:[#allocation2 + $0xa8] sm:$0xff] %vm1224_vm5, %v1167_v45  ;;  %v1819_v56 = vpack.c.bf16 %v1795_v55, %v1794_v54 }
 0x126   : > { %6691 = vmatmul.msk.bf16.gmra.mxu2 %vm1018_vm3, %v1817_v43 }
 0x129   : > { %v1296_v46 = vpop.permute.xlu0 %1295  ;;  %v1169_v49 = vpop.permute.xlu1 %1168 }
 0x12a   : > { %1374 = vst.msk [vmem:[#allocation2 + $0xa7] sm:$0xff] %vm1355_vm7, %v1296_v46  ;;  %v1306_v11 = vpop.permute.xlu2 %1305 }
 0x12b   : > { %1245 = vst.msk [vmem:[#allocation2 + $0xb0] sm:$0xff] %vm1224_vm5, %v1169_v49 }
 0x12d   : > { %6649 = vmatmul.msk.bf16.gmra.mxu0 %vm1018_vm3, %v1816_v35  ;;  %6670 = vmatmul.msk.bf16.gmra.mxu1 %vm1018_vm3, %v1816_v35 }
 0x131   : > { %v1300_v52 = vpop.permute.xlu1 %1299  ;;  %v1298_v53 = vpop.permute.xlu0 %1297  ;;  %v1796_v62 = vld [vmem:[#allocation2 + $0xa0] sm:$0xff]  ;;  %v1797_v63 = vld [vmem:[#allocation2 + $0xa8] sm:$0xff] }
 0x132   : > { %1376 = vst.msk [vmem:[#allocation2 + $0xb7] sm:$0xff] %vm1355_vm7, %v1300_v52  ;;  %v1820_v2 = vpack.c.bf16 %v1797_v63, %v1796_v62  ;;  %v1183_v26 = vpop.permute.xlu2 %1182 }
 0x133   : > { %1375 = vst.msk [vmem:[#allocation2 + $0xaf] sm:$0xfe] %vm1353_vm6, %v1298_v53 }
 0x134   : > { %1252 = vst.msk [vmem:[#allocation2 + $0xe8] sm:$0xff] %vm1224_vm5, %v1183_v26 }
 0x136   : > { %6692 = vmatmul.msk.bf16.gmra.mxu2 %vm1018_vm3, %v1818_v50 }
 0x139   : > { %v1175_v59 = vpop.permute.xlu0 %1174  ;;  %v1302_v60 = vpop.permute.xlu1 %1301  ;;  %v1799_v14 = vld [vmem:[#allocation2 + $0xb8] sm:$0xff] }
 0x13a   : > { %1248 = vst.msk [vmem:[#allocation2 + $0xc8] sm:$0xff] %vm1224_vm5, %v1175_v59  ;;  %v1798_v13 = vld [vmem:[#allocation2 + $0xb0] sm:$0xff]  ;;  %v1185_v37 = vpop.permute.xlu2 %1184 }
 0x13b   : > { %1377 = vst.msk [vmem:[#allocation2 + $0xbf] sm:$0xfe] %vm1353_vm6, %v1302_v60  ;;  %v1821_v18 = vpack.c.bf16 %v1799_v14, %v1798_v13 }
 0x13c   : > { %1378 = vst.msk [vmem:[#allocation2 + $0xc7] sm:$0xff] %vm1355_vm7, %v1304_v61 }
 0x13d   : > { %6650 = vmatmul.msk.bf16.gmra.mxu0 %vm1018_vm3, %v1817_v43  ;;  %6671 = vmatmul.msk.bf16.gmra.mxu1 %vm1018_vm3, %v1817_v43  ;;  %1253 = vst.msk [vmem:[#allocation2 + $0xf0] sm:$0xff] %vm1224_vm5, %v1185_v37 }
 0x141   : > { %v1177_v3 = vpop.permute.xlu0 %1176  ;;  %v1179_v9 = vpop.permute.xlu1 %1178 }
 0x142   : > { %1249 = vst.msk [vmem:[#allocation2 + $0xd0] sm:$0xff] %vm1224_vm5, %v1177_v3  ;;  %v1316_v45 = vpop.permute.xlu2 %1315 }
 0x143   : > { %1250 = vst.msk [vmem:[#allocation2 + $0xd8] sm:$0xff] %vm1224_vm5, %v1179_v9  ;;  %v1800_v30 = vld [vmem:[#allocation2 + $0xc0] sm:$0xff]  ;;  %v1801_v31 = vld [vmem:[#allocation2 + $0xc8] sm:$0xff] }
 0x144   : > { %1379 = vst.msk [vmem:[#allocation2 + $0xcf] sm:$0xfe] %vm1353_vm6, %v1306_v11  ;;  %v1822_v35 = vpack.c.bf16 %v1801_v31, %v1800_v30 }
 0x146   : > { %6693 = vmatmul.msk.bf16.gmra.mxu2 %vm1018_vm3, %v1819_v56 }
 0x149   : > { %v1308_v10 = vpop.permute.xlu0 %1307  ;;  %v1181_v20 = vpop.permute.xlu1 %1180 }
 0x14a   : > { %1380 = vst.msk [vmem:[#allocation2 + $0xd7] sm:$0xff] %vm1355_vm7, %v1308_v10  ;;  %v1318_v62 = vpop.permute.xlu2 %1317 }
 0x14b   : > { %1251 = vst.msk [vmem:[#allocation2 + $0xe0] sm:$0xff] %vm1224_vm5, %v1181_v20 }
 0x14d   : > { %6651 = vmatmul.msk.bf16.gmra.mxu0 %vm1018_vm3, %v1818_v50  ;;  %6672 = vmatmul.msk.bf16.gmra.mxu1 %vm1018_vm3, %v1818_v50 }
 0x151   : > { %v1312_v27 = vpop.permute.xlu1 %1311  ;;  %v1310_v28 = vpop.permute.xlu0 %1309  ;;  %v1802_v47 = vld [vmem:[#allocation2 + $0xd0] sm:$0xff]  ;;  %v1803_v48 = vld [vmem:[#allocation2 + $0xd8] sm:$0xff] }
 0x152   : > { %1382 = vst.msk [vmem:[#allocation2 + $0xe7] sm:$0xff] %vm1355_vm7, %v1312_v27  ;;  %v1823_v52 = vpack.c.bf16 %v1803_v48, %v1802_v47 }
 0x153   : > { %1381 = vst.msk [vmem:[#allocation2 + $0xdf] sm:$0xfe] %vm1353_vm6, %v1310_v28 }
 0x156   : > { %6694 = vmatmul.msk.bf16.gmra.mxu2 %vm1018_vm3, %v1820_v2 }
 0x158   : > { %v1896_v5 = vpop.f32.mrf.mxu2 }
 0x159   : > { %v1187_v43 = vpop.permute.xlu0 %1186  ;;  %v1314_v44 = vpop.permute.xlu1 %1313 }
 0x15a   : > { %v1554_v6 = vpop.f32.mrf.mxu0  ;;  %v1704_v7 = vpop.f32.mrf.mxu1  ;;  %1254 = vst.msk [vmem:[#allocation2 + $0xf8] sm:$0xff] %vm1224_vm5, %v1187_v43 }
 0x15b   : > { %v1700_v8 = vadd.f32 %v1699_v58, %v1554_v6  ;;  %1383 = vst.msk [vmem:[#allocation2 + $0xef] sm:$0xfe] %vm1353_vm6, %v1314_v44 }
 0x15c   : > { %1384 = vst.msk [vmem:[#allocation2 + $0xf7] sm:$0xff] %vm1355_vm7, %v1316_v45 }
 0x15d   : > { %v7742_v12 = vadd.f32 %v1896_v5, %v1700_v8  ;;  %6652 = vmatmul.msk.bf16.gmra.mxu0 %vm1018_vm3, %v1819_v56  ;;  %6673 = vmatmul.msk.bf16.gmra.mxu1 %vm1018_vm3, %v1819_v56 }
 0x160   : > { %v1898_v15 = vpop.f32.mrf.mxu2 }
 0x161   : > { %v1189_v54 = vpop.permute.xlu0 %1188  ;;  %v1191_v60 = vpop.permute.xlu1 %1190 }
 0x162   : > { %v1556_v16 = vpop.f32.mrf.mxu0  ;;  %v1706_v17 = vpop.f32.mrf.mxu1  ;;  %1255 = vst.msk [vmem:[#allocation2 + $0x100] sm:$0xff] %vm1224_vm5, %v1189_v54 }
 0x163   : > { %v1702_v19 = vadd.f32 %v1701_v0, %v1556_v16  ;;  %1256 = vst.msk [vmem:[#allocation2 + $0x108] sm:$0xff] %vm1224_vm5, %v1191_v60  ;;  %v1804_v0 = vld [vmem:[#allocation2 + $0xe0] sm:$0xff]  ;;  %v1807_v16 = vld [vmem:[#allocation2 + $0xf8] sm:$0xff]  ;;  %vm3976_vm5 = vcmask 1043459  }
 0x164   : > { %1385 = vst.msk [vmem:[#allocation2 + $0xff] sm:$0xfe] %vm1353_vm6, %v1318_v62  ;;  %vm3978_vm6 = vcmask 1044484  }
 0x165   : > { %v7749_v21 = vadd.f32 %v1898_v15, %v1702_v19  ;;  %v1806_v15 = vld [vmem:[#allocation2 + $0xf0] sm:$0xff] }
 0x166   : > { %6695 = vmatmul.msk.bf16.gmra.mxu2 %vm1018_vm3, %v1821_v18  ;;  %v1825_v20 = vpack.c.bf16 %v1807_v16, %v1806_v15 }
 0x169   : > { %v1901_v22 = vpop.f32.mrf.mxu2  ;;  %v1320_v61 = vpop.permute.xlu0 %1319 }
 0x16a   : > { %v1559_v23 = vpop.f32.mrf.mxu0  ;;  %v1709_v24 = vpop.f32.mrf.mxu1  ;;  %1386 = vst.msk [vmem:[#allocation2 + $0x107] sm:$0xff] %vm1355_vm7, %v1320_v61  ;;  %vm3980_vm7 = vcmask 1045509  }
 0x16b   : > { %v1705_v25 = vadd.f32 %v1704_v7, %v1559_v23 }
 0x16d   : > { %v7753_v29 = vadd.f32 %v1901_v22, %v1705_v25  ;;  %6653 = vmatmul.msk.bf16.gmra.mxu0 %vm1018_vm3, %v1820_v2  ;;  %6674 = vmatmul.msk.bf16.gmra.mxu1 %vm1018_vm3, %v1820_v2  ;;  %v1805_v2 = vld [vmem:[#allocation2 + $0xe8] sm:$0xff] }
 0x16e   : > { %v1824_v6 = vpack.c.bf16 %v1805_v2, %v1804_v0 }
 0x171   : > { %v1903_v32 = vpop.f32.mrf.mxu2  ;;  %v1808_v27 = vld [vmem:[#allocation2 + $0x100] sm:$0xff]  ;;  %v1809_v28 = vld [vmem:[#allocation2 + $0x108] sm:$0xff] }
 0x172   : > { %v1561_v33 = vpop.f32.mrf.mxu0  ;;  %v1711_v34 = vpop.f32.mrf.mxu1 }
 0x173   : > { %v1707_v36 = vadd.f32 %v1706_v17, %v1561_v33  ;;  %v1826_v33 = vpack.c.bf16 %v1809_v28, %v1808_v27 }
 0x175   : > { %v7760_v38 = vadd.f32 %v1903_v32, %v1707_v36 }
 0x176   : > { %6696 = vmatmul.msk.bf16.gmra.mxu2 %vm1018_vm3, %v1822_v35 }
 0x179   : > { %v1906_v39 = vpop.f32.mrf.mxu2 }
 0x17a   : > { %v1564_v40 = vpop.f32.mrf.mxu0  ;;  %v1714_v41 = vpop.f32.mrf.mxu1 }
 0x17b   : > { %v1710_v42 = vadd.f32 %v1709_v24, %v1564_v40  ;;  %v1810_v40 = vld [vmem:[#allocation2 + $0x110] sm:$0xff] }
 0x17d   : > { %v7764_v46 = vadd.f32 %v1906_v39, %v1710_v42  ;;  %6654 = vmatmul.msk.bf16.gmra.mxu0 %vm1018_vm3, %v1821_v18  ;;  %6675 = vmatmul.msk.bf16.gmra.mxu1 %vm1018_vm3, %v1821_v18 }
 0x181   : > { %v1908_v49 = vpop.f32.mrf.mxu2 }
 0x182   : > { %v1566_v50 = vpop.f32.mrf.mxu0  ;;  %v1716_v51 = vpop.f32.mrf.mxu1 }
 0x183   : > { %v1712_v53 = vadd.f32 %v1711_v34, %v1566_v50 }
 0x185   : > { %v7771_v55 = vadd.f32 %v1908_v49, %v1712_v53 }
 0x186   : > { %6697 = vmatmul.msk.bf16.gmra.mxu2 %vm1018_vm3, %v1823_v52 }
 0x189   : > { %v1911_v56 = vpop.f32.mrf.mxu2 }
 0x18a   : > { %v1569_v57 = vpop.f32.mrf.mxu0  ;;  %v1719_v58 = vpop.f32.mrf.mxu1 }
 0x18b   : > { %v1715_v59 = vadd.f32 %v1714_v41, %v1569_v57  ;;  %v1811_v41 = vld [vmem:[#allocation2 + $0x118] sm:$0xff] }
 0x18c   : > { %v1827_v45 = vpack.c.bf16 %v1811_v41, %v1810_v40 }
 0x18d   : > { %v7775_v63 = vadd.f32 %v1911_v56, %v1715_v59  ;;  %6655 = vmatmul.msk.bf16.gmra.mxu0 %vm1018_vm3, %v1822_v35  ;;  %6676 = vmatmul.msk.bf16.gmra.mxu1 %vm1018_vm3, %v1822_v35 }
 0x191   : > { %v1913_v3 = vpop.f32.mrf.mxu2 }
 0x192   : > { %v1571_v4 = vpop.f32.mrf.mxu0  ;;  %v7781_v5 = vpop.f32.mrf.mxu1 }
 0x193   : > { %v1717_v7 = vadd.f32 %v1716_v51, %v1571_v4 }
 0x195   : > { %v7783_v8 = vadd.f32 %v1913_v3, %v1717_v7 }
 0x196   : > { %6698 = vmatmul.msk.bf16.gmra.mxu2 %vm1018_vm3, %v1824_v6 }
 0x199   : > { %v1916_v9 = vpop.f32.mrf.mxu2 }
 0x19a   : > { %v1574_v10 = vpop.f32.mrf.mxu0  ;;  %v1724_v11 = vpop.f32.mrf.mxu1 }
 0x19b   : > { %v1720_v13 = vadd.f32 %v1719_v58, %v1574_v10 }
 0x19d   : > { %v7786_v14 = vadd.f32 %v1916_v9, %v1720_v13  ;;  %6656 = vmatmul.msk.bf16.gmra.mxu0 %vm1018_vm3, %v1823_v52  ;;  %6677 = vmatmul.msk.bf16.gmra.mxu1 %vm1018_vm3, %v1823_v52 }
 0x1a1   : > { %v7790_v17 = vpop.f32.mrf.mxu2 }
 0x1a2   : > { %v7792_v18 = vpop.f32.mrf.mxu0  ;;  %v7794_v19 = vpop.f32.mrf.mxu1 }
 0x1a6   : > { %6699 = vmatmul.msk.bf16.gmra.mxu2 %vm1018_vm3, %v1825_v20 }
 0x1a9   : > { %v1921_v22 = vpop.f32.mrf.mxu2 }
 0x1aa   : > { %v1579_v23 = vpop.f32.mrf.mxu0  ;;  %v1729_v24 = vpop.f32.mrf.mxu1 }
 0x1ab   : > { %v1725_v25 = vadd.f32 %v1724_v11, %v1579_v23 }
 0x1ad   : > { %v7797_v26 = vadd.f32 %v1921_v22, %v1725_v25  ;;  %6657 = vmatmul.msk.bf16.gmra.mxu0 %vm1018_vm3, %v1824_v6  ;;  %6678 = vmatmul.msk.bf16.gmra.mxu1 %vm1018_vm3, %v1824_v6 }
 0x1b1   : > { %v7801_v30 = vpop.f32.mrf.mxu2 }
 0x1b2   : > { %v7803_v31 = vpop.f32.mrf.mxu0  ;;  %v7805_v32 = vpop.f32.mrf.mxu1 }
 0x1b6   : > { %6700 = vmatmul.msk.bf16.gmra.mxu2 %vm1018_vm3, %v1826_v33 }
 0x1b9   : > { %v1926_v34 = vpop.f32.mrf.mxu2 }
 0x1ba   : > { %v1584_v35 = vpop.f32.mrf.mxu0  ;;  %v1734_v36 = vpop.f32.mrf.mxu1 }
 0x1bb   : > { %v1730_v37 = vadd.f32 %v1729_v24, %v1584_v35  ;;  %v7863_v35 = vld [vmem:[%s7284_s13] ss:$0 sm:$0xff] }
 0x1bc   : > { %v7873_v40 = vadd.f32 %v7863_v35, %v7742_v12 }
 0x1bd   : > { %v7808_v39 = vadd.f32 %v1926_v34, %v1730_v37  ;;  %6658 = vmatmul.msk.bf16.gmra.mxu0 %vm1018_vm3, %v1825_v20  ;;  %6679 = vmatmul.msk.bf16.gmra.mxu1 %vm1018_vm3, %v1825_v20  ;;  %v7869_v37 = vadd.f32 %v7863_v35, %v7749_v21 }
 0x1be   : > { %v2114_v12 = vmul.f32 %v7873_v40, %v7873_v40 }
 0x1c1   : > { %v7812_v42 = vpop.f32.mrf.mxu2 }
 0x1c2   : > { %v7814_v43 = vpop.f32.mrf.mxu0  ;;  %v7816_v44 = vpop.f32.mrf.mxu1 }
 0x1c6   : > { %6701 = vmatmul.msk.bf16.gmra.mxu2 %vm1018_vm3, %v1827_v45  ;;  %v7879_v45 = vadd.f32 %v7863_v35, %v7753_v29 }
 0x1c8   : > { %v2116_v29 = vmul.f32 %v7879_v45, %v7879_v45 }
 0x1c9   : > { %v1931_v47 = vpop.f32.mrf.mxu2 }
 0x1ca   : > { %v1589_v48 = vpop.f32.mrf.mxu0  ;;  %v1739_v49 = vpop.f32.mrf.mxu1 }
 0x1cb   : > { %v1735_v50 = vadd.f32 %v1734_v36, %v1589_v48  ;;  %v7885_v48 = vadd.f32 %v7863_v35, %v7760_v38  ;;  %v2045_v38 = vsel %vm2044_vm8, %v7873_v40, 0.0 }
 0x1cd   : > { %v7819_v51 = vadd.f32 %v1931_v47, %v1735_v50  ;;  %6659 = vmatmul.msk.bf16.gmra.mxu0 %vm1018_vm3, %v1826_v33  ;;  %v2115_v47 = vmul.f32 %v7869_v37, %v7869_v37  ;;  %v2046_v50 = vsel %vm2044_vm8, %v7869_v37, 0.0  ;;  %vm3972_vm3 = vcmask 1041409  }
 0x1d1   : > { %v7822_v52 = vpop.f32.mrf.mxu2 }
 0x1d2   : > { %v7824_v53 = vpop.f32.mrf.mxu0  ;;  %v7826_v54 = vpop.f32.mrf.mxu1 }
 0x1d9   : > { %v1936_v56 = vpop.f32.mrf.mxu2 }
 0x1da   : > { %v1594_v57 = vpop.f32.mrf.mxu0  ;;  %v1744_v58 = vpop.f32.mrf.mxu1 }
 0x1db   : > { %v1740_v59 = vadd.f32 %v1739_v49, %v1594_v57  ;;  %v7905_v57 = vadd.f32 %v7863_v35, %v7771_v55  ;;  %v2050_v55 = vsel %vm2044_vm8, %v7885_v48, 0.0 }
 0x1dd   : > { %v7828_v60 = vadd.f32 %v1936_v56, %v1740_v59  ;;  %v7899_v56 = vadd.f32 %v7863_v35, %v7764_v46  ;;  %9706 = vst [vmem:[#allocation26_spill] sm:$0xff] %v7905_v57  ;;  %v2048_v59 = vsel %vm2044_vm8, %v7879_v45, 0.0  ;;  %v2146_v46 = vsel %vm2044_vm8, %v2114_v12, 0.0 }
 0x1e1   : > { %v7830_v61 = vpop.f32.mrf.mxu2 }
 0x1e2   : > { %v7832_v62 = vpop.f32.mrf.mxu0  ;;  %v7834_v0 = vpop.f32.mrf.mxu1 }
 0x1e9   : > { %v1941_v2 = vpop.f32.mrf.mxu2 }
 0x1ea   : > { %v1599_v3 = vpop.f32.mrf.mxu0  ;;  %v1749_v4 = vpop.f32.mrf.mxu1 }
 0x1eb   : > { %v1745_v6 = vadd.f32 %v1744_v58, %v1599_v3  ;;  %v2147_v58 = vsel %vm2044_vm8, %v2115_v47, 0.0  ;;  %v1722_v3 = vadd.f32 %v7781_v5, %v7792_v18  ;;  %v2119_v5 = vmul.f32 %v7905_v57, %v7905_v57 }
 0x1ec   : > { %v1727_v18 = vadd.f32 %v7794_v19, %v7803_v31  ;;  %v2054_v31 = vsel %vm2044_vm8, %v7905_v57, 0.0 }
 0x1ed   : > { %v7836_v7 = vadd.f32 %v1941_v2, %v1745_v6  ;;  %v2117_v2 = vmul.f32 %v7885_v48, %v7885_v48  ;;  %v2149_v6 = vsel %vm2044_vm8, %v2116_v29, 0.0  ;;  %v2052_v29 = vsel %vm2044_vm8, %v7899_v56, 0.0 }
 0x1f1   : > { %v7838_v9 = vpop.f32.mrf.mxu2 }
 0x1f2   : > { %v7840_v10 = vpop.f32.mrf.mxu0  ;;  %v7842_v11 = vpop.f32.mrf.mxu1 }
 0x1f9   : > { %v1946_v13 = vpop.f32.mrf.mxu2 }
 0x1fa   : > { %v1604_v15 = vpop.f32.mrf.mxu0  ;;  %v7844_v16 = vpop.f32.mrf.mxu1 }
 0x1fb   : > { %v1750_v20 = vadd.f32 %v1749_v4, %v1604_v15  ;;  %v2047_v4 = vadd.f32 %v2046_v50, %v2045_v38  ;;  %v7922_v15 = vadd.f32 %v7863_v35, %v7775_v63  ;;  %v2151_v50 = vsel %vm2044_vm8, %v2117_v2, 0.0 }
 0x1fc   : > { %v7935_v38 = vadd.f32 %v7863_v35, %v7783_v8  ;;  %v1985_v63 = vadd.f32 %v7790_v17, %v1722_v3  ;;  %v7949_v8 = vadd.f32 %v7863_v35, %v7786_v14  ;;  %v2155_v3 = vsel %vm2044_vm8, %v2119_v5, 0.0 }
 0x1fd   : > { %v7846_v22 = vadd.f32 %v1946_v13, %v1750_v20  ;;  %v2118_v13 = vmul.f32 %v7899_v56, %v7899_v56  ;;  %v2148_v20 = vadd.f32 %v2147_v58, %v2146_v46  ;;  %v2049_v47 = vadd.f32 %v2048_v59, %v2047_v4 }
 0x1fe   : > { %v2120_v2 = vmul.f32 %v7922_v15, %v7922_v15  ;;  %v2058_v5 = vsel %vm2044_vm8, %v7935_v38, 0.0 }
 0x1ff   : > { %v2150_v59 = vadd.f32 %v2149_v6, %v2148_v20  ;;  %v2051_v46 = vadd.f32 %v2050_v55, %v2049_v47  ;;  %v2153_v19 = vsel %vm2044_vm8, %v2118_v13, 0.0  ;;  %v1987_v6 = vadd.f32 %v7801_v30, %v1727_v18 }
 0x200   : > { %v2056_v55 = vsel %vm2044_vm8, %v7922_v15, 0.0  ;;  %v2121_v13 = vmul.f32 %v7935_v38, %v7935_v38  ;;  %v7958_v20 = vadd.f32 %v7863_v35, %v1985_v63  ;;  %v1732_v47 = vadd.f32 %v7805_v32, %v7814_v43 }
 0x201   : > { %v7848_v23 = vpop.f32.mrf.mxu2  ;;  %v2152_v1 = vadd.f32 %v2151_v50, %v2150_v59  ;;  %v2053_v17 = vadd.f32 %v2052_v29, %v2051_v46  ;;  %v2157_v50 = vsel %vm2044_vm8, %v2120_v2, 0.0  ;;  %v2122_v30 = vmul.f32 %v7949_v8, %v7949_v8 }
 0x202   : > { %v7850_v24 = vpop.f32.mrf.mxu0  ;;  %v7852_v25 = vpop.f32.mrf.mxu1  ;;  %v7969_v18 = vadd.f32 %v7863_v35, %v7797_v26  ;;  %v7972_v59 = vadd.f32 %v7863_v35, %v1987_v6  ;;  %v2159_v32 = vsel %vm2044_vm8, %v2121_v13, 0.0  ;;  %v2060_v43 = vsel %vm2044_vm8, %v7949_v8, 0.0 }
 0x203   : > { %v2154_v14 = vadd.f32 %v2153_v19, %v2152_v1  ;;  %v2055_v57 = vadd.f32 %v2054_v31, %v2053_v17  ;;  %v1737_v1 = vadd.f32 %v7816_v44, %v7824_v53  ;;  %v2123_v46 = vmul.f32 %v7958_v20, %v7958_v20 }
 0x204   : > { %v1989_v19 = vadd.f32 %v7812_v42, %v1732_v47  ;;  %v2161_v44 = vsel %vm2044_vm8, %v2122_v30, 0.0  ;;  %v2062_v53 = vsel %vm2044_vm8, %v7958_v20, 0.0  ;;  %v7995_v6 = vadd.f32 %v7863_v35, %v7808_v39 }
 0x205   : > { %v2156_v29 = vadd.f32 %v2155_v3, %v2154_v14  ;;  %v2057_v63 = vadd.f32 %v2056_v55, %v2055_v57  ;;  %v2124_v3 = vmul.f32 %v7969_v18, %v7969_v18  ;;  %v2125_v13 = vmul.f32 %v7972_v59, %v7972_v59 }
 0x206   : > { %v1991_v47 = vadd.f32 %v7822_v52, %v1737_v1  ;;  %v2163_v14 = vsel %vm2044_vm8, %v2123_v46, 0.0  ;;  %v1742_v30 = vadd.f32 %v7826_v54, %v7832_v62  ;;  %v2126_v52 = vmul.f32 %v7995_v6, %v7995_v6 }
 0x207   : > { %v2158_v31 = vadd.f32 %v2157_v50, %v2156_v29  ;;  %v2059_v57 = vadd.f32 %v2058_v5, %v2057_v63  ;;  %v2064_v50 = vsel %vm2044_vm8, %v7969_v18, 0.0  ;;  %v8004_v5 = vadd.f32 %v7863_v35, %v1989_v19 }
 0x208   : > { %v2165_v63 = vsel %vm2044_vm8, %v2124_v3, 0.0  ;;  %v8015_v1 = vadd.f32 %v7863_v35, %v7819_v51  ;;  %v2167_v19 = vsel %vm2044_vm8, %v2125_v13, 0.0  ;;  %v8019_v54 = vadd.f32 %v7863_v35, %v1991_v47 }
 0x209   : > { %v7854_v27 = vpop.f32.mrf.mxu2  ;;  %v2160_v42 = vadd.f32 %v2159_v32, %v2158_v31  ;;  %v2061_v55 = vadd.f32 %v2060_v43, %v2059_v57  ;;  %v2066_v32 = vsel %vm2044_vm8, %v7972_v59, 0.0  ;;  %v2068_v62 = vsel %vm2044_vm8, %v7995_v6, 0.0 }
 0x20a   : > { %v7856_v28 = vpop.f32.mrf.mxu0  ;;  %v7858_v33 = vpop.f32.mrf.mxu1  ;;  %v2127_v31 = vmul.f32 %v8004_v5, %v8004_v5  ;;  %v1993_v57 = vadd.f32 %v7830_v61, %v1742_v30  ;;  %v2169_v13 = vsel %vm2044_vm8, %v2126_v52, 0.0  ;;  %v2070_v47 = vsel %vm2044_vm8, %v8004_v5, 0.0 }
 0x20b   : > { %v2162_v39 = vadd.f32 %v2161_v44, %v2160_v42  ;;  %v2063_v29 = vadd.f32 %v2062_v53, %v2061_v55  ;;  %v1747_v44 = vadd.f32 %v7834_v0, %v7840_v10  ;;  %v8032_v42 = vadd.f32 %v7863_v35, %v7828_v60 }
 0x20c   : > { %v2128_v61 = vmul.f32 %v8015_v1, %v8015_v1  ;;  %v2129_v0 = vmul.f32 %v8019_v54, %v8019_v54  ;;  %v1752_v10 = vadd.f32 %v7842_v11, %v7850_v24  ;;  %v2171_v60 = vsel %vm2044_vm8, %v2127_v31, 0.0 }
 0x20d   : > { %v2164_v43 = vadd.f32 %v2163_v14, %v2162_v39  ;;  %v2065_v46 = vadd.f32 %v2064_v50, %v2063_v29  ;;  %v2072_v39 = vsel %vm2044_vm8, %v8015_v1, 0.0  ;;  %v8049_v29 = vadd.f32 %v7863_v35, %v1993_v57 }
 0x20e   : > { %v2074_v11 = vsel %vm2044_vm8, %v8019_v54, 0.0  ;;  %v8059_v24 = vadd.f32 %v7863_v35, %v7836_v7  ;;  %v1997_v57 = vadd.f32 %v7848_v23, %v1752_v10 }
 0x20f   : > { %v2166_v53 = vadd.f32 %v2165_v63, %v2164_v43  ;;  %v2067_v3 = vadd.f32 %v2066_v32, %v2065_v46  ;;  %v1995_v63 = vadd.f32 %v7838_v9, %v1747_v44  ;;  %v2130_v43 = vmul.f32 %v8032_v42, %v8032_v42 }
 0x210   : > { %v2173_v46 = vsel %vm2044_vm8, %v2128_v61, 0.0  ;;  %v2175_v9 = vsel %vm2044_vm8, %v2129_v0, 0.0  ;;  %v2076_v44 = vsel %vm2044_vm8, %v8032_v42, 0.0  ;;  %v8083_v0 = vadd.f32 %v7863_v35, %v7846_v22 }
 0x211   : > { %v7860_v34 = vpop.f32.mrf.mxu2  ;;  %v2168_v14 = vadd.f32 %v2167_v19, %v2166_v53  ;;  %v2069_v50 = vadd.f32 %v2068_v62, %v2067_v3  ;;  %v1755_v19 = vadd.f32 %v7844_v16, %v7856_v28  ;;  %v2131_v53 = vmul.f32 %v8049_v29, %v8049_v29 }
 0x212   : > { %v7865_v36 = vpop.f32.mrf.mxu0  ;;  %v7875_v41 = vpop.f32.mrf.mxu1  ;;  %v8070_v3 = vadd.f32 %v7863_v35, %v1995_v63 }
 0x213   : > { %v2170_v32 = vadd.f32 %v2169_v13, %v2168_v14  ;;  %v2071_v52 = vadd.f32 %v2070_v47, %v2069_v50  ;;  %v1757_v7 = vadd.f32 %v7852_v25, %v7865_v36  ;;  %v2177_v47 = vsel %vm2044_vm8, %v2130_v43, 0.0 }
 0x214   : > { %v2078_v14 = vsel %vm2044_vm8, %v8049_v29, 0.0  ;;  %v2132_v50 = vmul.f32 %v8059_v24, %v8059_v24  ;;  %v1998_v25 = vadd.f32 %v7854_v27, %v1755_v19  ;;  %v2133_v63 = vmul.f32 %v8070_v3, %v8070_v3 }
 0x215   : > { %v2172_v62 = vadd.f32 %v2171_v60, %v2170_v32  ;;  %v2073_v31 = vadd.f32 %v2072_v39, %v2071_v52  ;;  %v8087_v60 = vadd.f32 %v7863_v35, %v1997_v57  ;;  %v2080_v39 = vsel %vm2044_vm8, %v8059_v24, 0.0 }
 0x216   : > { %v1999_v22 = vadd.f32 %v7860_v34, %v1757_v7  ;;  %v8106_v19 = vadd.f32 %v7863_v35, %v1998_v25 }
 0x217   : > { %v2174_v16 = vadd.f32 %v2173_v46, %v2172_v62  ;;  %v2075_v28 = vadd.f32 %v2074_v11, %v2073_v31  ;;  %v2134_v11 = vmul.f32 %v8083_v0, %v8083_v0 }
 0x219   : > { %v7887_v21 = vpop.f32.mrf.mxu2  ;;  %v2176_v36 = vadd.f32 %v2175_v9, %v2174_v16  ;;  %v2077_v10 = vadd.f32 %v2076_v44, %v2075_v28  ;;  %v8115_v9 = vadd.f32 %v7863_v35, %v1999_v22 }
 0x21a   : > { %v7891_v49 = vpop.f32.mrf.mxu0  ;;  %v7928_v12 = vpop.f32.mrf.mxu1 }
 0x21b   : > { %v1760_v23 = vadd.f32 %v7858_v33, %v7891_v49  ;;  %v2179_v49 = vsel %vm2044_vm8, %v2131_v53, 0.0  ;;  %v2178_v32 = vadd.f32 %v2177_v47, %v2176_v36  ;;  %v2079_v27 = vadd.f32 %v2078_v14, %v2077_v10 }
 0x21c   : > { %v2136_v14 = vmul.f32 %v8106_v19, %v8106_v19  ;;  %v2137_v10 = vmul.f32 %v8115_v9, %v8115_v9 }
 0x21d   : > { %v2000_v52 = vadd.f32 %v7887_v21, %v1760_v23  ;;  %v2180_v34 = vadd.f32 %v2179_v49, %v2178_v32  ;;  %v2081_v62 = vadd.f32 %v2080_v39, %v2079_v27  ;;  %v2135_v21 = vmul.f32 %v8087_v60, %v8087_v60 }
 0x21e   : > { %v2086_v23 = vsel %vm2044_vm8, %v8087_v60, 0.0  ;;  %v2189_v22 = vsel %vm2044_vm8, %v2136_v14, 0.0  ;;  %v2090_v32 = vsel %vm2044_vm8, %v8115_v9, 0.0 }
 0x21f   : > { %v8119_v16 = vadd.f32 %v7863_v35, %v2000_v52  ;;  %v2187_v25 = vsel %vm2044_vm8, %v2135_v21, 0.0 }
 0x221   : > { %v7938_v58 = vpop.f32.mrf.mxu2 }
 0x222   : > { %v7940_v4 = vpop.f32.mrf.mxu0  ;;  %v7984_v2 = vpop.f32.mrf.mxu1 }
 0x223   : > { %v1762_v33 = vadd.f32 %v7875_v41, %v7940_v4  ;;  %v2181_v41 = vsel %vm2044_vm8, %v2132_v50, 0.0  ;;  %v2082_v4 = vsel %vm2044_vm8, %v8070_v3, 0.0 }
 0x224   : > { %v2182_v53 = vadd.f32 %v2181_v41, %v2180_v34  ;;  %v2083_v7 = vadd.f32 %v2082_v4, %v2081_v62  ;;  %v2191_v41 = vsel %vm2044_vm8, %v2137_v10, 0.0  ;;  %v2092_v4 = vsel %vm2044_vm8, %v8119_v16, 0.0 }
 0x225   : > { %v2001_v31 = vadd.f32 %v7938_v58, %v1762_v33  ;;  %v2185_v58 = vsel %vm2044_vm8, %v2134_v11, 0.0 }
 0x227   : > { %v8130_v36 = vadd.f32 %v7863_v35, %v2001_v31 }
 0x229   : > { %v7982_v26 = vpop.f32.mrf.mxu2 }
 0x22a   : > { %v7986_v17 = vpop.f32.mrf.mxu0  ;;  %v8043_v30 = vpop.f32.mrf.mxu1 }
 0x22b   : > { %v1765_v43 = vadd.f32 %v7928_v12, %v7986_v17  ;;  %v2183_v12 = vsel %vm2044_vm8, %v2133_v63, 0.0  ;;  %v2084_v17 = vsel %vm2044_vm8, %v8083_v0, 0.0 }
 0x22d   : > { %v2002_v28 = vadd.f32 %v7982_v26, %v1765_v43  ;;  %v2088_v26 = vsel %vm2044_vm8, %v8106_v19, 0.0 }
 0x231   : > { %v8028_v51 = vpop.f32.mrf.mxu2 }
 0x232   : > { %v1621_v55 = vpop.f32.mrf.mxu0  ;;  %v1771_v46 = vpop.f32.mrf.mxu1 }
 0x233   : > { %v1767_v57 = vadd.f32 %v7984_v2, %v1621_v55  ;;  %v2184_v2 = vadd.f32 %v2183_v12, %v2182_v53  ;;  %v2085_v55 = vadd.f32 %v2084_v17, %v2083_v7  ;;  %v2094_v53 = vsel %vm2044_vm8, %v8130_v36, 0.0 }
 0x235   : > { %v2003_v33 = vadd.f32 %v8028_v51, %v1767_v57  ;;  %v2186_v39 = vadd.f32 %v2185_v58, %v2184_v2  ;;  %v2087_v63 = vadd.f32 %v2086_v23, %v2085_v55  ;;  %v2139_v51 = vmul.f32 %v8130_v36, %v8130_v36  ;;  %v6749_v57 = vld [vmem:[%s7304_s29 + $0x20] sm:$0xf] }
 0x237   : > { %v2188_v52 = vadd.f32 %v2187_v25, %v2186_v39  ;;  %v2089_v43 = vadd.f32 %v2088_v26, %v2087_v63  ;;  %v8151_v11 = vadd.f32 %v7863_v35, %v2003_v33  ;;  %v2195_v23 = vsel %vm2044_vm8, %v2139_v51, 0.0 }
 0x239   : > { %v1966_v13 = vpop.f32.mrf.mxu2  ;;  %v2190_v62 = vadd.f32 %v2189_v22, %v2188_v52  ;;  %v2091_v21 = vadd.f32 %v2090_v32, %v2089_v43 }
 0x23a   : > { %v1624_v61 = vpop.f32.mrf.mxu0 }
 0x23b   : > { %v1770_v50 = vadd.f32 %v8043_v30, %v1624_v61  ;;  %v2138_v30 = vmul.f32 %v8119_v16, %v8119_v16  ;;  %v8140_v61 = vadd.f32 %v7863_v35, %v2002_v28  ;;  %v2192_v58 = vadd.f32 %v2191_v41, %v2190_v62 }
 0x23d   : > { %v2004_v27 = vadd.f32 %v1966_v13, %v1770_v50  ;;  %v2193_v31 = vsel %vm2044_vm8, %v2138_v30, 0.0  ;;  %v2140_v13 = vmul.f32 %v8140_v61, %v8140_v61  ;;  %v2096_v14 = vsel %vm2044_vm8, %v8140_v61, 0.0 }
 0x23e   : > { %v2141_v50 = vmul.f32 %v8151_v11, %v8151_v11  ;;  %v2194_v26 = vadd.f32 %v2193_v31, %v2192_v58 }
 0x23f   : > { %v8160_v7 = vadd.f32 %v7863_v35, %v2004_v27  ;;  %v2197_v33 = vsel %vm2044_vm8, %v2140_v13, 0.0 }
 0x240   : > { %v2196_v22 = vadd.f32 %v2195_v23, %v2194_v26  ;;  %v2199_v27 = vsel %vm2044_vm8, %v2141_v50, 0.0 }
 0x241   : > { %v1968_v44 = vpop.f32.mrf.mxu2  ;;  %v2142_v39 = vmul.f32 %v8160_v7, %v8160_v7  ;;  %v2100_v52 = vsel %vm2044_vm8, %v8160_v7, 0.0 }
 0x242   : > { %v1626_v47 = vpop.f32.mrf.mxu0  ;;  %v2198_v51 = vadd.f32 %v2197_v33, %v2196_v22 }
 0x243   : > { %v1772_v49 = vadd.f32 %v1771_v46, %v1626_v47  ;;  %v1774_v46 = vpop.f32.mrf.mxu1  ;;  %v3209_v47 = vunpack.c.l.b16 %v6749_v57 }
 0x244   : > { %v2200_v13 = vadd.f32 %v2199_v27, %v2198_v51 }
 0x245   : > { %v2005_v34 = vadd.f32 %v1968_v44, %v1772_v49  ;;  %v2093_v44 = vadd.f32 %v2092_v4, %v2091_v21  ;;  %v3211_v25 = vpack.c.b16 %v3209_v47, %v3209_v47  ;;  %v2098_v49 = vsel %vm2044_vm8, %v8151_v11, 0.0 }
 0x247   : > { %v8168_v2 = vadd.f32 %v7863_v35, %v2005_v34  ;;  %v2095_v10 = vadd.f32 %v2094_v53, %v2093_v44  ;;  %v3262_v30 = vsel %vm2909_vm9, %v3211_v25, 0  ;;  %v2201_v34 = vsel %vm2044_vm8, %v2142_v39, 0.0 }
 0x248   : > { %3270 = vmatpush.bf16.msrb.mxu1 %v3262_v30  ;;  %v2202_v47 = vadd.f32 %v2201_v34, %v2200_v13 }
 0x249   : > { %v1971_v12 = vpop.f32.mrf.mxu2  ;;  %v2097_v32 = vadd.f32 %v2096_v14, %v2095_v10  ;;  %v2143_v43 = vmul.f32 %v8168_v2, %v8168_v2  ;;  %v2102_v62 = vsel %vm2044_vm8, %v8168_v2, 0.0 }
 0x24a   : > { %v1629_v17 = vpop.f32.mrf.mxu0 }
 0x24b   : > { %v1775_v28 = vadd.f32 %v1774_v46, %v1629_v17  ;;  %v2099_v46 = vadd.f32 %v2098_v49, %v2097_v32  ;;  %v1776_v41 = vpop.f32.mrf.mxu1  ;;  %v2203_v57 = vsel %vm2044_vm8, %v2143_v43, 0.0 }
 0x24c   : > { %v2204_v14 = vadd.f32 %v2203_v57, %v2202_v47  ;;  %v9707_v47 = vmov 0.0  }
 0x24d   : > { %v2006_v55 = vadd.f32 %v1971_v12, %v1775_v28  ;;  %v2101_v12 = vadd.f32 %v2100_v52, %v2099_v46  ;;  %2407 = vst.msk [vmem:[#allocation3 + $0x1f] sm:$0x1] %vm2387_vm10, %v9707_v47 }
 0x24e   : > { %2389 = vst.msk [vmem:[#allocation3 + $0x10] sm:$0x1] %vm2387_vm10, %v9707_v47 }
 0x24f   : > { %v8176_v63 = vadd.f32 %v7863_v35, %v2006_v55  ;;  %v2103_v58 = vadd.f32 %v2102_v62, %v2101_v12  ;;  %2390 = vst.msk [vmem:[#allocation3 + $0x20] sm:$0x1] %vm2387_vm10, %v9707_v47 }
 0x250   : > { %2391 = vst.msk [vmem:[#allocation3 + $0x30] sm:$0x1] %vm2387_vm10, %v9707_v47 }
 0x251   : > { %v2144_v21 = vmul.f32 %v8176_v63, %v8176_v63  ;;  %v1973_v17 = vpop.f32.mrf.mxu2  ;;  %v2104_v53 = vsel %vm2044_vm8, %v8176_v63, 0.0  ;;  %2392 = vst.msk [vmem:[#allocation3 + $0x40] sm:$0x1] %vm2387_vm10, %v9707_v47 }
 0x252   : > { %v1631_v4 = vpop.f32.mrf.mxu0  ;;  %v2105_v50 = vadd.f32 %v2104_v53, %v2103_v58  ;;  %v7116_v53 = vld [vmem:[%s7304_s29 + $0x18] sm:$0xff]  ;;  %2393 = vst.msk [vmem:[#allocation3 + $0x50] sm:$0x1] %vm2387_vm10, %v9707_v47 }
 0x253   : > { %v1777_v31 = vadd.f32 %v1776_v41, %v1631_v4  ;;  %v2205_v44 = vsel %vm2044_vm8, %v2144_v21, 0.0  ;;  %3271 = vmatpush.bf16.msrb.mxu1 %v7116_v53  ;;  %2394 = vst.msk [vmem:[#allocation3 + $0x60] sm:$0x1] %vm2387_vm10, %v9707_v47 }
 0x254   : > { %v2206_v10 = vadd.f32 %v2205_v44, %v2204_v14  ;;  %2395 = vst.msk [vmem:[#allocation3 + $0x70] sm:$0x1] %vm2387_vm10, %v9707_v47 }
 0x255   : > { %v2007_v28 = vadd.f32 %v1973_v17, %v1777_v31  ;;  %2396 = vst.msk [vmem:[#allocation3 + $0x80] sm:$0x1] %vm2387_vm10, %v9707_v47 }
 0x256   : > { %2397 = vst.msk [vmem:[#allocation3 + $0x90] sm:$0x1] %vm2387_vm10, %v9707_v47 }
 0x257   : > { %v8194_v23 = vadd.f32 %v7863_v35, %v2007_v28  ;;  %2398 = vst.msk [vmem:[#allocation3 + $0xa0] sm:$0x1] %vm2387_vm10, %v9707_v47 }
 0x258   : > { %2399 = vst.msk [vmem:[#allocation3 + $0xb0] sm:$0x1] %vm2387_vm10, %v9707_v47 }
 0x259   : > { %v2106_v55 = vsel %vm2044_vm8, %v8194_v23, 0.0  ;;  %v2145_v25 = vmul.f32 %v8194_v23, %v8194_v23  ;;  %2400 = vst.msk [vmem:[#allocation3 + $0xc0] sm:$0x1] %vm2387_vm10, %v9707_v47 }
 0x25a   : > { %v2107_v26 = vadd.f32 %v2106_v55, %v2105_v50  ;;  %v2276_v50 = vld [vmem:[%s7294_s21] sm:$0x1]  ;;  %2401 = vst.msk [vmem:[#allocation3 + $0xd0] sm:$0x1] %vm2387_vm10, %v9707_v47 }
 0x25b   : > { %v2207_v33 = vsel %vm2044_vm8, %v2145_v25, 0.0  ;;  %2402 = vst.msk [vmem:[#allocation3 + $0xe0] sm:$0x1] %vm2387_vm10, %v9707_v47 }
 0x25c   : > { %v2108_v49 = vrot.slane %v2107_v26, 4  ;;  %v2208_v39 = vadd.f32 %v2207_v33, %v2206_v10  ;;  %2403 = vst.msk [vmem:[#allocation3 + $0xf0] sm:$0x1] %vm2387_vm10, %v9707_v47 }
 0x25d   : > { %2404 = vst.msk [vmem:[#allocation3 + $0x100] sm:$0x1] %vm2387_vm10, %v9707_v47 }
 0x25e   : > { %v2109_v30 = vadd.f32 %v2108_v49, %v2107_v26  ;;  %v2209_v22 = vrot.slane %v2208_v39, 4  ;;  %v2278_v26 = vld [vmem:[%s7299_s25] sm:$0x1]  ;;  %2408 = vst.msk [vmem:[#allocation3 + $0x2f] sm:$0x1] %vm2387_vm10, %v9707_v47 }
 0x25f   : > { %2409 = vst.msk [vmem:[#allocation3 + $0x3f] sm:$0x1] %vm2387_vm10, %v9707_v47 }
 0x260   : > { %v2110_v32 = vrot.slane %v2109_v30, 2  ;;  %v2210_v27 = vadd.f32 %v2209_v22, %v2208_v39  ;;  %2410 = vst.msk [vmem:[#allocation3 + $0x4f] sm:$0x1] %vm2387_vm10, %v9707_v47 }
 0x261   : > { %2411 = vst.msk [vmem:[#allocation3 + $0x5f] sm:$0x1] %vm2387_vm10, %v9707_v47 }
 0x262   : > { %v2111_v35 = vadd.f32 %v2110_v32, %v2109_v30  ;;  %v2211_v52 = vrot.slane %v2210_v27, 2  ;;  %2412 = vst.msk [vmem:[#allocation3 + $0x6f] sm:$0x1] %vm2387_vm10, %v9707_v47 }
 0x263   : > { %2413 = vst.msk [vmem:[#allocation3 + $0x7f] sm:$0x1] %vm2387_vm10, %v9707_v47 }
 0x264   : > { %v2112_v43 = vrot.slane %v2111_v35, 1  ;;  %v2212_v51 = vadd.f32 %v2211_v52, %v2210_v27  ;;  %2414 = vst.msk [vmem:[#allocation3 + $0x8f] sm:$0x1] %vm2387_vm10, %v9707_v47 }
 0x265   : > { %2415 = vst.msk [vmem:[#allocation3 + $0x9f] sm:$0x1] %vm2387_vm10, %v9707_v47 }
 0x266   : > { %v2113_v46 = vadd.f32 %v2112_v43, %v2111_v35  ;;  %v2213_v41 = vrot.slane %v2212_v51, 1  ;;  %2416 = vst.msk [vmem:[#allocation3 + $0xaf] sm:$0x1] %vm2387_vm10, %v9707_v47 }
 0x267   : > { %2417 = vst.msk [vmem:[#allocation3 + $0xbf] sm:$0x1] %vm2387_vm10, %v9707_v47 }
 0x268   : > { %6702 = vmatmul.msk.f32.vlgmr.msrb.gmra.mxu0 %vm2044_vm8, %v2113_v46  ;;  %v2214_v4 = vadd.f32 %v2213_v41, %v2212_v51  ;;  %2418 = vst.msk [vmem:[#allocation3 + $0xcf] sm:$0x1] %vm2387_vm10, %v9707_v47 }
 0x269   : > { %2419 = vst.msk [vmem:[#allocation3 + $0xdf] sm:$0x1] %vm2387_vm10, %v9707_v47 }
 0x26a   : > { %6703 = vmatmul.msk.f32.vlgmr.msra.gmra.mxu3 %vm2044_vm8, %v2214_v4  ;;  %2420 = vst.msk [vmem:[#allocation3 + $0xef] sm:$0x1] %vm2387_vm10, %v9707_v47 }
 0x26b   : > { %2421 = vst.msk [vmem:[#allocation3 + $0xff] sm:$0x1] %vm2387_vm10, %v9707_v47 }
 0x26c   : > { %2422 = vst.msk [vmem:[#allocation3 + $0x10f] sm:$0x1] %vm2387_vm10, %v9707_v47 }
 0x26d   : > { %3841 = vst.msk [vmem:[#allocation4 + $0x8] sm:$0x1] %vm2387_vm10, %v9707_v47 }
 0x26e   : > { %3842 = vst.msk [vmem:[#allocation4 + $0x10] sm:$0x1] %vm2387_vm10, %v9707_v47 }
 0x26f   : > { %3843 = vst.msk [vmem:[#allocation4 + $0x18] sm:$0x1] %vm2387_vm10, %v9707_v47 }
 0x270   : > { %3844 = vst.msk [vmem:[#allocation4 + $0x20] sm:$0x1] %vm2387_vm10, %v9707_v47 }
 0x271   : > { %3845 = vst.msk [vmem:[#allocation4 + $0x28] sm:$0x1] %vm2387_vm10, %v9707_v47 }
 0x272   : > { %3846 = vst.msk [vmem:[#allocation4 + $0x30] sm:$0x1] %vm2387_vm10, %v9707_v47 }
 0x273   : > { %3847 = vst.msk [vmem:[#allocation4 + $0x38] sm:$0x1] %vm2387_vm10, %v9707_v47 }
 0x274   : > { %3848 = vst.msk [vmem:[#allocation4 + $0x40] sm:$0x1] %vm2387_vm10, %v9707_v47 }
 0x275   : > { %3851 = vst.msk [vmem:[#allocation4 + $0xf] sm:$0x1] %vm2387_vm10, %v9707_v47 }
 0x276   : > { %3852 = vst.msk [vmem:[#allocation4 + $0x17] sm:$0x1] %vm2387_vm10, %v9707_v47 }
 0x277   : > { %3853 = vst.msk [vmem:[#allocation4 + $0x1f] sm:$0x1] %vm2387_vm10, %v9707_v47 }
 0x278   : > { %3854 = vst.msk [vmem:[#allocation4 + $0x27] sm:$0x1] %vm2387_vm10, %v9707_v47 }
 0x279   : > { %3855 = vst.msk [vmem:[#allocation4 + $0x2f] sm:$0x1] %vm2387_vm10, %v9707_v47 }
 0x27a   : > { %3856 = vst.msk [vmem:[#allocation4 + $0x37] sm:$0x1] %vm2387_vm10, %v9707_v47 }
 0x27b   : > { %3857 = vst.msk [vmem:[#allocation4 + $0x3f] sm:$0x1] %vm2387_vm10, %v9707_v47 }
 0x27c   : > { %3858 = vst.msk [vmem:[#allocation4 + $0x47] sm:$0x1] %vm2387_vm10, %v9707_v47 }
 0x27d   : > { %4556 = vst.msk [vmem:[#allocation5 + $0x8] sm:$0x1] %vm2387_vm10, %v9707_v47 }
 0x27e   : > { %4557 = vst.msk [vmem:[#allocation5 + $0x10] sm:$0x1] %vm2387_vm10, %v9707_v47 }
 0x27f   : > { %4558 = vst.msk [vmem:[#allocation5 + $0x18] sm:$0x1] %vm2387_vm10, %v9707_v47 }
 0x280   : > { %4559 = vst.msk [vmem:[#allocation5 + $0x20] sm:$0x1] %vm2387_vm10, %v9707_v47 }
 0x281   : > { %4560 = vst.msk [vmem:[#allocation5 + $0x28] sm:$0x1] %vm2387_vm10, %v9707_v47 }
 0x282   : > { %4561 = vst.msk [vmem:[#allocation5 + $0x30] sm:$0x1] %vm2387_vm10, %v9707_v47 }
 0x283   : > { %4562 = vst.msk [vmem:[#allocation5 + $0x38] sm:$0x1] %vm2387_vm10, %v9707_v47 }
 0x284   : > { %4563 = vst.msk [vmem:[#allocation5 + $0x40] sm:$0x1] %vm2387_vm10, %v9707_v47 }
 0x285   : > { %4566 = vst.msk [vmem:[#allocation5 + $0xf] sm:$0x1] %vm2387_vm10, %v9707_v47 }
 0x286   : > { %4567 = vst.msk [vmem:[#allocation5 + $0x17] sm:$0x1] %vm2387_vm10, %v9707_v47 }
 0x287   : > { %4568 = vst.msk [vmem:[#allocation5 + $0x1f] sm:$0x1] %vm2387_vm10, %v9707_v47 }
 0x288   : > { %4569 = vst.msk [vmem:[#allocation5 + $0x27] sm:$0x1] %vm2387_vm10, %v9707_v47 }
 0x289   : > { %4570 = vst.msk [vmem:[#allocation5 + $0x2f] sm:$0x1] %vm2387_vm10, %v9707_v47 }
 0x28a   : > { %4571 = vst.msk [vmem:[#allocation5 + $0x37] sm:$0x1] %vm2387_vm10, %v9707_v47 }
 0x28b   : > { %4572 = vst.msk [vmem:[#allocation5 + $0x3f] sm:$0x1] %vm2387_vm10, %v9707_v47 }
 0x28c   : > { %4573 = vst.msk [vmem:[#allocation5 + $0x47] sm:$0x1] %vm2387_vm10, %v9707_v47 }
 0x28d   : > { %4895 = vst.msk [vmem:[#allocation6 + $0x8] sm:$0x1] %vm2387_vm10, %v9707_v47 }
 0x28e   : > { %4896 = vst.msk [vmem:[#allocation6 + $0x10] sm:$0x1] %vm2387_vm10, %v9707_v47 }
 0x28f   : > { %4897 = vst.msk [vmem:[#allocation6 + $0x18] sm:$0x1] %vm2387_vm10, %v9707_v47 }
 0x290   : > { %4898 = vst.msk [vmem:[#allocation6 + $0x20] sm:$0x1] %vm2387_vm10, %v9707_v47 }
 0x291   : > { %4899 = vst.msk [vmem:[#allocation6 + $0x28] sm:$0x1] %vm2387_vm10, %v9707_v47 }
 0x292   : > { %4900 = vst.msk [vmem:[#allocation6 + $0x30] sm:$0x1] %vm2387_vm10, %v9707_v47 }
 0x293   : > { %4901 = vst.msk [vmem:[#allocation6 + $0x38] sm:$0x1] %vm2387_vm10, %v9707_v47 }
 0x294   : > { %4902 = vst.msk [vmem:[#allocation6 + $0x40] sm:$0x1] %vm2387_vm10, %v9707_v47 }
 0x295   : > { %4905 = vst.msk [vmem:[#allocation6 + $0xf] sm:$0x1] %vm2387_vm10, %v9707_v47 }
 0x296   : > { %4906 = vst.msk [vmem:[#allocation6 + $0x17] sm:$0x1] %vm2387_vm10, %v9707_v47 }
 0x297   : > { %4907 = vst.msk [vmem:[#allocation6 + $0x1f] sm:$0x1] %vm2387_vm10, %v9707_v47 }
 0x298   : > { %4908 = vst.msk [vmem:[#allocation6 + $0x27] sm:$0x1] %vm2387_vm10, %v9707_v47 }
 0x299   : > { %4909 = vst.msk [vmem:[#allocation6 + $0x2f] sm:$0x1] %vm2387_vm10, %v9707_v47 }
 0x29a   : > { %4910 = vst.msk [vmem:[#allocation6 + $0x37] sm:$0x1] %vm2387_vm10, %v9707_v47 }
 0x29b   : > { %4911 = vst.msk [vmem:[#allocation6 + $0x3f] sm:$0x1] %vm2387_vm10, %v9707_v47 }
 0x29c   : > { %4912 = vst.msk [vmem:[#allocation6 + $0x47] sm:$0x1] %vm2387_vm10, %v9707_v47 }
 0x29d   : > { %2382 = vst.msk [vmem:[#allocation3] sm:$0xff] %vm2381_vm15, %v9707_v47 }
 0x29e   : > { %2383 = vst.msk [vmem:[#allocation3 + $0x8] sm:$0xff] %vm2381_vm15, %v9707_v47 }
 0x29f   : > { %2388 = vst.msk [vmem:[#allocation3] sm:$0x1] %vm2387_vm10, %v9707_v47 }
 0x2a0   : > { %2406 = vst.msk [vmem:[#allocation3 + $0xf] sm:$0x1] %vm2387_vm10, %v9707_v47 }
 0x2a1   : > { %2385 = vst.msk [vmem:[#allocation3 + $0x110] sm:$0xff] %vm2381_vm15, %v9707_v47 }
 0x2a2   : > { %2386 = vst.msk [vmem:[#allocation3 + $0x118] sm:$0xff] %vm2381_vm15, %v9707_v47 }
 0x2a3   : > { %3837 = vst.msk [vmem:[#allocation4] sm:$0xff] %vm2381_vm15, %v9707_v47 }
 0x2a4   : > { %3839 = vst.msk [vmem:[#allocation4 + $0x48] sm:$0xff] %vm2381_vm15, %v9707_v47 }
 0x2a5   : > { %4552 = vst.msk [vmem:[#allocation5] sm:$0xff] %vm2381_vm15, %v9707_v47 }
 0x2a6   : > { %4554 = vst.msk [vmem:[#allocation5 + $0x48] sm:$0xff] %vm2381_vm15, %v9707_v47 }
 0x2a7   : > { %4891 = vst.msk [vmem:[#allocation6] sm:$0xff] %vm2381_vm15, %v9707_v47 }
 0x2a8   : > { %4893 = vst.msk [vmem:[#allocation6 + $0x48] sm:$0xff] %vm2381_vm15, %v9707_v47 }
 0x2a9   : > { %2405 = vst.msk [vmem:[#allocation3 + $0x110] sm:$0x1] %vm2387_vm10, %v9707_v47 }
 0x2aa   : > { %2423 = vst.msk [vmem:[#allocation3 + $0x11f] sm:$0x1] %vm2387_vm10, %v9707_v47 }
 0x2ab   : > { %3840 = vst.msk [vmem:[#allocation4] sm:$0x1] %vm2387_vm10, %v9707_v47 }
 0x2ac   : > { %3849 = vst.msk [vmem:[#allocation4 + $0x48] sm:$0x1] %vm2387_vm10, %v9707_v47 }
 0x2ad   : > { %3850 = vst.msk [vmem:[#allocation4 + $0x7] sm:$0x1] %vm2387_vm10, %v9707_v47 }
 0x2ae   : > { %3859 = vst.msk [vmem:[#allocation4 + $0x4f] sm:$0x1] %vm2387_vm10, %v9707_v47 }
 0x2af   : > { %4555 = vst.msk [vmem:[#allocation5] sm:$0x1] %vm2387_vm10, %v9707_v47 }
 0x2b0   : > { %4564 = vst.msk [vmem:[#allocation5 + $0x48] sm:$0x1] %vm2387_vm10, %v9707_v47 }
 0x2b1   : > { %4565 = vst.msk [vmem:[#allocation5 + $0x7] sm:$0x1] %vm2387_vm10, %v9707_v47 }
 0x2b2   : > { %4574 = vst.msk [vmem:[#allocation5 + $0x4f] sm:$0x1] %vm2387_vm10, %v9707_v47 }
 0x2b3   : > { %4894 = vst.msk [vmem:[#allocation6] sm:$0x1] %vm2387_vm10, %v9707_v47 }
 0x2b4   : > { %4903 = vst.msk [vmem:[#allocation6 + $0x48] sm:$0x1] %vm2387_vm10, %v9707_v47 }
 0x2b5   : > { %4904 = vst.msk [vmem:[#allocation6 + $0x7] sm:$0x1] %vm2387_vm10, %v9707_v47 }
 0x2b6   : > { %4913 = vst.msk [vmem:[#allocation6 + $0x4f] sm:$0x1] %vm2387_vm10, %v9707_v47  ;;  %vm3982_vm10 = vcmask 1046534  }
 0x2e5   : > { %v2236_v34 = vpop.f32.mrf.mxu0 }
 0x2e6   : > { %v2262_v62 = vmul.f32 %v2236_v34, %v2236_v34 }
 0x2ed   : > { %v2259_v21 = vpop.f32.mrf.mxu3 }
 0x2ee   : > { %v2263_v31 = vsub.f32 %v2259_v21, %v2262_v62 }
 0x2f0   : > { %v2264_v13 = vmax.f32 %v2263_v31, 0.0 }
 0x2f2   : > { %v2265_v12 = vadd.f32 1e-05, %v2264_v13 }
 0x2f4   : > { %7211 = vrsqrt.f32 %v2265_v12  ;;  %vm2272_vm12 = vweird.f32 %v2265_v12 }
 0x2fa   : > { %v7212_v17 = vpop.eup %7211 }
 0x2fb   : > { %v2267_v57 = vmul.f32 %v7212_v17, %v2265_v12  ;;  %vm2273_vm11 = vweird.f32 %v7212_v17 }
 0x2fc   : > { %vm2274_vm13 = vmor %vm2272_vm12, %vm2273_vm11  ;;  %vm4059_vm11 = vcmask 1047559   ;;  %vm4172_vm12 = vcmask 194688  }
 0x2fd   : > { %v2268_v28 = vmul.f32 %v7212_v17, %v2267_v57 }
 0x2ff   : > { %v2269_v58 = vmul.f32 0.5, %v2268_v28 }
 0x301   : > { %v2270_v44 = vsub.f32 1.5, %v2269_v58 }
 0x303   : > { %v2271_v14 = vmul.f32 %v7212_v17, %v2270_v44  ;;  %v9708_v44 = vld [vmem:[#allocation26_spill] sm:$0xff] }
 0x305   : > { %v2275_v55 = vsel %vm2274_vm13, %v7212_v17, %v2271_v14 }
 0x306   : > { %v2277_v25 = vmul.f32 %v2276_v50, %v2275_v55 }
 0x308   : > { %v2279_v10 = vmul.f32 %v2277_v25, %v2236_v34  ;;  %v8228_v33 = vperm.slane %v2277_v25, 0 }
 0x30a   : > { %v2280_v49 = vsub.f32 %v2278_v26, %v2279_v10  ;;  %v2283_v30 = vmul.f32 %v8228_v33, %v7869_v37  ;;  %v2282_v22 = vmul.f32 %v8228_v33, %v7873_v40  ;;  %v2284_v32 = vmul.f32 %v8228_v33, %v7879_v45 }
 0x30b   : > { %v2286_v27 = vmul.f32 %v8228_v33, %v7899_v56  ;;  %v2288_v35 = vmul.f32 %v8228_v33, %v7922_v15  ;;  %v2290_v56 = vmul.f32 %v8228_v33, %v7949_v8  ;;  %v2292_v41 = vmul.f32 %v8228_v33, %v7969_v18 }
 0x30c   : > { %v8238_v39 = vperm.slane %v2280_v49, 0  ;;  %v2294_v62 = vmul.f32 %v8228_v33, %v7995_v6  ;;  %v2285_v8 = vmul.f32 %v8228_v33, %v7885_v48  ;;  %v2296_v48 = vmul.f32 %v8228_v33, %v8015_v1 }
 0x30d   : > { %v2298_v53 = vmul.f32 %v8228_v33, %v8032_v42  ;;  %v2287_v14 = vmul.f32 %v8228_v33, %v9708_v44  ;;  %v2289_v25 = vmul.f32 %v8228_v33, %v7935_v38  ;;  %v2291_v10 = vmul.f32 %v8228_v33, %v7958_v20  ;;  %v2749_v44 = vld [vmem:[#allocation3] sm:$0xff] }
 0x30e   : > { %v2318_v37 = vadd.f32 %v8238_v39, %v2283_v30  ;;  %v2317_v52 = vadd.f32 %v8238_v39, %v2282_v22  ;;  %v2319_v40 = vadd.f32 %v8238_v39, %v2284_v32  ;;  %v2321_v45 = vadd.f32 %v8238_v39, %v2286_v27 }
 0x30f   : > { %v2323_v43 = vadd.f32 %v8238_v39, %v2288_v35  ;;  %v2325_v18 = vadd.f32 %v8238_v39, %v2290_v56  ;;  %v2327_v21 = vadd.f32 %v8238_v39, %v2292_v41  ;;  %v2329_v6 = vadd.f32 %v8238_v39, %v2294_v62  ;;  %v2799_v62 = vld [vmem:[%s7304_s29 + $0x8] sm:$0xf] }
 0x310   : > { %v2350_v15 = vmax.f32 %v2318_v37, 0.0  ;;  %v2349_v51 = vmax.f32 %v2317_v52, 0.0  ;;  %v2351_v46 = vmax.f32 %v2319_v40, 0.0  ;;  %v2353_v4 = vmax.f32 %v2321_v45, 0.0 }
 0x311   : > { %v8269_v34 = vmax.f32 %v2323_v43, 0.0  ;;  %v2320_v31 = vadd.f32 %v8238_v39, %v2285_v8  ;;  %v8287_v13 = vmax.f32 %v2325_v18, 0.0  ;;  %v8289_v12 = vmax.f32 %v2327_v21, 0.0 }
 0x312   : > { %2492 = vrot.lane.b32.xlu2 %v2350_v15, %s7261_s2  ;;  %2619 = vrot.lane.b32.xlu0 %v2349_v51, %s7263_s10  ;;  %2425 = vst.msk [vmem:[#allocation3 + $0x11] sm:$0xff] %vm2044_vm8, %v2349_v51  ;;  %v8295_v17 = vmax.f32 %v2329_v6, 0.0  ;;  %v2331_v57 = vadd.f32 %v8238_v39, %v2296_v48  ;;  %v2333_v58 = vadd.f32 %v8238_v39, %v2298_v53  ;;  %v3007_v21 = vunpack.c.l.b16 %v2799_v62 }
 0x313   : > { %2490 = vrot.lane.b32.xlu1 %v2349_v51, %s7261_s2  ;;  %2428 = vst.msk [vmem:[#allocation3 + $0x21] sm:$0xff] %vm2044_vm8, %v2351_v46  ;;  %v8304_v28 = vmax.f32 %v2320_v31, 0.0  ;;  %v2322_v50 = vadd.f32 %v8238_v39, %v2287_v14  ;;  %v2324_v26 = vadd.f32 %v8238_v39, %v2289_v25  ;;  %v2326_v49 = vadd.f32 %v8238_v39, %v2291_v10  ;;  %v7115_v10 = vld [vmem:[%s7304_s29 + $0xc] sm:$0xff] }
 0x314   : > { %2430 = vst.msk [vmem:[#allocation3 + $0x31] sm:$0xff] %vm2044_vm8, %v2353_v4  ;;  %v8308_v1 = vmax.f32 %v2331_v57, 0.0  ;;  %v8317_v42 = vmax.f32 %v2333_v58, 0.0  ;;  %v2293_v30 = vmul.f32 %v8228_v33, %v7972_v59  ;;  %v2295_v32 = vmul.f32 %v8228_v33, %v8004_v5 }
 0x315   : > { %2432 = vst.msk [vmem:[#allocation3 + $0x41] sm:$0xff] %vm2044_vm8, %v8269_v34  ;;  %v8353_v55 = vmax.f32 %v2322_v50, 0.0  ;;  %v8379_v38 = vmax.f32 %v2324_v26, 0.0  ;;  %v8406_v20 = vmax.f32 %v2326_v49, 0.0  ;;  %v2297_v35 = vmul.f32 %v8228_v33, %v8019_v54  ;;  %v2750_v50 = vld [vmem:[#allocation3 + $0x8] sm:$0xff] }
 0x316   : > { %2434 = vst.msk [vmem:[#allocation3 + $0x51] sm:$0xff] %vm2044_vm8, %v8287_v13  ;;  %v2328_v22 = vadd.f32 %v8238_v39, %v2293_v30  ;;  %v2330_v27 = vadd.f32 %v8238_v39, %v2295_v32  ;;  %v2299_v52 = vmul.f32 %v8228_v33, %v8049_v29  ;;  %v2301_v54 = vmul.f32 %v8228_v33, %v8070_v3 }
 0x317   : > { %2436 = vst.msk [vmem:[#allocation3 + $0x61] sm:$0xff] %vm2044_vm8, %v8289_v12  ;;  %v2332_v37 = vadd.f32 %v8238_v39, %v2297_v35  ;;  %v2300_v45 = vmul.f32 %v8228_v33, %v8059_v24  ;;  %v2302_v29 = vmul.f32 %v8228_v33, %v8083_v0  ;;  %v2304_v51 = vmul.f32 %v8228_v33, %v8106_v19 }
 0x318   : > { %2438 = vst.msk [vmem:[#allocation3 + $0x71] sm:$0xff] %vm2044_vm8, %v8295_v17  ;;  %v2360_v59 = vmax.f32 %v2328_v22, 0.0  ;;  %v2362_v5 = vmax.f32 %v2330_v27, 0.0  ;;  %v2334_v40 = vadd.f32 %v8238_v39, %v2299_v52  ;;  %v2336_v43 = vadd.f32 %v8238_v39, %v2301_v54 }
 0x319   : > { %2427 = vst.msk [vmem:[#allocation3 + $0x19] sm:$0x7f] %vm2426_vm14, %v2350_v15  ;;  %v2364_v56 = vmax.f32 %v2332_v37, 0.0  ;;  %v2335_v3 = vadd.f32 %v8238_v39, %v2300_v45  ;;  %v2337_v24 = vadd.f32 %v8238_v39, %v2302_v29  ;;  %v2339_v19 = vadd.f32 %v8238_v39, %v2304_v51 }
 0x31a   : > { %2494 = vrot.lane.b32.xlu2 %v2351_v46, %s7261_s2  ;;  %2496 = vrot.lane.b32.xlu0 %v8304_v28, %s7261_s2  ;;  %2440 = vst.msk [vmem:[#allocation3 + $0x81] sm:$0xff] %vm2044_vm8, %v8308_v1  ;;  %v2366_v0 = vmax.f32 %v2334_v40, 0.0  ;;  %v8531_v41 = vmax.f32 %v2336_v43, 0.0  ;;  %v2308_v31 = vmul.f32 %v8228_v33, %v8140_v61  ;;  %v2309_v49 = vmul.f32 %v8228_v33, %v8151_v11 }
 0x31b   : > { %2621 = vrot.lane.b32.xlu1 %v2350_v15, %s7263_s10  ;;  %2442 = vst.msk [vmem:[#allocation3 + $0x91] sm:$0xff] %vm2044_vm8, %v8317_v42  ;;  %v2303_v15 = vmul.f32 %v8228_v33, %v8087_v60  ;;  %v8543_v18 = vmax.f32 %v2337_v24, 0.0 }
 0x31c   : > { %2429 = vst.msk [vmem:[#allocation3 + $0x29] sm:$0x7f] %vm2426_vm14, %v8304_v28  ;;  %v2343_v48 = vadd.f32 %v8238_v39, %v2308_v31  ;;  %v2344_v22 = vadd.f32 %v8238_v39, %v2309_v49 }
 0x31d   : > { %2431 = vst.msk [vmem:[#allocation3 + $0x39] sm:$0x7f] %vm2426_vm14, %v8353_v55  ;;  %v2338_v60 = vadd.f32 %v8238_v39, %v2303_v15 }
 0x31e   : > { %2433 = vst.msk [vmem:[#allocation3 + $0x49] sm:$0x7f] %vm2426_vm14, %v8379_v38  ;;  %v8577_v58 = vmax.f32 %v2343_v48, 0.0  ;;  %v8663_v32 = vmax.f32 %v2344_v22, 0.0 }
 0x31f   : > { %2435 = vst.msk [vmem:[#allocation3 + $0x59] sm:$0x7f] %vm2426_vm14, %v8406_v20 }
 0x320   : > { %2437 = vst.msk [vmem:[#allocation3 + $0x69] sm:$0x7f] %vm2426_vm14, %v2360_v59 }
 0x321   : > { %2439 = vst.msk [vmem:[#allocation3 + $0x79] sm:$0x7f] %vm2426_vm14, %v2362_v5 }
 0x322   : > { %2625 = vrot.lane.b32.xlu2 %v8304_v28, %s7263_s10  ;;  %2498 = vrot.lane.b32.xlu0 %v2353_v4, %s7261_s2  ;;  %2441 = vst.msk [vmem:[#allocation3 + $0x89] sm:$0x7f] %vm2426_vm14, %v2364_v56  ;;  %v7114_v28 = vld [vmem:[%s7304_s29] sm:$0xff] }
 0x323   : > { %2623 = vrot.lane.b32.xlu1 %v2351_v46, %s7263_s10  ;;  %v2305_v46 = vmul.f32 %v8228_v33, %v8115_v9  ;;  %v2306_v9 = vmul.f32 %v8228_v33, %v8119_v16  ;;  %2443 = vst.msk [vmem:[#allocation3 + $0x99] sm:$0x7f] %vm2426_vm14, %v2366_v0  ;;  %v3009_v16 = vpack.c.b16 %v3007_v21, %v3007_v21 }
 0x324   : > { %2445 = vst.msk [vmem:[#allocation3 + $0xa9] sm:$0x7f] %vm2426_vm14, %v8531_v41 }
 0x325   : > { %v2340_v8 = vadd.f32 %v8238_v39, %v2305_v46  ;;  %2446 = vst.msk [vmem:[#allocation3 + $0xb1] sm:$0xff] %vm2044_vm8, %v8543_v18  ;;  %v3060_v61 = vsel %vm2909_vm9, %v3009_v16, 0 }
 0x326   : > { %3068 = vmatpush.bf16.msra.mxu0 %v3060_v61  ;;  %2452 = vst.msk [vmem:[#allocation3 + $0xe1] sm:$0xff] %vm2044_vm8, %v8577_v58 }
 0x327   : > { %2453 = vst.msk [vmem:[#allocation3 + $0xe9] sm:$0x7f] %vm2426_vm14, %v8663_v32 }
 0x32a   : > { %2627 = vrot.lane.b32.xlu2 %v2353_v4, %s7263_s10  ;;  %2629 = vrot.lane.b32.xlu0 %v8353_v55, %s7263_s10  ;;  %v2307_v4 = vmul.f32 %v8228_v33, %v8130_v36  ;;  %v8549_v36 = vmax.f32 %v2338_v60, 0.0 }
 0x32b   : > { %2500 = vrot.lane.b32.xlu1 %v8353_v55, %s7261_s2  ;;  %3069 = vmatpush.bf16.msra.mxu0 %v7114_v28  ;;  %v2781_v55 = vpack.c.bf16 %v2750_v50, %v2749_v44 }
 0x32c   : > { %v2342_v6 = vadd.f32 %v8238_v39, %v2307_v4  ;;  %2447 = vst.msk [vmem:[#allocation3 + $0xb9] sm:$0x7f] %vm2426_vm14, %v8549_v36 }
 0x32e   : > { %v8563_v57 = vmax.f32 %v2342_v6, 0.0  ;;  %6731 = vmatmul.msk.bf16.vlgmr.msra.gmra.mxu0 %vm2381_vm15, %v2781_v55 }
 0x330   : > { %2451 = vst.msk [vmem:[#allocation3 + $0xd9] sm:$0x7f] %vm2426_vm14, %v8563_v57 }
 0x332   : > { %2504 = vrot.lane.b32.xlu2 %v8379_v38, %s7261_s2  ;;  %2631 = vrot.lane.b32.xlu0 %v8269_v34, %s7263_s10 }
 0x333   : > { %2502 = vrot.lane.b32.xlu1 %v8269_v34, %s7261_s2  ;;  %v2367_v34 = vmax.f32 %v2335_v3, 0.0 }
 0x335   : > { %2444 = vst.msk [vmem:[#allocation3 + $0xa1] sm:$0xff] %vm2044_vm8, %v2367_v34 }
 0x33a   : > { %2506 = vrot.lane.b32.xlu2 %v8287_v13, %s7261_s2  ;;  %2508 = vrot.lane.b32.xlu0 %v8406_v20, %s7261_s2 }
 0x33b   : > { %2633 = vrot.lane.b32.xlu1 %v8379_v38, %s7263_s10 }
 0x342   : > { %2637 = vrot.lane.b32.xlu2 %v8406_v20, %s7263_s10  ;;  %2510 = vrot.lane.b32.xlu0 %v8289_v12, %s7261_s2  ;;  %v2310_v20 = vmul.f32 %v8228_v33, %v8160_v7  ;;  %v2313_v7 = vmul.f32 %v8228_v33, %v8194_v23 }
 0x343   : > { %2635 = vrot.lane.b32.xlu1 %v8287_v13, %s7263_s10  ;;  %v2341_v13 = vadd.f32 %v8238_v39, %v2306_v9 }
 0x344   : > { %v2345_v11 = vadd.f32 %v8238_v39, %v2310_v20  ;;  %v2348_v35 = vadd.f32 %v8238_v39, %v2313_v7 }
 0x345   : > { %v8570_v53 = vmax.f32 %v2341_v13, 0.0 }
 0x346   : > { %v8688_v54 = vmax.f32 %v2348_v35, 0.0 }
 0x347   : > { %2450 = vst.msk [vmem:[#allocation3 + $0xd1] sm:$0xff] %vm2044_vm8, %v8570_v53 }
 0x348   : > { %2457 = vst.msk [vmem:[#allocation3 + $0x109] sm:$0x7f] %vm2426_vm14, %v8688_v54 }
 0x34a   : > { %2639 = vrot.lane.b32.xlu2 %v8289_v12, %s7263_s10  ;;  %2641 = vrot.lane.b32.xlu0 %v2360_v59, %s7263_s10  ;;  %v8554_v12 = vmax.f32 %v2339_v19, 0.0 }
 0x34b   : > { %2512 = vrot.lane.b32.xlu1 %v2360_v59, %s7261_s2  ;;  %v2311_v59 = vmul.f32 %v8228_v33, %v8168_v2  ;;  %v8670_v2 = vmax.f32 %v2345_v11, 0.0 }
 0x34c   : > { %2448 = vst.msk [vmem:[#allocation3 + $0xc1] sm:$0xff] %vm2044_vm8, %v8554_v12 }
 0x34d   : > { %v2346_v27 = vadd.f32 %v8238_v39, %v2311_v59  ;;  %2454 = vst.msk [vmem:[#allocation3 + $0xf1] sm:$0xff] %vm2044_vm8, %v8670_v2 }
 0x34f   : > { %v2378_v37 = vmax.f32 %v2346_v27, 0.0 }
 0x351   : > { %2455 = vst.msk [vmem:[#allocation3 + $0xf9] sm:$0x7f] %vm2426_vm14, %v2378_v37 }
 0x352   : > { %2516 = vrot.lane.b32.xlu2 %v2362_v5, %s7261_s2  ;;  %2643 = vrot.lane.b32.xlu0 %v8295_v17, %s7263_s10 }
 0x353   : > { %2514 = vrot.lane.b32.xlu1 %v8295_v17, %s7261_s2  ;;  %v8558_v17 = vmax.f32 %v2340_v8, 0.0 }
 0x355   : > { %2449 = vst.msk [vmem:[#allocation3 + $0xc9] sm:$0x7f] %vm2426_vm14, %v8558_v17 }
 0x35a   : > { %2518 = vrot.lane.b32.xlu2 %v8308_v1, %s7261_s2  ;;  %2520 = vrot.lane.b32.xlu0 %v2364_v56, %s7261_s2 }
 0x35b   : > { %2645 = vrot.lane.b32.xlu1 %v2362_v5, %s7263_s10  ;;  %v2312_v5 = vmul.f32 %v8228_v33, %v8176_v63 }
 0x35d   : > { %v2347_v23 = vadd.f32 %v8238_v39, %v2312_v5 }
 0x35f   : > { %v8691_v39 = vmax.f32 %v2347_v23, 0.0 }
 0x361   : > { %2456 = vst.msk [vmem:[#allocation3 + $0x101] sm:$0xff] %vm2044_vm8, %v8691_v39 }
 0x362   : > { %2649 = vrot.lane.b32.xlu2 %v2364_v56, %s7263_s10  ;;  %2522 = vrot.lane.b32.xlu0 %v8317_v42, %s7261_s2 }
 0x363   : > { %2647 = vrot.lane.b32.xlu1 %v8308_v1, %s7263_s10 }
 0x36a   : > { %2651 = vrot.lane.b32.xlu2 %v8317_v42, %s7263_s10  ;;  %2653 = vrot.lane.b32.xlu0 %v2366_v0, %s7263_s10  ;;  %v6706_v42 = vld [vmem:[%s7304_s29 + $0x14] sm:$0xf] }
 0x36b   : > { %2524 = vrot.lane.b32.xlu1 %v2366_v0, %s7261_s2  ;;  %v2857_v14 = vunpack.c.l.b16 %v6706_v42 }
 0x36c   : > { %v2493_v1 = vpop.permute.xlu2 %2492 }
 0x36d   : > { %2588 = vst.msk [vmem:[#allocation3 + $0x18] sm:$0xff] %vm2586_vm0, %v2493_v1  ;;  %v2859_v25 = vpack.c.b16 %v2857_v14, %v2857_v14 }
 0x36f   : > { %v2911_v38 = vsel %vm2909_vm9, %v2859_v25, 0 }
 0x370   : > { %2919 = vmatpush.bf16.msrb.mxu3 %v2911_v38 }
 0x372   : > { %2528 = vrot.lane.b32.xlu2 %v8531_v41, %s7261_s2  ;;  %2655 = vrot.lane.b32.xlu0 %v2367_v34, %s7263_s10 }
 0x373   : > { %2526 = vrot.lane.b32.xlu1 %v2367_v34, %s7261_s2 }
 0x374   : > { %v2495_v26 = vpop.permute.xlu2 %2494  ;;  %2920 = vmatpush.bf16.msrb.mxu3 %v7115_v10 }
 0x375   : > { %2589 = vst.msk [vmem:[#allocation3 + $0x20] sm:$0xff] %vm2586_vm0, %v2495_v26 }
 0x37a   : > { %2530 = vrot.lane.b32.xlu2 %v8543_v18, %s7261_s2  ;;  %2532 = vrot.lane.b32.xlu0 %v8549_v36, %s7261_s2 }
 0x37b   : > { %2657 = vrot.lane.b32.xlu1 %v8531_v41, %s7263_s10 }
 0x37c   : > { %v2626_v30 = vpop.permute.xlu2 %2625 }
 0x382   : > { %2661 = vrot.lane.b32.xlu2 %v8549_v36, %s7263_s10  ;;  %2534 = vrot.lane.b32.xlu0 %v8554_v12, %s7261_s2 }
 0x383   : > { %2659 = vrot.lane.b32.xlu1 %v8543_v18, %s7263_s10 }
 0x384   : > { %v2628_v63 = vpop.permute.xlu2 %2627  ;;  %v2620_v33 = vpop.permute.xlu0 %2619 }
 0x385   : > { %v2491_v52 = vpop.permute.xlu1 %2490 }
 0x386   : > { %2587 = vst.msk [vmem:[#allocation3 + $0x10] sm:$0xff] %vm2586_vm0, %v2491_v52 }
 0x387   : > { %2716 = vst.msk [vmem:[#allocation3 + $0xf] sm:$0xfe] %vm2715_vm1, %v2620_v33 }
 0x38a   : > { %2663 = vrot.lane.b32.xlu2 %v8554_v12, %s7263_s10  ;;  %2665 = vrot.lane.b32.xlu0 %v8558_v17, %s7263_s10 }
 0x38b   : > { %2536 = vrot.lane.b32.xlu1 %v8558_v17, %s7261_s2 }
 0x38c   : > { %v2505_v40 = vpop.permute.xlu2 %2504  ;;  %v2497_v45 = vpop.permute.xlu0 %2496 }
 0x38d   : > { %2594 = vst.msk [vmem:[#allocation3 + $0x48] sm:$0xff] %vm2586_vm0, %v2505_v40  ;;  %v2622_v43 = vpop.permute.xlu1 %2621 }
 0x38e   : > { %2590 = vst.msk [vmem:[#allocation3 + $0x28] sm:$0xff] %vm2586_vm0, %v2497_v45 }
 0x38f   : > { %2720 = vst.msk [vmem:[#allocation3 + $0x27] sm:$0xff] %vm2717_vm2, %v2626_v30 }
 0x390   : > { %2718 = vst.msk [vmem:[#allocation3 + $0x17] sm:$0xff] %vm2717_vm2, %v2622_v43 }
 0x392   : > { %2540 = vrot.lane.b32.xlu2 %v8563_v57, %s7261_s2  ;;  %2667 = vrot.lane.b32.xlu0 %v8570_v53, %s7263_s10 }
 0x393   : > { %2538 = vrot.lane.b32.xlu1 %v8570_v53, %s7261_s2 }
 0x394   : > { %v2507_v29 = vpop.permute.xlu2 %2506  ;;  %v2499_v56 = vpop.permute.xlu0 %2498 }
 0x395   : > { %2595 = vst.msk [vmem:[#allocation3 + $0x50] sm:$0xff] %vm2586_vm0, %v2507_v29  ;;  %v2624_v3 = vpop.permute.xlu1 %2623 }
 0x396   : > { %2591 = vst.msk [vmem:[#allocation3 + $0x30] sm:$0xff] %vm2586_vm0, %v2499_v56  ;;  %v3153_v19 = vld [vmem:[#allocation3 + $0x28] sm:$0xff] }
 0x397   : > { %2721 = vst.msk [vmem:[#allocation3 + $0x2f] sm:$0xfe] %vm2715_vm1, %v2628_v63  ;;  %v2800_v15 = vld [vmem:[#allocation3 + $0x10] sm:$0xff]  ;;  %v2801_v24 = vld [vmem:[#allocation3 + $0x18] sm:$0xff] }
 0x398   : > { %2719 = vst.msk [vmem:[#allocation3 + $0x1f] sm:$0xfe] %vm2715_vm1, %v2624_v3  ;;  %v2832_v51 = vpack.c.bf16 %v2801_v24, %v2800_v15 }
 0x39a   : > { %6711 = vmatmul.msk.bf16.vlgmr.msrb.gmra.mxu3 %vm2381_vm15, %v2832_v51  ;;  %6732 = vmatmul.msk.bf16.gmra.mxu0 %vm2381_vm15, %v2832_v51 }
 0x39b   : > { %2542 = vrot.lane.b32.xlu2 %v8577_v58, %s7261_s2  ;;  %2544 = vrot.lane.b32.xlu0 %v8663_v32, %s7261_s2 }
 0x39c   : > { %2669 = vrot.lane.b32.xlu1 %v8563_v57, %s7263_s10  ;;  %v2638_v0 = vpop.permute.xlu2 %2637  ;;  %v2630_v60 = vpop.permute.xlu0 %2629 }
 0x39d   : > { %v2501_v46 = vpop.permute.xlu1 %2500 }
 0x39e   : > { %2592 = vst.msk [vmem:[#allocation3 + $0x38] sm:$0xff] %vm2586_vm0, %v2501_v46 }
 0x39f   : > { %2722 = vst.msk [vmem:[#allocation3 + $0x37] sm:$0xff] %vm2717_vm2, %v2630_v60  ;;  %v3152_v41 = vld [vmem:[#allocation3 + $0x20] sm:$0xff] }
 0x3a0   : > { %v3184_v4 = vpack.c.bf16 %v3153_v19, %v3152_v41 }
 0x3a2   : > { %6754 = vmatmul.msk.bf16.vlgmr.msrb.gmra.mxu1 %vm2381_vm15, %v3184_v4 }
 0x3a3   : > { %2673 = vrot.lane.b32.xlu2 %v8663_v32, %s7263_s10  ;;  %2546 = vrot.lane.b32.xlu0 %v8670_v2, %s7261_s2 }
 0x3a4   : > { %2671 = vrot.lane.b32.xlu1 %v8577_v58, %s7263_s10  ;;  %v2640_v34 = vpop.permute.xlu2 %2639  ;;  %v2632_v62 = vpop.permute.xlu0 %2631 }
 0x3a5   : > { %v2503_v8 = vpop.permute.xlu1 %2502 }
 0x3a6   : > { %2593 = vst.msk [vmem:[#allocation3 + $0x40] sm:$0xff] %vm2586_vm0, %v2503_v8  ;;  %v3154_v6 = vld [vmem:[#allocation3 + $0x30] sm:$0xff]  ;;  %v3155_v31 = vld [vmem:[#allocation3 + $0x38] sm:$0xff] }
 0x3a7   : > { %2723 = vst.msk [vmem:[#allocation3 + $0x3f] sm:$0xfe] %vm2715_vm1, %v2632_v62  ;;  %v3185_v36 = vpack.c.bf16 %v3155_v31, %v3154_v6 }
 0x3aa   : > { %6712 = vmatmul.msk.bf16.gmra.mxu3 %vm2381_vm15, %v3184_v4  ;;  %6733 = vmatmul.msk.bf16.gmra.mxu0 %vm2381_vm15, %v3184_v4 }
 0x3ab   : > { %2675 = vrot.lane.b32.xlu2 %v8670_v2, %s7263_s10  ;;  %2677 = vrot.lane.b32.xlu0 %v2378_v37, %s7263_s10  ;;  %v3071_v15 = vpop.f32.mrf.mxu0 }
 0x3ac   : > { %2548 = vrot.lane.b32.xlu1 %v2378_v37, %s7261_s2  ;;  %v2517_v9 = vpop.permute.xlu2 %2516  ;;  %v2509_v18 = vpop.permute.xlu0 %2508 }
 0x3ad   : > { %2600 = vst.msk [vmem:[#allocation3 + $0x78] sm:$0xff] %vm2586_vm0, %v2517_v9  ;;  %v2634_v21 = vpop.permute.xlu1 %2633 }
 0x3ae   : > { %2596 = vst.msk [vmem:[#allocation3 + $0x58] sm:$0xff] %vm2586_vm0, %v2509_v18 }
 0x3af   : > { %2726 = vst.msk [vmem:[#allocation3 + $0x57] sm:$0xff] %vm2717_vm2, %v2638_v0 }
 0x3b0   : > { %2724 = vst.msk [vmem:[#allocation3 + $0x47] sm:$0xff] %vm2717_vm2, %v2634_v21 }
 0x3b2   : > { %6755 = vmatmul.msk.bf16.gmra.mxu1 %vm2381_vm15, %v3185_v36 }
 0x3b3   : > { %2552 = vrot.lane.b32.xlu2 %v8688_v54, %s7261_s2  ;;  %2679 = vrot.lane.b32.xlu0 %v8691_v39, %s7263_s10  ;;  %v3073_v60 = vpop.f32.mrf.mxu0 }
 0x3b4   : > { %2550 = vrot.lane.b32.xlu1 %v8691_v39, %s7261_s2  ;;  %v2519_v13 = vpop.permute.xlu2 %2518  ;;  %v2511_v16 = vpop.permute.xlu0 %2510 }
 0x3b5   : > { %2601 = vst.msk [vmem:[#allocation3 + $0x80] sm:$0xff] %vm2586_vm0, %v2519_v13  ;;  %v2636_v12 = vpop.permute.xlu1 %2635 }
 0x3b6   : > { %2597 = vst.msk [vmem:[#allocation3 + $0x60] sm:$0xff] %vm2586_vm0, %v2511_v16  ;;  %v3159_v25 = vld [vmem:[#allocation3 + $0x58] sm:$0xff] }
 0x3b7   : > { %2727 = vst.msk [vmem:[#allocation3 + $0x5f] sm:$0xfe] %vm2715_vm1, %v2640_v34  ;;  %v3156_v57 = vld [vmem:[#allocation3 + $0x40] sm:$0xff]  ;;  %v3157_v53 = vld [vmem:[#allocation3 + $0x48] sm:$0xff] }
 0x3b8   : > { %2725 = vst.msk [vmem:[#allocation3 + $0x4f] sm:$0xfe] %vm2715_vm1, %v2636_v12  ;;  %v3186_v28 = vpack.c.bf16 %v3157_v53, %v3156_v57 }
 0x3ba   : > { %6713 = vmatmul.msk.bf16.gmra.mxu3 %vm2381_vm15, %v3185_v36  ;;  %6734 = vmatmul.msk.bf16.gmra.mxu0 %vm2381_vm15, %v3185_v36 }
 0x3bc   : > { %2681 = vrot.lane.b32.xlu1 %v8688_v54, %s7263_s10  ;;  %v2650_v48 = vpop.permute.xlu2 %2649  ;;  %v2642_v17 = vpop.permute.xlu0 %2641 }
 0x3bd   : > { %v2513_v61 = vpop.permute.xlu1 %2512 }
 0x3be   : > { %2598 = vst.msk [vmem:[#allocation3 + $0x68] sm:$0xff] %vm2586_vm0, %v2513_v61 }
 0x3bf   : > { %2728 = vst.msk [vmem:[#allocation3 + $0x67] sm:$0xff] %vm2717_vm2, %v2642_v17  ;;  %v3158_v55 = vld [vmem:[#allocation3 + $0x50] sm:$0xff] }
 0x3c0   : > { %v3187_v26 = vpack.c.bf16 %v3159_v25, %v3158_v55 }
 0x3c2   : > { %6756 = vmatmul.msk.bf16.gmra.mxu1 %vm2381_vm15, %v3186_v28 }
 0x3c4   : > { %v2652_v58 = vpop.permute.xlu2 %2651  ;;  %v2644_v1 = vpop.permute.xlu0 %2643 }
 0x3c5   : > { %v2515_v42 = vpop.permute.xlu1 %2514 }
 0x3c6   : > { %2599 = vst.msk [vmem:[#allocation3 + $0x70] sm:$0xff] %vm2586_vm0, %v2515_v42  ;;  %v3160_v11 = vld [vmem:[#allocation3 + $0x60] sm:$0xff]  ;;  %v3161_v59 = vld [vmem:[#allocation3 + $0x68] sm:$0xff]  ;;  %v8826_v42 = vld [vmem:[%s7309_s3] ss:$0 sm:$0xff] }
 0x3c7   : > { %2729 = vst.msk [vmem:[#allocation3 + $0x6f] sm:$0xfe] %vm2715_vm1, %v2644_v1  ;;  %v3188_v7 = vpack.c.bf16 %v3161_v59, %v3160_v11 }
 0x3ca   : > { %6714 = vmatmul.msk.bf16.gmra.mxu3 %vm2381_vm15, %v3186_v28  ;;  %6735 = vmatmul.msk.bf16.gmra.mxu0 %vm2381_vm15, %v3186_v28 }
 0x3cc   : > { %v2529_v44 = vpop.permute.xlu2 %2528  ;;  %v2521_v14 = vpop.permute.xlu0 %2520 }
 0x3cd   : > { %2606 = vst.msk [vmem:[#allocation3 + $0xa8] sm:$0xff] %vm2586_vm0, %v2529_v44  ;;  %v2646_v50 = vpop.permute.xlu1 %2645 }
 0x3ce   : > { %2602 = vst.msk [vmem:[#allocation3 + $0x88] sm:$0xff] %vm2586_vm0, %v2521_v14 }
 0x3cf   : > { %2732 = vst.msk [vmem:[#allocation3 + $0x87] sm:$0xff] %vm2717_vm2, %v2650_v48 }
 0x3d0   : > { %2730 = vst.msk [vmem:[#allocation3 + $0x77] sm:$0xff] %vm2717_vm2, %v2646_v50 }
 0x3d2   : > { %6757 = vmatmul.msk.bf16.gmra.mxu1 %vm2381_vm15, %v3187_v26 }
 0x3d4   : > { %v2531_v38 = vpop.permute.xlu2 %2530  ;;  %v2523_v10 = vpop.permute.xlu0 %2522 }
 0x3d5   : > { %2607 = vst.msk [vmem:[#allocation3 + $0xb0] sm:$0xff] %vm2586_vm0, %v2531_v38  ;;  %v2648_v49 = vpop.permute.xlu1 %2647 }
 0x3d6   : > { %2603 = vst.msk [vmem:[#allocation3 + $0x90] sm:$0xff] %vm2586_vm0, %v2523_v10  ;;  %v3165_v56 = vld [vmem:[#allocation3 + $0x88] sm:$0xff] }
 0x3d7   : > { %2733 = vst.msk [vmem:[#allocation3 + $0x8f] sm:$0xfe] %vm2715_vm1, %v2652_v58  ;;  %v3162_v63 = vld [vmem:[#allocation3 + $0x70] sm:$0xff]  ;;  %v3163_v33 = vld [vmem:[#allocation3 + $0x78] sm:$0xff] }
 0x3d8   : > { %2731 = vst.msk [vmem:[#allocation3 + $0x7f] sm:$0xfe] %vm2715_vm1, %v2648_v49  ;;  %v3189_v37 = vpack.c.bf16 %v3163_v33, %v3162_v63 }
 0x3da   : > { %6715 = vmatmul.msk.bf16.gmra.mxu3 %vm2381_vm15, %v3187_v26  ;;  %6736 = vmatmul.msk.bf16.gmra.mxu0 %vm2381_vm15, %v3187_v26 }
 0x3dc   : > { %v2662_v20 = vpop.permute.xlu2 %2661  ;;  %v2654_v30 = vpop.permute.xlu0 %2653 }
 0x3dd   : > { %v2525_v22 = vpop.permute.xlu1 %2524 }
 0x3de   : > { %2604 = vst.msk [vmem:[#allocation3 + $0x98] sm:$0xff] %vm2586_vm0, %v2525_v22 }
 0x3df   : > { %2734 = vst.msk [vmem:[#allocation3 + $0x97] sm:$0xff] %vm2717_vm2, %v2654_v30  ;;  %v3164_v29 = vld [vmem:[#allocation3 + $0x80] sm:$0xff] }
 0x3e0   : > { %v3190_v3 = vpack.c.bf16 %v3165_v56, %v3164_v29 }
 0x3e2   : > { %6758 = vmatmul.msk.bf16.gmra.mxu1 %vm2381_vm15, %v3188_v7 }
 0x3e4   : > { %v2664_v32 = vpop.permute.xlu2 %2663  ;;  %v2656_v27 = vpop.permute.xlu0 %2655 }
 0x3e5   : > { %v2527_v5 = vpop.permute.xlu1 %2526 }
 0x3e6   : > { %2605 = vst.msk [vmem:[#allocation3 + $0xa0] sm:$0xff] %vm2586_vm0, %v2527_v5  ;;  %v3166_v19 = vld [vmem:[#allocation3 + $0x90] sm:$0xff]  ;;  %v3167_v4 = vld [vmem:[#allocation3 + $0x98] sm:$0xff] }
 0x3e7   : > { %2735 = vst.msk [vmem:[#allocation3 + $0x9f] sm:$0xfe] %vm2715_vm1, %v2656_v27  ;;  %v3191_v62 = vpack.c.bf16 %v3167_v4, %v3166_v19 }
 0x3ea   : > { %6716 = vmatmul.msk.bf16.gmra.mxu3 %vm2381_vm15, %v3188_v7  ;;  %6737 = vmatmul.msk.bf16.gmra.mxu0 %vm2381_vm15, %v3188_v7 }
 0x3ec   : > { %v2541_v2 = vpop.permute.xlu2 %2540  ;;  %v2533_v35 = vpop.permute.xlu0 %2532 }
 0x3ed   : > { %2612 = vst.msk [vmem:[#allocation3 + $0xd8] sm:$0xff] %vm2586_vm0, %v2541_v2  ;;  %v2658_v23 = vpop.permute.xlu1 %2657 }
 0x3ee   : > { %2608 = vst.msk [vmem:[#allocation3 + $0xb8] sm:$0xff] %vm2586_vm0, %v2533_v35 }
 0x3ef   : > { %2738 = vst.msk [vmem:[#allocation3 + $0xb7] sm:$0xff] %vm2717_vm2, %v2662_v20 }
 0x3f0   : > { %2736 = vst.msk [vmem:[#allocation3 + $0xa7] sm:$0xff] %vm2717_vm2, %v2658_v23 }
 0x3f2   : > { %6759 = vmatmul.msk.bf16.gmra.mxu1 %vm2381_vm15, %v3189_v37 }
 0x3f4   : > { %v2535_v52 = vpop.permute.xlu0 %2534 }
 0x3f5   : > { %v2543_v54 = vpop.permute.xlu2 %2542  ;;  %2609 = vst.msk [vmem:[#allocation3 + $0xc0] sm:$0xff] %vm2586_vm0, %v2535_v52  ;;  %v2660_v39 = vpop.permute.xlu1 %2659 }
 0x3f6   : > { %2613 = vst.msk [vmem:[#allocation3 + $0xe0] sm:$0xff] %vm2586_vm0, %v2543_v54  ;;  %v3171_v38 = vld [vmem:[#allocation3 + $0xb8] sm:$0xff] }
 0x3f7   : > { %2739 = vst.msk [vmem:[#allocation3 + $0xbf] sm:$0xfe] %vm2715_vm1, %v2664_v32  ;;  %v3168_v31 = vld [vmem:[#allocation3 + $0xa0] sm:$0xff]  ;;  %v3169_v36 = vld [vmem:[#allocation3 + $0xa8] sm:$0xff] }
 0x3f8   : > { %2737 = vst.msk [vmem:[#allocation3 + $0xaf] sm:$0xfe] %vm2715_vm1, %v2660_v39  ;;  %v3192_v48 = vpack.c.bf16 %v3169_v36, %v3168_v31 }
 0x3fa   : > { %6717 = vmatmul.msk.bf16.gmra.mxu3 %vm2381_vm15, %v3189_v37  ;;  %6738 = vmatmul.msk.bf16.gmra.mxu0 %vm2381_vm15, %v3189_v37 }
 0x3fc   : > { %v2666_v40 = vpop.permute.xlu0 %2665 }
 0x3fd   : > { %v2674_v45 = vpop.permute.xlu2 %2673  ;;  %v2537_v43 = vpop.permute.xlu1 %2536 }
 0x3fe   : > { %2610 = vst.msk [vmem:[#allocation3 + $0xc8] sm:$0xff] %vm2586_vm0, %v2537_v43 }
 0x3ff   : > { %2740 = vst.msk [vmem:[#allocation3 + $0xc7] sm:$0xff] %vm2717_vm2, %v2666_v40  ;;  %v3170_v14 = vld [vmem:[#allocation3 + $0xb0] sm:$0xff] }
 0x400   : > { %v3193_v20 = vpack.c.bf16 %v3171_v38, %v3170_v14 }
 0x402   : > { %6760 = vmatmul.msk.bf16.gmra.mxu1 %vm2381_vm15, %v3190_v3 }
 0x404   : > { %v2668_v24 = vpop.permute.xlu0 %2667 }
 0x405   : > { %v2676_v51 = vpop.permute.xlu2 %2675  ;;  %v2539_v0 = vpop.permute.xlu1 %2538 }
 0x406   : > { %2611 = vst.msk [vmem:[#allocation3 + $0xd0] sm:$0xff] %vm2586_vm0, %v2539_v0  ;;  %v3172_v0 = vld [vmem:[#allocation3 + $0xc0] sm:$0xff] }
 0x407   : > { %2741 = vst.msk [vmem:[#allocation3 + $0xcf] sm:$0xfe] %vm2715_vm1, %v2668_v24 }
 0x40a   : > { %6718 = vmatmul.msk.bf16.gmra.mxu3 %vm2381_vm15, %v3190_v3  ;;  %6739 = vmatmul.msk.bf16.gmra.mxu0 %vm2381_vm15, %v3190_v3 }
 0x40d   : > { %v2553_v46 = vpop.permute.xlu2 %2552  ;;  %v2545_v41 = vpop.permute.xlu0 %2544 }
 0x40e   : > { %2618 = vst.msk [vmem:[#allocation3 + $0x108] sm:$0xff] %vm2586_vm0, %v2553_v46  ;;  %v2670_v34 = vpop.permute.xlu1 %2669 }
 0x40f   : > { %2614 = vst.msk [vmem:[#allocation3 + $0xe8] sm:$0xff] %vm2586_vm0, %v2545_v41 }
 0x410   : > { %2744 = vst.msk [vmem:[#allocation3 + $0xe7] sm:$0xff] %vm2717_vm2, %v2674_v45 }
 0x411   : > { %2742 = vst.msk [vmem:[#allocation3 + $0xd7] sm:$0xff] %vm2717_vm2, %v2670_v34 }
 0x412   : > { %6761 = vmatmul.msk.bf16.gmra.mxu1 %vm2381_vm15, %v3191_v62 }
 0x415   : > { %v2547_v8 = vpop.permute.xlu0 %2546 }
 0x416   : > { %2615 = vst.msk [vmem:[#allocation3 + $0xf0] sm:$0xff] %vm2586_vm0, %v2547_v8  ;;  %v2672_v9 = vpop.permute.xlu1 %2671 }
 0x417   : > { %2745 = vst.msk [vmem:[#allocation3 + $0xef] sm:$0xfe] %vm2715_vm1, %v2676_v51  ;;  %v3076_v18 = vpop.f32.mrf.mxu0 }
 0x418   : > { %2743 = vst.msk [vmem:[#allocation3 + $0xdf] sm:$0xfe] %vm2715_vm1, %v2672_v9 }
 0x41a   : > { %6719 = vmatmul.msk.bf16.gmra.mxu3 %vm2381_vm15, %v3191_v62  ;;  %6740 = vmatmul.msk.bf16.gmra.mxu0 %vm2381_vm15, %v3191_v62 }
 0x41d   : > { %v2922_v21 = vpop.f32.mrf.mxu3  ;;  %v2678_v6 = vpop.permute.xlu0 %2677 }
 0x41e   : > { %v2549_v13 = vpop.permute.xlu1 %2548  ;;  %v3072_v58 = vadd.f32 %v3071_v15, %v2922_v21 }
 0x41f   : > { %v3273_v16 = vpop.f32.mrf.mxu1  ;;  %2616 = vst.msk [vmem:[#allocation3 + $0xf8] sm:$0xff] %vm2586_vm0, %v2549_v13  ;;  %v3078_v12 = vpop.f32.mrf.mxu0 }
 0x420   : > { %2746 = vst.msk [vmem:[#allocation3 + $0xf7] sm:$0xff] %vm2717_vm2, %v2678_v6  ;;  %v3353_v1 = vadd.f32 %v3273_v16, %v3072_v58 }
 0x422   : > { %6762 = vmatmul.msk.bf16.gmra.mxu1 %vm2381_vm15, %v3192_v48  ;;  %v3389_v10 = vadd.f32 %v8826_v42, %v3353_v1 }
 0x424   : > { %v3421_v11 = vmax.f32 %v3389_v10, 0.0 }
 0x425   : > { %v2924_v17 = vpop.f32.mrf.mxu3  ;;  %v2680_v61 = vpop.permute.xlu0 %2679 }
 0x426   : > { %v2551_v57 = vpop.permute.xlu1 %2550  ;;  %v3074_v30 = vadd.f32 %v3073_v60, %v2924_v17  ;;  %v3173_v60 = vld [vmem:[#allocation3 + $0xc8] sm:$0xff] }
 0x427   : > { %v3275_v53 = vpop.f32.mrf.mxu1  ;;  %2617 = vst.msk [vmem:[#allocation3 + $0x100] sm:$0xff] %vm2586_vm0, %v2551_v57  ;;  %v8820_v28 = vpop.f32.mrf.mxu0  ;;  %v3194_v9 = vpack.c.bf16 %v3173_v60, %v3172_v0 }
 0x428   : > { %2747 = vst.msk [vmem:[#allocation3 + $0xff] sm:$0xfe] %vm2715_vm1, %v2680_v61  ;;  %v3354_v7 = vadd.f32 %v3275_v53, %v3074_v30 }
 0x42a   : > { %6720 = vmatmul.msk.bf16.gmra.mxu3 %vm2381_vm15, %v3192_v48  ;;  %6741 = vmatmul.msk.bf16.gmra.mxu0 %vm2381_vm15, %v3192_v48  ;;  %v3390_v52 = vadd.f32 %v8826_v42, %v3354_v7 }
 0x42c   : > { %v3422_v15 = vmax.f32 %v3390_v52, 0.0 }
 0x42d   : > { %v2927_v44 = vpop.f32.mrf.mxu3 }
 0x42e   : > { %v3077_v50 = vadd.f32 %v3076_v18, %v2927_v44  ;;  %v2682_v55 = vpop.permute.xlu1 %2681 }
 0x42f   : > { %v3278_v25 = vpop.f32.mrf.mxu1  ;;  %2748 = vst.msk [vmem:[#allocation3 + $0x107] sm:$0xff] %vm2717_vm2, %v2682_v55  ;;  %v8829_v26 = vpop.f32.mrf.mxu0 }
 0x430   : > { %v3355_v49 = vadd.f32 %v3278_v25, %v3077_v50 }
 0x432   : > { %v3391_v22 = vadd.f32 %v8826_v42, %v3355_v49  ;;  %6763 = vmatmul.msk.bf16.gmra.mxu1 %vm2381_vm15, %v3193_v20 }
 0x434   : > { %v3423_v59 = vmax.f32 %v3391_v22, 0.0 }
 0x435   : > { %v2929_v32 = vpop.f32.mrf.mxu3 }
 0x436   : > { %v3453_v27 = vmax.f32 %v3421_v11, %v3423_v59  ;;  %v3079_v5 = vadd.f32 %v3078_v12, %v2929_v32 }
 0x437   : > { %v8834_v2 = vpop.f32.mrf.mxu0  ;;  %v3280_v35 = vpop.f32.mrf.mxu1 }
 0x438   : > { %v3485_v23 = vrot.slane %v3453_v27, 2  ;;  %v3486_v63 = vrot.slane %v3453_v27, 4  ;;  %v3487_v33 = vrot.slane %v3453_v27, 6  ;;  %v6770_v37 = vrot.slane %v3453_v27, 9 }
 0x439   : > { %v3356_v54 = vadd.f32 %v3280_v35, %v3079_v5 }
 0x43a   : > { %v6771_v39 = vrot.slane %v3485_v23, 9  ;;  %v6772_v40 = vrot.slane %v3486_v63, 9  ;;  %v3773_v45 = vmax.f32 %v3453_v27, %v6770_v37  ;;  %6721 = vmatmul.msk.bf16.gmra.mxu3 %vm2381_vm15, %v3193_v20  ;;  %6742 = vmatmul.msk.bf16.gmra.mxu0 %vm2381_vm15, %v3193_v20  ;;  %v6773_v43 = vrot.slane %v3487_v33, 9 }
 0x43b   : > { %v3392_v29 = vadd.f32 %v8826_v42, %v3356_v54 }
 0x43c   : > { %v3774_v56 = vmax.f32 %v3485_v23, %v6771_v39  ;;  %v3775_v3 = vmax.f32 %v3486_v63, %v6772_v40  ;;  %v3916_v46 = vperm.slane %v3773_v45, 0  ;;  %v3776_v41 = vmax.f32 %v3487_v33, %v6773_v43  ;;  %v3174_v63 = vld [vmem:[#allocation3 + $0xd0] sm:$0xff]  ;;  %v3175_v33 = vld [vmem:[#allocation3 + $0xd8] sm:$0xff] }
 0x43d   : > { %v3424_v24 = vmax.f32 %v3392_v29, 0.0  ;;  %v2932_v51 = vpop.f32.mrf.mxu3  ;;  %v3195_v45 = vpack.c.bf16 %v3175_v33, %v3174_v63 }
 0x43e   : > { %v3917_v19 = vperm.slane %v3774_v56, 0  ;;  %v3918_v4 = vperm.slane %v3775_v3, 0  ;;  %v3919_v13 = vperm.slane %v3776_v41, 0  ;;  %v3082_v30 = vadd.f32 %v8820_v28, %v2932_v51 }
 0x43f   : > { %v3454_v34 = vmax.f32 %v3422_v15, %v3424_v24  ;;  %v8840_v62 = vpop.f32.mrf.mxu0  ;;  %v3283_v8 = vpop.f32.mrf.mxu1 }
 0x440   : > { %v3973_v18 = vsel %vm3972_vm3, %v3917_v19, %v3916_v46  ;;  %v4100_v16 = vsel %vm3972_vm3, %v3918_v4, %v3917_v19  ;;  %v3357_v35 = vadd.f32 %v3283_v8, %v3082_v30 }
 0x441   : > { %v3488_v21 = vrot.slane %v3454_v34, 2  ;;  %v3489_v6 = vrot.slane %v3454_v34, 4  ;;  %v3490_v31 = vrot.slane %v3454_v34, 6  ;;  %v6774_v36 = vrot.slane %v3454_v34, 9 }
 0x442   : > { %6764 = vmatmul.msk.bf16.gmra.mxu1 %vm2381_vm15, %v3194_v9  ;;  %v3975_v57 = vsel %vm3974_vm4, %v3918_v4, %v3973_v18  ;;  %v4101_v50 = vsel %vm3974_vm4, %v3919_v13, %v4100_v16  ;;  %v3393_v39 = vadd.f32 %v8826_v42, %v3357_v35 }
 0x443   : > { %v6775_v12 = vrot.slane %v3488_v21, 9  ;;  %v6776_v48 = vrot.slane %v3489_v6, 9  ;;  %v6777_v17 = vrot.slane %v3490_v31, 9  ;;  %v3777_v61 = vmax.f32 %v3454_v34, %v6774_v36 }
 0x444   : > { %v3977_v20 = vsel %vm3976_vm5, %v3919_v13, %v3975_v57  ;;  %v3425_v56 = vmax.f32 %v3393_v39, 0.0 }
 0x445   : > { %v2934_v53 = vpop.f32.mrf.mxu3  ;;  %v3778_v58 = vmax.f32 %v3488_v21, %v6775_v12  ;;  %v3779_v1 = vmax.f32 %v3489_v6, %v6776_v48  ;;  %v3780_v44 = vmax.f32 %v3490_v31, %v6777_v17  ;;  %v3920_v14 = vperm.slane %v3777_v61, 0  ;;  %v3176_v12 = vld [vmem:[#allocation3 + $0xe0] sm:$0xff] }
 0x446   : > { %v3084_v43 = vadd.f32 %v8829_v26, %v2934_v53  ;;  %v6836_v53 = vld [vmem:[%s7314_s8 + $0x14] sm:$0xf] }
 0x447   : > { %v8847_v55 = vpop.f32.mrf.mxu0  ;;  %v3285_v25 = vpop.f32.mrf.mxu1  ;;  %v3921_v38 = vperm.slane %v3778_v58, 0  ;;  %v3922_v10 = vperm.slane %v3779_v1, 0  ;;  %v4102_v49 = vsel %vm3976_vm5, %v3920_v14, %v4101_v50  ;;  %v3979_v22 = vsel %vm3978_vm6, %v3920_v14, %v3977_v20  ;;  %v3177_v14 = vld [vmem:[#allocation3 + $0xe8] sm:$0xff] }
 0x448   : > { %v4051_v11 = vperm.slane %v3780_v44, 0  ;;  %v3358_v15 = vadd.f32 %v3285_v25, %v3084_v43  ;;  %v4217_v50 = vunpack.c.l.b16 %v6836_v53  ;;  %v3196_v25 = vpack.c.bf16 %v3177_v14, %v3176_v12 }
 0x449   : > { %v4103_v59 = vsel %vm3978_vm6, %v3921_v38, %v4102_v49  ;;  %v3981_v7 = vsel %vm3980_vm7, %v3921_v38, %v3979_v22 }
 0x44a   : > { %6722 = vmatmul.msk.bf16.gmra.mxu3 %vm2381_vm15, %v3194_v9  ;;  %6743 = vmatmul.msk.bf16.gmra.mxu0 %vm2381_vm15, %v3194_v9  ;;  %v4104_v32 = vsel %vm3980_vm7, %v3922_v10, %v4103_v59  ;;  %v3983_v27 = vsel %vm3982_vm10, %v3922_v10, %v3981_v7  ;;  %v3394_v26 = vadd.f32 %v8826_v42, %v3358_v15 }
 0x44b   : > { %v4105_v5 = vsel %vm3982_vm10, %v4051_v11, %v4104_v32  ;;  %v4060_v28 = vsel %vm4059_vm11, %v4051_v11, %v3983_v27  ;;  %4035 = vst.msk [vmem:[#allocation4 + $0x9] sm:$0x7f] %vm2426_vm14, %v3983_v27  ;;  %v4219_v59 = vpack.c.b16 %v4217_v50, %v4217_v50 }
 0x44c   : > { %4148 = vrot.lane.b32.xlu1 %v4105_v5, %s7263_s10  ;;  %4068 = vrot.lane.b32.xlu2 %v4060_v28, %s7261_s2  ;;  %v3426_v36 = vmax.f32 %v3394_v26, 0.0 }
 0x44d   : > { %v2937_v23 = vpop.f32.mrf.mxu3  ;;  %v4234_v35 = vsel %vm2909_vm9, %v4219_v59, 0 }
 0x44e   : > { %v3087_v37 = vadd.f32 %v8834_v2, %v2937_v23  ;;  %4242 = vmatpush.bf16.msrb.mxu2 %v4234_v35 }
 0x44f   : > { %v8865_v52 = vpop.f32.mrf.mxu0  ;;  %v3288_v54 = vpop.f32.mrf.mxu1 }
 0x450   : > { %v3359_v40 = vadd.f32 %v3288_v54, %v3087_v37 }
 0x452   : > { %v3395_v29 = vadd.f32 %v8826_v42, %v3359_v40  ;;  %6765 = vmatmul.msk.bf16.gmra.mxu1 %vm2381_vm15, %v3195_v45 }
 0x454   : > { %v3427_v3 = vmax.f32 %v3395_v29, 0.0 }
 0x455   : > { %v2939_v24 = vpop.f32.mrf.mxu3 }
 0x456   : > { %v3455_v51 = vmax.f32 %v3425_v56, %v3427_v3  ;;  %v3089_v2 = vadd.f32 %v8840_v62, %v2939_v24 }
 0x457   : > { %v8872_v0 = vpop.f32.mrf.mxu0  ;;  %v3290_v60 = vpop.f32.mrf.mxu1 }
 0x458   : > { %v3491_v46 = vrot.slane %v3455_v51, 2  ;;  %v3492_v41 = vrot.slane %v3455_v51, 4  ;;  %v3493_v19 = vrot.slane %v3455_v51, 6  ;;  %v6778_v4 = vrot.slane %v3455_v51, 9 }
 0x459   : > { %v3360_v34 = vadd.f32 %v3290_v60, %v3089_v2 }
 0x45a   : > { %v6779_v8 = vrot.slane %v3491_v46, 9  ;;  %v6780_v9 = vrot.slane %v3492_v41, 9  ;;  %v3781_v18 = vmax.f32 %v3455_v51, %v6778_v4  ;;  %6723 = vmatmul.msk.bf16.gmra.mxu3 %vm2381_vm15, %v3195_v45  ;;  %6744 = vmatmul.msk.bf16.gmra.mxu0 %vm2381_vm15, %v3195_v45  ;;  %v6781_v21 = vrot.slane %v3493_v19, 9 }
 0x45b   : > { %v3396_v62 = vadd.f32 %v8826_v42, %v3360_v34  ;;  %v3178_v34 = vld [vmem:[#allocation3 + $0xf0] sm:$0xff] }
 0x45c   : > { %v3782_v6 = vmax.f32 %v3491_v46, %v6779_v8  ;;  %v3783_v31 = vmax.f32 %v3492_v41, %v6780_v9  ;;  %v3923_v48 = vperm.slane %v3781_v18, 0  ;;  %v3784_v17 = vmax.f32 %v3493_v19, %v6781_v21  ;;  %v3179_v8 = vld [vmem:[#allocation3 + $0xf8] sm:$0xff] }
 0x45d   : > { %v3428_v13 = vmax.f32 %v3396_v62, 0.0  ;;  %v2942_v16 = vpop.f32.mrf.mxu3 }
 0x45e   : > { %v3924_v61 = vperm.slane %v3782_v6, 0  ;;  %v3925_v57 = vperm.slane %v3783_v31, 0  ;;  %v3926_v22 = vperm.slane %v3784_v17, 0  ;;  %v3092_v15 = vadd.f32 %v8847_v55, %v2942_v16 }
 0x45f   : > { %v3456_v58 = vmax.f32 %v3426_v36, %v3428_v13  ;;  %v8879_v1 = vpop.f32.mrf.mxu0  ;;  %v3293_v44 = vpop.f32.mrf.mxu1  ;;  %v3197_v36 = vpack.c.bf16 %v3179_v8, %v3178_v34 }
 0x460   : > { %v3984_v38 = vsel %vm3972_vm3, %v3924_v61, %v3923_v48  ;;  %v4106_v28 = vsel %vm3972_vm3, %v3925_v57, %v3924_v61  ;;  %v3361_v4 = vadd.f32 %v3293_v44, %v3092_v15 }
 0x461   : > { %v3494_v10 = vrot.slane %v3456_v58, 2  ;;  %v3495_v49 = vrot.slane %v3456_v58, 4  ;;  %v3496_v20 = vrot.slane %v3456_v58, 6  ;;  %v6782_v30 = vrot.slane %v3456_v58, 9 }
 0x462   : > { %6766 = vmatmul.msk.bf16.gmra.mxu1 %vm2381_vm15, %v3196_v25  ;;  %v3985_v11 = vsel %vm3974_vm4, %v3925_v57, %v3984_v38  ;;  %v4107_v3 = vsel %vm3974_vm4, %v3926_v22, %v4106_v28  ;;  %v3397_v6 = vadd.f32 %v8826_v42, %v3361_v4 }
 0x463   : > { %v6783_v7 = vrot.slane %v3494_v10, 9  ;;  %v6784_v32 = vrot.slane %v3495_v49, 9  ;;  %v6785_v27 = vrot.slane %v3496_v20, 9  ;;  %v3785_v5 = vmax.f32 %v3456_v58, %v6782_v30 }
 0x464   : > { %v3986_v39 = vsel %vm3976_vm5, %v3926_v22, %v3985_v11  ;;  %v3429_v12 = vmax.f32 %v3397_v6, 0.0 }
 0x465   : > { %v2944_v23 = vpop.f32.mrf.mxu3  ;;  %v3786_v63 = vmax.f32 %v3494_v10, %v6783_v7  ;;  %v3787_v33 = vmax.f32 %v3495_v49, %v6784_v32  ;;  %v3788_v37 = vmax.f32 %v3496_v20, %v6785_v27  ;;  %v3927_v54 = vperm.slane %v3785_v5, 0  ;;  %v3180_v32 = vld [vmem:[#allocation3 + $0x100] sm:$0xff]  ;;  %v3181_v27 = vld [vmem:[#allocation3 + $0x108] sm:$0xff] }
 0x466   : > { %v3094_v18 = vadd.f32 %v8865_v52, %v2944_v23 }
 0x467   : > { %v8887_v40 = vpop.f32.mrf.mxu0  ;;  %v3295_v45 = vpop.f32.mrf.mxu1  ;;  %v3928_v43 = vperm.slane %v3786_v63, 0  ;;  %v3929_v29 = vperm.slane %v3787_v33, 0  ;;  %v3987_v56 = vsel %vm3978_vm6, %v3927_v54, %v3986_v39  ;;  %v4108_v24 = vsel %vm3976_vm5, %v3927_v54, %v4107_v3 }
 0x468   : > { %v4052_v2 = vperm.slane %v3788_v37, 0  ;;  %v3362_v16 = vadd.f32 %v3295_v45, %v3094_v18  ;;  %v3198_v54 = vpack.c.bf16 %v3181_v27, %v3180_v32 }
 0x469   : > { %v3988_v51 = vsel %vm3980_vm7, %v3928_v43, %v3987_v56  ;;  %v4109_v60 = vsel %vm3978_vm6, %v3928_v43, %v4108_v24 }
 0x46a   : > { %6724 = vmatmul.msk.bf16.gmra.mxu3 %vm2381_vm15, %v3196_v25  ;;  %6745 = vmatmul.msk.bf16.gmra.mxu0 %vm2381_vm15, %v3196_v25  ;;  %v3989_v46 = vsel %vm3982_vm10, %v3929_v29, %v3988_v51  ;;  %v4110_v41 = vsel %vm3980_vm7, %v3929_v29, %v4109_v60  ;;  %v3398_v52 = vadd.f32 %v8826_v42, %v3362_v16 }
 0x46b   : > { %v4061_v19 = vsel %vm4059_vm11, %v4052_v2, %v3989_v46  ;;  %4036 = vst.msk [vmem:[#allocation4 + $0x11] sm:$0x7f] %vm2426_vm14, %v3989_v46  ;;  %v4111_v55 = vsel %vm3982_vm10, %v4052_v2, %v4110_v41 }
 0x46c   : > { %4070 = vrot.lane.b32.xlu0 %v4061_v19, %s7261_s2  ;;  %4150 = vrot.lane.b32.xlu2 %v4111_v55, %s7263_s10  ;;  %v3430_v30 = vmax.f32 %v3398_v52, 0.0 }
 0x46d   : > { %v2947_v26 = vpop.f32.mrf.mxu3 }
 0x46e   : > { %v3097_v9 = vadd.f32 %v8872_v0, %v2947_v26 }
 0x46f   : > { %v8906_v21 = vpop.f32.mrf.mxu0  ;;  %v3298_v62 = vpop.f32.mrf.mxu1 }
 0x470   : > { %v3363_v31 = vadd.f32 %v3298_v62, %v3097_v9 }
 0x472   : > { %v3399_v13 = vadd.f32 %v8826_v42, %v3363_v31  ;;  %6767 = vmatmul.msk.bf16.gmra.mxu1 %vm2381_vm15, %v3197_v36 }
 0x474   : > { %v3431_v48 = vmax.f32 %v3399_v13, 0.0 }
 0x475   : > { %v2949_v17 = vpop.f32.mrf.mxu3 }
 0x476   : > { %v3457_v61 = vmax.f32 %v3429_v12, %v3431_v48  ;;  %v3099_v0 = vadd.f32 %v8879_v1, %v2949_v17 }
 0x477   : > { %v8913_v57 = vpop.f32.mrf.mxu0  ;;  %v3300_v53 = vpop.f32.mrf.mxu1 }
 0x478   : > { %v3497_v58 = vrot.slane %v3457_v61, 2  ;;  %v3498_v44 = vrot.slane %v3457_v61, 4  ;;  %v6786_v14 = vrot.slane %v3457_v61, 9  ;;  %v3364_v50 = vadd.f32 %v3300_v53, %v3099_v0  ;;  %v3183_v53 = vld [vmem:[#allocation3 + $0x118] sm:$0xff] }
 0x479   : > { %v3499_v25 = vrot.slane %v3457_v61, 6 }
 0x47a   : > { %v6787_v38 = vrot.slane %v3497_v58, 9  ;;  %v3400_v10 = vadd.f32 %v8826_v42, %v3364_v50  ;;  %6725 = vmatmul.msk.bf16.gmra.mxu3 %vm2381_vm15, %v3197_v36  ;;  %6746 = vmatmul.msk.bf16.gmra.mxu0 %vm2381_vm15, %v3197_v36  ;;  %v6788_v49 = vrot.slane %v3498_v44, 9  ;;  %v3789_v20 = vmax.f32 %v3457_v61, %v6786_v14 }
 0x47b   : > { %v6789_v1 = vrot.slane %v3499_v25, 9 }
 0x47c   : > { %v3432_v22 = vmax.f32 %v3400_v10, 0.0  ;;  %v3790_v11 = vmax.f32 %v3497_v58, %v6787_v38  ;;  %v3791_v59 = vmax.f32 %v3498_v44, %v6788_v49  ;;  %v3930_v23 = vperm.slane %v3789_v20, 0 }
 0x47d   : > { %v2952_v7 = vpop.f32.mrf.mxu3  ;;  %v3792_v28 = vmax.f32 %v3499_v25, %v6789_v1 }
 0x47e   : > { %v3458_v5 = vmax.f32 %v3430_v30, %v3432_v22  ;;  %v3931_v35 = vperm.slane %v3790_v11, 0  ;;  %v3932_v37 = vperm.slane %v3791_v59, 0  ;;  %v3102_v13 = vadd.f32 %v8887_v40, %v2952_v7  ;;  %v3182_v40 = vld [vmem:[#allocation3 + $0x110] sm:$0xff] }
 0x47f   : > { %v3108_v63 = vpop.f32.mrf.mxu0  ;;  %v3303_v33 = vpop.f32.mrf.mxu1  ;;  %v3933_v51 = vperm.slane %v3792_v28, 0  ;;  %v3199_v50 = vpack.c.bf16 %v3183_v53, %v3182_v40 }
 0x480   : > { %v3500_v39 = vrot.slane %v3458_v5, 2  ;;  %v3501_v45 = vrot.slane %v3458_v5, 4  ;;  %v3502_v43 = vrot.slane %v3458_v5, 6  ;;  %v6790_v29 = vrot.slane %v3458_v5, 9 }
 0x481   : > { %v3990_v56 = vsel %vm3972_vm3, %v3931_v35, %v3930_v23  ;;  %v4112_v46 = vsel %vm3972_vm3, %v3932_v37, %v3931_v35  ;;  %v3365_v58 = vadd.f32 %v3303_v33, %v3102_v13 }
 0x482   : > { %6768 = vmatmul.msk.bf16.gmra.mxu1 %vm2381_vm15, %v3198_v54  ;;  %v6791_v3 = vrot.slane %v3500_v39, 9  ;;  %v6792_v15 = vrot.slane %v3501_v45, 9  ;;  %v6793_v24 = vrot.slane %v3502_v43, 9  ;;  %v3793_v2 = vmax.f32 %v3458_v5, %v6790_v29 }
 0x483   : > { %v3991_v60 = vsel %vm3974_vm4, %v3932_v37, %v3990_v56  ;;  %v4113_v18 = vsel %vm3974_vm4, %v3933_v51, %v4112_v46  ;;  %v3401_v49 = vadd.f32 %v8826_v42, %v3365_v58 }
 0x484   : > { %v3794_v41 = vmax.f32 %v3500_v39, %v6791_v3  ;;  %v3795_v19 = vmax.f32 %v3501_v45, %v6792_v15  ;;  %v3796_v55 = vmax.f32 %v3502_v43, %v6793_v24  ;;  %v3934_v26 = vperm.slane %v3793_v2, 0 }
 0x485   : > { %v2954_v4 = vpop.f32.mrf.mxu3  ;;  %v3992_v9 = vsel %vm3976_vm5, %v3933_v51, %v3991_v60  ;;  %v3433_v22 = vmax.f32 %v3401_v49, 0.0  ;;  %v4195_v60 = vld [vmem:[%s7314_s8 + $0x8] sm:$0xf]  ;;  %v7117_v49 = vld [vmem:[%s7314_s8] sm:$0xff] }
 0x486   : > { %v3935_v34 = vperm.slane %v3794_v41, 0  ;;  %v3936_v8 = vperm.slane %v3795_v19, 0  ;;  %v3993_v31 = vsel %vm3978_vm6, %v3934_v26, %v3992_v9  ;;  %v4114_v36 = vsel %vm3976_vm5, %v3934_v26, %v4113_v18 }
 0x487   : > { %v8924_v62 = vpop.f32.mrf.mxu0  ;;  %v3305_v6 = vpop.f32.mrf.mxu1  ;;  %v4053_v12 = vperm.slane %v3796_v55, 0  ;;  %v3104_v25 = vadd.f32 %v8906_v21, %v2954_v4  ;;  %v4270_v4 = vunpack.c.l.b16 %v4195_v60 }
 0x488   : > { %v3994_v16 = vsel %vm3980_vm7, %v3935_v34, %v3993_v31  ;;  %v4115_v48 = vsel %vm3978_vm6, %v3935_v34, %v4114_v36 }
 0x489   : > { %v3995_v17 = vsel %vm3982_vm10, %v3936_v8, %v3994_v16  ;;  %v4116_v61 = vsel %vm3980_vm7, %v3936_v8, %v4115_v48  ;;  %v3366_v30 = vadd.f32 %v3305_v6, %v3104_v25  ;;  %v4272_v6 = vpack.c.b16 %v4270_v4, %v4270_v4 }
 0x48a   : > { %6726 = vmatmul.msk.bf16.gmra.mxu3 %vm2381_vm15, %v3198_v54  ;;  %4037 = vst.msk [vmem:[#allocation4 + $0x19] sm:$0x7f] %vm2426_vm14, %v3995_v17  ;;  %v4062_v0 = vsel %vm4059_vm11, %v4053_v12, %v3995_v17  ;;  %v4117_v52 = vsel %vm3982_vm10, %v4053_v12, %v4116_v61 }
 0x48b   : > { %4072 = vrot.lane.b32.xlu0 %v4062_v0, %s7261_s2  ;;  %4152 = vrot.lane.b32.xlu2 %v4117_v52, %s7263_s10  ;;  %v4287_v61 = vsel %vm2909_vm9, %v4272_v6, 0 }
 0x48c   : > { %4295 = vmatpush.bf16.msra.mxu3 %v4287_v61 }
 0x48d   : > { %v2957_v44 = vpop.f32.mrf.mxu3 }
 0x48e   : > { %v3107_v14 = vadd.f32 %v8913_v57, %v2957_v44  ;;  %v3402_v57 = vadd.f32 %v8826_v42, %v3366_v30 }
 0x48f   : > { %v8941_v38 = vpop.f32.mrf.mxu0  ;;  %v3308_v10 = vpop.f32.mrf.mxu1 }
 0x490   : > { %v3367_v20 = vadd.f32 %v3308_v10, %v3107_v14  ;;  %v3434_v29 = vmax.f32 %v3402_v57, 0.0  ;;  %4296 = vmatpush.bf16.msra.mxu3 %v7117_v49 }
 0x492   : > { %v3403_v1 = vadd.f32 %v8826_v42, %v3367_v20  ;;  %6769 = vmatmul.msk.bf16.gmra.mxu1 %vm2381_vm15, %v3199_v50 }
 0x494   : > { %v3435_v11 = vmax.f32 %v3403_v1, 0.0 }
 0x495   : > { %v2959_v59 = vpop.f32.mrf.mxu3 }
 0x496   : > { %v3459_v7 = vmax.f32 %v3433_v22, %v3435_v11  ;;  %v3109_v32 = vadd.f32 %v3108_v63, %v2959_v59 }
 0x497   : > { %v8947_v27 = vpop.f32.mrf.mxu0  ;;  %v3310_v21 = vpop.f32.mrf.mxu1 }
 0x498   : > { %v3503_v5 = vrot.slane %v3459_v7, 2  ;;  %v3504_v28 = vrot.slane %v3459_v7, 4  ;;  %v6794_v35 = vrot.slane %v3459_v7, 9  ;;  %v3368_v23 = vadd.f32 %v3310_v21, %v3109_v32 }
 0x499   : > { %v3505_v33 = vrot.slane %v3459_v7, 6 }
 0x49a   : > { %v3404_v37 = vadd.f32 %v8826_v42, %v3368_v23  ;;  %v6795_v54 = vrot.slane %v3503_v5, 9  ;;  %v6796_v39 = vrot.slane %v3504_v28, 9  ;;  %v3797_v45 = vmax.f32 %v3459_v7, %v6794_v35 }
 0x49b   : > { %v6797_v43 = vrot.slane %v3505_v33, 9 }
 0x49c   : > { %v3436_v56 = vmax.f32 %v3404_v37, 0.0  ;;  %v3798_v63 = vmax.f32 %v3503_v5, %v6795_v54  ;;  %v3799_v3 = vmax.f32 %v3504_v28, %v6796_v39  ;;  %v3937_v46 = vperm.slane %v3797_v45, 0 }
 0x49d   : > { %v2962_v15 = vpop.f32.mrf.mxu3  ;;  %v3800_v51 = vmax.f32 %v3505_v33, %v6797_v43 }
 0x49e   : > { %v3460_v24 = vmax.f32 %v3434_v29, %v3436_v56  ;;  %v3938_v2 = vperm.slane %v3798_v63, 0  ;;  %v3939_v55 = vperm.slane %v3799_v3, 0  ;;  %v3112_v11 = vadd.f32 %v8924_v62, %v2962_v15 }
 0x49f   : > { %v3118_v41 = vpop.f32.mrf.mxu0  ;;  %v3313_v19 = vpop.f32.mrf.mxu1  ;;  %v3940_v16 = vperm.slane %v3800_v51, 0 }
 0x4a0   : > { %v3506_v26 = vrot.slane %v3460_v24, 2  ;;  %v3507_v34 = vrot.slane %v3460_v24, 4  ;;  %v3508_v8 = vrot.slane %v3460_v24, 6  ;;  %v6798_v9 = vrot.slane %v3460_v24, 9 }
 0x4a1   : > { %v3996_v18 = vsel %vm3972_vm3, %v3938_v2, %v3937_v46  ;;  %v4118_v48 = vsel %vm3972_vm3, %v3939_v55, %v3938_v2  ;;  %v3369_v62 = vadd.f32 %v3313_v19, %v3112_v11 }
 0x4a2   : > { %v6799_v31 = vrot.slane %v3506_v26, 9  ;;  %v6800_v36 = vrot.slane %v3507_v34, 9  ;;  %v6801_v13 = vrot.slane %v3508_v8, 9  ;;  %v3801_v12 = vmax.f32 %v3460_v24, %v6798_v9 }
 0x4a3   : > { %v3997_v17 = vsel %vm3974_vm4, %v3939_v55, %v3996_v18  ;;  %v4119_v25 = vsel %vm3974_vm4, %v3940_v16, %v4118_v48  ;;  %v3405_v54 = vadd.f32 %v8826_v42, %v3369_v62 }
 0x4a4   : > { %v3802_v0 = vmax.f32 %v3506_v26, %v6799_v31  ;;  %v3803_v52 = vmax.f32 %v3507_v34, %v6800_v36  ;;  %v3804_v40 = vmax.f32 %v3508_v8, %v6801_v13  ;;  %v3941_v58 = vperm.slane %v3801_v12, 0 }
 0x4a5   : > { %v2964_v53 = vpop.f32.mrf.mxu3  ;;  %v3998_v10 = vsel %vm3976_vm5, %v3940_v16, %v3997_v17  ;;  %v3437_v56 = vmax.f32 %v3405_v54, 0.0 }
 0x4a6   : > { %v4069_v44 = vpop.permute.xlu2 %4068  ;;  %v3942_v14 = vperm.slane %v3802_v0, 0  ;;  %v3943_v50 = vperm.slane %v3803_v52, 0  ;;  %v4120_v30 = vsel %vm3976_vm5, %v3941_v58, %v4119_v25  ;;  %v3999_v22 = vsel %vm3978_vm6, %v3941_v58, %v3998_v10 }
 0x4a7   : > { %4092 = vst.msk [vmem:[#allocation4 + $0x8] sm:$0xff] %vm2586_vm0, %v4069_v44  ;;  %v8959_v20 = vpop.f32.mrf.mxu0  ;;  %v3315_v1 = vpop.f32.mrf.mxu1  ;;  %v4054_v59 = vperm.slane %v3804_v40, 0  ;;  %v3114_v33 = vadd.f32 %v8941_v38, %v2964_v53 }
 0x4a8   : > { %v4121_v7 = vsel %vm3978_vm6, %v3942_v14, %v4120_v30  ;;  %v4000_v32 = vsel %vm3980_vm7, %v3942_v14, %v3999_v22  ;;  %v4181_v22 = vld [vmem:[#allocation4] sm:$0xff] }
 0x4a9   : > { %v4122_v57 = vsel %vm3980_vm7, %v3943_v50, %v4121_v7  ;;  %v4001_v21 = vsel %vm3982_vm10, %v3943_v50, %v4000_v32  ;;  %v3370_v29 = vadd.f32 %v3315_v1, %v3114_v33  ;;  %v7118_v33 = vld [vmem:[%s7314_s8 + $0xc] sm:$0xff] }
 0x4aa   : > { %v4123_v5 = vsel %vm3982_vm10, %v4054_v59, %v4122_v57  ;;  %4038 = vst.msk [vmem:[#allocation4 + $0x21] sm:$0x7f] %vm2426_vm14, %v4001_v21  ;;  %v4063_v28 = vsel %vm4059_vm11, %v4054_v59, %v4001_v21  ;;  %4243 = vmatpush.bf16.msrb.mxu2 %v7118_v33 }
 0x4ab   : > { %4154 = vrot.lane.b32.xlu0 %v4123_v5, %s7263_s10  ;;  %4074 = vrot.lane.b32.xlu1 %v4063_v28, %s7261_s2  ;;  %v3406_v51 = vadd.f32 %v8826_v42, %v3370_v29 }
 0x4ad   : > { %v2967_v35 = vpop.f32.mrf.mxu3  ;;  %v3438_v18 = vmax.f32 %v3406_v51, 0.0 }
 0x4ae   : > { %v3117_v23 = vadd.f32 %v8947_v27, %v2967_v35 }
 0x4af   : > { %v3318_v37 = vpop.f32.mrf.mxu1  ;;  %v8976_v45 = vpop.f32.mrf.mxu0 }
 0x4b0   : > { %v3371_v39 = vadd.f32 %v3318_v37, %v3117_v23 }
 0x4b2   : > { %v3407_v43 = vadd.f32 %v8826_v42, %v3371_v39 }
 0x4b4   : > { %v3439_v63 = vmax.f32 %v3407_v43, 0.0 }
 0x4b5   : > { %v2969_v3 = vpop.f32.mrf.mxu3 }
 0x4b6   : > { %v3461_v15 = vmax.f32 %v3437_v56, %v3439_v63  ;;  %v3119_v24 = vadd.f32 %v3118_v41, %v2969_v3 }
 0x4b7   : > { %v3320_v2 = vpop.f32.mrf.mxu1  ;;  %v3126_v8 = vpop.f32.mrf.mxu0 }
 0x4b8   : > { %v3509_v27 = vrot.slane %v3461_v15, 2  ;;  %v3510_v60 = vrot.slane %v3461_v15, 4  ;;  %v6802_v38 = vrot.slane %v3461_v15, 9  ;;  %v3372_v46 = vadd.f32 %v3320_v2, %v3119_v24 }
 0x4b9   : > { %v3511_v19 = vrot.slane %v3461_v15, 6 }
 0x4ba   : > { %v3408_v55 = vadd.f32 %v8826_v42, %v3372_v46  ;;  %v6803_v4 = vrot.slane %v3509_v27, 9  ;;  %v6804_v26 = vrot.slane %v3510_v60, 9  ;;  %v3805_v34 = vmax.f32 %v3461_v15, %v6802_v38 }
 0x4bb   : > { %v6805_v9 = vrot.slane %v3511_v19, 9 }
 0x4bc   : > { %v3440_v6 = vmax.f32 %v3408_v55, 0.0  ;;  %v3806_v31 = vmax.f32 %v3509_v27, %v6803_v4  ;;  %v3807_v41 = vmax.f32 %v3510_v60, %v6804_v26  ;;  %v3944_v17 = vperm.slane %v3805_v34, 0 }
 0x4bd   : > { %v2972_v36 = vpop.f32.mrf.mxu3  ;;  %v3808_v12 = vmax.f32 %v3511_v19, %v6805_v9 }
 0x4be   : > { %v3462_v13 = vmax.f32 %v3438_v18, %v3440_v6  ;;  %v4149_v16 = vpop.permute.xlu1 %4148  ;;  %v3945_v48 = vperm.slane %v3806_v31, 0  ;;  %v3946_v0 = vperm.slane %v3807_v41, 0  ;;  %v3122_v29 = vadd.f32 %v8959_v20, %v2972_v36 }
 0x4bf   : > { %4173 = vst.msk [vmem:[#allocation4 + $0x8] sm:$0x7f] %vm4172_vm12, %v4149_v16  ;;  %v3323_v61 = vpop.f32.mrf.mxu1  ;;  %v3947_v10 = vperm.slane %v3808_v12, 0  ;;  %v3128_v32 = vpop.f32.mrf.mxu0 }
 0x4c0   : > { %v3512_v52 = vrot.slane %v3462_v13, 2  ;;  %v3513_v40 = vrot.slane %v3462_v13, 4  ;;  %v3514_v53 = vrot.slane %v3462_v13, 6  ;;  %v6806_v58 = vrot.slane %v3462_v13, 9 }
 0x4c1   : > { %v4002_v44 = vsel %vm3972_vm3, %v3945_v48, %v3944_v17  ;;  %v4124_v1 = vsel %vm3972_vm3, %v3946_v0, %v3945_v48  ;;  %v3373_v20 = vadd.f32 %v3323_v61, %v3122_v29 }
 0x4c2   : > { %v6807_v14 = vrot.slane %v3512_v52, 9  ;;  %v6808_v50 = vrot.slane %v3513_v40, 9  ;;  %v6809_v25 = vrot.slane %v3514_v53, 9  ;;  %v3809_v49 = vmax.f32 %v3462_v13, %v6806_v58 }
 0x4c3   : > { %v4003_v30 = vsel %vm3974_vm4, %v3946_v0, %v4002_v44  ;;  %v4125_v35 = vsel %vm3974_vm4, %v3947_v10, %v4124_v1  ;;  %v3409_v19 = vadd.f32 %v8826_v42, %v3373_v20 }
 0x4c4   : > { %v3810_v11 = vmax.f32 %v3512_v52, %v6807_v14  ;;  %v3811_v59 = vmax.f32 %v3513_v40, %v6808_v50  ;;  %v3812_v7 = vmax.f32 %v3514_v53, %v6809_v25  ;;  %v3948_v21 = vperm.slane %v3809_v49, 0 }
 0x4c5   : > { %v2974_v57 = vpop.f32.mrf.mxu3  ;;  %v4004_v23 = vsel %vm3976_vm5, %v3947_v10, %v4003_v30  ;;  %v3441_v34 = vmax.f32 %v3409_v19, 0.0 }
 0x4c6   : > { %v8985_v5 = vld [vmem:[#allocation4 + $0x8] sm:$0xff]  ;;  %v3949_v28 = vperm.slane %v3810_v11, 0  ;;  %v3950_v62 = vperm.slane %v3811_v59, 0  ;;  %v4126_v39 = vsel %vm3976_vm5, %v3948_v21, %v4125_v35  ;;  %v4005_v43 = vsel %vm3978_vm6, %v3948_v21, %v4004_v23  ;;  %v4151_v11 = vpop.permute.xlu2 %4150 }
 0x4c7   : > { %v3325_v37 = vpop.f32.mrf.mxu1  ;;  %v4189_v54 = vpack.c.bf16 %v8985_v5, %v4181_v22  ;;  %v4055_v56 = vperm.slane %v3812_v7, 0  ;;  %v9004_v38 = vpop.f32.mrf.mxu0  ;;  %v3124_v4 = vadd.f32 %v8976_v45, %v2974_v57 }
 0x4c8   : > { %v4127_v63 = vsel %vm3978_vm6, %v3949_v28, %v4126_v39  ;;  %v4006_v3 = vsel %vm3980_vm7, %v3949_v28, %v4005_v43 }
 0x4c9   : > { %6849 = vmatmul.msk.bf16.vlgmr.msra.gmra.mxu3 %vm2381_vm15, %v4189_v54  ;;  %v4128_v15 = vsel %vm3980_vm7, %v3950_v62, %v4127_v63  ;;  %v4007_v24 = vsel %vm3982_vm10, %v3950_v62, %v4006_v3  ;;  %v3374_v18 = vadd.f32 %v3325_v37, %v3124_v4 }
 0x4ca   : > { %v4129_v51 = vsel %vm3982_vm10, %v4055_v56, %v4128_v15  ;;  %4039 = vst.msk [vmem:[#allocation4 + $0x29] sm:$0x7f] %vm2426_vm14, %v4007_v24  ;;  %v4064_v2 = vsel %vm4059_vm11, %v4055_v56, %v4007_v24 }
 0x4cb   : > { %4156 = vrot.lane.b32.xlu0 %v4129_v51, %s7263_s10  ;;  %4076 = vrot.lane.b32.xlu1 %v4064_v2, %s7261_s2  ;;  %v3410_v48 = vadd.f32 %v8826_v42, %v3374_v18 }
 0x4cd   : > { %v2977_v27 = vpop.f32.mrf.mxu3  ;;  %v3442_v14 = vmax.f32 %v3410_v48, 0.0 }
 0x4ce   : > { %v3127_v60 = vadd.f32 %v3126_v8, %v2977_v27 }
 0x4cf   : > { %v3328_v46 = vpop.f32.mrf.mxu1  ;;  %v9010_v17 = vpop.f32.mrf.mxu0 }
 0x4d0   : > { %v3375_v55 = vadd.f32 %v3328_v46, %v3127_v60 }
 0x4d2   : > { %v3411_v26 = vadd.f32 %v8826_v42, %v3375_v55 }
 0x4d4   : > { %v3443_v9 = vmax.f32 %v3411_v26, 0.0 }
 0x4d5   : > { %v2979_v6 = vpop.f32.mrf.mxu3 }
 0x4d6   : > { %v3463_v31 = vmax.f32 %v3441_v34, %v3443_v9  ;;  %v3129_v41 = vadd.f32 %v3128_v32, %v2979_v6 }
 0x4d7   : > { %v3330_v36 = vpop.f32.mrf.mxu1  ;;  %v3136_v23 = vpop.f32.mrf.mxu0 }
 0x4d8   : > { %v3515_v13 = vrot.slane %v3463_v31, 2  ;;  %v3516_v16 = vrot.slane %v3463_v31, 4  ;;  %v3517_v8 = vrot.slane %v3463_v31, 6  ;;  %v6810_v12 = vrot.slane %v3463_v31, 9 }
 0x4d9   : > { %v3376_v61 = vadd.f32 %v3330_v36, %v3129_v41 }
 0x4da   : > { %v6811_v0 = vrot.slane %v3515_v13, 9  ;;  %v6812_v45 = vrot.slane %v3516_v16, 9  ;;  %v3813_v52 = vmax.f32 %v3463_v31, %v6810_v12  ;;  %v6813_v40 = vrot.slane %v3517_v8, 9 }
 0x4db   : > { %v3412_v53 = vadd.f32 %v8826_v42, %v3376_v61 }
 0x4dc   : > { %v3814_v58 = vmax.f32 %v3515_v13, %v6811_v0  ;;  %v3815_v44 = vmax.f32 %v3516_v16, %v6812_v45  ;;  %v3951_v10 = vperm.slane %v3813_v52, 0  ;;  %v3816_v1 = vmax.f32 %v3517_v8, %v6813_v40  ;;  %v9038_v8 = vld [vmem:[%s7309_s3] ss:$0 sm:$0xff] }
 0x4dd   : > { %v3444_v50 = vmax.f32 %v3412_v53, 0.0  ;;  %v2982_v25 = vpop.f32.mrf.mxu3 }
 0x4de   : > { %v4071_v49 = vpop.permute.xlu0 %4070  ;;  %v3952_v30 = vperm.slane %v3814_v58, 0  ;;  %v3953_v22 = vperm.slane %v3815_v44, 0  ;;  %v3954_v62 = vperm.slane %v3816_v1, 0  ;;  %v3132_v19 = vadd.f32 %v9004_v38, %v2982_v25 }
 0x4df   : > { %v3464_v59 = vmax.f32 %v3442_v14, %v3444_v50  ;;  %4093 = vst.msk [vmem:[#allocation4 + $0x10] sm:$0xff] %vm2586_vm0, %v4071_v49  ;;  %v3333_v7 = vpop.f32.mrf.mxu1  ;;  %v3138_v41 = vpop.f32.mrf.mxu0 }
 0x4e0   : > { %4174 = vst.msk [vmem:[#allocation4 + $0x10] sm:$0x7f] %vm4172_vm12, %v4151_v11  ;;  %v4008_v32 = vsel %vm3972_vm3, %v3952_v30, %v3951_v10  ;;  %v4130_v35 = vsel %vm3972_vm3, %v3953_v22, %v3952_v30  ;;  %v3377_v38 = vadd.f32 %v3333_v7, %v3132_v19 }
 0x4e1   : > { %v3518_v42 = vrot.slane %v3464_v59, 2  ;;  %v3519_v57 = vrot.slane %v3464_v59, 4  ;;  %v3520_v21 = vrot.slane %v3464_v59, 6  ;;  %v6814_v28 = vrot.slane %v3464_v59, 9 }
 0x4e2   : > { %v4009_v43 = vsel %vm3974_vm4, %v3953_v22, %v4008_v32  ;;  %v4131_v24 = vsel %vm3974_vm4, %v3954_v62, %v4130_v35  ;;  %v3413_v12 = vadd.f32 %v9038_v8, %v3377_v38 }
 0x4e3   : > { %v6815_v33 = vrot.slane %v3518_v42, 9  ;;  %v6816_v37 = vrot.slane %v3519_v57, 9  ;;  %v6817_v54 = vrot.slane %v3520_v21, 9  ;;  %v3817_v39 = vmax.f32 %v3464_v59, %v6814_v28 }
 0x4e4   : > { %v4010_v46 = vsel %vm3976_vm5, %v3954_v62, %v4009_v43  ;;  %v3445_v45 = vmax.f32 %v3413_v12, 0.0 }
 0x4e5   : > { %v2984_v29 = vpop.f32.mrf.mxu3  ;;  %v3818_v56 = vmax.f32 %v3518_v42, %v6815_v33  ;;  %v3819_v63 = vmax.f32 %v3519_v57, %v6816_v37  ;;  %v3820_v3 = vmax.f32 %v3520_v21, %v6817_v54  ;;  %v3955_v15 = vperm.slane %v3817_v39, 0 }
 0x4e6   : > { %v3134_v61 = vadd.f32 %v9010_v17, %v2984_v29 }
 0x4e7   : > { %v3335_v51 = vpop.f32.mrf.mxu1  ;;  %v9019_v2 = vld [vmem:[#allocation4 + $0x10] sm:$0xff]  ;;  %v3956_v20 = vperm.slane %v3818_v56, 0  ;;  %v3957_v27 = vperm.slane %v3819_v63, 0  ;;  %v4132_v60 = vsel %vm3976_vm5, %v3955_v15, %v4131_v24  ;;  %v4011_v4 = vsel %vm3978_vm6, %v3955_v15, %v4010_v46  ;;  %v3141_v14 = vpop.f32.mrf.mxu0 }
 0x4e8   : > { %v4204_v55 = vpack.c.bf16 %v9019_v2, %v8985_v5  ;;  %v4056_v26 = vperm.slane %v3820_v3, 0  ;;  %v3378_v40 = vadd.f32 %v3335_v51, %v3134_v61 }
 0x4e9   : > { %v4133_v34 = vsel %vm3978_vm6, %v3956_v20, %v4132_v60  ;;  %v4012_v9 = vsel %vm3980_vm7, %v3956_v20, %v4011_v4 }
 0x4ea   : > { %6841 = vmatmul.msk.bf16.vlgmr.msrb.gmra.mxu2 %vm2381_vm15, %v4204_v55  ;;  %v4134_v18 = vsel %vm3980_vm7, %v3957_v27, %v4133_v34  ;;  %v4013_v6 = vsel %vm3982_vm10, %v3957_v27, %v4012_v9  ;;  %v3414_v30 = vadd.f32 %v9038_v8, %v3378_v40 }
 0x4eb   : > { %v4135_v31 = vsel %vm3982_vm10, %v4056_v26, %v4134_v18  ;;  %4040 = vst.msk [vmem:[#allocation4 + $0x31] sm:$0x7f] %vm2426_vm14, %v4013_v6  ;;  %v4065_v5 = vsel %vm4059_vm11, %v4056_v26, %v4013_v6 }
 0x4ec   : > { %4158 = vrot.lane.b32.xlu1 %v4135_v31, %s7263_s10  ;;  %4078 = vrot.lane.b32.xlu2 %v4065_v5, %s7261_s2  ;;  %v3446_v21 = vmax.f32 %v3414_v30, 0.0 }
 0x4ed   : > { %v2987_v36 = vpop.f32.mrf.mxu3 }
 0x4ee   : > { %v3137_v13 = vadd.f32 %v3136_v23, %v2987_v36  ;;  %v4153_v23 = vpop.permute.xlu2 %4152 }
 0x4ef   : > { %v3338_v16 = vpop.f32.mrf.mxu1  ;;  %v3143_v63 = vpop.f32.mrf.mxu0 }
 0x4f0   : > { %v3379_v48 = vadd.f32 %v3338_v16, %v3137_v13 }
 0x4f2   : > { %v3415_v0 = vadd.f32 %v9038_v8, %v3379_v48 }
 0x4f4   : > { %v3447_v52 = vmax.f32 %v3415_v0, 0.0 }
 0x4f5   : > { %v2989_v53 = vpop.f32.mrf.mxu3 }
 0x4f6   : > { %v3465_v58 = vmax.f32 %v3445_v45, %v3447_v52  ;;  %v3139_v44 = vadd.f32 %v3138_v41, %v2989_v53 }
 0x4f7   : > { %v3340_v50 = vpop.f32.mrf.mxu1  ;;  %v3146_v53 = vpop.f32.mrf.mxu0 }
 0x4f8   : > { %v3521_v25 = vrot.slane %v3465_v58, 2  ;;  %v3522_v10 = vrot.slane %v3465_v58, 4  ;;  %v3523_v49 = vrot.slane %v3465_v58, 6  ;;  %v6818_v1 = vrot.slane %v3465_v58, 9 }
 0x4f9   : > { %v3380_v22 = vadd.f32 %v3340_v50, %v3139_v44 }
 0x4fa   : > { %v6819_v11 = vrot.slane %v3521_v25, 9  ;;  %v6820_v59 = vrot.slane %v3522_v10, 9  ;;  %v3821_v17 = vmax.f32 %v3465_v58, %v6818_v1  ;;  %v6821_v7 = vrot.slane %v3523_v49, 9 }
 0x4fb   : > { %v3416_v32 = vadd.f32 %v9038_v8, %v3380_v22 }
 0x4fc   : > { %v3822_v42 = vmax.f32 %v3521_v25, %v6819_v11  ;;  %v3823_v57 = vmax.f32 %v3522_v10, %v6820_v59  ;;  %v3958_v33 = vperm.slane %v3821_v17, 0  ;;  %v3824_v37 = vmax.f32 %v3523_v49, %v6821_v7 }
 0x4fd   : > { %v3448_v28 = vmax.f32 %v3416_v32, 0.0  ;;  %v2992_v62 = vpop.f32.mrf.mxu3  ;;  %v4073_v35 = vpop.permute.xlu0 %4072 }
 0x4fe   : > { %4094 = vst.msk [vmem:[#allocation4 + $0x18] sm:$0xff] %vm2586_vm0, %v4073_v35  ;;  %v3959_v54 = vperm.slane %v3822_v42, 0  ;;  %v3960_v39 = vperm.slane %v3823_v57, 0  ;;  %v3961_v20 = vperm.slane %v3824_v37, 0  ;;  %v3142_v12 = vadd.f32 %v3141_v14, %v2992_v62 }
 0x4ff   : > { %v3466_v43 = vmax.f32 %v3446_v21, %v3448_v28  ;;  %4175 = vst.msk [vmem:[#allocation4 + $0x18] sm:$0x7f] %vm4172_vm12, %v4153_v23  ;;  %v3343_v29 = vpop.f32.mrf.mxu1  ;;  %v3148_v17 = vpop.f32.mrf.mxu0 }
 0x500   : > { %v4014_v56 = vsel %vm3972_vm3, %v3959_v54, %v3958_v33  ;;  %v4136_v27 = vsel %vm3972_vm3, %v3960_v39, %v3959_v54  ;;  %v3381_v14 = vadd.f32 %v3343_v29, %v3142_v12 }
 0x501   : > { %v3524_v3 = vrot.slane %v3466_v43, 2  ;;  %v3525_v15 = vrot.slane %v3466_v43, 4  ;;  %v3526_v24 = vrot.slane %v3466_v43, 6  ;;  %v6822_v51 = vrot.slane %v3466_v43, 9 }
 0x502   : > { %v4015_v4 = vsel %vm3974_vm4, %v3960_v39, %v4014_v56  ;;  %v4137_v5 = vsel %vm3974_vm4, %v3961_v20, %v4136_v27  ;;  %v3417_v49 = vadd.f32 %v9038_v8, %v3381_v14 }
 0x503   : > { %v6823_v60 = vrot.slane %v3524_v3, 9  ;;  %v6824_v46 = vrot.slane %v3525_v15, 9  ;;  %v6825_v19 = vrot.slane %v3526_v24, 9  ;;  %v3825_v55 = vmax.f32 %v3466_v43, %v6822_v51 }
 0x504   : > { %v4016_v16 = vsel %vm3976_vm5, %v3961_v20, %v4015_v4  ;;  %v3449_v11 = vmax.f32 %v3417_v49, 0.0 }
 0x505   : > { %v2994_v26 = vpop.f32.mrf.mxu3  ;;  %v3826_v34 = vmax.f32 %v3524_v3, %v6823_v60  ;;  %v3827_v9 = vmax.f32 %v3525_v15, %v6824_v46  ;;  %v3828_v18 = vmax.f32 %v3526_v24, %v6825_v19  ;;  %v3962_v6 = vperm.slane %v3825_v55, 0 }
 0x506   : > { %v9050_v31 = vld [vmem:[#allocation4 + $0x18] sm:$0xff]  ;;  %v3144_v30 = vadd.f32 %v3143_v63, %v2994_v26 }
 0x507   : > { %v3345_v38 = vpop.f32.mrf.mxu1  ;;  %v9055_v41 = vpack.c.bf16 %v9050_v31, %v9019_v2  ;;  %v3963_v36 = vperm.slane %v3826_v34, 0  ;;  %v3964_v13 = vperm.slane %v3827_v9, 0  ;;  %v4138_v48 = vsel %vm3976_vm5, %v3962_v6, %v4137_v5 }
 0x508   : > { %v4017_v61 = vsel %vm3978_vm6, %v3962_v6, %v4016_v16  ;;  %v4057_v0 = vperm.slane %v3828_v18, 0  ;;  %v3382_v7 = vadd.f32 %v3345_v38, %v3144_v30 }
 0x509   : > { %6850 = vmatmul.msk.bf16.gmra.mxu3 %vm2381_vm15, %v9055_v41  ;;  %v4139_v45 = vsel %vm3978_vm6, %v3963_v36, %v4138_v48  ;;  %v4018_v52 = vsel %vm3980_vm7, %v3963_v36, %v4017_v61 }
 0x50a   : > { %v4140_v2 = vsel %vm3980_vm7, %v3964_v13, %v4139_v45  ;;  %v4019_v40 = vsel %vm3982_vm10, %v3964_v13, %v4018_v52  ;;  %v3418_v33 = vadd.f32 %v9038_v8, %v3382_v7 }
 0x50b   : > { %v4141_v58 = vsel %vm3982_vm10, %v4057_v0, %v4140_v2  ;;  %4041 = vst.msk [vmem:[#allocation4 + $0x39] sm:$0x7f] %vm2426_vm14, %v4019_v40  ;;  %v4066_v44 = vsel %vm4059_vm11, %v4057_v0, %v4019_v40 }
 0x50c   : > { %4160 = vrot.lane.b32.xlu1 %v4141_v58, %s7263_s10  ;;  %4080 = vrot.lane.b32.xlu2 %v4066_v44, %s7261_s2  ;;  %v3450_v15 = vmax.f32 %v3418_v33, 0.0  ;;  %v7119_v33 = vld [vmem:[%s7314_s8 + $0x18] sm:$0xff] }
 0x50d   : > { %v2997_v50 = vpop.f32.mrf.mxu3 }
 0x50e   : > { %v3147_v25 = vadd.f32 %v3146_v53, %v2997_v50 }
 0x50f   : > { %v3348_v10 = vpop.f32.mrf.mxu1 }
 0x510   : > { %v3383_v1 = vadd.f32 %v3348_v10, %v3147_v25 }
 0x512   : > { %v3419_v22 = vadd.f32 %v9038_v8, %v3383_v1 }
 0x514   : > { %v3451_v59 = vmax.f32 %v3419_v22, 0.0 }
 0x515   : > { %v2999_v32 = vpop.f32.mrf.mxu3 }
 0x516   : > { %v3467_v42 = vmax.f32 %v3449_v11, %v3451_v59  ;;  %v3149_v57 = vadd.f32 %v3148_v17, %v2999_v32  ;;  %v6855_v32 = vld [vmem:[%s7314_s8 + $0x20] sm:$0xf] }
 0x517   : > { %v3350_v21 = vpop.f32.mrf.mxu1 }
 0x518   : > { %v3527_v28 = vrot.slane %v3467_v42, 2  ;;  %v3528_v62 = vrot.slane %v3467_v42, 4  ;;  %v3529_v35 = vrot.slane %v3467_v42, 6  ;;  %v6826_v23 = vrot.slane %v3467_v42, 9 }
 0x519   : > { %v3384_v37 = vadd.f32 %v3350_v21, %v3149_v57 }
 0x51a   : > { %v6827_v54 = vrot.slane %v3527_v28, 9  ;;  %v6828_v39 = vrot.slane %v3528_v62, 9  ;;  %v3829_v43 = vmax.f32 %v3467_v42, %v6826_v23  ;;  %v6829_v29 = vrot.slane %v3529_v35, 9 }
 0x51b   : > { %v3420_v56 = vadd.f32 %v9038_v8, %v3384_v37  ;;  %v4340_v42 = vunpack.c.l.b16 %v6855_v32 }
 0x51c   : > { %v3830_v63 = vmax.f32 %v3527_v28, %v6827_v54  ;;  %v3831_v3 = vmax.f32 %v3528_v62, %v6828_v39  ;;  %v3965_v27 = vperm.slane %v3829_v43, 0  ;;  %v3832_v60 = vmax.f32 %v3529_v35, %v6829_v29 }
 0x51d   : > { %v3452_v24 = vmax.f32 %v3420_v56, 0.0  ;;  %v4155_v51 = vpop.permute.xlu0 %4154  ;;  %v4075_v20 = vpop.permute.xlu1 %4074  ;;  %v4342_v57 = vpack.c.b16 %v4340_v42, %v4340_v42 }
 0x51e   : > { %4095 = vst.msk [vmem:[#allocation4 + $0x20] sm:$0xff] %vm2586_vm0, %v4075_v20  ;;  %v3966_v46 = vperm.slane %v3830_v63, 0  ;;  %v3967_v19 = vperm.slane %v3831_v3, 0  ;;  %v3968_v18 = vperm.slane %v3832_v60, 0  ;;  %v4326_v3 = vld [vmem:[#allocation4 + $0x48] sm:$0xff] }
 0x51f   : > { %v3468_v55 = vmax.f32 %v3450_v15, %v3452_v24  ;;  %4176 = vst.msk [vmem:[#allocation4 + $0x20] sm:$0x7f] %vm4172_vm12, %v4155_v51  ;;  %v4357_v21 = vsel %vm2909_vm9, %v4342_v57, 0 }
 0x520   : > { %v4020_v4 = vsel %vm3972_vm3, %v3966_v46, %v3965_v27  ;;  %v4142_v5 = vsel %vm3972_vm3, %v3967_v19, %v3966_v46  ;;  %4365 = vmatpush.bf16.msra.mxu2 %v4357_v21 }
 0x521   : > { %v3530_v26 = vrot.slane %v3468_v55, 2  ;;  %v3531_v34 = vrot.slane %v3468_v55, 4  ;;  %v3532_v8 = vrot.slane %v3468_v55, 6  ;;  %v6830_v9 = vrot.slane %v3468_v55, 9 }
 0x522   : > { %v4021_v6 = vsel %vm3974_vm4, %v3967_v19, %v4020_v4  ;;  %v4143_v2 = vsel %vm3974_vm4, %v3968_v18, %v4142_v5 }
 0x523   : > { %v6831_v38 = vrot.slane %v3530_v26, 9  ;;  %v6832_v36 = vrot.slane %v3531_v34, 9  ;;  %v6833_v13 = vrot.slane %v3532_v8, 9  ;;  %v3833_v16 = vmax.f32 %v3468_v55, %v6830_v9  ;;  %v4458_v55 = vld [vmem:[%s7324_s19] sm:$0xff] }
 0x524   : > { %v4022_v52 = vsel %vm3976_vm5, %v3968_v18, %v4021_v6  ;;  %4366 = vmatpush.bf16.msra.mxu2 %v7119_v33  ;;  %4477 = vmatpush.msrb.mxu3 %v4458_v55 }
 0x525   : > { %v3834_v12 = vmax.f32 %v3530_v26, %v6831_v38  ;;  %v3835_v48 = vmax.f32 %v3531_v34, %v6832_v36  ;;  %v3836_v61 = vmax.f32 %v3532_v8, %v6833_v13  ;;  %v3969_v0 = vperm.slane %v3833_v16, 0 }
 0x526   : > { %v4199_v45 = vld [vmem:[#allocation4 + $0x20] sm:$0xff]  ;;  %4500 = vmatpush.msra.mxu3 %v4458_v55 }
 0x527   : > { %v4205_v40 = vpack.c.bf16 %v4199_v45, %v9050_v31  ;;  %v3970_v53 = vperm.slane %v3834_v12, 0  ;;  %v3971_v58 = vperm.slane %v3835_v48, 0  ;;  %v4023_v44 = vsel %vm3978_vm6, %v3969_v0, %v4022_v52 }
 0x528   : > { %v4144_v14 = vsel %vm3976_vm5, %v3969_v0, %v4143_v2  ;;  %v4058_v25 = vperm.slane %v3836_v61, 0 }
 0x529   : > { %6842 = vmatmul.msk.bf16.gmra.mxu2 %vm2381_vm15, %v4205_v40  ;;  %v4024_v50 = vsel %vm3980_vm7, %v3970_v53, %v4023_v44  ;;  %v4145_v10 = vsel %vm3978_vm6, %v3970_v53, %v4144_v14 }
 0x52a   : > { %v4025_v49 = vsel %vm3982_vm10, %v3971_v58, %v4024_v50  ;;  %v4146_v1 = vsel %vm3980_vm7, %v3971_v58, %v4145_v10  ;;  %vm5435_vm7 = vcmask 261248  }
 0x52b   : > { %4042 = vst.msk [vmem:[#allocation4 + $0x41] sm:$0x7f] %vm2426_vm14, %v4025_v49  ;;  %v4067_v31 = vsel %vm4059_vm11, %v4058_v25, %v4025_v49  ;;  %v4147_v30 = vsel %vm3982_vm10, %v4058_v25, %v4146_v1  ;;  %vm5368_vm10 = vcmask 392192   ;;  %vm5468_vm11 = vcmask 392449  }
 0x52c   : > { %4082 = vrot.lane.b32.xlu0 %v4067_v31, %s7261_s2  ;;  %4162 = vrot.lane.b32.xlu2 %v4147_v30, %s7263_s10  ;;  %5369 = vst.msk [vmem:[#allocation7] sm:$0xff] %vm5368_vm10, %v9707_v47 }
 0x52d   : > { %5371 = vst.msk [vmem:[#allocation7 + $0x48] sm:$0xff] %vm5368_vm10, %v9707_v47 }
 0x53d   : > { %v4157_v22 = vpop.permute.xlu0 %4156  ;;  %v4077_v11 = vpop.permute.xlu1 %4076 }
 0x53e   : > { %4096 = vst.msk [vmem:[#allocation4 + $0x28] sm:$0xff] %vm2586_vm0, %v4077_v11 }
 0x53f   : > { %4177 = vst.msk [vmem:[#allocation4 + $0x28] sm:$0x7f] %vm4172_vm12, %v4157_v22 }
 0x546   : > { %v4079_v59 = vpop.permute.xlu2 %4078  ;;  %v4186_v17 = vld [vmem:[#allocation4 + $0x28] sm:$0xff] }
 0x547   : > { %4097 = vst.msk [vmem:[#allocation4 + $0x30] sm:$0xff] %vm2586_vm0, %v4079_v59  ;;  %v4191_v7 = vpack.c.bf16 %v4186_v17, %v4199_v45  ;;  %v7204_v45 = vld [vmem:[%s7319_s14] ss:$0 sm:$0xff] }
 0x549   : > { %6851 = vmatmul.msk.bf16.gmra.mxu3 %vm2381_vm15, %v4191_v7 }
 0x54c   : > { %v4298_v4 = vpop.f32.mrf.mxu3 }
 0x554   : > { %v4300_v26 = vpop.f32.mrf.mxu3 }
 0x55e   : > { %v4159_v28 = vpop.permute.xlu1 %4158 }
 0x55f   : > { %4178 = vst.msk [vmem:[#allocation4 + $0x30] sm:$0x7f] %vm4172_vm12, %v4159_v28 }
 0x566   : > { %v4081_v62 = vpop.permute.xlu2 %4080  ;;  %v4201_v35 = vld [vmem:[#allocation4 + $0x30] sm:$0xff] }
 0x567   : > { %4098 = vst.msk [vmem:[#allocation4 + $0x38] sm:$0xff] %vm2586_vm0, %v4081_v62  ;;  %v4206_v23 = vpack.c.bf16 %v4201_v35, %v4186_v17 }
 0x569   : > { %6843 = vmatmul.msk.bf16.gmra.mxu2 %vm2381_vm15, %v4206_v23 }
 0x56d   : > { %v4245_v24 = vpop.f32.mrf.mxu2 }
 0x56e   : > { %v4299_v16 = vadd.f32 %v4298_v4, %v4245_v24 }
 0x575   : > { %v4247_v51 = vpop.f32.mrf.mxu2 }
 0x576   : > { %v4301_v13 = vadd.f32 %v4300_v26, %v4247_v51 }
 0x57e   : > { %v4161_v37 = vpop.permute.xlu1 %4160 }
 0x57f   : > { %4179 = vst.msk [vmem:[#allocation4 + $0x38] sm:$0x7f] %vm4172_vm12, %v4161_v37 }
 0x586   : > { %v4188_v54 = vld [vmem:[#allocation4 + $0x38] sm:$0xff]  ;;  %v4163_v29 = vpop.permute.xlu2 %4162 }
 0x587   : > { %v4192_v39 = vpack.c.bf16 %v4188_v54, %v4201_v35 }
 0x589   : > { %6852 = vmatmul.msk.bf16.gmra.mxu3 %vm2381_vm15, %v4192_v39 }
 0x58c   : > { %v4303_v8 = vpop.f32.mrf.mxu3 }
 0x594   : > { %v4305_v6 = vpop.f32.mrf.mxu3 }
 0x59e   : > { %v4083_v43 = vpop.permute.xlu0 %4082 }
 0x59f   : > { %4099 = vst.msk [vmem:[#allocation4 + $0x40] sm:$0xff] %vm2586_vm0, %v4083_v43 }
 0x5a0   : > { %4180 = vst.msk [vmem:[#allocation4 + $0x40] sm:$0x7f] %vm4172_vm12, %v4163_v29  ;;  %vm5888_vm12 = vcmask 124928  }
 0x5a7   : > { %v4203_v56 = vld [vmem:[#allocation4 + $0x40] sm:$0xff] }
 0x5a8   : > { %v4207_v63 = vpack.c.bf16 %v4203_v56, %v4188_v54  ;;  %v4330_v15 = vpack.c.bf16 %v4326_v3, %v4203_v56 }
 0x5aa   : > { %6844 = vmatmul.msk.bf16.gmra.mxu2 %vm2381_vm15, %v4207_v63 }
 0x5ac   : > { %v4250_v20 = vpop.f32.mrf.mxu2 }
 0x5ad   : > { %v4304_v61 = vadd.f32 %v4303_v8, %v4250_v20 }
 0x5b4   : > { %v4252_v27 = vpop.f32.mrf.mxu2 }
 0x5b5   : > { %v4306_v52 = vadd.f32 %v4305_v6, %v4252_v27 }
 0x5ba   : > { %6860 = vmatmul.msk.bf16.vlgmr.msra.gmra.mxu2 %vm2381_vm15, %v9055_v41 }
 0x5ca   : > { %6861 = vmatmul.msk.bf16.gmra.mxu2 %vm2381_vm15, %v4191_v7 }
 0x5cc   : > { %v4308_v38 = vpop.f32.mrf.mxu3 }
 0x5d4   : > { %v4310_v12 = vpop.f32.mrf.mxu3 }
 0x5da   : > { %6862 = vmatmul.msk.bf16.gmra.mxu2 %vm2381_vm15, %v4192_v39 }
 0x5ea   : > { %6863 = vmatmul.msk.bf16.gmra.mxu2 %vm2381_vm15, %v4330_v15 }
 0x5ec   : > { %v4255_v60 = vpop.f32.mrf.mxu2 }
 0x5ed   : > { %v4309_v58 = vadd.f32 %v4308_v38, %v4255_v60 }
 0x5f4   : > { %v4257_v46 = vpop.f32.mrf.mxu2 }
 0x5f5   : > { %v4311_v50 = vadd.f32 %v4310_v12, %v4257_v46 }
 0x60c   : > { %v4313_v49 = vpop.f32.mrf.mxu3 }
 0x614   : > { %v4315_v24 = vpop.f32.mrf.mxu3 }
 0x62d   : > { %v4260_v19 = vpop.f32.mrf.mxu2 }
 0x62e   : > { %v4314_v11 = vadd.f32 %v4313_v49, %v4260_v19 }
 0x635   : > { %v4262_v41 = vpop.f32.mrf.mxu2 }
 0x636   : > { %v4316_v27 = vadd.f32 %v4315_v24, %v4262_v41 }
 0x63d   : > { %v4368_v34 = vpop.f32.mrf.mxu2 }
 0x63e   : > { %v4388_v0 = vadd.f32 %v4368_v34, %v4299_v16 }
 0x640   : > { %v9119_v14 = vadd.f32 %v7204_v45, %v4388_v0 }
 0x642   : > { %v4429_v22 = vmul.f32 %v9119_v14, %v9119_v14  ;;  %v4408_v32 = vsel %vm2044_vm8, %v9119_v14, 0.0 }
 0x644   : > { %v4437_v23 = vsel %vm2044_vm8, %v4429_v22, 0.0 }
 0x645   : > { %v4370_v9 = vpop.f32.mrf.mxu2 }
 0x646   : > { %v4389_v48 = vadd.f32 %v4370_v9, %v4301_v13 }
 0x648   : > { %v9117_v40 = vadd.f32 %v7204_v45, %v4389_v48 }
 0x64a   : > { %v4430_v1 = vmul.f32 %v9117_v40, %v9117_v40  ;;  %v4409_v59 = vsel %vm2044_vm8, %v9117_v40, 0.0 }
 0x64b   : > { %v4410_v33 = vadd.f32 %v4409_v59, %v4408_v32 }
 0x64c   : > { %v4438_v42 = vsel %vm2044_vm8, %v4430_v1, 0.0 }
 0x64d   : > { %v4373_v18 = vpop.f32.mrf.mxu2  ;;  %v4439_v29 = vadd.f32 %v4438_v42, %v4437_v23 }
 0x64e   : > { %v4390_v2 = vadd.f32 %v4373_v18, %v4304_v61 }
 0x650   : > { %v9121_v25 = vadd.f32 %v7204_v45, %v4390_v2 }
 0x652   : > { %v4431_v17 = vmul.f32 %v9121_v25, %v9121_v25  ;;  %v4411_v21 = vsel %vm2044_vm8, %v9121_v25, 0.0 }
 0x653   : > { %v4412_v56 = vadd.f32 %v4411_v21, %v4410_v33 }
 0x654   : > { %v4440_v37 = vsel %vm2044_vm8, %v4431_v17, 0.0 }
 0x655   : > { %v4375_v5 = vpop.f32.mrf.mxu2  ;;  %v4441_v51 = vadd.f32 %v4440_v37, %v4439_v29 }
 0x656   : > { %v4391_v44 = vadd.f32 %v4375_v5, %v4306_v52 }
 0x658   : > { %v9125_v31 = vadd.f32 %v7204_v45, %v4391_v44 }
 0x65a   : > { %v4432_v28 = vmul.f32 %v9125_v31, %v9125_v31  ;;  %v4413_v54 = vsel %vm2044_vm8, %v9125_v31, 0.0 }
 0x65b   : > { %v4414_v20 = vadd.f32 %v4413_v54, %v4412_v56  ;;  %v4519_v54 = vld [vmem:[%s7329_s24] sm:$0x1] }
 0x65c   : > { %v4442_v63 = vsel %vm2044_vm8, %v4432_v28, 0.0  ;;  %v4521_v56 = vld [vmem:[%s7334_s30] sm:$0x1] }
 0x65d   : > { %v4378_v36 = vpop.f32.mrf.mxu2  ;;  %v4443_v55 = vadd.f32 %v4442_v63, %v4441_v51 }
 0x65e   : > { %v4392_v10 = vadd.f32 %v4378_v36, %v4309_v58 }
 0x660   : > { %v9133_v7 = vadd.f32 %v7204_v45, %v4392_v10 }
 0x662   : > { %v4433_v39 = vmul.f32 %v9133_v7, %v9133_v7  ;;  %v4415_v3 = vsel %vm2044_vm8, %v9133_v7, 0.0 }
 0x663   : > { %v4416_v4 = vadd.f32 %v4415_v3, %v4414_v20 }
 0x664   : > { %v4444_v60 = vsel %vm2044_vm8, %v4433_v39, 0.0 }
 0x665   : > { %v4380_v53 = vpop.f32.mrf.mxu2  ;;  %v4445_v18 = vadd.f32 %v4444_v60, %v4443_v55 }
 0x666   : > { %v4393_v30 = vadd.f32 %v4380_v53, %v4311_v50 }
 0x668   : > { %v9142_v62 = vadd.f32 %v7204_v45, %v4393_v30 }
 0x66a   : > { %v4434_v15 = vmul.f32 %v9142_v62, %v9142_v62  ;;  %v4417_v46 = vsel %vm2044_vm8, %v9142_v62, 0.0 }
 0x66b   : > { %v4418_v6 = vadd.f32 %v4417_v46, %v4416_v4 }
 0x66c   : > { %v4446_v34 = vsel %vm2044_vm8, %v4434_v15, 0.0 }
 0x66d   : > { %v4383_v57 = vpop.f32.mrf.mxu2  ;;  %v4447_v38 = vadd.f32 %v4446_v34, %v4445_v18 }
 0x66e   : > { %v4394_v35 = vadd.f32 %v4383_v57, %v4314_v11 }
 0x670   : > { %v9150_v43 = vadd.f32 %v7204_v45, %v4394_v35 }
 0x672   : > { %v4435_v19 = vmul.f32 %v9150_v43, %v9150_v43  ;;  %v4419_v8 = vsel %vm2044_vm8, %v9150_v43, 0.0 }
 0x673   : > { %v4420_v36 = vadd.f32 %v4419_v8, %v4418_v6 }
 0x674   : > { %v4448_v41 = vsel %vm2044_vm8, %v4435_v19, 0.0 }
 0x675   : > { %v4385_v26 = vpop.f32.mrf.mxu2  ;;  %v4449_v12 = vadd.f32 %v4448_v41, %v4447_v38 }
 0x676   : > { %v4395_v9 = vadd.f32 %v4385_v26, %v4316_v27 }
 0x678   : > { %v4407_v5 = vadd.f32 %v7204_v45, %v4395_v9 }
 0x67a   : > { %v4421_v13 = vsel %vm2044_vm8, %v4407_v5, 0.0  ;;  %v4436_v16 = vmul.f32 %v4407_v5, %v4407_v5 }
 0x67b   : > { %v4422_v48 = vadd.f32 %v4421_v13, %v4420_v36 }
 0x67c   : > { %v4450_v61 = vsel %vm2044_vm8, %v4436_v16, 0.0 }
 0x67d   : > { %v4423_v0 = vrot.slane %v4422_v48, 4  ;;  %v4451_v52 = vadd.f32 %v4450_v61, %v4449_v12  ;;  %v7120_v61 = vld [vmem:[%s7339_s6] sm:$0xff] }
 0x67f   : > { %v4424_v2 = vadd.f32 %v4423_v0, %v4422_v48  ;;  %v4452_v53 = vrot.slane %v4451_v52, 4  ;;  %v6868_v0 = vld [vmem:[%s7339_s6 + $0x14] sm:$0xf] }
 0x681   : > { %v4425_v58 = vrot.slane %v4424_v2, 2  ;;  %v4453_v44 = vadd.f32 %v4452_v53, %v4451_v52  ;;  %v4692_v52 = vunpack.c.l.b16 %v6868_v0 }
 0x683   : > { %v4426_v50 = vadd.f32 %v4425_v58, %v4424_v2  ;;  %v4454_v10 = vrot.slane %v4453_v44, 2  ;;  %v4694_v2 = vpack.c.b16 %v4692_v52, %v4692_v52 }
 0x685   : > { %v4427_v49 = vrot.slane %v4426_v50, 1  ;;  %v4455_v45 = vadd.f32 %v4454_v10, %v4453_v44  ;;  %v4709_v53 = vsel %vm2909_vm9, %v4694_v2, 0  ;;  %v7121_v44 = vld [vmem:[%s7339_s6 + $0xc] sm:$0xff] }
 0x687   : > { %v4428_v1 = vadd.f32 %v4427_v49, %v4426_v50  ;;  %v4456_v30 = vrot.slane %v4455_v45, 1  ;;  %v6887_v50 = vld [vmem:[%s7339_s6 + $0x20] sm:$0xf] }
 0x688   : > { %v4815_v10 = vunpack.c.l.b16 %v6887_v50 }
 0x689   : > { %6864 = vmatmul.msk.f32.vlgmr.msrb.gmra.mxu3 %vm2044_vm8, %v4428_v1  ;;  %v4457_v22 = vadd.f32 %v4456_v30, %v4455_v45 }
 0x68a   : > { %4717 = vmatpush.bf16.msrb.mxu3 %v4709_v53  ;;  %v4817_v49 = vpack.c.b16 %v4815_v10, %v4815_v10 }
 0x68c   : > { %v4832_v45 = vsel %vm2909_vm9, %v4817_v49, 0 }
 0x68e   : > { %4718 = vmatpush.bf16.msrb.mxu3 %v7121_v44 }
 0x691   : > { %6865 = vmatmul.msk.f32.vlgmr.msra.gmra.mxu3 %vm2044_vm8, %v4457_v22  ;;  %vm5222_vm8 = vcmask 130048  }
 0x692   : > { %4840 = vmatpush.bf16.msra.mxu3 %v4832_v45 }
 0x70c   : > { %v4479_v11 = vpop.f32.mrf.mxu3 }
 0x70d   : > { %v4505_v59 = vmul.f32 %v4479_v11, %v4479_v11 }
 0x714   : > { %v4502_v17 = vpop.f32.mrf.mxu3 }
 0x715   : > { %v4506_v32 = vsub.f32 %v4502_v17, %v4505_v59  ;;  %v4656_v59 = vld [vmem:[#allocation5] sm:$0xff] }
 0x717   : > { %v4507_v42 = vmax.f32 %v4506_v32, 0.0 }
 0x719   : > { %v4508_v57 = vadd.f32 1e-05, %v4507_v42 }
 0x71b   : > { %7213 = vrsqrt.f32 %v4508_v57  ;;  %vm4515_vm2 = vweird.f32 %v4508_v57 }
 0x721   : > { %v7214_v21 = vpop.eup %7213 }
 0x722   : > { %v4510_v28 = vmul.f32 %v7214_v21, %v4508_v57  ;;  %vm4516_vm13 = vweird.f32 %v7214_v21 }
 0x723   : > { %vm4517_vm6 = vmor %vm4515_vm2, %vm4516_vm13  ;;  %vm5835_vm13 = vcmask 388096  }
 0x724   : > { %v4511_v35 = vmul.f32 %v7214_v21, %v4510_v28  ;;  %5836 = vst.msk [vmem:[#allocation8] sm:$0xf] %vm5835_vm13, %v9707_v47 }
 0x725   : > { %6246 = vst.msk [vmem:[#allocation9 + $0x14] sm:$0xf] %vm5835_vm13, %v9707_v47 }
 0x726   : > { %v4512_v23 = vmul.f32 0.5, %v4511_v35  ;;  %5838 = vst.msk [vmem:[#allocation8 + $0x14] sm:$0xf] %vm5835_vm13, %v9707_v47 }
 0x727   : > { %6244 = vst.msk [vmem:[#allocation9] sm:$0xf] %vm5835_vm13, %v9707_v47 }
 0x728   : > { %v4513_v33 = vsub.f32 1.5, %v4512_v23  ;;  %v7122_v23 = vld [vmem:[%s7339_s6 + $0x18] sm:$0xff] }
 0x729   : > { %4841 = vmatpush.bf16.msra.mxu3 %v7122_v23  ;;  %v5009_v23 = vld [vmem:[%s9709_s11 + $0x8] sm:$0xf] }
 0x72a   : > { %v4514_v37 = vmul.f32 %v7214_v21, %v4513_v33 }
 0x72c   : > { %v4518_v39 = vsel %vm4517_vm6, %v7214_v21, %v4514_v37 }
 0x72d   : > { %v4520_v29 = vmul.f32 %v4519_v54, %v4518_v39 }
 0x72f   : > { %v4522_v63 = vmul.f32 %v4520_v29, %v4479_v11  ;;  %v4524_v3 = vperm.slane %v4520_v29, 0 }
 0x731   : > { %v4523_v15 = vsub.f32 %v4521_v56, %v4522_v63  ;;  %v4526_v24 = vmul.f32 %v4524_v3, %v9117_v40  ;;  %v4525_v20 = vmul.f32 %v4524_v3, %v9119_v14  ;;  %v4527_v27 = vmul.f32 %v4524_v3, %v9121_v25 }
 0x732   : > { %v4528_v60 = vmul.f32 %v4524_v3, %v9125_v31  ;;  %v4529_v46 = vmul.f32 %v4524_v3, %v9133_v7  ;;  %v4530_v19 = vmul.f32 %v4524_v3, %v9142_v62  ;;  %v4532_v55 = vmul.f32 %v4524_v3, %v4407_v5 }
 0x733   : > { %v4534_v51 = vperm.slane %v4523_v15, 0  ;;  %v4531_v31 = vmul.f32 %v4524_v3, %v9150_v43  ;;  %v4670_v43 = vld [vmem:[%s7339_s6 + $0x8] sm:$0xf] }
 0x734   : > { %v4745_v13 = vunpack.c.l.b16 %v4670_v43 }
 0x735   : > { %v4537_v4 = vadd.f32 %v4534_v51, %v4526_v24  ;;  %v4536_v26 = vadd.f32 %v4534_v51, %v4525_v20  ;;  %v4538_v34 = vadd.f32 %v4534_v51, %v4527_v27  ;;  %v4539_v8 = vadd.f32 %v4534_v51, %v4528_v60 }
 0x736   : > { %v4540_v9 = vadd.f32 %v4534_v51, %v4529_v46  ;;  %v4541_v18 = vadd.f32 %v4534_v51, %v4530_v19  ;;  %v4543_v38 = vadd.f32 %v4534_v51, %v4532_v55  ;;  %v4542_v5 = vadd.f32 %v4534_v51, %v4531_v31 }
 0x737   : > { %v4545_v6 = vmax.f32 %v4537_v4, 0.0  ;;  %v4544_v40 = vmax.f32 %v4536_v26, 0.0  ;;  %v4546_v41 = vmax.f32 %v4538_v34, 0.0  ;;  %v4547_v14 = vmax.f32 %v4539_v8, 0.0  ;;  %v6917_v34 = vld [vmem:[%s9709_s11 + $0x20] sm:$0xf] }
 0x738   : > { %v4548_v25 = vmax.f32 %v4540_v9, 0.0  ;;  %v4549_v7 = vmax.f32 %v4541_v18, 0.0  ;;  %v4551_v62 = vmax.f32 %v4543_v38, 0.0  ;;  %v4550_v36 = vmax.f32 %v4542_v5, 0.0 }
 0x739   : > { %4594 = vrot.lane.b32.xlu1 %v4545_v6, %s7261_s2  ;;  %4577 = vst.msk [vmem:[#allocation5 + $0x11] sm:$0x7f] %vm2426_vm14, %v4545_v6  ;;  %4624 = vrot.lane.b32.xlu2 %v4544_v40, %s7263_s10  ;;  %v4747_v16 = vpack.c.b16 %v4745_v13, %v4745_v13  ;;  %v5154_v8 = vunpack.c.l.b16 %v6917_v34 }
 0x73a   : > { %4576 = vst.msk [vmem:[#allocation5 + $0x9] sm:$0x7f] %vm2426_vm14, %v4544_v40  ;;  %4592 = vrot.lane.b32.xlu0 %v4544_v40, %s7261_s2 }
 0x73b   : > { %4578 = vst.msk [vmem:[#allocation5 + $0x19] sm:$0x7f] %vm2426_vm14, %v4546_v41  ;;  %v4762_v48 = vsel %vm2909_vm9, %v4747_v16, 0  ;;  %v5156_v9 = vpack.c.b16 %v5154_v8, %v5154_v8 }
 0x73c   : > { %4579 = vst.msk [vmem:[#allocation5 + $0x21] sm:$0x7f] %vm2426_vm14, %v4547_v14  ;;  %4770 = vmatpush.bf16.msrb.mxu2 %v4762_v48 }
 0x73d   : > { %4580 = vst.msk [vmem:[#allocation5 + $0x29] sm:$0x7f] %vm2426_vm14, %v4548_v25  ;;  %v5171_v18 = vsel %vm2909_vm9, %v5156_v9, 0 }
 0x73e   : > { %4581 = vst.msk [vmem:[#allocation5 + $0x31] sm:$0x7f] %vm2426_vm14, %v4549_v7  ;;  %5179 = vmatpush.bf16.msrb.mxu0 %v5171_v18 }
 0x73f   : > { %4583 = vst.msk [vmem:[#allocation5 + $0x41] sm:$0x7f] %vm2426_vm14, %v4551_v62 }
 0x740   : > { %4582 = vst.msk [vmem:[#allocation5 + $0x39] sm:$0x7f] %vm2426_vm14, %v4550_v36  ;;  %4771 = vmatpush.bf16.msrb.mxu2 %v7120_v61 }
 0x741   : > { %4596 = vrot.lane.b32.xlu1 %v4546_v41, %s7261_s2  ;;  %4598 = vrot.lane.b32.xlu2 %v4547_v14, %s7261_s2 }
 0x742   : > { %4626 = vrot.lane.b32.xlu0 %v4545_v6, %s7263_s10  ;;  %v4801_v6 = vld [vmem:[#allocation5 + $0x48] sm:$0xff] }
 0x749   : > { %4630 = vrot.lane.b32.xlu1 %v4547_v14, %s7263_s10  ;;  %4600 = vrot.lane.b32.xlu2 %v4548_v25, %s7261_s2 }
 0x74a   : > { %4628 = vrot.lane.b32.xlu0 %v4546_v41, %s7263_s10 }
 0x751   : > { %4632 = vrot.lane.b32.xlu1 %v4548_v25, %s7263_s10  ;;  %4634 = vrot.lane.b32.xlu2 %v4549_v7, %s7263_s10 }
 0x752   : > { %4602 = vrot.lane.b32.xlu0 %v4549_v7, %s7261_s2 }
 0x759   : > { %4606 = vrot.lane.b32.xlu1 %v4551_v62, %s7261_s2  ;;  %4636 = vrot.lane.b32.xlu2 %v4550_v36, %s7263_s10 }
 0x75a   : > { %4604 = vrot.lane.b32.xlu0 %v4550_v36, %s7261_s2  ;;  %v7125_v36 = vld [vmem:[%s9709_s11 + $0x18] sm:$0xff] }
 0x75b   : > { %5180 = vmatpush.bf16.msrb.mxu0 %v7125_v36 }
 0x762   : > { %4638 = vrot.lane.b32.xlu0 %v4551_v62, %s7263_s10 }
 0x793   : > { %v4625_v12 = vpop.permute.xlu2 %4624 }
 0x79b   : > { %v4599_v58 = vpop.permute.xlu2 %4598 }
 0x79c   : > { %4619 = vst.msk [vmem:[#allocation5 + $0x20] sm:$0xff] %vm2586_vm0, %v4599_v58 }
 0x7a3   : > { %v4601_v1 = vpop.permute.xlu2 %4600 }
 0x7a4   : > { %4620 = vst.msk [vmem:[#allocation5 + $0x28] sm:$0xff] %vm2586_vm0, %v4601_v1 }
 0x7ab   : > { %v4595_v30 = vpop.permute.xlu1 %4594  ;;  %v4635_v33 = vpop.permute.xlu2 %4634 }
 0x7ac   : > { %4617 = vst.msk [vmem:[#allocation5 + $0x10] sm:$0xff] %vm2586_vm0, %v4595_v30  ;;  %v4593_v22 = vpop.permute.xlu0 %4592 }
 0x7ad   : > { %4616 = vst.msk [vmem:[#allocation5 + $0x8] sm:$0xff] %vm2586_vm0, %v4593_v22 }
 0x7ae   : > { %4648 = vst.msk [vmem:[#allocation5 + $0x7] sm:$0xfe] %vm2715_vm1, %v4625_v12  ;;  %v9248_v12 = vld [vmem:[%s9710_s15] ss:$0 sm:$0xff]  ;;  %s9719_s15 = sld [smem:[#allocation20_spill]] }
 0x7b3   : > { %v4597_v11 = vpop.permute.xlu1 %4596  ;;  %v4637_v15 = vpop.permute.xlu2 %4636 }
 0x7b4   : > { %4618 = vst.msk [vmem:[#allocation5 + $0x18] sm:$0xff] %vm2586_vm0, %v4597_v11  ;;  %v4627_v17 = vpop.permute.xlu0 %4626 }
 0x7b5   : > { %4649 = vst.msk [vmem:[#allocation5 + $0xf] sm:$0xfe] %vm2715_vm1, %v4627_v17  ;;  %v4657_v32 = vld [vmem:[#allocation5 + $0x8] sm:$0xff] }
 0x7b6   : > { %v4664_v42 = vpack.c.bf16 %v4657_v32, %v4656_v59 }
 0x7b8   : > { %6881 = vmatmul.msk.bf16.vlgmr.msrb.gmra.mxu2 %vm2381_vm15, %v4664_v42 }
 0x7bb   : > { %v4631_v57 = vpop.permute.xlu1 %4630 }
 0x7bc   : > { %4651 = vst.msk [vmem:[#allocation5 + $0x1f] sm:$0xfe] %vm2715_vm1, %v4631_v57  ;;  %v4629_v21 = vpop.permute.xlu0 %4628  ;;  %v4672_v28 = vld [vmem:[#allocation5 + $0x10] sm:$0xff] }
 0x7bd   : > { %4650 = vst.msk [vmem:[#allocation5 + $0x17] sm:$0xfe] %vm2715_vm1, %v4629_v21  ;;  %v4679_v35 = vpack.c.bf16 %v4672_v28, %v4657_v32 }
 0x7bf   : > { %6873 = vmatmul.msk.bf16.vlgmr.msrb.gmra.mxu3 %vm2381_vm15, %v4679_v35  ;;  %v6898_v35 = vld [vmem:[%s9709_s11 + $0x14] sm:$0xf] }
 0x7c3   : > { %v4633_v37 = vpop.permute.xlu1 %4632  ;;  %v4674_v56 = vld [vmem:[#allocation5 + $0x20] sm:$0xff] }
 0x7c4   : > { %4652 = vst.msk [vmem:[#allocation5 + $0x27] sm:$0xfe] %vm2715_vm1, %v4633_v37  ;;  %v4603_v54 = vpop.permute.xlu0 %4602  ;;  %v4659_v39 = vld [vmem:[#allocation5 + $0x18] sm:$0xff]  ;;  %v5031_v37 = vunpack.c.l.b16 %v6898_v35 }
 0x7c5   : > { %4621 = vst.msk [vmem:[#allocation5 + $0x30] sm:$0xff] %vm2586_vm0, %v4603_v54  ;;  %v4665_v29 = vpack.c.bf16 %v4659_v39, %v4672_v28  ;;  %v4680_v24 = vpack.c.bf16 %v4674_v56, %v4659_v39  ;;  %v5084_v54 = vunpack.c.l.b16 %v5009_v23  ;;  %v5274_v39 = vld [vmem:[%s9711_s16 + $0x8] sm:$0xff] }
 0x7c6   : > { %4653 = vst.msk [vmem:[#allocation5 + $0x2f] sm:$0xfe] %vm2715_vm1, %v4635_v33  ;;  %5292 = vmatpush.msra.mxu1 %v5274_v39 }
 0x7c8   : > { %6882 = vmatmul.msk.bf16.gmra.mxu2 %vm2381_vm15, %v4665_v29 }
 0x7cb   : > { %v4607_v63 = vpop.permute.xlu1 %4606  ;;  %v4661_v51 = vld [vmem:[#allocation5 + $0x28] sm:$0xff] }
 0x7cc   : > { %4623 = vst.msk [vmem:[#allocation5 + $0x40] sm:$0xff] %vm2586_vm0, %v4607_v63  ;;  %v4605_v3 = vpop.permute.xlu0 %4604  ;;  %v4666_v27 = vpack.c.bf16 %v4661_v51, %v4674_v56  ;;  %v5033_v63 = vpack.c.b16 %v5031_v37, %v5031_v37 }
 0x7cd   : > { %4622 = vst.msk [vmem:[#allocation5 + $0x38] sm:$0xff] %vm2586_vm0, %v4605_v3  ;;  %v4676_v60 = vld [vmem:[#allocation5 + $0x30] sm:$0xff]  ;;  %v5086_v3 = vpack.c.b16 %v5084_v54, %v5084_v54  ;;  %v5140_v54 = vld [vmem:[#allocation6 + $0x48] sm:$0xff] }
 0x7ce   : > { %4654 = vst.msk [vmem:[#allocation5 + $0x37] sm:$0xfe] %vm2715_vm1, %v4637_v15  ;;  %v4681_v46 = vpack.c.bf16 %v4676_v60, %v4661_v51 }
 0x7cf   : > { %6874 = vmatmul.msk.bf16.gmra.mxu3 %vm2381_vm15, %v4680_v24  ;;  %v5048_v24 = vsel %vm2909_vm9, %v5033_v63, 0  ;;  %v5101_v51 = vsel %vm2909_vm9, %v5086_v3, 0 }
 0x7d0   : > { %5056 = vmatpush.bf16.msra.mxu2 %v5048_v24  ;;  %5109 = vmatpush.bf16.msrb.mxu3 %v5101_v51 }
 0x7d4   : > { %v4639_v20 = vpop.permute.xlu0 %4638 }
 0x7d5   : > { %4655 = vst.msk [vmem:[#allocation5 + $0x3f] sm:$0xfe] %vm2715_vm1, %v4639_v20  ;;  %v4663_v19 = vld [vmem:[#allocation5 + $0x38] sm:$0xff] }
 0x7d6   : > { %v4667_v55 = vpack.c.bf16 %v4663_v19, %v4676_v60 }
 0x7d8   : > { %6883 = vmatmul.msk.bf16.gmra.mxu2 %vm2381_vm15, %v4666_v27 }
 0x7dc   : > { %v4678_v4 = vld [vmem:[#allocation5 + $0x40] sm:$0xff] }
 0x7dd   : > { %v4682_v26 = vpack.c.bf16 %v4678_v4, %v4663_v19  ;;  %v4805_v40 = vpack.c.bf16 %v4801_v6, %v4678_v4 }
 0x7df   : > { %6875 = vmatmul.msk.bf16.gmra.mxu3 %vm2381_vm15, %v4681_v46 }
 0x7e8   : > { %6884 = vmatmul.msk.bf16.gmra.mxu2 %vm2381_vm15, %v4667_v55 }
 0x7ef   : > { %6876 = vmatmul.msk.bf16.gmra.mxu3 %vm2381_vm15, %v4682_v26 }
 0x7ff   : > { %6892 = vmatmul.msk.bf16.vlgmr.msra.gmra.mxu3 %vm2381_vm15, %v4665_v29 }
 0x80f   : > { %6893 = vmatmul.msk.bf16.gmra.mxu3 %vm2381_vm15, %v4666_v27 }
 0x81f   : > { %6894 = vmatmul.msk.bf16.gmra.mxu3 %vm2381_vm15, %v4667_v55 }
 0x82f   : > { %6895 = vmatmul.msk.bf16.gmra.mxu3 %vm2381_vm15, %v4805_v40 }
 0x83b   : > { %v4773_v62 = vpop.f32.mrf.mxu2 }
 0x842   : > { %v4720_v41 = vpop.f32.mrf.mxu3 }
 0x843   : > { %v4775_v13 = vpop.f32.mrf.mxu2  ;;  %v4774_v16 = vadd.f32 %v4773_v62, %v4720_v41 }
 0x84a   : > { %v4722_v38 = vpop.f32.mrf.mxu3 }
 0x84b   : > { %v4778_v52 = vpop.f32.mrf.mxu2  ;;  %v4776_v53 = vadd.f32 %v4775_v13, %v4722_v38 }
 0x852   : > { %v4725_v14 = vpop.f32.mrf.mxu3 }
 0x853   : > { %v4780_v49 = vpop.f32.mrf.mxu2  ;;  %v4779_v1 = vadd.f32 %v4778_v52, %v4725_v14 }
 0x85a   : > { %v4727_v25 = vpop.f32.mrf.mxu3 }
 0x85b   : > { %v4781_v59 = vadd.f32 %v4780_v49, %v4727_v25  ;;  %v4783_v17 = vpop.f32.mrf.mxu2 }
 0x862   : > { %v4730_v31 = vpop.f32.mrf.mxu3 }
 0x863   : > { %v4784_v28 = vadd.f32 %v4783_v17, %v4730_v31  ;;  %v4785_v56 = vpop.f32.mrf.mxu2  ;;  %v7124_v31 = vld [vmem:[%s9709_s11 + $0xc] sm:$0xff] }
 0x864   : > { %5057 = vmatpush.bf16.msra.mxu2 %v7124_v31 }
 0x868   : > { %5315 = vmatpush.msrb.mxu2 %v5274_v39 }
 0x86a   : > { %v4732_v7 = vpop.f32.mrf.mxu3 }
 0x86b   : > { %v4786_v27 = vadd.f32 %v4785_v56, %v4732_v7  ;;  %v4788_v55 = vpop.f32.mrf.mxu2  ;;  %v7123_v7 = vld [vmem:[%s9709_s11] sm:$0xff] }
 0x86c   : > { %5110 = vmatpush.bf16.msrb.mxu3 %v7123_v7 }
 0x872   : > { %v9242_v5 = vpop.f32.mrf.mxu3 }
 0x873   : > { %v4789_v26 = vadd.f32 %v4788_v55, %v9242_v5  ;;  %v4790_v6 = vpop.f32.mrf.mxu2 }
 0x87a   : > { %v9245_v43 = vpop.f32.mrf.mxu3 }
 0x87b   : > { %v4791_v40 = vadd.f32 %v4790_v6, %v9245_v43 }
 0x882   : > { %v4843_v48 = vpop.f32.mrf.mxu3 }
 0x883   : > { %v4863_v61 = vadd.f32 %v4843_v48, %v4774_v16  ;;  %v4995_v16 = vld [vmem:[#allocation6] sm:$0xff] }
 0x885   : > { %v4875_v0 = vadd.f32 %v9248_v12, %v4863_v61 }
 0x887   : > { %v4883_v2 = vmax.f32 %v4875_v0, 0.0 }
 0x889   : > { %4915 = vst.msk [vmem:[#allocation6 + $0x9] sm:$0x7f] %vm2426_vm14, %v4883_v2  ;;  %4963 = vrot.lane.b32.xlu0 %v4883_v2, %s7263_s10  ;;  %4931 = vrot.lane.b32.xlu1 %v4883_v2, %s7261_s2 }
 0x88a   : > { %v4845_v58 = vpop.f32.mrf.mxu3 }
 0x88b   : > { %v4864_v44 = vadd.f32 %v4845_v58, %v4776_v53 }
 0x88d   : > { %v4876_v50 = vadd.f32 %v9248_v12, %v4864_v44 }
 0x88f   : > { %v4884_v10 = vmax.f32 %v4876_v50, 0.0 }
 0x891   : > { %4916 = vst.msk [vmem:[#allocation6 + $0x11] sm:$0x7f] %vm2426_vm14, %v4884_v10  ;;  %4933 = vrot.lane.b32.xlu2 %v4884_v10, %s7261_s2  ;;  %4965 = vrot.lane.b32.xlu1 %v4884_v10, %s7263_s10 }
 0x892   : > { %v4848_v45 = vpop.f32.mrf.mxu3 }
 0x893   : > { %v4865_v30 = vadd.f32 %v4848_v45, %v4779_v1 }
 0x895   : > { %v4877_v22 = vadd.f32 %v9248_v12, %v4865_v30 }
 0x897   : > { %v4885_v11 = vmax.f32 %v4877_v22, 0.0 }
 0x899   : > { %4917 = vst.msk [vmem:[#allocation6 + $0x19] sm:$0x7f] %vm2426_vm14, %v4885_v11  ;;  %4935 = vrot.lane.b32.xlu2 %v4885_v11, %s7261_s2  ;;  %4967 = vrot.lane.b32.xlu0 %v4885_v11, %s7263_s10 }
 0x89a   : > { %v4850_v32 = vpop.f32.mrf.mxu3 }
 0x89b   : > { %v4866_v42 = vadd.f32 %v4850_v32, %v4781_v59  ;;  %v5273_v59 = vld [vmem:[%s9711_s16] sm:$0xff] }
 0x89c   : > { %5293 = vmatpush.msra.mxu1 %v5273_v59  ;;  %5316 = vmatpush.msrb.mxu2 %v5273_v59 }
 0x89d   : > { %v4878_v57 = vadd.f32 %v9248_v12, %v4866_v42 }
 0x89f   : > { %v4886_v21 = vmax.f32 %v4878_v57, 0.0 }
 0x8a1   : > { %4918 = vst.msk [vmem:[#allocation6 + $0x21] sm:$0x7f] %vm2426_vm14, %v4886_v21  ;;  %4969 = vrot.lane.b32.xlu2 %v4886_v21, %s7263_s10  ;;  %4937 = vrot.lane.b32.xlu1 %v4886_v21, %s7261_s2 }
 0x8a2   : > { %v4853_v33 = vpop.f32.mrf.mxu3 }
 0x8a3   : > { %v4867_v29 = vadd.f32 %v4853_v33, %v4784_v28 }
 0x8a5   : > { %v4879_v15 = vadd.f32 %v9248_v12, %v4867_v29 }
 0x8a7   : > { %v4887_v20 = vmax.f32 %v4879_v15, 0.0 }
 0x8a9   : > { %4919 = vst.msk [vmem:[#allocation6 + $0x29] sm:$0x7f] %vm2426_vm14, %v4887_v20  ;;  %4939 = vrot.lane.b32.xlu0 %v4887_v20, %s7261_s2  ;;  %4971 = vrot.lane.b32.xlu1 %v4887_v20, %s7263_s10 }
 0x8aa   : > { %v4855_v60 = vpop.f32.mrf.mxu3 }
 0x8ab   : > { %v4868_v46 = vadd.f32 %v4855_v60, %v4786_v27 }
 0x8ad   : > { %v4880_v19 = vadd.f32 %v9248_v12, %v4868_v46 }
 0x8af   : > { %v4888_v4 = vmax.f32 %v4880_v19, 0.0 }
 0x8b1   : > { %4920 = vst.msk [vmem:[#allocation6 + $0x31] sm:$0x7f] %vm2426_vm14, %v4888_v4  ;;  %4941 = vrot.lane.b32.xlu2 %v4888_v4, %s7261_s2  ;;  %4973 = vrot.lane.b32.xlu0 %v4888_v4, %s7263_s10 }
 0x8b2   : > { %v4858_v34 = vpop.f32.mrf.mxu3 }
 0x8b3   : > { %v4869_v8 = vadd.f32 %v4858_v34, %v4789_v26 }
 0x8b5   : > { %v4881_v9 = vadd.f32 %v9248_v12, %v4869_v8 }
 0x8b7   : > { %v4889_v18 = vmax.f32 %v4881_v9, 0.0 }
 0x8b9   : > { %4921 = vst.msk [vmem:[#allocation6 + $0x39] sm:$0x7f] %vm2426_vm14, %v4889_v18  ;;  %4975 = vrot.lane.b32.xlu2 %v4889_v18, %s7263_s10  ;;  %4943 = vrot.lane.b32.xlu1 %v4889_v18, %s7261_s2 }
 0x8ba   : > { %v4860_v41 = vpop.f32.mrf.mxu3 }
 0x8bb   : > { %v4870_v38 = vadd.f32 %v4860_v41, %v4791_v40 }
 0x8bd   : > { %v4882_v14 = vadd.f32 %v9248_v12, %v4870_v38  ;;  %v7206_v38 = vld [vmem:[%s9712_s18] ss:$0 sm:$0xff]  ;;  %s9720_s18 = sld [smem:[#allocation22_spill]] }
 0x8bf   : > { %v4890_v25 = vmax.f32 %v4882_v14, 0.0 }
 0x8c1   : > { %4922 = vst.msk [vmem:[#allocation6 + $0x41] sm:$0x7f] %vm2426_vm14, %v4890_v25  ;;  %4945 = vrot.lane.b32.xlu0 %v4890_v25, %s7261_s2  ;;  %4977 = vrot.lane.b32.xlu1 %v4890_v25, %s7263_s10  ;;  %s9717_s2 = sld [smem:[#allocation19_spill]] }
 0x8eb   : > { %v4934_v62 = vpop.permute.xlu2 %4933 }
 0x8ec   : > { %4956 = vst.msk [vmem:[#allocation6 + $0x10] sm:$0xff] %vm2586_vm0, %v4934_v62 }
 0x8f3   : > { %v4936_v5 = vpop.permute.xlu2 %4935 }
 0x8f4   : > { %4957 = vst.msk [vmem:[#allocation6 + $0x18] sm:$0xff] %vm2586_vm0, %v4936_v5 }
 0x8fb   : > { %v4964_v36 = vpop.permute.xlu0 %4963  ;;  %v4932_v43 = vpop.permute.xlu1 %4931 }
 0x8fc   : > { %4955 = vst.msk [vmem:[#allocation6 + $0x8] sm:$0xff] %vm2586_vm0, %v4932_v43  ;;  %v4970_v13 = vpop.permute.xlu2 %4969 }
 0x8fd   : > { %4987 = vst.msk [vmem:[#allocation6 + $0x7] sm:$0xfe] %vm2715_vm1, %v4964_v36 }
 0x903   : > { %v4966_v12 = vpop.permute.xlu1 %4965 }
 0x904   : > { %4988 = vst.msk [vmem:[#allocation6 + $0xf] sm:$0xfe] %vm2715_vm1, %v4966_v12  ;;  %v4996_v48 = vld [vmem:[#allocation6 + $0x8] sm:$0xff] }
 0x905   : > { %v5003_v61 = vpack.c.bf16 %v4996_v48, %v4995_v16 }
 0x907   : > { %6911 = vmatmul.msk.bf16.vlgmr.msrb.gmra.mxu3 %vm2381_vm15, %v5003_v61 }
 0x90b   : > { %v4942_v0 = vpop.permute.xlu2 %4941  ;;  %v4968_v52 = vpop.permute.xlu0 %4967  ;;  %v5011_v2 = vld [vmem:[#allocation6 + $0x10] sm:$0xff] }
 0x90c   : > { %4960 = vst.msk [vmem:[#allocation6 + $0x30] sm:$0xff] %vm2586_vm0, %v4942_v0  ;;  %v5018_v53 = vpack.c.bf16 %v5011_v2, %v4996_v48 }
 0x90d   : > { %4989 = vst.msk [vmem:[#allocation6 + $0x17] sm:$0xfe] %vm2715_vm1, %v4968_v52 }
 0x90e   : > { %6903 = vmatmul.msk.bf16.vlgmr.msra.gmra.mxu2 %vm2381_vm15, %v5018_v53 }
 0x913   : > { %v4938_v58 = vpop.permute.xlu1 %4937  ;;  %v4976_v42 = vpop.permute.xlu2 %4975 }
 0x914   : > { %4958 = vst.msk [vmem:[#allocation6 + $0x20] sm:$0xff] %vm2586_vm0, %v4938_v58  ;;  %v5134_v44 = vld [vmem:[#allocation6 + $0x18] sm:$0xff] }
 0x915   : > { %4990 = vst.msk [vmem:[#allocation6 + $0x1f] sm:$0xfe] %vm2715_vm1, %v4970_v13  ;;  %v5141_v50 = vpack.c.bf16 %v5134_v44, %v5011_v2 }
 0x917   : > { %6922 = vmatmul.msk.bf16.vlgmr.msrb.gmra.mxu0 %vm2381_vm15, %v5141_v50  ;;  %6912 = vmatmul.msk.bf16.gmra.mxu3 %vm2381_vm15, %v5141_v50 }
 0x91b   : > { %v4940_v10 = vpop.permute.xlu0 %4939  ;;  %v4972_v49 = vpop.permute.xlu1 %4971 }
 0x91c   : > { %4959 = vst.msk [vmem:[#allocation6 + $0x28] sm:$0xff] %vm2586_vm0, %v4940_v10  ;;  %v5013_v1 = vld [vmem:[#allocation6 + $0x20] sm:$0xff] }
 0x91d   : > { %4991 = vst.msk [vmem:[#allocation6 + $0x27] sm:$0xfe] %vm2715_vm1, %v4972_v49  ;;  %v5019_v45 = vpack.c.bf16 %v5013_v1, %v5134_v44 }
 0x91f   : > { %6904 = vmatmul.msk.bf16.gmra.mxu2 %vm2381_vm15, %v5019_v45 }
 0x923   : > { %v4974_v30 = vpop.permute.xlu0 %4973 }
 0x924   : > { %4992 = vst.msk [vmem:[#allocation6 + $0x2f] sm:$0xfe] %vm2715_vm1, %v4974_v30  ;;  %v5000_v22 = vld [vmem:[#allocation6 + $0x28] sm:$0xff] }
 0x925   : > { %v5005_v11 = vpack.c.bf16 %v5000_v22, %v5013_v1 }
 0x927   : > { %6923 = vmatmul.msk.bf16.gmra.mxu0 %vm2381_vm15, %v5005_v11  ;;  %6913 = vmatmul.msk.bf16.gmra.mxu3 %vm2381_vm15, %v5005_v11 }
 0x92b   : > { %v4944_v17 = vpop.permute.xlu1 %4943  ;;  %v5015_v32 = vld [vmem:[#allocation6 + $0x30] sm:$0xff] }
 0x92c   : > { %4961 = vst.msk [vmem:[#allocation6 + $0x38] sm:$0xff] %vm2586_vm0, %v4944_v17  ;;  %v5020_v57 = vpack.c.bf16 %v5015_v32, %v5000_v22 }
 0x92d   : > { %4993 = vst.msk [vmem:[#allocation6 + $0x37] sm:$0xfe] %vm2715_vm1, %v4976_v42 }
 0x92f   : > { %6905 = vmatmul.msk.bf16.gmra.mxu2 %vm2381_vm15, %v5020_v57 }
 0x933   : > { %v4946_v21 = vpop.permute.xlu0 %4945  ;;  %v4978_v28 = vpop.permute.xlu1 %4977 }
 0x934   : > { %4962 = vst.msk [vmem:[#allocation6 + $0x40] sm:$0xff] %vm2586_vm0, %v4946_v21  ;;  %v5002_v35 = vld [vmem:[#allocation6 + $0x38] sm:$0xff]  ;;  %vm5372_vm0 = vcmask 385024  }
 0x935   : > { %4994 = vst.msk [vmem:[#allocation6 + $0x3f] sm:$0xfe] %vm2715_vm1, %v4978_v28  ;;  %v5006_v23 = vpack.c.bf16 %v5002_v35, %v5015_v32  ;;  %vm5394_vm1 = vcmask 129024  }
 0x936   : > { %5374 = vst.msk [vmem:[#allocation7 + $0x8] sm:$0x1] %vm5372_vm0, %v9707_v47 }
 0x937   : > { %6924 = vmatmul.msk.bf16.gmra.mxu0 %vm2381_vm15, %v5006_v23  ;;  %6914 = vmatmul.msk.bf16.gmra.mxu3 %vm2381_vm15, %v5006_v23  ;;  %5384 = vst.msk [vmem:[#allocation7 + $0xf] sm:$0x1] %vm5372_vm0, %v9707_v47 }
 0x938   : > { %5375 = vst.msk [vmem:[#allocation7 + $0x10] sm:$0x1] %vm5372_vm0, %v9707_v47 }
 0x939   : > { %5376 = vst.msk [vmem:[#allocation7 + $0x18] sm:$0x1] %vm5372_vm0, %v9707_v47 }
 0x93a   : > { %5377 = vst.msk [vmem:[#allocation7 + $0x20] sm:$0x1] %vm5372_vm0, %v9707_v47 }
 0x93b   : > { %5378 = vst.msk [vmem:[#allocation7 + $0x28] sm:$0x1] %vm5372_vm0, %v9707_v47 }
 0x93c   : > { %v5017_v33 = vld [vmem:[#allocation6 + $0x40] sm:$0xff]  ;;  %5379 = vst.msk [vmem:[#allocation7 + $0x30] sm:$0x1] %vm5372_vm0, %v9707_v47 }
 0x93d   : > { %v5021_v37 = vpack.c.bf16 %v5017_v33, %v5002_v35  ;;  %v5144_v39 = vpack.c.bf16 %v5140_v54, %v5017_v33  ;;  %5380 = vst.msk [vmem:[#allocation7 + $0x38] sm:$0x1] %vm5372_vm0, %v9707_v47 }
 0x93e   : > { %5381 = vst.msk [vmem:[#allocation7 + $0x40] sm:$0x1] %vm5372_vm0, %v9707_v47 }
 0x93f   : > { %6906 = vmatmul.msk.bf16.gmra.mxu2 %vm2381_vm15, %v5021_v37  ;;  %5385 = vst.msk [vmem:[#allocation7 + $0x17] sm:$0x1] %vm5372_vm0, %v9707_v47 }
 0x940   : > { %5386 = vst.msk [vmem:[#allocation7 + $0x1f] sm:$0x1] %vm5372_vm0, %v9707_v47 }
 0x941   : > { %5387 = vst.msk [vmem:[#allocation7 + $0x27] sm:$0x1] %vm5372_vm0, %v9707_v47 }
 0x942   : > { %5388 = vst.msk [vmem:[#allocation7 + $0x2f] sm:$0x1] %vm5372_vm0, %v9707_v47 }
 0x943   : > { %5389 = vst.msk [vmem:[#allocation7 + $0x37] sm:$0x1] %vm5372_vm0, %v9707_v47 }
 0x944   : > { %5390 = vst.msk [vmem:[#allocation7 + $0x3f] sm:$0x1] %vm5372_vm0, %v9707_v47 }
 0x945   : > { %5391 = vst.msk [vmem:[#allocation7 + $0x47] sm:$0x1] %vm5372_vm0, %v9707_v47 }
 0x946   : > { %5840 = vst.msk [vmem:[#allocation8 + $0x4] sm:$0x1] %vm5372_vm0, %v9707_v47 }
 0x947   : > { %6925 = vmatmul.msk.bf16.gmra.mxu0 %vm2381_vm15, %v5144_v39  ;;  %5841 = vst.msk [vmem:[#allocation8 + $0x8] sm:$0x1] %vm5372_vm0, %v9707_v47 }
 0x948   : > { %5842 = vst.msk [vmem:[#allocation8 + $0xc] sm:$0x1] %vm5372_vm0, %v9707_v47 }
 0x949   : > { %5843 = vst.msk [vmem:[#allocation8 + $0x10] sm:$0x1] %vm5372_vm0, %v9707_v47 }
 0x94a   : > { %5846 = vst.msk [vmem:[#allocation8 + $0x7] sm:$0x1] %vm5372_vm0, %v9707_v47 }
 0x94b   : > { %5847 = vst.msk [vmem:[#allocation8 + $0xb] sm:$0x1] %vm5372_vm0, %v9707_v47 }
 0x94c   : > { %5848 = vst.msk [vmem:[#allocation8 + $0xf] sm:$0x1] %vm5372_vm0, %v9707_v47 }
 0x94d   : > { %5849 = vst.msk [vmem:[#allocation8 + $0x13] sm:$0x1] %vm5372_vm0, %v9707_v47 }
 0x94e   : > { %6248 = vst.msk [vmem:[#allocation9 + $0x4] sm:$0x1] %vm5372_vm0, %v9707_v47 }
 0x94f   : > { %6249 = vst.msk [vmem:[#allocation9 + $0x8] sm:$0x1] %vm5372_vm0, %v9707_v47 }
 0x950   : > { %6250 = vst.msk [vmem:[#allocation9 + $0xc] sm:$0x1] %vm5372_vm0, %v9707_v47 }
 0x951   : > { %6251 = vst.msk [vmem:[#allocation9 + $0x10] sm:$0x1] %vm5372_vm0, %v9707_v47 }
 0x952   : > { %6254 = vst.msk [vmem:[#allocation9 + $0x7] sm:$0x1] %vm5372_vm0, %v9707_v47 }
 0x953   : > { %6255 = vst.msk [vmem:[#allocation9 + $0xb] sm:$0x1] %vm5372_vm0, %v9707_v47 }
 0x954   : > { %6256 = vst.msk [vmem:[#allocation9 + $0xf] sm:$0x1] %vm5372_vm0, %v9707_v47 }
 0x955   : > { %6257 = vst.msk [vmem:[#allocation9 + $0x13] sm:$0x1] %vm5372_vm0, %v9707_v47 }
 0x956   : > { %5373 = vst.msk [vmem:[#allocation7] sm:$0x1] %vm5372_vm0, %v9707_v47 }
 0x957   : > { %5383 = vst.msk [vmem:[#allocation7 + $0x7] sm:$0x1] %vm5372_vm0, %v9707_v47 }
 0x958   : > { %5382 = vst.msk [vmem:[#allocation7 + $0x48] sm:$0x1] %vm5372_vm0, %v9707_v47 }
 0x959   : > { %5392 = vst.msk [vmem:[#allocation7 + $0x4f] sm:$0x1] %vm5372_vm0, %v9707_v47 }
 0x95a   : > { %5839 = vst.msk [vmem:[#allocation8] sm:$0x1] %vm5372_vm0, %v9707_v47 }
 0x95b   : > { %5845 = vst.msk [vmem:[#allocation8 + $0x3] sm:$0x1] %vm5372_vm0, %v9707_v47 }
 0x95c   : > { %6252 = vst.msk [vmem:[#allocation9 + $0x14] sm:$0x1] %vm5372_vm0, %v9707_v47 }
 0x95d   : > { %6258 = vst.msk [vmem:[#allocation9 + $0x17] sm:$0x1] %vm5372_vm0, %v9707_v47 }
 0x95e   : > { %5844 = vst.msk [vmem:[#allocation8 + $0x14] sm:$0x1] %vm5372_vm0, %v9707_v47 }
 0x95f   : > { %5850 = vst.msk [vmem:[#allocation8 + $0x17] sm:$0x1] %vm5372_vm0, %v9707_v47 }
 0x960   : > { %6247 = vst.msk [vmem:[#allocation9] sm:$0x1] %vm5372_vm0, %v9707_v47 }
 0x961   : > { %6253 = vst.msk [vmem:[#allocation9 + $0x3] sm:$0x1] %vm5372_vm0, %v9707_v47  ;;  %v7142_v47 = vld [vmem:[%s9717_s2 + $0x38] sm:$0xff] }
 0x98a   : > { %v5112_v29 = vpop.f32.mrf.mxu3 }
 0x991   : > { %v5059_v56 = vpop.f32.mrf.mxu2 }
 0x992   : > { %v5114_v63 = vpop.f32.mrf.mxu3  ;;  %v5113_v8 = vadd.f32 %v5112_v29, %v5059_v56 }
 0x994   : > { %v5182_v3 = vpop.f32.mrf.mxu0 }
 0x995   : > { %v5202_v41 = vadd.f32 %v5182_v3, %v5113_v8 }
 0x997   : > { %v9323_v43 = vadd.f32 %v7206_v38, %v5202_v41 }
 0x999   : > { %v5061_v15 = vpop.f32.mrf.mxu2  ;;  %v5244_v52 = vmul.f32 %v9323_v43, %v9323_v43  ;;  %v5223_v10 = vsel %vm5222_vm8, %v9323_v43, 0.0 }
 0x99a   : > { %v5117_v24 = vpop.f32.mrf.mxu3  ;;  %v5115_v26 = vadd.f32 %v5114_v63, %v5061_v15 }
 0x99b   : > { %v5252_v59 = vsel %vm5222_vm8, %v5244_v52, 0.0 }
 0x99c   : > { %v5184_v51 = vpop.f32.mrf.mxu0 }
 0x99d   : > { %v5203_v6 = vadd.f32 %v5184_v51, %v5115_v26 }
 0x99f   : > { %v9321_v7 = vadd.f32 %v7206_v38, %v5203_v6 }
 0x9a1   : > { %v5245_v12 = vmul.f32 %v9321_v7, %v9321_v7  ;;  %v5224_v53 = vsel %vm5222_vm8, %v9321_v7, 0.0 }
 0x9a2   : > { %v5064_v20 = vpop.f32.mrf.mxu2  ;;  %v5119_v27 = vpop.f32.mrf.mxu3  ;;  %v5225_v17 = vadd.f32 %v5224_v53, %v5223_v10 }
 0x9a3   : > { %v5118_v18 = vadd.f32 %v5117_v24, %v5064_v20  ;;  %v5253_v49 = vsel %vm5222_vm8, %v5245_v12, 0.0 }
 0x9a4   : > { %v5187_v60 = vpop.f32.mrf.mxu0  ;;  %v5254_v28 = vadd.f32 %v5253_v49, %v5252_v59 }
 0x9a5   : > { %v5204_v25 = vadd.f32 %v5187_v60, %v5118_v18 }
 0x9a7   : > { %v9325_v13 = vadd.f32 %v7206_v38, %v5204_v25 }
 0x9a9   : > { %v5246_v58 = vmul.f32 %v9325_v13, %v9325_v13  ;;  %v5226_v45 = vsel %vm5222_vm8, %v9325_v13, 0.0 }
 0x9aa   : > { %v5066_v46 = vpop.f32.mrf.mxu2  ;;  %v5122_v19 = vpop.f32.mrf.mxu3  ;;  %v5227_v35 = vadd.f32 %v5226_v45, %v5225_v17 }
 0x9ab   : > { %v5120_v40 = vadd.f32 %v5119_v27, %v5066_v46  ;;  %v5255_v32 = vsel %vm5222_vm8, %v5246_v58, 0.0 }
 0x9ac   : > { %v5189_v55 = vpop.f32.mrf.mxu0  ;;  %v5256_v54 = vadd.f32 %v5255_v32, %v5254_v28 }
 0x9ad   : > { %v5205_v5 = vadd.f32 %v5189_v55, %v5120_v40 }
 0x9af   : > { %v9329_v61 = vadd.f32 %v7206_v38, %v5205_v5 }
 0x9b1   : > { %v5247_v30 = vmul.f32 %v9329_v61, %v9329_v61  ;;  %v5228_v42 = vsel %vm5222_vm8, %v9329_v61, 0.0 }
 0x9b2   : > { %v5069_v4 = vpop.f32.mrf.mxu2  ;;  %v5124_v9 = vpop.f32.mrf.mxu3  ;;  %v5229_v39 = vadd.f32 %v5228_v42, %v5227_v35 }
 0x9b3   : > { %v5123_v31 = vadd.f32 %v5122_v19, %v5069_v4  ;;  %v5257_v23 = vsel %vm5222_vm8, %v5247_v30, 0.0 }
 0x9b4   : > { %v5192_v34 = vpop.f32.mrf.mxu0  ;;  %v5258_v51 = vadd.f32 %v5257_v23, %v5256_v54  ;;  %v5337_v23 = vld [vmem:[%s9714_s22] sm:$0x1]  ;;  %s9722_s22 = sld [smem:[#allocation24_spill]] }
 0x9b5   : > { %v5206_v16 = vadd.f32 %v5192_v34, %v5123_v31 }
 0x9b7   : > { %v9337_v44 = vadd.f32 %v7206_v38, %v5206_v16 }
 0x9b9   : > { %v5248_v57 = vmul.f32 %v9337_v44, %v9337_v44  ;;  %v5230_v33 = vsel %vm5222_vm8, %v9337_v44, 0.0 }
 0x9ba   : > { %v5071_v14 = vpop.f32.mrf.mxu2  ;;  %v5127_v48 = vpop.f32.mrf.mxu3  ;;  %v5231_v20 = vadd.f32 %v5230_v33, %v5229_v39 }
 0x9bb   : > { %v5125_v36 = vadd.f32 %v5124_v9, %v5071_v14  ;;  %v5259_v63 = vsel %vm5222_vm8, %v5248_v57, 0.0  ;;  %v5335_v57 = vld [vmem:[%s9713_s23] sm:$0x1]  ;;  %s9721_s23 = sld [smem:[#allocation23_spill]] }
 0x9bc   : > { %v5194_v62 = vpop.f32.mrf.mxu0  ;;  %v5260_v55 = vadd.f32 %v5259_v63, %v5258_v51 }
 0x9bd   : > { %v5207_v0 = vadd.f32 %v5194_v62, %v5125_v36 }
 0x9bf   : > { %v9346_v22 = vadd.f32 %v7206_v38, %v5207_v0 }
 0x9c1   : > { %v5249_v37 = vmul.f32 %v9346_v22, %v9346_v22  ;;  %v5232_v3 = vsel %vm5222_vm8, %v9346_v22, 0.0 }
 0x9c2   : > { %v5074_v2 = vpop.f32.mrf.mxu2  ;;  %v5129_v29 = vpop.f32.mrf.mxu3  ;;  %v5233_v4 = vadd.f32 %v5232_v3, %v5231_v20 }
 0x9c3   : > { %v5128_v50 = vadd.f32 %v5127_v48, %v5074_v2  ;;  %v5261_v60 = vsel %vm5222_vm8, %v5249_v37, 0.0 }
 0x9c4   : > { %v5197_v1 = vpop.f32.mrf.mxu0  ;;  %v5262_v8 = vadd.f32 %v5261_v60, %v5260_v55  ;;  %v7134_v60 = vld [vmem:[%s9715_s26 + $0x40] sm:$0xff] }
 0x9c5   : > { %v5208_v11 = vadd.f32 %v5197_v1, %v5128_v50  ;;  %5687 = vmatpush.bf16.msra.mxu3 %v7134_v60 }
 0x9c7   : > { %v9354_v21 = vadd.f32 %v7206_v38, %v5208_v11 }
 0x9c9   : > { %v5250_v15 = vmul.f32 %v9354_v21, %v9354_v21  ;;  %v5234_v46 = vsel %vm5222_vm8, %v9354_v21, 0.0 }
 0x9ca   : > { %v5076_v56 = vpop.f32.mrf.mxu2  ;;  %v5235_v9 = vadd.f32 %v5234_v46, %v5233_v4 }
 0x9cb   : > { %v5130_v24 = vadd.f32 %v5129_v29, %v5076_v56  ;;  %v5263_v26 = vsel %vm5222_vm8, %v5250_v15, 0.0 }
 0x9cc   : > { %v5199_v27 = vpop.f32.mrf.mxu0  ;;  %v5264_v40 = vadd.f32 %v5263_v26, %v5262_v8 }
 0x9cd   : > { %v5209_v19 = vadd.f32 %v5199_v27, %v5130_v24 }
 0x9cf   : > { %v9370_v34 = vadd.f32 %v7206_v38, %v5209_v19 }
 0x9d1   : > { %v5236_v18 = vsel %vm5222_vm8, %v9370_v34, 0.0  ;;  %v5251_v6 = vmul.f32 %v9370_v34, %v9370_v34 }
 0x9d2   : > { %v5237_v41 = vadd.f32 %v5236_v18, %v5235_v9  ;;  %v7133_v18 = vld [vmem:[%s9715_s26 + $0x38] sm:$0xff] }
 0x9d3   : > { %v5265_v14 = vsel %vm5222_vm8, %v5251_v6, 0.0  ;;  %5688 = vmatpush.bf16.msra.mxu3 %v7133_v18  ;;  %v7132_v6 = vld [vmem:[%s9715_s26 + $0x30] sm:$0xff] }
 0x9d4   : > { %v5238_v25 = vrot.slane %v5237_v41, 4  ;;  %v5266_v31 = vadd.f32 %v5265_v14, %v5264_v40  ;;  %v7128_v40 = vld [vmem:[%s9715_s26 + $0x10] sm:$0xff]  ;;  %v7131_v14 = vld [vmem:[%s9715_s26 + $0x28] sm:$0xff] }
 0x9d5   : > { %5608 = vmatpush.bf16.msra.mxu2 %v7128_v40  ;;  %5549 = vmatpush.bf16.msrb.mxu1 %v7131_v14 }
 0x9d6   : > { %v5239_v62 = vadd.f32 %v5238_v25, %v5237_v41  ;;  %v5267_v5 = vrot.slane %v5266_v31, 4  ;;  %v7127_v41 = vld [vmem:[%s9715_s26 + $0x8] sm:$0xff]  ;;  %v7126_v25 = vld [vmem:[%s9715_s26] sm:$0xff] }
 0x9d7   : > { %5689 = vmatpush.bf16.msra.mxu3 %v7132_v6 }
 0x9d8   : > { %v5240_v36 = vrot.slane %v5239_v62, 2  ;;  %v5268_v16 = vadd.f32 %v5267_v5, %v5266_v31  ;;  %v7129_v5 = vld [vmem:[%s9715_s26 + $0x18] sm:$0xff] }
 0x9d9   : > { %5609 = vmatpush.bf16.msra.mxu2 %v7127_v41 }
 0x9da   : > { %v5241_v38 = vadd.f32 %v5240_v36, %v5239_v62  ;;  %v5269_v12 = vrot.slane %v5268_v16, 2  ;;  %v7130_v62 = vld [vmem:[%s9715_s26 + $0x20] sm:$0xff] }
 0x9db   : > { %5550 = vmatpush.bf16.msrb.mxu1 %v7130_v62 }
 0x9dc   : > { %v5242_v48 = vrot.slane %v5241_v38, 1  ;;  %v5270_v0 = vadd.f32 %v5269_v12, %v5268_v16 }
 0x9dd   : > { %5610 = vmatpush.bf16.msra.mxu2 %v7126_v25 }
 0x9de   : > { %v5243_v52 = vadd.f32 %v5242_v48, %v5241_v38  ;;  %v5271_v2 = vrot.slane %v5270_v0, 1  ;;  %v5477_v48 = vld [vmem:[#allocation7] sm:$0xff] }
 0x9df   : > { %5551 = vmatpush.bf16.msrb.mxu1 %v7129_v5 }
 0x9e0   : > { %v5272_v53 = vadd.f32 %v5271_v2, %v5270_v0  ;;  %6926 = vmatmul.msk.f32.vlgmr.msra.gmra.mxu1 %vm5222_vm8, %v5243_v52 }
 0x9e2   : > { %6927 = vmatmul.msk.f32.vlgmr.msrb.gmra.mxu2 %vm5222_vm8, %v5272_v53 }
 0xa5d   : > { %v5295_v58 = vpop.f32.mrf.mxu1 }
 0xa5e   : > { %v5321_v50 = vmul.f32 %v5295_v58, %v5295_v58 }
 0xa65   : > { %v5318_v10 = vpop.f32.mrf.mxu2 }
 0xa66   : > { %v5322_v49 = vsub.f32 %v5318_v10, %v5321_v50 }
 0xa68   : > { %v5323_v1 = vmax.f32 %v5322_v49, 0.0 }
 0xa6a   : > { %v5324_v45 = vadd.f32 1e-05, %v5323_v1 }
 0xa6c   : > { %7215 = vrsqrt.f32 %v5324_v45  ;;  %vm5331_vm14 = vweird.f32 %v5324_v45 }
 0xa72   : > { %v7216_v30 = vpop.eup %7215 }
 0xa73   : > { %v5326_v11 = vmul.f32 %v7216_v30, %v5324_v45  ;;  %vm5332_vm9 = vweird.f32 %v7216_v30 }
 0xa74   : > { %vm5333_vm15 = vmor %vm5331_vm14, %vm5332_vm9  ;;  %vm6314_vm9 = vcmask 388353   ;;  %vm6550_vm14 = vcmask 0  }
 0xa75   : > { %v5327_v59 = vmul.f32 %v7216_v30, %v5326_v11 }
 0xa77   : > { %v5328_v17 = vmul.f32 0.5, %v5327_v59 }
 0xa79   : > { %v5329_v32 = vsub.f32 1.5, %v5328_v17 }
 0xa7b   : > { %v5330_v42 = vmul.f32 %v7216_v30, %v5329_v32 }
 0xa7d   : > { %v5334_v28 = vsel %vm5333_vm15, %v7216_v30, %v5330_v42 }
 0xa7e   : > { %v5336_v35 = vmul.f32 %v5335_v57, %v5334_v28 }
 0xa80   : > { %v5338_v33 = vmul.f32 %v5336_v35, %v5295_v58  ;;  %v5340_v37 = vperm.slane %v5336_v35, 0 }
 0xa82   : > { %v5339_v54 = vsub.f32 %v5337_v23, %v5338_v33  ;;  %v5342_v29 = vmul.f32 %v5340_v37, %v9321_v7  ;;  %v5341_v56 = vmul.f32 %v5340_v37, %v9323_v43  ;;  %v5343_v51 = vmul.f32 %v5340_v37, %v9325_v13 }
 0xa83   : > { %v5344_v43 = vmul.f32 %v5340_v37, %v9329_v61  ;;  %v5345_v27 = vmul.f32 %v5340_v37, %v9337_v44  ;;  %v5347_v19 = vmul.f32 %v5340_v37, %v9354_v21  ;;  %v5346_v55 = vmul.f32 %v5340_v37, %v9346_v22 }
 0xa84   : > { %v5350_v39 = vperm.slane %v5339_v54, 0  ;;  %v5348_v8 = vmul.f32 %v5340_v37, %v9370_v34 }
 0xa86   : > { %v5353_v63 = vadd.f32 %v5350_v39, %v5342_v29  ;;  %v5352_v3 = vadd.f32 %v5350_v39, %v5341_v56  ;;  %v5354_v20 = vadd.f32 %v5350_v39, %v5343_v51  ;;  %v5355_v13 = vadd.f32 %v5350_v39, %v5344_v43 }
 0xa87   : > { %v5356_v46 = vadd.f32 %v5350_v39, %v5345_v27  ;;  %v5358_v4 = vadd.f32 %v5350_v39, %v5347_v19  ;;  %v5357_v26 = vadd.f32 %v5350_v39, %v5346_v55  ;;  %v5359_v9 = vadd.f32 %v5350_v39, %v5348_v8 }
 0xa88   : > { %v9383_v15 = vmax.f32 %v5353_v63, 0.0  ;;  %v5360_v24 = vmax.f32 %v5352_v3, 0.0  ;;  %v9390_v7 = vmax.f32 %v5354_v20, 0.0  ;;  %v5363_v61 = vmax.f32 %v5355_v13, 0.0  ;;  %v5640_v63 = vld [vmem:[#allocation7 + $0x48] sm:$0xff] }
 0xa89   : > { %v5364_v44 = vmax.f32 %v5356_v46, 0.0  ;;  %v5366_v22 = vmax.f32 %v5358_v4, 0.0  ;;  %v5365_v21 = vmax.f32 %v5357_v26, 0.0  ;;  %v5367_v34 = vmax.f32 %v5359_v9, 0.0  ;;  %v9537_v13 = vld [vmem:[%s9716_s20] ss:$0 sm:$0xff] }
 0xa8a   : > { %5413 = vrot.lane.b32.xlu1 %v9383_v15, %s7263_s10  ;;  %5444 = vrot.lane.b32.xlu0 %v5360_v24, %s7264_s0  ;;  %5395 = vst.msk [vmem:[#allocation7 + $0x9] sm:$0x7f] %vm5394_vm1, %v5360_v24 }
 0xa8b   : > { %5411 = vrot.lane.b32.xlu2 %v5360_v24, %s7263_s10  ;;  %5396 = vst.msk [vmem:[#allocation7 + $0x11] sm:$0x7f] %vm5394_vm1, %v9383_v15 }
 0xa8c   : > { %5397 = vst.msk [vmem:[#allocation7 + $0x19] sm:$0x7f] %vm5394_vm1, %v9390_v7 }
 0xa8d   : > { %5398 = vst.msk [vmem:[#allocation7 + $0x21] sm:$0x7f] %vm5394_vm1, %v5363_v61 }
 0xa8e   : > { %5399 = vst.msk [vmem:[#allocation7 + $0x29] sm:$0x7f] %vm5394_vm1, %v5364_v44 }
 0xa8f   : > { %5400 = vst.msk [vmem:[#allocation7 + $0x31] sm:$0x7f] %vm5394_vm1, %v5365_v21 }
 0xa90   : > { %5401 = vst.msk [vmem:[#allocation7 + $0x39] sm:$0x7f] %vm5394_vm1, %v5366_v22 }
 0xa91   : > { %5402 = vst.msk [vmem:[#allocation7 + $0x41] sm:$0x7f] %vm5394_vm1, %v5367_v34 }
 0xa92   : > { %5448 = vrot.lane.b32.xlu1 %v9390_v7, %s7264_s0  ;;  %5446 = vrot.lane.b32.xlu0 %v9383_v15, %s7264_s0 }
 0xa93   : > { %5415 = vrot.lane.b32.xlu2 %v9390_v7, %s7263_s10 }
 0xa9a   : > { %5450 = vrot.lane.b32.xlu1 %v5363_v61, %s7264_s0  ;;  %5419 = vrot.lane.b32.xlu0 %v5364_v44, %s7263_s10 }
 0xa9b   : > { %5417 = vrot.lane.b32.xlu2 %v5363_v61, %s7263_s10 }
 0xaa2   : > { %5423 = vrot.lane.b32.xlu1 %v5366_v22, %s7263_s10  ;;  %5421 = vrot.lane.b32.xlu0 %v5365_v21, %s7263_s10 }
 0xaa3   : > { %5452 = vrot.lane.b32.xlu2 %v5364_v44, %s7264_s0 }
 0xaaa   : > { %5425 = vrot.lane.b32.xlu1 %v5367_v34, %s7263_s10  ;;  %5456 = vrot.lane.b32.xlu0 %v5366_v22, %s7264_s0 }
 0xaab   : > { %5454 = vrot.lane.b32.xlu2 %v5365_v21, %s7264_s0 }
 0xab3   : > { %5458 = vrot.lane.b32.xlu2 %v5367_v34, %s7264_s0 }
 0xae5   : > { %v5412_v31 = vpop.permute.xlu2 %5411 }
 0xae6   : > { %5436 = vst.msk [vmem:[#allocation7 + $0x8] sm:$0xff] %vm5435_vm7, %v5412_v31 }
 0xaed   : > { %v5416_v36 = vpop.permute.xlu2 %5415 }
 0xaee   : > { %5438 = vst.msk [vmem:[#allocation7 + $0x18] sm:$0xff] %vm5435_vm7, %v5416_v36 }
 0xaf5   : > { %v5418_v16 = vpop.permute.xlu2 %5417 }
 0xaf6   : > { %5439 = vst.msk [vmem:[#allocation7 + $0x20] sm:$0xff] %vm5435_vm7, %v5418_v16 }
 0xafc   : > { %v5414_v38 = vpop.permute.xlu1 %5413  ;;  %v5445_v12 = vpop.permute.xlu0 %5444 }
 0xafd   : > { %5437 = vst.msk [vmem:[#allocation7 + $0x10] sm:$0xff] %vm5435_vm7, %v5414_v38  ;;  %v5453_v58 = vpop.permute.xlu2 %5452 }
 0xafe   : > { %5469 = vst.msk [vmem:[#allocation7 + $0x7] sm:$0xfe] %vm5468_vm11, %v5445_v12 }
 0xb04   : > { %v5449_v0 = vpop.permute.xlu1 %5448  ;;  %v5447_v52 = vpop.permute.xlu0 %5446 }
 0xb05   : > { %5471 = vst.msk [vmem:[#allocation7 + $0x17] sm:$0xfe] %vm5468_vm11, %v5449_v0  ;;  %v5478_v2 = vld [vmem:[#allocation7 + $0x8] sm:$0xff]  ;;  %v5455_v11 = vpop.permute.xlu2 %5454 }
 0xb06   : > { %5470 = vst.msk [vmem:[#allocation7 + $0xf] sm:$0xfe] %vm5468_vm11, %v5447_v52  ;;  %v5485_v53 = vpack.c.bf16 %v5478_v2, %v5477_v48 }
 0xb08   : > { %6962 = vmatmul.msk.bf16.vlgmr.msra.gmra.mxu2 %vm5368_vm10, %v5485_v53 }
 0xb0c   : > { %v5451_v50 = vpop.permute.xlu1 %5450  ;;  %v5420_v10 = vpop.permute.xlu0 %5419  ;;  %v5634_v49 = vld [vmem:[#allocation7 + $0x18] sm:$0xff] }
 0xb0d   : > { %5472 = vst.msk [vmem:[#allocation7 + $0x1f] sm:$0xfe] %vm5468_vm11, %v5451_v50  ;;  %v5496_v1 = vld [vmem:[#allocation7 + $0x10] sm:$0xff]  ;;  %v5459_v35 = vpop.permute.xlu2 %5458 }
 0xb0e   : > { %5440 = vst.msk [vmem:[#allocation7 + $0x28] sm:$0xff] %vm5435_vm7, %v5420_v10  ;;  %v5503_v45 = vpack.c.bf16 %v5496_v1, %v5478_v2  ;;  %v5641_v30 = vpack.c.bf16 %v5634_v49, %v5496_v1 }
 0xb0f   : > { %5473 = vst.msk [vmem:[#allocation7 + $0x27] sm:$0xfe] %vm5468_vm11, %v5453_v58 }
 0xb10   : > { %6946 = vmatmul.msk.bf16.vlgmr.msrb.gmra.mxu1 %vm5368_vm10, %v5503_v45  ;;  %6984 = vmatmul.msk.bf16.vlgmr.msra.gmra.mxu3 %vm5368_vm10, %v5641_v30 }
 0xb14   : > { %v5424_v59 = vpop.permute.xlu1 %5423  ;;  %v5422_v17 = vpop.permute.xlu0 %5421  ;;  %v5498_v32 = vld [vmem:[#allocation7 + $0x20] sm:$0xff] }
 0xb15   : > { %5442 = vst.msk [vmem:[#allocation7 + $0x38] sm:$0xff] %vm5435_vm7, %v5424_v59  ;;  %v5504_v23 = vpack.c.bf16 %v5498_v32, %v5634_v49 }
 0xb16   : > { %5441 = vst.msk [vmem:[#allocation7 + $0x30] sm:$0xff] %vm5435_vm7, %v5422_v17  ;;  %v5636_v42 = vld [vmem:[#allocation7 + $0x28] sm:$0xff] }
 0xb17   : > { %5474 = vst.msk [vmem:[#allocation7 + $0x2f] sm:$0xfe] %vm5468_vm11, %v5455_v11  ;;  %v5642_v33 = vpack.c.bf16 %v5636_v42, %v5498_v32 }
 0xb18   : > { %6963 = vmatmul.msk.bf16.gmra.mxu2 %vm5368_vm10, %v5641_v30 }
 0xb1c   : > { %v5426_v57 = vpop.permute.xlu1 %5425  ;;  %v5457_v28 = vpop.permute.xlu0 %5456 }
 0xb1d   : > { %5443 = vst.msk [vmem:[#allocation7 + $0x40] sm:$0xff] %vm5435_vm7, %v5426_v57 }
 0xb1e   : > { %5476 = vst.msk [vmem:[#allocation7 + $0x3f] sm:$0xfe] %vm5468_vm11, %v5459_v35  ;;  %v5500_v37 = vld [vmem:[#allocation7 + $0x30] sm:$0xff] }
 0xb1f   : > { %5475 = vst.msk [vmem:[#allocation7 + $0x37] sm:$0xfe] %vm5468_vm11, %v5457_v28  ;;  %v5505_v39 = vpack.c.bf16 %v5500_v37, %v5636_v42 }
 0xb20   : > { %6947 = vmatmul.msk.bf16.gmra.mxu1 %vm5368_vm10, %v5504_v23  ;;  %6985 = vmatmul.msk.bf16.gmra.mxu3 %vm5368_vm10, %v5642_v33 }
 0xb25   : > { %v5502_v56 = vld [vmem:[#allocation7 + $0x40] sm:$0xff] }
 0xb26   : > { %v5638_v54 = vld [vmem:[#allocation7 + $0x38] sm:$0xff]  ;;  %v5644_v15 = vpack.c.bf16 %v5640_v63, %v5502_v56 }
 0xb27   : > { %v5643_v29 = vpack.c.bf16 %v5638_v54, %v5500_v37  ;;  %v5506_v3 = vpack.c.bf16 %v5502_v56, %v5638_v54 }
 0xb28   : > { %6964 = vmatmul.msk.bf16.gmra.mxu2 %vm5368_vm10, %v5642_v33 }
 0xb30   : > { %6948 = vmatmul.msk.bf16.gmra.mxu1 %vm5368_vm10, %v5505_v39  ;;  %6986 = vmatmul.msk.bf16.gmra.mxu3 %vm5368_vm10, %v5643_v29 }
 0xb38   : > { %6965 = vmatmul.msk.bf16.gmra.mxu2 %vm5368_vm10, %v5643_v29 }
 0xb40   : > { %6949 = vmatmul.msk.bf16.gmra.mxu1 %vm5368_vm10, %v5506_v3  ;;  %6987 = vmatmul.msk.bf16.gmra.mxu3 %vm5368_vm10, %v5644_v15 }
 0xb8b   : > { %v5612_v24 = vpop.f32.mrf.mxu2 }
 0xb8d   : > { %v5553_v51 = vpop.f32.mrf.mxu1 }
 0xb8e   : > { %v5613_v27 = vadd.f32 %v5612_v24, %v5553_v51 }
 0xb93   : > { %v5614_v20 = vpop.f32.mrf.mxu2  ;;  %v5691_v7 = vpop.f32.mrf.mxu3 }
 0xb94   : > { %v5711_v60 = vadd.f32 %v5691_v7, %v5613_v27 }
 0xb95   : > { %v5555_v43 = vpop.f32.mrf.mxu1 }
 0xb96   : > { %v5615_v46 = vadd.f32 %v5614_v20, %v5555_v43  ;;  %v5723_v19 = vadd.f32 %v9537_v13, %v5711_v60 }
 0xb98   : > { %v5731_v22 = vmax.f32 %v5723_v19, 0.0 }
 0xb9b   : > { %v5617_v61 = vpop.f32.mrf.mxu2  ;;  %v5693_v44 = vpop.f32.mrf.mxu3 }
 0xb9c   : > { %v5712_v55 = vadd.f32 %v5693_v44, %v5615_v46 }
 0xb9d   : > { %v5558_v4 = vpop.f32.mrf.mxu1 }
 0xb9e   : > { %v5724_v26 = vadd.f32 %v9537_v13, %v5712_v55  ;;  %v5618_v25 = vadd.f32 %v5617_v61, %v5558_v4 }
 0xba0   : > { %v5732_v21 = vmax.f32 %v5724_v26, 0.0 }
 0xba2   : > { %v5739_v8 = vmax.f32 %v5731_v22, %v5732_v21 }
 0xba3   : > { %v5619_v9 = vpop.f32.mrf.mxu2  ;;  %v5696_v34 = vpop.f32.mrf.mxu3 }
 0xba4   : > { %v5747_v18 = vrot.slane %v5739_v8, 2  ;;  %v5748_v6 = vrot.slane %v5739_v8, 4  ;;  %v5749_v40 = vrot.slane %v5739_v8, 6  ;;  %v6988_v14 = vrot.slane %v5739_v8, 9 }
 0xba5   : > { %v5560_v41 = vpop.f32.mrf.mxu1  ;;  %v5713_v36 = vadd.f32 %v5696_v34, %v5618_v25 }
 0xba6   : > { %v6989_v31 = vrot.slane %v5747_v18, 9  ;;  %v6990_v62 = vrot.slane %v5748_v6, 9  ;;  %v6991_v5 = vrot.slane %v5749_v40, 9  ;;  %v5819_v48 = vmax.f32 %v5739_v8, %v6988_v14 }
 0xba7   : > { %v5620_v0 = vadd.f32 %v5619_v9, %v5560_v41  ;;  %v5725_v10 = vadd.f32 %v9537_v13, %v5713_v36 }
 0xba8   : > { %v5820_v16 = vmax.f32 %v5747_v18, %v6989_v31  ;;  %v5821_v38 = vmax.f32 %v5748_v6, %v6990_v62  ;;  %v5822_v12 = vmax.f32 %v5749_v40, %v6991_v5  ;;  %v5863_v11 = vperm.slane %v5819_v48, 0 }
 0xba9   : > { %v5733_v32 = vmax.f32 %v5725_v10, 0.0 }
 0xbaa   : > { %v5864_v52 = vperm.slane %v5820_v16, 0  ;;  %v5865_v2 = vperm.slane %v5821_v38, 0  ;;  %v5897_v50 = vperm.slane %v5822_v12, 0 }
 0xbab   : > { %v5622_v53 = vpop.f32.mrf.mxu2  ;;  %v5698_v58 = vpop.f32.mrf.mxu3 }
 0xbac   : > { %v5714_v49 = vadd.f32 %v5698_v58, %v5620_v0  ;;  %v5922_v1 = vsel %vm3972_vm3, %v5865_v2, %v5864_v52  ;;  %v5875_v17 = vsel %vm3972_vm3, %v5864_v52, %v5863_v11 }
 0xbad   : > { %v5563_v45 = vpop.f32.mrf.mxu1  ;;  %v5923_v30 = vsel %vm3974_vm4, %v5897_v50, %v5922_v1  ;;  %v9548_v28 = vsel %vm3974_vm4, %v5865_v2, %v5875_v17 }
 0xbae   : > { %v5726_v59 = vadd.f32 %v9537_v13, %v5714_v49  ;;  %5930 = vrot.lane.b32.xlu0 %v5923_v30, %s7264_s0  ;;  %v5901_v29 = vsel %vm3976_vm5, %v5897_v50, %v9548_v28  ;;  %v5623_v63 = vadd.f32 %v5622_v53, %v5563_v45  ;;  %5889 = vst.msk [vmem:[#allocation8 + $0x5] sm:$0x7] %vm5888_vm12, %v9548_v28  ;;  %v5947_v28 = vld [vmem:[#allocation8] sm:$0xf] }
 0xbaf   : > { %5955 = vst [vmem:[#allocation1] ss:$2 sm:$0xff] %v5947_v28 }
 0xbb0   : > { %v5734_v42 = vmax.f32 %v5726_v59, 0.0 }
 0xbb2   : > { %v5740_v57 = vmax.f32 %v5733_v32, %v5734_v42 }
 0xbb3   : > { %v5701_v35 = vpop.f32.mrf.mxu3  ;;  %v5624_v54 = vpop.f32.mrf.mxu2 }
 0xbb4   : > { %v5750_v23 = vrot.slane %v5740_v57, 2  ;;  %v5751_v33 = vrot.slane %v5740_v57, 4  ;;  %v5752_v37 = vrot.slane %v5740_v57, 6  ;;  %v6992_v56 = vrot.slane %v5740_v57, 9 }
 0xbb5   : > { %v5565_v39 = vpop.f32.mrf.mxu1  ;;  %v5715_v20 = vadd.f32 %v5701_v35, %v5623_v63 }
 0xbb6   : > { %5905 = vrot.lane.b32.xlu0 %v5901_v29, %s7263_s10  ;;  %v6993_v3 = vrot.slane %v5750_v23, 9  ;;  %v6994_v15 = vrot.slane %v5751_v33, 9  ;;  %v6995_v24 = vrot.slane %v5752_v37, 9  ;;  %v5823_v51 = vmax.f32 %v5740_v57, %v6992_v56 }
 0xbb7   : > { %v5625_v60 = vadd.f32 %v5624_v54, %v5565_v39  ;;  %v5727_v55 = vadd.f32 %v9537_v13, %v5715_v20 }
 0xbb8   : > { %v5824_v7 = vmax.f32 %v5750_v23, %v6993_v3  ;;  %v5825_v43 = vmax.f32 %v5751_v33, %v6994_v15  ;;  %v5826_v27 = vmax.f32 %v5752_v37, %v6995_v24  ;;  %v5866_v46 = vperm.slane %v5823_v51, 0 }
 0xbb9   : > { %v5735_v6 = vmax.f32 %v5727_v55, 0.0 }
 0xbba   : > { %v5867_v61 = vperm.slane %v5824_v7, 0  ;;  %v5868_v44 = vperm.slane %v5825_v43, 0  ;;  %v5898_v22 = vperm.slane %v5826_v27, 0 }
 0xbbb   : > { %v5703_v19 = vpop.f32.mrf.mxu3  ;;  %v5627_v18 = vpop.f32.mrf.mxu2 }
 0xbbc   : > { %v5716_v4 = vadd.f32 %v5703_v19, %v5625_v60  ;;  %v5877_v26 = vsel %vm3972_vm3, %v5867_v61, %v5866_v46  ;;  %v5924_v25 = vsel %vm3972_vm3, %v5868_v44, %v5867_v61 }
 0xbbd   : > { %v5568_v21 = vpop.f32.mrf.mxu1  ;;  %v9556_v8 = vsel %vm3974_vm4, %v5868_v44, %v5877_v26  ;;  %v5925_v38 = vsel %vm3974_vm4, %v5898_v22, %v5924_v25  ;;  %v7135_v25 = vld [vmem:[%s9717_s2] sm:$0xff] }
 0xbbe   : > { %v5728_v9 = vadd.f32 %v9537_v13, %v5716_v4  ;;  %v5902_v34 = vsel %vm3976_vm5, %v5898_v22, %v9556_v8  ;;  %v5628_v16 = vadd.f32 %v5627_v18, %v5568_v21  ;;  %5890 = vst.msk [vmem:[#allocation8 + $0x9] sm:$0x7] %vm5888_vm12, %v9556_v8  ;;  %v7143_v8 = vld [vmem:[%s9717_s2 + $0x40] sm:$0xff] }
 0xbbf   : > { %5907 = vrot.lane.b32.xlu1 %v5902_v34, %s7263_s10  ;;  %v7137_v34 = vld [vmem:[%s9717_s2 + $0x10] sm:$0xff]  ;;  %6124 = vmatpush.bf16.msrb.mxu2 %v7143_v8 }
 0xbc0   : > { %v5736_v40 = vmax.f32 %v5728_v9, 0.0  ;;  %v7140_v9 = vld [vmem:[%s9717_s2 + $0x28] sm:$0xff]  ;;  %6061 = vmatpush.bf16.msra.mxu1 %v7137_v34 }
 0xbc1   : > { %6026 = vmatpush.bf16.msra.mxu0 %v7140_v9 }
 0xbc2   : > { %v5741_v41 = vmax.f32 %v5735_v6, %v5736_v40 }
 0xbc3   : > { %v5706_v14 = vpop.f32.mrf.mxu3  ;;  %v5629_v10 = vpop.f32.mrf.mxu2  ;;  %6125 = vmatpush.bf16.msrb.mxu2 %v7142_v47 }
 0xbc4   : > { %v5753_v31 = vrot.slane %v5741_v41, 2  ;;  %v5754_v62 = vrot.slane %v5741_v41, 4  ;;  %v5755_v5 = vrot.slane %v5741_v41, 6  ;;  %v6996_v36 = vrot.slane %v5741_v41, 9 }
 0xbc5   : > { %v5570_v0 = vpop.f32.mrf.mxu1  ;;  %v5717_v53 = vadd.f32 %v5706_v14, %v5628_v16  ;;  %v7139_v14 = vld [vmem:[%s9717_s2 + $0x20] sm:$0xff] }
 0xbc6   : > { %v6997_v12 = vrot.slane %v5753_v31, 9  ;;  %v6998_v48 = vrot.slane %v5754_v62, 9  ;;  %v6999_v52 = vrot.slane %v5755_v5, 9  ;;  %v5827_v2 = vmax.f32 %v5741_v41, %v6996_v36  ;;  %v7136_v41 = vld [vmem:[%s9717_s2 + $0x8] sm:$0xff]  ;;  %6027 = vmatpush.bf16.msra.mxu0 %v7139_v14 }
 0xbc7   : > { %5932 = vrot.lane.b32.xlu1 %v5925_v38, %s7264_s0  ;;  %v5630_v1 = vadd.f32 %v5629_v10, %v5570_v0  ;;  %v5729_v17 = vadd.f32 %v9537_v13, %v5717_v53  ;;  %6062 = vmatpush.bf16.msra.mxu1 %v7136_v41 }
 0xbc8   : > { %v5828_v58 = vmax.f32 %v5753_v31, %v6997_v12  ;;  %v5829_v50 = vmax.f32 %v5754_v62, %v6998_v48  ;;  %v5830_v49 = vmax.f32 %v5755_v5, %v6999_v52  ;;  %v5869_v45 = vperm.slane %v5827_v2, 0  ;;  %v7141_v52 = vld [vmem:[%s9717_s2 + $0x30] sm:$0xff]  ;;  %v7138_v2 = vld [vmem:[%s9717_s2 + $0x18] sm:$0xff] }
 0xbc9   : > { %v5737_v37 = vmax.f32 %v5729_v17, 0.0  ;;  %6126 = vmatpush.bf16.msrb.mxu2 %v7141_v52 }
 0xbca   : > { %v5870_v30 = vperm.slane %v5828_v58, 0  ;;  %v5871_v11 = vperm.slane %v5829_v50, 0  ;;  %v5899_v57 = vperm.slane %v5830_v49, 0  ;;  %6028 = vmatpush.bf16.msra.mxu0 %v7138_v2  ;;  %v6223_v2 = vld [vmem:[%s9720_s18] sm:$0x1] }
 0xbcb   : > { %v5708_v59 = vpop.f32.mrf.mxu3  ;;  %6063 = vmatpush.bf16.msra.mxu1 %v7135_v25 }
 0xbcc   : > { %v5718_v32 = vadd.f32 %v5708_v59, %v5630_v1  ;;  %v5879_v42 = vsel %vm3972_vm3, %v5870_v30, %v5869_v45  ;;  %v5926_v29 = vsel %vm3972_vm3, %v5871_v11, %v5870_v30  ;;  %v6074_v59 = vld [vmem:[#allocation8 + $0x14] sm:$0xf] }
 0xbcd   : > { %v5880_v35 = vsel %vm3974_vm4, %v5871_v11, %v5879_v42  ;;  %v5927_v24 = vsel %vm3974_vm4, %v5899_v57, %v5926_v29 }
 0xbce   : > { %v5730_v23 = vadd.f32 %v9537_v13, %v5718_v32  ;;  %v5903_v33 = vsel %vm3976_vm5, %v5899_v57, %v5880_v35  ;;  %5891 = vst.msk [vmem:[#allocation8 + $0xd] sm:$0x7] %vm5888_vm12, %v5880_v35 }
 0xbcf   : > { %5909 = vrot.lane.b32.xlu2 %v5903_v33, %s7263_s10 }
 0xbd0   : > { %v5738_v54 = vmax.f32 %v5730_v23, 0.0 }
 0xbd2   : > { %v5742_v39 = vmax.f32 %v5737_v37, %v5738_v54  ;;  %v6162_v54 = vld [vmem:[%s9718_s7 + $0x8] sm:$0xff] }
 0xbd3   : > { %6180 = vmatpush.msrb.mxu0 %v6162_v54 }
 0xbd4   : > { %v5756_v56 = vrot.slane %v5742_v39, 2  ;;  %v5757_v63 = vrot.slane %v5742_v39, 4  ;;  %v5758_v3 = vrot.slane %v5742_v39, 6  ;;  %v7000_v15 = vrot.slane %v5742_v39, 9 }
 0xbd6   : > { %v7001_v51 = vrot.slane %v5756_v56, 9  ;;  %v7002_v20 = vrot.slane %v5757_v63, 9  ;;  %v7003_v7 = vrot.slane %v5758_v3, 9  ;;  %v5831_v43 = vmax.f32 %v5742_v39, %v7000_v15  ;;  %v6161_v39 = vld [vmem:[%s9718_s7] sm:$0xff] }
 0xbd7   : > { %5934 = vrot.lane.b32.xlu2 %v5927_v24, %s7264_s0  ;;  %6181 = vmatpush.msrb.mxu0 %v6161_v39 }
 0xbd8   : > { %v5832_v13 = vmax.f32 %v5756_v56, %v7001_v51  ;;  %v5833_v27 = vmax.f32 %v5757_v63, %v7002_v20  ;;  %v5834_v60 = vmax.f32 %v5758_v3, %v7003_v7  ;;  %v5872_v19 = vperm.slane %v5831_v43, 0  ;;  %v7208_v3 = vld [vmem:[%s9719_s15] ss:$0 sm:$0xff] }
 0xbda   : > { %v5873_v46 = vperm.slane %v5832_v13, 0  ;;  %v5874_v61 = vperm.slane %v5833_v27, 0  ;;  %v5900_v44 = vperm.slane %v5834_v60, 0 }
 0xbdc   : > { %v5928_v55 = vsel %vm3972_vm3, %v5874_v61, %v5873_v46  ;;  %v5881_v4 = vsel %vm3972_vm3, %v5873_v46, %v5872_v19  ;;  %vm5917_vm3 = vcmask 257152  }
 0xbdd   : > { %v5929_v26 = vsel %vm3974_vm4, %v5900_v44, %v5928_v55  ;;  %v5882_v22 = vsel %vm3974_vm4, %v5874_v61, %v5881_v4  ;;  %vm5942_vm4 = vcmask 387328  }
 0xbde   : > { %5936 = vrot.lane.b32.xlu1 %v5929_v26, %s7264_s0  ;;  %v5904_v21 = vsel %vm3976_vm5, %v5900_v44, %v5882_v22  ;;  %5892 = vst.msk [vmem:[#allocation8 + $0x11] sm:$0x7] %vm5888_vm12, %v5882_v22 }
 0xbdf   : > { %5911 = vrot.lane.b32.xlu0 %v5904_v21, %s7263_s10 }
 0xc20   : > { %v5931_v18 = vpop.permute.xlu0 %5930 }
 0xc28   : > { %v5906_v6 = vpop.permute.xlu0 %5905 }
 0xc29   : > { %5918 = vst.msk [vmem:[#allocation8 + $0x4] sm:$0xf] %vm5917_vm3, %v5906_v6  ;;  %v5910_v40 = vpop.permute.xlu2 %5909 }
 0xc2a   : > { %5943 = vst.msk [vmem:[#allocation8 + $0x4] sm:$0x7] %vm5942_vm4, %v5931_v18 }
 0xc2b   : > { %5920 = vst.msk [vmem:[#allocation8 + $0xc] sm:$0xf] %vm5917_vm3, %v5910_v40 }
 0xc31   : > { %v5948_v31 = vld [vmem:[#allocation8 + $0x4] sm:$0xf]  ;;  %v5935_v62 = vpop.permute.xlu2 %5934  ;;  %v5908_v5 = vpop.permute.xlu1 %5907 }
 0xc32   : > { %5957 = vst [vmem:[#allocation1 + $0x1] ss:$2 sm:$0xff] %v5948_v31  ;;  %v5973_v16 = vld [vmem:[#allocation8 + $0x4] sm:$0xf] }
 0xc33   : > { %5945 = vst.msk [vmem:[#allocation8 + $0xc] sm:$0x7] %vm5942_vm4, %v5935_v62 }
 0xc34   : > { %5919 = vst.msk [vmem:[#allocation8 + $0x8] sm:$0xf] %vm5917_vm3, %v5908_v5 }
 0xc39   : > { %v5962_v36 = vld.sshfl [vmem:[#allocation1] sm:$0xff pattern:$0x75316420]  ;;  %v5933_v38 = vpop.permute.xlu1 %5932 }
 0xc3a   : > { %5981 = vst [vmem:[#allocation1] ss:$2 sm:$0xff] %v5973_v16  ;;  %v5950_v12 = vld [vmem:[#allocation8 + $0xc] sm:$0xf] }
 0xc3b   : > { %5961 = vst [vmem:[#allocation1 + $0x11] ss:$2 sm:$0xff] %v5950_v12  ;;  %v5975_v53 = vld [vmem:[#allocation8 + $0xc] sm:$0xf] }
 0xc3c   : > { %5944 = vst.msk [vmem:[#allocation8 + $0x8] sm:$0x7] %vm5942_vm4, %v5933_v38  ;;  %v6072_v1 = vld [vmem:[#allocation8 + $0xc] sm:$0xf] }
 0xc43   : > { %v5949_v48 = vld [vmem:[#allocation8 + $0x8] sm:$0xf] }
 0xc44   : > { %v5974_v0 = vld [vmem:[#allocation8 + $0x8] sm:$0xf]  ;;  %5959 = vst [vmem:[#allocation1 + $0x10] ss:$2 sm:$0xff] %v5949_v48 }
 0xc45   : > { %5983 = vst [vmem:[#allocation1 + $0x1] ss:$2 sm:$0xff] %v5974_v0  ;;  %v6071_v50 = vld [vmem:[#allocation8 + $0x8] sm:$0xf] }
 0xc4b   : > { %v5963_v58 = vld.sshfl [vmem:[#allocation1 + $0x10] sm:$0xff pattern:$0x75316420] }
 0xc4c   : > { %5985 = vst [vmem:[#allocation1 + $0x10] ss:$2 sm:$0xff] %v5975_v53  ;;  %v5988_v10 = vld.sshfl [vmem:[#allocation1] sm:$0xff pattern:$0x75316420]  ;;  %v5966_v49 = vpack.c.bf16 %v5963_v58, %v5962_v36 }
 0xc4d   : > { %6079 = vst [vmem:[#allocation1] ss:$2 sm:$0xff] %v6071_v50  ;;  %v6225_v50 = vld [vmem:[%s9721_s23] sm:$0x1] }
 0xc4e   : > { %6081 = vst [vmem:[#allocation1 + $0x1] ss:$2 sm:$0xff] %v6072_v1  ;;  %7035 = vmatmul.msk.bf16.vlgmr.msra.gmra.mxu1 %vm5368_vm10, %v5966_v49 }
 0xc50   : > { %v5937_v30 = vpop.permute.xlu1 %5936 }
 0xc51   : > { %v5912_v45 = vpop.permute.xlu0 %5911 }
 0xc52   : > { %5921 = vst.msk [vmem:[#allocation8 + $0x10] sm:$0xf] %vm5917_vm3, %v5912_v45 }
 0xc53   : > { %5946 = vst.msk [vmem:[#allocation8 + $0x10] sm:$0x7] %vm5942_vm4, %v5937_v30 }
 0xc55   : > { %v6086_v57 = vld.sshfl [vmem:[#allocation1] sm:$0xff pattern:$0x75316420] }
 0xc5a   : > { %v5976_v11 = vld [vmem:[#allocation8 + $0x10] sm:$0xf] }
 0xc5b   : > { %5987 = vst [vmem:[#allocation1 + $0x11] ss:$2 sm:$0xff] %v5976_v11  ;;  %v6073_v32 = vld [vmem:[#allocation8 + $0x10] sm:$0xf] }
 0xc62   : > { %v5989_v17 = vld.sshfl [vmem:[#allocation1 + $0x10] sm:$0xff pattern:$0x75316420] }
 0xc63   : > { %6083 = vst [vmem:[#allocation1 + $0x10] ss:$2 sm:$0xff] %v6073_v32  ;;  %v5992_v42 = vpack.c.bf16 %v5989_v17, %v5988_v10 }
 0xc64   : > { %6085 = vst [vmem:[#allocation1 + $0x11] ss:$2 sm:$0xff] %v6074_v59 }
 0xc65   : > { %7022 = vmatmul.msk.bf16.vlgmr.msra.gmra.mxu0 %vm5368_vm10, %v5992_v42 }
 0xc66   : > { %6203 = vmatpush.msra.mxu0 %v6162_v54  ;;  %v6319_v54 = vld [vmem:[#allocation9] sm:$0xf] }
 0xc68   : > { %6204 = vmatpush.msra.mxu0 %v6161_v39 }
 0xc6b   : > { %v6087_v35 = vld.sshfl [vmem:[#allocation1 + $0x10] sm:$0xff pattern:$0x75316420] }
 0xc6c   : > { %v6090_v23 = vpack.c.bf16 %v6087_v35, %v6086_v57 }
 0xc6e   : > { %7054 = vmatmul.msk.bf16.vlgmr.msrb.gmra.mxu2 %vm5368_vm10, %v6090_v23 }
 0xccb   : > { %v6065_v37 = vpop.f32.mrf.mxu1 }
 0xcd3   : > { %v6067_v24 = vpop.f32.mrf.mxu1 }
 0xce2   : > { %v6030_v33 = vpop.f32.mrf.mxu0 }
 0xce3   : > { %v6066_v56 = vadd.f32 %v6065_v37, %v6030_v33 }
 0xcea   : > { %v6032_v15 = vpop.f32.mrf.mxu0 }
 0xceb   : > { %v6068_v51 = vadd.f32 %v6067_v24, %v6032_v15  ;;  %v7152_v15 = vld [vmem:[%s9722_s22 + $0x40] sm:$0xff]  ;;  %v7151_v24 = vld [vmem:[%s9722_s22 + $0x38] sm:$0xff] }
 0xcec   : > { %6496 = vmatpush.bf16.msrb.mxu3 %v7152_v15 }
 0xcf0   : > { %6497 = vmatpush.bf16.msrb.mxu3 %v7151_v24 }
 0xcf1   : > { %v6128_v29 = vpop.f32.mrf.mxu2 }
 0xcf2   : > { %v6133_v63 = vadd.f32 %v6128_v29, %v6066_v56 }
 0xcf4   : > { %v6139_v20 = vadd.f32 %v7208_v3, %v6133_v63 }
 0xcf6   : > { %v6150_v13 = vmul.f32 %v6139_v20, %v6139_v20  ;;  %v6141_v60 = vsel %vm5222_vm8, %v6139_v20, 0.0 }
 0xcf8   : > { %v6152_v19 = vsel %vm5222_vm8, %v6150_v13, 0.0 }
 0xcf9   : > { %v6130_v7 = vpop.f32.mrf.mxu2 }
 0xcfa   : > { %v6134_v43 = vadd.f32 %v6130_v7, %v6068_v51  ;;  %v7146_v7 = vld [vmem:[%s9722_s22 + $0x10] sm:$0xff] }
 0xcfb   : > { %6433 = vmatpush.bf16.msra.mxu2 %v7146_v7 }
 0xcfc   : > { %v6140_v27 = vadd.f32 %v7208_v3, %v6134_v43 }
 0xcfe   : > { %v6142_v46 = vsel %vm5222_vm8, %v6140_v27, 0.0  ;;  %v6151_v61 = vmul.f32 %v6140_v27, %v6140_v27 }
 0xcff   : > { %v6143_v44 = vadd.f32 %v6142_v46, %v6141_v60  ;;  %v7150_v60 = vld [vmem:[%s9722_s22 + $0x30] sm:$0xff]  ;;  %v7149_v46 = vld [vmem:[%s9722_s22 + $0x28] sm:$0xff] }
 0xd00   : > { %v6153_v55 = vsel %vm5222_vm8, %v6151_v61, 0.0  ;;  %6498 = vmatpush.bf16.msrb.mxu3 %v7150_v60  ;;  %v7144_v61 = vld [vmem:[%s9722_s22] sm:$0xff]  ;;  %6398 = vmatpush.bf16.msrb.mxu1 %v7149_v46  ;;  %v6548_v60 = vld [vmem:[#allocation10] sm:$0x1] }
 0xd01   : > { %v6144_v4 = vrot.slane %v6143_v44, 4  ;;  %v6154_v26 = vadd.f32 %v6153_v55, %v6152_v19  ;;  %v7148_v55 = vld [vmem:[%s9722_s22 + $0x20] sm:$0xff] }
 0xd03   : > { %v6145_v22 = vadd.f32 %v6144_v4, %v6143_v44  ;;  %v6155_v21 = vrot.slane %v6154_v26, 4 }
 0xd04   : > { %6399 = vmatpush.bf16.msrb.mxu1 %v7148_v55 }
 0xd05   : > { %v6146_v28 = vrot.slane %v6145_v22, 2  ;;  %v6156_v8 = vadd.f32 %v6155_v21, %v6154_v26 }
 0xd07   : > { %v6147_v9 = vadd.f32 %v6146_v28, %v6145_v22  ;;  %v6157_v34 = vrot.slane %v6156_v8, 2  ;;  %v7147_v22 = vld [vmem:[%s9722_s22 + $0x18] sm:$0xff] }
 0xd08   : > { %6400 = vmatpush.bf16.msrb.mxu1 %v7147_v22 }
 0xd09   : > { %v6148_v18 = vrot.slane %v6147_v9, 1  ;;  %v6158_v40 = vadd.f32 %v6157_v34, %v6156_v8  ;;  %v6521_v8 = vld [vmem:[%s7424_s12] sm:$0xff] }
 0xd0b   : > { %v6149_v6 = vadd.f32 %v6148_v18, %v6147_v9  ;;  %v6159_v47 = vrot.slane %v6158_v40, 1  ;;  %v6522_v9 = vld [vmem:[%s7424_s12 + $0x8] sm:$0xff]  ;;  %v7265_v18 = vmov 0  }
 0xd0c   : > { %7199 = vset.pattern.permute.xlu1 %v7265_v18  ;;  %7200 = vset.pattern.permute.xlu2 %v7265_v18 }
 0xd0d   : > { %7055 = vmatmul.msk.f32.vlgmr.msrb.gmra.mxu0 %vm5222_vm8, %v6149_v6  ;;  %v6160_v41 = vadd.f32 %v6159_v47, %v6158_v40  ;;  %7201 = vset.pattern.permute.xlu0 %v7265_v18 }
 0xd15   : > { %7056 = vmatmul.msk.f32.vlgmr.msra.gmra.mxu0 %vm5222_vm8, %v6160_v41 }
 0xd8a   : > { %v6183_v14 = vpop.f32.mrf.mxu0 }
 0xd8b   : > { %v6209_v25 = vmul.f32 %v6183_v14, %v6183_v14 }
 0xd92   : > { %v6206_v31 = vpop.f32.mrf.mxu0 }
 0xd93   : > { %v6210_v62 = vsub.f32 %v6206_v31, %v6209_v25 }
 0xd95   : > { %v6211_v5 = vmax.f32 %v6210_v62, 0.0 }
 0xd97   : > { %v6212_v36 = vadd.f32 1e-05, %v6211_v5 }
 0xd99   : > { %7217 = vrsqrt.f32 %v6212_v36  ;;  %vm6219_vm2 = vweird.f32 %v6212_v36 }
 0xd9f   : > { %v7218_v16 = vpop.eup %7217 }
 0xda0   : > { %v6214_v38 = vmul.f32 %v7218_v16, %v6212_v36  ;;  %vm6220_vm5 = vweird.f32 %v7218_v16 }
 0xda1   : > { %vm6221_vm6 = vmor %vm6219_vm2, %vm6220_vm5 }
 0xda2   : > { %v6215_v12 = vmul.f32 %v7218_v16, %v6214_v38 }
 0xda4   : > { %v6216_v48 = vmul.f32 0.5, %v6215_v12 }
 0xda6   : > { %v6217_v0 = vsub.f32 1.5, %v6216_v48 }
 0xda8   : > { %v6218_v52 = vmul.f32 %v7218_v16, %v6217_v0 }
 0xdaa   : > { %v6222_v53 = vsel %vm6221_vm6, %v7218_v16, %v6218_v52  ;;  %v6446_v16 = vld [vmem:[#allocation9 + $0x14] sm:$0xf] }
 0xdab   : > { %v6224_v58 = vmul.f32 %v6223_v2, %v6222_v53 }
 0xdad   : > { %v6226_v10 = vmul.f32 %v6224_v58, %v6183_v14  ;;  %v6228_v49 = vperm.slane %v6224_v58, 0 }
 0xdaf   : > { %v6227_v1 = vsub.f32 %v6225_v50, %v6226_v10  ;;  %v6229_v45 = vmul.f32 %v6228_v49, %v6139_v20  ;;  %v6230_v30 = vmul.f32 %v6228_v49, %v6140_v27  ;;  %v7145_v27 = vld [vmem:[%s9722_s22 + $0x8] sm:$0xff] }
 0xdb0   : > { %6434 = vmatpush.bf16.msra.mxu2 %v7145_v27 }
 0xdb1   : > { %v6232_v11 = vperm.slane %v6227_v1, 0 }
 0xdb3   : > { %v6234_v59 = vadd.f32 %v6232_v11, %v6229_v45  ;;  %v6235_v17 = vadd.f32 %v6232_v11, %v6230_v30  ;;  %v7210_v30 = vld [vmem:[%s7419_s4] ss:$0 sm:$0xff] }
 0xdb4   : > { %6435 = vmatpush.bf16.msra.mxu2 %v7144_v61 }
 0xdb5   : > { %v6236_v32 = vmax.f32 %v6234_v59, 0.0  ;;  %v6237_v42 = vmax.f32 %v6235_v17, 0.0 }
 0xdb7   : > { %v6240_v57 = vrot.slane %v6236_v32, 4  ;;  %6264 = vst [vmem:[#allocation1] ss:$2 sm:$0xff] %v6236_v32  ;;  %v6241_v35 = vrot.slane %v6237_v42, 4 }
 0xdb8   : > { %6260 = vst.msk [vmem:[#allocation9 + $0x5] sm:$0x7] %vm5888_vm12, %v6236_v32 }
 0xdb9   : > { %6267 = vst [vmem:[#allocation1 + $0x10] ss:$2 sm:$0xff] %v6240_v57 }
 0xdba   : > { %6261 = vst.msk [vmem:[#allocation9 + $0x9] sm:$0x7] %vm5888_vm12, %v6240_v57 }
 0xdbb   : > { %6270 = vst [vmem:[#allocation1 + $0x20] ss:$2 sm:$0xff] %v6237_v42 }
 0xdbc   : > { %6262 = vst.msk [vmem:[#allocation9 + $0xd] sm:$0x7] %vm5888_vm12, %v6237_v42 }
 0xdbd   : > { %6273 = vst [vmem:[#allocation1 + $0x30] ss:$2 sm:$0xff] %v6241_v35 }
 0xdbe   : > { %v6265_v23 = vld.sshfl [vmem:[#allocation1] sm:$0xff pattern:$0x75316420]  ;;  %6263 = vst.msk [vmem:[#allocation9 + $0x11] sm:$0x7] %vm5888_vm12, %v6241_v35 }
 0xdbf   : > { %6275 = vrot.lane.b32.xlu2 %v6265_v23, %s7263_s10  ;;  %6291 = vst [vmem:[#allocation1] ss:$2 sm:$0xff] %v6236_v32 }
 0xdc0   : > { %v6268_v33 = vld.sshfl [vmem:[#allocation1 + $0x10] sm:$0xff pattern:$0x75316420] }
 0xdc1   : > { %6277 = vrot.lane.b32.xlu0 %v6268_v33, %s7263_s10  ;;  %6294 = vst [vmem:[#allocation1 + $0x10] ss:$2 sm:$0xff] %v6240_v57 }
 0xdc2   : > { %v6271_v37 = vld.sshfl [vmem:[#allocation1 + $0x20] sm:$0xff pattern:$0x75316420] }
 0xdc3   : > { %6279 = vrot.lane.b32.xlu1 %v6271_v37, %s7263_s10  ;;  %6297 = vst [vmem:[#allocation1 + $0x20] ss:$2 sm:$0xff] %v6237_v42 }
 0xdc4   : > { %v6274_v39 = vld.sshfl [vmem:[#allocation1 + $0x30] sm:$0xff pattern:$0x75316420] }
 0xdc5   : > { %6300 = vst [vmem:[#allocation1 + $0x30] ss:$2 sm:$0xff] %v6241_v35 }
 0xdc6   : > { %v6292_v29 = vld.sshfl [vmem:[#allocation1] sm:$0xff pattern:$0x75316420] }
 0xdc7   : > { %6302 = vrot.lane.b32.xlu2 %v6292_v29, %s7264_s0  ;;  %6327 = vst [vmem:[#allocation1] ss:$2 sm:$0xff] %v6319_v54 }
 0xdc8   : > { %v6295_v56 = vld.sshfl [vmem:[#allocation1 + $0x10] sm:$0xff pattern:$0x75316420] }
 0xdc9   : > { %6304 = vrot.lane.b32.xlu0 %v6295_v56, %s7264_s0 }
 0xdca   : > { %v6298_v63 = vld.sshfl [vmem:[#allocation1 + $0x20] sm:$0xff pattern:$0x75316420] }
 0xdcb   : > { %6306 = vrot.lane.b32.xlu1 %v6298_v63, %s7264_s0 }
 0xdcc   : > { %v6301_v3 = vld.sshfl [vmem:[#allocation1 + $0x30] sm:$0xff pattern:$0x75316420] }
 0xdcf   : > { %6281 = vrot.lane.b32.xlu2 %v6274_v39, %s7263_s10  ;;  %s9723_s10 = sld [smem:[#allocation25_spill]] }
 0xdd1   : > { %6308 = vrot.lane.b32.xlu0 %v6301_v3, %s7264_s0  ;;  %s984_s0 = scalar_lea.vmem %s7432_s27, %s9725_s1 }
 0xdd3   : > { %6525 = vperm.xlu1 %7199, %v6521_v8  }
 0xdd5   : > { %v7209_v10 = vld [vmem:[%s9723_s10] ss:$0 sm:$0xff] }
 0xdd7   : > { %6530 = vperm.xlu2 %7200, %v6522_v9  }
 0xe19   : > { %v6276_v51 = vpop.permute.xlu2 %6275 }
 0xe1a   : > { %6287 = vst.msk [vmem:[#allocation9 + $0x4] sm:$0xf] %vm5917_vm3, %v6276_v51 }
 0xe21   : > { %v6303_v20 = vpop.permute.xlu2 %6302 }
 0xe22   : > { %6315 = vst.msk [vmem:[#allocation9 + $0x3] sm:$0xe] %vm6314_vm9, %v6303_v20 }
 0xe29   : > { %v6320_v43 = vld [vmem:[#allocation9 + $0x4] sm:$0xf]  ;;  %v6282_v13 = vpop.permute.xlu2 %6281 }
 0xe2a   : > { %6329 = vst [vmem:[#allocation1 + $0x1] ss:$2 sm:$0xff] %v6320_v43  ;;  %v6345_v44 = vld [vmem:[#allocation9 + $0x4] sm:$0xf] }
 0xe2b   : > { %6290 = vst.msk [vmem:[#allocation9 + $0x10] sm:$0xf] %vm5917_vm3, %v6282_v13 }
 0xe31   : > { %v6334_v19 = vld.sshfl [vmem:[#allocation1] sm:$0xff pattern:$0x75316420]  ;;  %v6531_v29 = vpop.permute.xlu2 %6530 }
 0xe32   : > { %6353 = vst [vmem:[#allocation1] ss:$2 sm:$0xff] %v6345_v44 }
 0xe33   : > { %v6278_v4 = vpop.permute.xlu0 %6277 }
 0xe34   : > { %6288 = vst.msk [vmem:[#allocation9 + $0x8] sm:$0xf] %vm5917_vm3, %v6278_v4 }
 0xe35   : > { %v6280_v26 = vpop.permute.xlu1 %6279 }
 0xe36   : > { %6289 = vst.msk [vmem:[#allocation9 + $0xc] sm:$0xf] %vm5917_vm3, %v6280_v26 }
 0xe3b   : > { %v6305_v21 = vpop.permute.xlu0 %6304 }
 0xe3c   : > { %6316 = vst.msk [vmem:[#allocation9 + $0x7] sm:$0xe] %vm6314_vm9, %v6305_v21 }
 0xe3d   : > { %v6307_v28 = vpop.permute.xlu1 %6306 }
 0xe3e   : > { %6317 = vst.msk [vmem:[#allocation9 + $0xb] sm:$0xe] %vm6314_vm9, %v6307_v28 }
 0xe43   : > { %v6321_v34 = vld [vmem:[#allocation9 + $0x8] sm:$0xf]  ;;  %v6309_v6 = vpop.permute.xlu0 %6308 }
 0xe44   : > { %6331 = vst [vmem:[#allocation1 + $0x10] ss:$2 sm:$0xff] %v6321_v34  ;;  %v6346_v47 = vld [vmem:[#allocation9 + $0x8] sm:$0xf] }
 0xe45   : > { %v6322_v40 = vld [vmem:[#allocation9 + $0xc] sm:$0xf]  ;;  %6318 = vst.msk [vmem:[#allocation9 + $0xf] sm:$0xe] %vm6314_vm9, %v6309_v6  ;;  %v6443_v25 = vld [vmem:[#allocation9 + $0x8] sm:$0xf]  ;;  %v6526_v32 = vpop.permute.xlu1 %6525 }
 0xe46   : > { %6333 = vst [vmem:[#allocation1 + $0x11] ss:$2 sm:$0xff] %v6322_v40  ;;  %v6347_v41 = vld [vmem:[#allocation9 + $0xc] sm:$0xf] }
 0xe47   : > { %6355 = vst [vmem:[#allocation1 + $0x1] ss:$2 sm:$0xff] %v6346_v47  ;;  %v6444_v36 = vld [vmem:[#allocation9 + $0xc] sm:$0xf] }
 0xe4c   : > { %v6348_v31 = vld [vmem:[#allocation9 + $0x10] sm:$0xf] }
 0xe4d   : > { %v6335_v14 = vld.sshfl [vmem:[#allocation1 + $0x10] sm:$0xff pattern:$0x75316420] }
 0xe4e   : > { %v6338_v62 = vpack.c.bf16 %v6335_v14, %v6334_v19  ;;  %6357 = vst [vmem:[#allocation1 + $0x10] ss:$2 sm:$0xff] %v6347_v41  ;;  %v6360_v5 = vld.sshfl [vmem:[#allocation1] sm:$0xff pattern:$0x75316420] }
 0xe4f   : > { %6359 = vst [vmem:[#allocation1 + $0x11] ss:$2 sm:$0xff] %v6348_v31  ;;  %v6445_v38 = vld [vmem:[#allocation9 + $0x10] sm:$0xf] }
 0xe50   : > { %7088 = vmatmul.msk.bf16.vlgmr.msra.gmra.mxu2 %vm5368_vm10, %v6338_v62  ;;  %6451 = vst [vmem:[#allocation1] ss:$2 sm:$0xff] %v6443_v25 }
 0xe51   : > { %6453 = vst [vmem:[#allocation1 + $0x1] ss:$2 sm:$0xff] %v6444_v36 }
 0xe56   : > { %v6361_v12 = vld.sshfl [vmem:[#allocation1 + $0x10] sm:$0xff pattern:$0x75316420] }
 0xe57   : > { %v6364_v48 = vpack.c.bf16 %v6361_v12, %v6360_v5  ;;  %6455 = vst [vmem:[#allocation1 + $0x10] ss:$2 sm:$0xff] %v6445_v38 }
 0xe58   : > { %6457 = vst [vmem:[#allocation1 + $0x11] ss:$2 sm:$0xff] %v6446_v16  ;;  %v6458_v0 = vld.sshfl [vmem:[#allocation1] sm:$0xff pattern:$0x75316420] }
 0xe59   : > { %7075 = vmatmul.msk.bf16.vlgmr.msrb.gmra.mxu1 %vm5368_vm10, %v6364_v48 }
 0xe5f   : > { %v6459_v52 = vld.sshfl [vmem:[#allocation1 + $0x10] sm:$0xff pattern:$0x75316420] }
 0xe60   : > { %v6462_v2 = vpack.c.bf16 %v6459_v52, %v6458_v0 }
 0xe62   : > { %7107 = vmatmul.msk.bf16.vlgmr.msrb.gmra.mxu3 %vm5368_vm10, %v6462_v2 }
 0xed3   : > { %v6437_v58 = vpop.f32.mrf.mxu2 }
 0xed6   : > { %v6402_v53 = vpop.f32.mrf.mxu1 }
 0xed7   : > { %v6438_v50 = vadd.f32 %v6437_v58, %v6402_v53 }
 0xedb   : > { %v6439_v17 = vpop.f32.mrf.mxu2 }
 0xede   : > { %v6404_v11 = vpop.f32.mrf.mxu1 }
 0xedf   : > { %v6440_v42 = vadd.f32 %v6439_v17, %v6404_v11 }
 0xee5   : > { %v6500_v49 = vpop.f32.mrf.mxu3 }
 0xee6   : > { %v6505_v1 = vadd.f32 %v6500_v49, %v6438_v50 }
 0xee8   : > { %v6511_v45 = vadd.f32 %v7209_v10, %v6505_v1 }
 0xeea   : > { %v6513_v59 = vmax.f32 %v6511_v45, 0.0 }
 0xeec   : > { %v6519_v57 = vmul.f32 %v7210_v30, %v6513_v59 }
 0xeed   : > { %v6502_v35 = vpop.f32.mrf.mxu3 }
 0xeee   : > { %v6533_v23 = vmul.f32 %v6526_v32, %v6519_v57  ;;  %v6506_v33 = vadd.f32 %v6502_v35, %v6440_v42 }
 0xef0   : > { %v6512_v37 = vadd.f32 %v7209_v10, %v6506_v33  ;;  %v6535_v54 = vsel %vm5222_vm8, %v6533_v23, 0.0 }
 0xef1   : > { %6536 = vadd.xlane.f32.xlu0 %v6535_v54 }
 0xef2   : > { %v6514_v39 = vmax.f32 %v6512_v37, 0.0 }
 0xef4   : > { %v6520_v56 = vmul.f32 %v7210_v30, %v6514_v39 }
 0xef6   : > { %v6534_v63 = vmul.f32 %v6531_v29, %v6520_v56 }
 0xef8   : > { %v6538_v3 = vsel %vm5222_vm8, %v6534_v63, 0.0 }
 0xef9   : > { %6539 = vadd.xlane.f32.xlu1 %v6538_v3 }
 0xf64   : > { %v6537_v15 = vpop.xlane.xlu0 %6536 }
 0xf6c   : > { %v6540_v24 = vpop.xlane.xlu1 %6539 }
 0xf6d   : > { %v6541_v51 = vadd.f32 %v6540_v24, %v6537_v15 }
 0xf6f   : > { %v6542_v20 = vrot.slane %v6541_v51, 4 }
 0xf71   : > { %v6543_v7 = vadd.f32 %v6542_v20, %v6541_v51 }
 0xf73   : > { %v6544_v43 = vrot.slane %v6543_v7, 2 }
 0xf75   : > { %v6545_v13 = vadd.f32 %v6544_v43, %v6543_v7 }
 0xf77   : > { %v6546_v27 = vrot.slane %v6545_v13, 1 }
 0xf79   : > { %v6547_v46 = vadd.f32 %v6546_v27, %v6545_v13 }
 0xf7b   : > { %v6549_v61 = vadd.f32 %v6548_v60, %v6547_v46 }
 0xf7d   : > { %6551 = vst.msk [vmem:[%s984_s0] sm:$0x1] %vm6550_vm14, %v6549_v61 }
 0xf7e PF: > { %s77_s28 = sadd.s32 1, %s7226_s28  }
 0xf7f   : > { %p74_p4 = scmp.ge.s32.totalorder %s77_s28, 4  }
 0xf81   :  { %76 = sbr.rel (!%p74_p4) target bundleno = 63 (0x3f), region = 274 }

</bundles_post_ra>
